<compile_context>
chip_gen: v6e
topology: v6e:2x2x1
jax: 0.10.0
libtpu: 0.0.40
codegen_flags: <defaults>
</compile_context>

<pallas_src>
import functools

import jax
import jax.numpy as jnp
from jax.experimental import pallas as pl
from jax.experimental.pallas import tpu as pltpu


def _resblock_kernel(x_ref, w1_ref, b1_ref, w2_ref, b2_ref, o_ref,
                     xpad_ref, y1pad_ref, im_ref, *, res_scale, ksize):
    # x_ref   : (1, H, W, Cp) f32   input tile (also the residual)
    # w*_ref  : (k*k*Cp, Cp)  bf16  im2col-reshaped weights
    # b*_ref  : (1, Cp)       f32
    # o_ref   : (1, H, W, Cp) f32
    # xpad_ref, y1pad_ref: VMEM (H+2p, W+2p, Cp) bf16 padded activations
    # im_ref  : VMEM (H, W, k*k*Cp) bf16 im2col scratch (reused by both convs)
    H, W, Cp = x_ref.shape[1], x_ref.shape[2], x_ref.shape[3]
    p = ksize // 2
    Hp, Wp = H + 2 * p, W + 2 * p
    ntaps = ksize * ksize

    # ---- zero only the halo of the padded scratches. The interior is fully
    # overwritten below. Done every grid step (cheap) so that sharding the
    # batch axis across TensorCores ("parallel") stays correct.
    if p > 0:
        zrow = jnp.zeros((p, Wp, Cp), jnp.bfloat16)
        zcol = jnp.zeros((H, p, Cp), jnp.bfloat16)
        for ref in (xpad_ref, y1pad_ref):
            ref[0:p, :, :] = zrow
            ref[Hp - p:Hp, :, :] = zrow
            ref[p:p + H, 0:p, :] = zcol
            ref[p:p + H, Wp - p:Wp, :] = zcol

    x = x_ref[0]                                             # (H, W, Cp) f32
    xpad_ref[p:p + H, p:p + W, :] = x.astype(jnp.bfloat16)

    def conv(src_ref, w_ref, b_ref):
        # Build the im2col operand once, then a single MXU matmul with
        # contraction length k*k*Cp.
        src = src_ref[...]                                   # (Hp, Wp, Cp) bf16
        t = 0
        for dy in range(ksize):
            for dx in range(ksize):
                # 3-D slice -> 3-D lane-aligned store (no per-tap 2-D reshape).
                im_ref[:, :, t * Cp:(t + 1) * Cp] = src[dy:dy + H, dx:dx + W, :]
                t += 1
        patches = im_ref[...].reshape(H * W, ntaps * Cp)     # bf16
        acc = jnp.dot(patches, w_ref[...],
                      preferred_element_type=jnp.float32)    # (H*W, Cp) f32
        return acc + b_ref[...]                              # f32 bias add

    # conv1 + ReLU (f32 epilogue), re-pad intermediate as bf16.
    y1 = jnp.maximum(conv(xpad_ref, w1_ref, b1_ref), 0.0)
    y1pad_ref[p:p + H, p:p + W, :] = y1.reshape(H, W, Cp).astype(jnp.bfloat16)

    # conv2 + residual (all f32).
    y2 = conv(y1pad_ref, w2_ref, b2_ref)
    out = y2.reshape(H, W, Cp) * res_scale + x
    o_ref[0] = out.astype(o_ref.dtype)


def resblock_forward(x_nchw, w1, b1, w2, b2, *, res_scale=1.0):
    """x_nchw: (N, C, H, W) f32; w*: (k, k, C, C) HWIO; b*: (C,). Returns NCHW f32."""
    N, C, H, W = x_nchw.shape
    k = w1.shape[0]
    assert k % 2 == 1, "SAME padding here assumes an odd kernel size"
    p = k // 2
    Cp = ((C + 127) // 128) * 128      # lane-dense channel padding
    ntaps = k * k

    # NCHW -> NHWC (+ channel pad). The transpose materializes anyway; the pad
    # is fused into it by XLA. Input/output stay f32 so the residual is exact.
    x = jnp.transpose(x_nchw, (0, 2, 3, 1)).astype(jnp.float32)
    if Cp != C:
        x = jnp.pad(x, ((0, 0), (0, 0), (0, 0), (0, Cp - C)))

    def prep_w(w):
        wp = jnp.pad(w.astype(jnp.float32),
                     ((0, 0), (0, 0), (0, Cp - C), (0, Cp - C)))
        # (k, k, Cp, Cp) -> (k*k*Cp, Cp), tap order (dy, dx, cin) matches kernel.
        return wp.reshape(ntaps * Cp, Cp).astype(jnp.bfloat16)

    def prep_b(b):
        return jnp.pad(b.astype(jnp.float32), ((0, Cp - C),)).reshape(1, Cp)

    w1p, w2p = prep_w(w1), prep_w(w2)
    b1p, b2p = prep_b(b1), prep_b(b2)

    kernel = functools.partial(_resblock_kernel,
                               res_scale=float(res_scale), ksize=int(k))

    flops = 2 * 2 * N * (H * W) * (ntaps * Cp) * Cp            # two convs
    bytes_accessed = (2 * N * H * W * Cp * 4                   # in + out (f32)
                      + 2 * ntaps * Cp * Cp * 2                # weights (bf16)
                      + 2 * Cp * 4)                            # biases
    cost = pl.CostEstimate(flops=flops, transcendentals=0,
                           bytes_accessed=bytes_accessed)

    out_nhwc = pl.pallas_call(
        kernel,
        out_shape=jax.ShapeDtypeStruct((N, H, W, Cp), jnp.float32),
        grid_spec=pltpu.PrefetchScalarGridSpec(
            num_scalar_prefetch=0,
            grid=(N,),
            in_specs=[
                pl.BlockSpec((1, H, W, Cp), lambda n: (n, 0, 0, 0)),
                pl.BlockSpec((ntaps * Cp, Cp), lambda n: (0, 0)),
                pl.BlockSpec((1, Cp), lambda n: (0, 0)),
                pl.BlockSpec((ntaps * Cp, Cp), lambda n: (0, 0)),
                pl.BlockSpec((1, Cp), lambda n: (0, 0)),
            ],
            out_specs=pl.BlockSpec((1, H, W, Cp), lambda n: (n, 0, 0, 0)),
            scratch_shapes=[
                pltpu.VMEM((H + 2 * p, W + 2 * p, Cp), jnp.bfloat16),  # x padded
                pltpu.VMEM((H + 2 * p, W + 2 * p, Cp), jnp.bfloat16),  # y1 padded
                pltpu.VMEM((H, W, ntaps * Cp), jnp.bfloat16),          # im2col
            ],
        ),
        compiler_params=pltpu.CompilerParams(
            dimension_semantics=("parallel",),
            vmem_limit_bytes=48 * 1024 * 1024,
        ),
        cost_estimate=cost,
    )(x, w1p, b1p, w2p, b2p)

    out_nhwc = out_nhwc[..., :C]
    return jnp.transpose(out_nhwc, (0, 3, 1, 2))               # back to NCHW


def resblock_reference(x_nchw, w1, b1, w2, b2, *, res_scale=1.0):
    """Pure-JAX f32 reference (lax conv) for the correctness check."""
    x = jnp.transpose(x_nchw, (0, 2, 3, 1))
    dn = ("NHWC", "HWIO", "NHWC")
    y = jax.lax.conv_general_dilated(x, w1, (1, 1), "SAME",
                                     dimension_numbers=dn) + b1
    y = jnp.maximum(y, 0.0)
    y = jax.lax.conv_general_dilated(y, w2, (1, 1), "SAME",
                                     dimension_numbers=dn) + b2
    out = y * res_scale + x
    return jnp.transpose(out, (0, 3, 1, 2))


if __name__ == "__main__":
    # Small ResBlock-consistent shapes: n_feats=4, kernel_size=3.
    N, C, H, W = 2, 4, 16, 16
    K = 3
    res_scale = 1.0

    key = jax.random.PRNGKey(0)
    kx, kw1, kb1, kw2, kb2 = jax.random.split(key, 5)

    x = jax.random.normal(kx, (N, C, H, W), dtype=jnp.float32)

    fan_in = C * K * K
    scale = 1.0 / jnp.sqrt(jnp.float32(fan_in))

    def rnd(k, shape):
        return jax.random.normal(k, shape, dtype=jnp.float32) * scale

    # Keep weights bf16-representable so the kernel (bf16 MXU operands) and the
    # f32 reference share identical parameters; biases stay full f32.
    q = lambda a: a.astype(jnp.bfloat16).astype(jnp.float32)
    w1 = q(rnd(kw1, (K, K, C, C)))
    b1 = rnd(kb1, (C,))
    w2 = q(rnd(kw2, (K, K, C, C)))
    b2 = rnd(kb2, (C,))

    out = resblock_forward(x, w1, b1, w2, b2, res_scale=res_scale)
    out = jax.block_until_ready(out)

    ref = resblock_reference(x, w1, b1, w2, b2, res_scale=res_scale)
    assert out.shape == (N, C, H, W)
    # Tolerance sized for bf16 activations feeding the MXU (f32 accumulation,
    # f32 bias/ReLU/residual): two stacked 3x3 convs round at the ~1e-2 level.
    assert jnp.allclose(out, ref, atol=5e-2, rtol=5e-2), "mismatch vs reference"

    print("KERNEL_OK")
</pallas_src>

<mosaic_0001>
module attributes {stable_mosaic.version = 11 : i64} {
  func.func @_resblock_kernel(%arg0: i32, %arg1: memref<1x16x16x128xf32, #tpu.memory_space<vmem>>, %arg2: memref<1152x128xbf16, #tpu.memory_space<vmem>>, %arg3: memref<1x128xf32, #tpu.memory_space<vmem>>, %arg4: memref<1152x128xbf16, #tpu.memory_space<vmem>>, %arg5: memref<1x128xf32, #tpu.memory_space<vmem>>, %arg6: memref<1x16x16x128xf32, #tpu.memory_space<vmem>>, %arg7: memref<18x18x128xbf16, #tpu.memory_space<vmem>>, %arg8: memref<18x18x128xbf16, #tpu.memory_space<vmem>>, %arg9: memref<16x16x1152xbf16, #tpu.memory_space<vmem>>) attributes {dimension_semantics = [#tpu.dimension_semantics<parallel>], iteration_bounds = array<i64: 2>, scalar_prefetch = 0 : i64, scratch_operands = 3 : i64, tpu.core_type = #tpu.core_type<tc>, window_params = [{transform_indices = @transform_0, window_bounds = array<i64: 1, 16, 16, 128>}, {pipeline_mode = #tpu.pipeline_mode<synchronous>, transform_indices = @transform_1, window_bounds = array<i64: 1152, 128>}, {pipeline_mode = #tpu.pipeline_mode<synchronous>, transform_indices = @transform_2, window_bounds = array<i64: 1, 128>}, {pipeline_mode = #tpu.pipeline_mode<synchronous>, transform_indices = @transform_3, window_bounds = array<i64: 1152, 128>}, {pipeline_mode = #tpu.pipeline_mode<synchronous>, transform_indices = @transform_4, window_bounds = array<i64: 1, 128>}, {transform_indices = @transform_5, window_bounds = array<i64: 1, 16, 16, 128>}]} {
    %cst = arith.constant 0.000000e+00 : bf16
    %0 = vector.broadcast %cst : bf16 to vector<1x18x128xbf16>
    %cst_0 = arith.constant 0.000000e+00 : bf16
    %1 = vector.broadcast %cst_0 : bf16 to vector<16x1x128xbf16>
    %c0 = arith.constant 0 : index
    %c0_1 = arith.constant 0 : index
    %c0_2 = arith.constant 0 : index
    %2 = vector.load %arg7[%c0, %c0_1, %c0_2] : memref<18x18x128xbf16, #tpu.memory_space<vmem>>, vector<1x18x128xbf16>
    tpu.vector_store %arg7[%c0, %c0_1, %c0_2], %0 {strides = array<i32>} : memref<18x18x128xbf16, #tpu.memory_space<vmem>>, vector<1x18x128xbf16>,
    %c17 = arith.constant 17 : index
    %c0_3 = arith.constant 0 : index
    %c0_4 = arith.constant 0 : index
    %3 = vector.load %arg7[%c17, %c0_3, %c0_4] : memref<18x18x128xbf16, #tpu.memory_space<vmem>>, vector<1x18x128xbf16>
    tpu.vector_store %arg7[%c17, %c0_3, %c0_4], %0 {strides = array<i32>} : memref<18x18x128xbf16, #tpu.memory_space<vmem>>, vector<1x18x128xbf16>,
    %c1 = arith.constant 1 : index
    %c0_5 = arith.constant 0 : index
    %c0_6 = arith.constant 0 : index
    %4 = vector.load %arg7[%c1, %c0_5, %c0_6] : memref<18x18x128xbf16, #tpu.memory_space<vmem>>, vector<16x1x128xbf16>
    tpu.vector_store %arg7[%c1, %c0_5, %c0_6], %1 {strides = array<i32>} : memref<18x18x128xbf16, #tpu.memory_space<vmem>>, vector<16x1x128xbf16>,
    %c1_7 = arith.constant 1 : index
    %c17_8 = arith.constant 17 : index
    %c0_9 = arith.constant 0 : index
    %5 = vector.load %arg7[%c1_7, %c17_8, %c0_9] : memref<18x18x128xbf16, #tpu.memory_space<vmem>>, vector<16x1x128xbf16>
    tpu.vector_store %arg7[%c1_7, %c17_8, %c0_9], %1 {strides = array<i32>} : memref<18x18x128xbf16, #tpu.memory_space<vmem>>, vector<16x1x128xbf16>,
    %c0_10 = arith.constant 0 : index
    %c0_11 = arith.constant 0 : index
    %c0_12 = arith.constant 0 : index
    %6 = vector.load %arg8[%c0_10, %c0_11, %c0_12] : memref<18x18x128xbf16, #tpu.memory_space<vmem>>, vector<1x18x128xbf16>
    tpu.vector_store %arg8[%c0_10, %c0_11, %c0_12], %0 {strides = array<i32>} : memref<18x18x128xbf16, #tpu.memory_space<vmem>>, vector<1x18x128xbf16>,
    %c17_13 = arith.constant 17 : index
    %c0_14 = arith.constant 0 : index
    %c0_15 = arith.constant 0 : index
    %7 = vector.load %arg8[%c17_13, %c0_14, %c0_15] : memref<18x18x128xbf16, #tpu.memory_space<vmem>>, vector<1x18x128xbf16>
    tpu.vector_store %arg8[%c17_13, %c0_14, %c0_15], %0 {strides = array<i32>} : memref<18x18x128xbf16, #tpu.memory_space<vmem>>, vector<1x18x128xbf16>,
    %c1_16 = arith.constant 1 : index
    %c0_17 = arith.constant 0 : index
    %c0_18 = arith.constant 0 : index
    %8 = vector.load %arg8[%c1_16, %c0_17, %c0_18] : memref<18x18x128xbf16, #tpu.memory_space<vmem>>, vector<16x1x128xbf16>
    tpu.vector_store %arg8[%c1_16, %c0_17, %c0_18], %1 {strides = array<i32>} : memref<18x18x128xbf16, #tpu.memory_space<vmem>>, vector<16x1x128xbf16>,
    %c1_19 = arith.constant 1 : index
    %c17_20 = arith.constant 17 : index
    %c0_21 = arith.constant 0 : index
    %9 = vector.load %arg8[%c1_19, %c17_20, %c0_21] : memref<18x18x128xbf16, #tpu.memory_space<vmem>>, vector<16x1x128xbf16>
    tpu.vector_store %arg8[%c1_19, %c17_20, %c0_21], %1 {strides = array<i32>} : memref<18x18x128xbf16, #tpu.memory_space<vmem>>, vector<16x1x128xbf16>,
    %c0_22 = arith.constant 0 : index
    %c0_23 = arith.constant 0 : index
    %c0_24 = arith.constant 0 : index
    %c0_25 = arith.constant 0 : index
    %10 = vector.load %arg1[%c0_22, %c0_23, %c0_24, %c0_25] : memref<1x16x16x128xf32, #tpu.memory_space<vmem>>, vector<1x16x16x128xf32>
    %11 = vector.shape_cast %10 : vector<1x16x16x128xf32> to vector<16x16x128xf32>
    %12 = arith.truncf %11 : vector<16x16x128xf32> to vector<16x16x128xbf16>
    %c1_26 = arith.constant 1 : index
    %c1_27 = arith.constant 1 : index
    %c0_28 = arith.constant 0 : index
    %13 = vector.load %arg7[%c1_26, %c1_27, %c0_28] : memref<18x18x128xbf16, #tpu.memory_space<vmem>>, vector<16x16x128xbf16>
    tpu.vector_store %arg7[%c1_26, %c1_27, %c0_28], %12 {strides = array<i32>} : memref<18x18x128xbf16, #tpu.memory_space<vmem>>, vector<16x16x128xbf16>,
    %c0_29 = arith.constant 0 : index
    %c0_30 = arith.constant 0 : index
    %c0_31 = arith.constant 0 : index
    %14 = vector.load %arg7[%c0_29, %c0_30, %c0_31] : memref<18x18x128xbf16, #tpu.memory_space<vmem>>, vector<18x18x128xbf16>
    %15 = vector.extract_strided_slice %14 {offsets = [0, 0, 0], sizes = [16, 16, 128], strides = [1, 1, 1]} : vector<18x18x128xbf16> to vector<16x16x128xbf16>
    %c0_32 = arith.constant 0 : index
    %c0_33 = arith.constant 0 : index
    %c0_34 = arith.constant 0 : index
    %16 = vector.load %arg9[%c0_32, %c0_33, %c0_34] : memref<16x16x1152xbf16, #tpu.memory_space<vmem>>, vector<16x16x128xbf16>
    tpu.vector_store %arg9[%c0_32, %c0_33, %c0_34], %15 {strides = array<i32>} : memref<16x16x1152xbf16, #tpu.memory_space<vmem>>, vector<16x16x128xbf16>,
    %17 = vector.extract_strided_slice %14 {offsets = [0, 1, 0], sizes = [16, 16, 128], strides = [1, 1, 1]} : vector<18x18x128xbf16> to vector<16x16x128xbf16>
    %c0_35 = arith.constant 0 : index
    %c0_36 = arith.constant 0 : index
    %c128 = arith.constant 128 : index
    %18 = vector.load %arg9[%c0_35, %c0_36, %c128] : memref<16x16x1152xbf16, #tpu.memory_space<vmem>>, vector<16x16x128xbf16>
    tpu.vector_store %arg9[%c0_35, %c0_36, %c128], %17 {strides = array<i32>} : memref<16x16x1152xbf16, #tpu.memory_space<vmem>>, vector<16x16x128xbf16>,
    %19 = vector.extract_strided_slice %14 {offsets = [0, 2, 0], sizes = [16, 16, 128], strides = [1, 1, 1]} : vector<18x18x128xbf16> to vector<16x16x128xbf16>
    %c0_37 = arith.constant 0 : index
    %c0_38 = arith.constant 0 : index
    %c256 = arith.constant 256 : index
    %20 = vector.load %arg9[%c0_37, %c0_38, %c256] : memref<16x16x1152xbf16, #tpu.memory_space<vmem>>, vector<16x16x128xbf16>
    tpu.vector_store %arg9[%c0_37, %c0_38, %c256], %19 {strides = array<i32>} : memref<16x16x1152xbf16, #tpu.memory_space<vmem>>, vector<16x16x128xbf16>,
    %21 = vector.extract_strided_slice %14 {offsets = [1, 0, 0], sizes = [16, 16, 128], strides = [1, 1, 1]} : vector<18x18x128xbf16> to vector<16x16x128xbf16>
    %c0_39 = arith.constant 0 : index
    %c0_40 = arith.constant 0 : index
    %c384 = arith.constant 384 : index
    %22 = vector.load %arg9[%c0_39, %c0_40, %c384] : memref<16x16x1152xbf16, #tpu.memory_space<vmem>>, vector<16x16x128xbf16>
    tpu.vector_store %arg9[%c0_39, %c0_40, %c384], %21 {strides = array<i32>} : memref<16x16x1152xbf16, #tpu.memory_space<vmem>>, vector<16x16x128xbf16>,
    %23 = vector.extract_strided_slice %14 {offsets = [1, 1, 0], sizes = [16, 16, 128], strides = [1, 1, 1]} : vector<18x18x128xbf16> to vector<16x16x128xbf16>
    %c0_41 = arith.constant 0 : index
    %c0_42 = arith.constant 0 : index
    %c512 = arith.constant 512 : index
    %24 = vector.load %arg9[%c0_41, %c0_42, %c512] : memref<16x16x1152xbf16, #tpu.memory_space<vmem>>, vector<16x16x128xbf16>
    tpu.vector_store %arg9[%c0_41, %c0_42, %c512], %23 {strides = array<i32>} : memref<16x16x1152xbf16, #tpu.memory_space<vmem>>, vector<16x16x128xbf16>,
    %25 = vector.extract_strided_slice %14 {offsets = [1, 2, 0], sizes = [16, 16, 128], strides = [1, 1, 1]} : vector<18x18x128xbf16> to vector<16x16x128xbf16>
    %c0_43 = arith.constant 0 : index
    %c0_44 = arith.constant 0 : index
    %c640 = arith.constant 640 : index
    %26 = vector.load %arg9[%c0_43, %c0_44, %c640] : memref<16x16x1152xbf16, #tpu.memory_space<vmem>>, vector<16x16x128xbf16>
    tpu.vector_store %arg9[%c0_43, %c0_44, %c640], %25 {strides = array<i32>} : memref<16x16x1152xbf16, #tpu.memory_space<vmem>>, vector<16x16x128xbf16>,
    %27 = vector.extract_strided_slice %14 {offsets = [2, 0, 0], sizes = [16, 16, 128], strides = [1, 1, 1]} : vector<18x18x128xbf16> to vector<16x16x128xbf16>
    %c0_45 = arith.constant 0 : index
    %c0_46 = arith.constant 0 : index
    %c768 = arith.constant 768 : index
    %28 = vector.load %arg9[%c0_45, %c0_46, %c768] : memref<16x16x1152xbf16, #tpu.memory_space<vmem>>, vector<16x16x128xbf16>
    tpu.vector_store %arg9[%c0_45, %c0_46, %c768], %27 {strides = array<i32>} : memref<16x16x1152xbf16, #tpu.memory_space<vmem>>, vector<16x16x128xbf16>,
    %29 = vector.extract_strided_slice %14 {offsets = [2, 1, 0], sizes = [16, 16, 128], strides = [1, 1, 1]} : vector<18x18x128xbf16> to vector<16x16x128xbf16>
    %c0_47 = arith.constant 0 : index
    %c0_48 = arith.constant 0 : index
    %c896 = arith.constant 896 : index
    %30 = vector.load %arg9[%c0_47, %c0_48, %c896] : memref<16x16x1152xbf16, #tpu.memory_space<vmem>>, vector<16x16x128xbf16>
    tpu.vector_store %arg9[%c0_47, %c0_48, %c896], %29 {strides = array<i32>} : memref<16x16x1152xbf16, #tpu.memory_space<vmem>>, vector<16x16x128xbf16>,
    %31 = vector.extract_strided_slice %14 {offsets = [2, 2, 0], sizes = [16, 16, 128], strides = [1, 1, 1]} : vector<18x18x128xbf16> to vector<16x16x128xbf16>
    %c0_49 = arith.constant 0 : index
    %c0_50 = arith.constant 0 : index
    %c1024 = arith.constant 1024 : index
    %32 = vector.load %arg9[%c0_49, %c0_50, %c1024] : memref<16x16x1152xbf16, #tpu.memory_space<vmem>>, vector<16x16x128xbf16>
    tpu.vector_store %arg9[%c0_49, %c0_50, %c1024], %31 {strides = array<i32>} : memref<16x16x1152xbf16, #tpu.memory_space<vmem>>, vector<16x16x128xbf16>,
    %c0_51 = arith.constant 0 : index
    %c0_52 = arith.constant 0 : index
    %c0_53 = arith.constant 0 : index
    %33 = vector.load %arg9[%c0_51, %c0_52, %c0_53] : memref<16x16x1152xbf16, #tpu.memory_space<vmem>>, vector<16x16x1152xbf16>
    %34 = vector.shape_cast %33 : vector<16x16x1152xbf16> to vector<256x1152xbf16>
    %c0_54 = arith.constant 0 : index
    %c0_55 = arith.constant 0 : index
    %35 = vector.load %arg2[%c0_54, %c0_55] : memref<1152x128xbf16, #tpu.memory_space<vmem>>, vector<1152x128xbf16>
    %cst_56 = arith.constant dense<0.000000e+00> : vector<256x128xf32>
    %36 = tpu.matmul %34, %35, %cst_56 {dimension_numbers = #tpu.dot_dimension_numbers<[1], [0], [0], [1], [0, 0, 1, 1], [], []>} : vector<256x1152xbf16>, vector<1152x128xbf16>, vector<256x128xf32> -> vector<256x128xf32>
    %c0_57 = arith.constant 0 : index
    %c0_58 = arith.constant 0 : index
    %37 = vector.load %arg3[%c0_57, %c0_58] : memref<1x128xf32, #tpu.memory_space<vmem>>, vector<1x128xf32>
    %38 = vector.broadcast %37 : vector<1x128xf32> to vector<256x128xf32>
    %39 = arith.addf %36, %38 : vector<256x128xf32>
    %cst_59 = arith.constant 0.000000e+00 : f32
    %40 = vector.broadcast %cst_59 : f32 to vector<256x128xf32>
    %41 = arith.maximumf %39, %40 : vector<256x128xf32>
    %42 = vector.shape_cast %41 : vector<256x128xf32> to vector<16x16x128xf32>
    %43 = arith.truncf %42 : vector<16x16x128xf32> to vector<16x16x128xbf16>
    %c1_60 = arith.constant 1 : index
    %c1_61 = arith.constant 1 : index
    %c0_62 = arith.constant 0 : index
    %44 = vector.load %arg8[%c1_60, %c1_61, %c0_62] : memref<18x18x128xbf16, #tpu.memory_space<vmem>>, vector<16x16x128xbf16>
    tpu.vector_store %arg8[%c1_60, %c1_61, %c0_62], %43 {strides = array<i32>} : memref<18x18x128xbf16, #tpu.memory_space<vmem>>, vector<16x16x128xbf16>,
    %c0_63 = arith.constant 0 : index
    %c0_64 = arith.constant 0 : index
    %c0_65 = arith.constant 0 : index
    %45 = vector.load %arg8[%c0_63, %c0_64, %c0_65] : memref<18x18x128xbf16, #tpu.memory_space<vmem>>, vector<18x18x128xbf16>
    %46 = vector.extract_strided_slice %45 {offsets = [0, 0, 0], sizes = [16, 16, 128], strides = [1, 1, 1]} : vector<18x18x128xbf16> to vector<16x16x128xbf16>
    %c0_66 = arith.constant 0 : index
    %c0_67 = arith.constant 0 : index
    %c0_68 = arith.constant 0 : index
    %47 = vector.load %arg9[%c0_66, %c0_67, %c0_68] : memref<16x16x1152xbf16, #tpu.memory_space<vmem>>, vector<16x16x128xbf16>
    tpu.vector_store %arg9[%c0_66, %c0_67, %c0_68], %46 {strides = array<i32>} : memref<16x16x1152xbf16, #tpu.memory_space<vmem>>, vector<16x16x128xbf16>,
    %48 = vector.extract_strided_slice %45 {offsets = [0, 1, 0], sizes = [16, 16, 128], strides = [1, 1, 1]} : vector<18x18x128xbf16> to vector<16x16x128xbf16>
    %c0_69 = arith.constant 0 : index
    %c0_70 = arith.constant 0 : index
    %c128_71 = arith.constant 128 : index
    %49 = vector.load %arg9[%c0_69, %c0_70, %c128_71] : memref<16x16x1152xbf16, #tpu.memory_space<vmem>>, vector<16x16x128xbf16>
    tpu.vector_store %arg9[%c0_69, %c0_70, %c128_71], %48 {strides = array<i32>} : memref<16x16x1152xbf16, #tpu.memory_space<vmem>>, vector<16x16x128xbf16>,
    %50 = vector.extract_strided_slice %45 {offsets = [0, 2, 0], sizes = [16, 16, 128], strides = [1, 1, 1]} : vector<18x18x128xbf16> to vector<16x16x128xbf16>
    %c0_72 = arith.constant 0 : index
    %c0_73 = arith.constant 0 : index
    %c256_74 = arith.constant 256 : index
    %51 = vector.load %arg9[%c0_72, %c0_73, %c256_74] : memref<16x16x1152xbf16, #tpu.memory_space<vmem>>, vector<16x16x128xbf16>
    tpu.vector_store %arg9[%c0_72, %c0_73, %c256_74], %50 {strides = array<i32>} : memref<16x16x1152xbf16, #tpu.memory_space<vmem>>, vector<16x16x128xbf16>,
    %52 = vector.extract_strided_slice %45 {offsets = [1, 0, 0], sizes = [16, 16, 128], strides = [1, 1, 1]} : vector<18x18x128xbf16> to vector<16x16x128xbf16>
    %c0_75 = arith.constant 0 : index
    %c0_76 = arith.constant 0 : index
    %c384_77 = arith.constant 384 : index
    %53 = vector.load %arg9[%c0_75, %c0_76, %c384_77] : memref<16x16x1152xbf16, #tpu.memory_space<vmem>>, vector<16x16x128xbf16>
    tpu.vector_store %arg9[%c0_75, %c0_76, %c384_77], %52 {strides = array<i32>} : memref<16x16x1152xbf16, #tpu.memory_space<vmem>>, vector<16x16x128xbf16>,
    %54 = vector.extract_strided_slice %45 {offsets = [1, 1, 0], sizes = [16, 16, 128], strides = [1, 1, 1]} : vector<18x18x128xbf16> to vector<16x16x128xbf16>
    %c0_78 = arith.constant 0 : index
    %c0_79 = arith.constant 0 : index
    %c512_80 = arith.constant 512 : index
    %55 = vector.load %arg9[%c0_78, %c0_79, %c512_80] : memref<16x16x1152xbf16, #tpu.memory_space<vmem>>, vector<16x16x128xbf16>
    tpu.vector_store %arg9[%c0_78, %c0_79, %c512_80], %54 {strides = array<i32>} : memref<16x16x1152xbf16, #tpu.memory_space<vmem>>, vector<16x16x128xbf16>,
    %56 = vector.extract_strided_slice %45 {offsets = [1, 2, 0], sizes = [16, 16, 128], strides = [1, 1, 1]} : vector<18x18x128xbf16> to vector<16x16x128xbf16>
    %c0_81 = arith.constant 0 : index
    %c0_82 = arith.constant 0 : index
    %c640_83 = arith.constant 640 : index
    %57 = vector.load %arg9[%c0_81, %c0_82, %c640_83] : memref<16x16x1152xbf16, #tpu.memory_space<vmem>>, vector<16x16x128xbf16>
    tpu.vector_store %arg9[%c0_81, %c0_82, %c640_83], %56 {strides = array<i32>} : memref<16x16x1152xbf16, #tpu.memory_space<vmem>>, vector<16x16x128xbf16>,
    %58 = vector.extract_strided_slice %45 {offsets = [2, 0, 0], sizes = [16, 16, 128], strides = [1, 1, 1]} : vector<18x18x128xbf16> to vector<16x16x128xbf16>
    %c0_84 = arith.constant 0 : index
    %c0_85 = arith.constant 0 : index
    %c768_86 = arith.constant 768 : index
    %59 = vector.load %arg9[%c0_84, %c0_85, %c768_86] : memref<16x16x1152xbf16, #tpu.memory_space<vmem>>, vector<16x16x128xbf16>
    tpu.vector_store %arg9[%c0_84, %c0_85, %c768_86], %58 {strides = array<i32>} : memref<16x16x1152xbf16, #tpu.memory_space<vmem>>, vector<16x16x128xbf16>,
    %60 = vector.extract_strided_slice %45 {offsets = [2, 1, 0], sizes = [16, 16, 128], strides = [1, 1, 1]} : vector<18x18x128xbf16> to vector<16x16x128xbf16>
    %c0_87 = arith.constant 0 : index
    %c0_88 = arith.constant 0 : index
    %c896_89 = arith.constant 896 : index
    %61 = vector.load %arg9[%c0_87, %c0_88, %c896_89] : memref<16x16x1152xbf16, #tpu.memory_space<vmem>>, vector<16x16x128xbf16>
    tpu.vector_store %arg9[%c0_87, %c0_88, %c896_89], %60 {strides = array<i32>} : memref<16x16x1152xbf16, #tpu.memory_space<vmem>>, vector<16x16x128xbf16>,
    %62 = vector.extract_strided_slice %45 {offsets = [2, 2, 0], sizes = [16, 16, 128], strides = [1, 1, 1]} : vector<18x18x128xbf16> to vector<16x16x128xbf16>
    %c0_90 = arith.constant 0 : index
    %c0_91 = arith.constant 0 : index
    %c1024_92 = arith.constant 1024 : index
    %63 = vector.load %arg9[%c0_90, %c0_91, %c1024_92] : memref<16x16x1152xbf16, #tpu.memory_space<vmem>>, vector<16x16x128xbf16>
    tpu.vector_store %arg9[%c0_90, %c0_91, %c1024_92], %62 {strides = array<i32>} : memref<16x16x1152xbf16, #tpu.memory_space<vmem>>, vector<16x16x128xbf16>,
    %c0_93 = arith.constant 0 : index
    %c0_94 = arith.constant 0 : index
    %c0_95 = arith.constant 0 : index
    %64 = vector.load %arg9[%c0_93, %c0_94, %c0_95] : memref<16x16x1152xbf16, #tpu.memory_space<vmem>>, vector<16x16x1152xbf16>
    %65 = vector.shape_cast %64 : vector<16x16x1152xbf16> to vector<256x1152xbf16>
    %c0_96 = arith.constant 0 : index
    %c0_97 = arith.constant 0 : index
    %66 = vector.load %arg4[%c0_96, %c0_97] : memref<1152x128xbf16, #tpu.memory_space<vmem>>, vector<1152x128xbf16>
    %cst_98 = arith.constant dense<0.000000e+00> : vector<256x128xf32>
    %67 = tpu.matmul %65, %66, %cst_98 {dimension_numbers = #tpu.dot_dimension_numbers<[1], [0], [0], [1], [0, 0, 1, 1], [], []>} : vector<256x1152xbf16>, vector<1152x128xbf16>, vector<256x128xf32> -> vector<256x128xf32>
    %c0_99 = arith.constant 0 : index
    %c0_100 = arith.constant 0 : index
    %68 = vector.load %arg5[%c0_99, %c0_100] : memref<1x128xf32, #tpu.memory_space<vmem>>, vector<1x128xf32>
    %69 = vector.broadcast %68 : vector<1x128xf32> to vector<256x128xf32>
    %70 = arith.addf %67, %69 : vector<256x128xf32>
    %71 = vector.shape_cast %70 : vector<256x128xf32> to vector<16x16x128xf32>
    %cst_101 = arith.constant 1.000000e+00 : f32
    %72 = vector.broadcast %cst_101 : f32 to vector<16x16x128xf32>
    %73 = arith.mulf %71, %72 : vector<16x16x128xf32>
    %74 = arith.addf %73, %11 : vector<16x16x128xf32>
    %c0_102 = arith.constant 0 : index
    %c0_103 = arith.constant 0 : index
    %c0_104 = arith.constant 0 : index
    %c0_105 = arith.constant 0 : index
    %75 = vector.load %arg6[%c0_102, %c0_103, %c0_104, %c0_105] : memref<1x16x16x128xf32, #tpu.memory_space<vmem>>, vector<1x16x16x128xf32>
    %76 = vector.shape_cast %75 : vector<1x16x16x128xf32> to vector<16x16x128xf32>
    %77 = vector.shape_cast %74 : vector<16x16x128xf32> to vector<1x16x16x128xf32>
    tpu.vector_store %arg6[%c0_102, %c0_103, %c0_104, %c0_105], %77 {strides = array<i32>} : memref<1x16x16x128xf32, #tpu.memory_space<vmem>>, vector<1x16x16x128xf32>,
    return
  }
  func.func @transform_0(%arg0: i32) -> (i32, i32, i32, i32) {
    %c0_i32 = arith.constant 0 : i32
    %c0_i32_0 = arith.constant 0 : i32
    %c0_i32_1 = arith.constant 0 : i32
    %c0_i32_2 = arith.constant 0 : i32
    return %arg0, %c0_i32, %c0_i32_0, %c0_i32_1 : i32, i32, i32, i32
  }
  func.func @transform_1(%arg0: i32) -> (i32, i32) {
    %c0_i32 = arith.constant 0 : i32
    %c0_i32_0 = arith.constant 0 : i32
    %c0_i32_1 = arith.constant 0 : i32
    return %c0_i32, %c0_i32_0 : i32, i32
  }
  func.func @transform_2(%arg0: i32) -> (i32, i32) {
    %c0_i32 = arith.constant 0 : i32
    %c0_i32_0 = arith.constant 0 : i32
    %c0_i32_1 = arith.constant 0 : i32
    return %c0_i32, %c0_i32_0 : i32, i32
  }
  func.func @transform_3(%arg0: i32) -> (i32, i32) {
    %c0_i32 = arith.constant 0 : i32
    %c0_i32_0 = arith.constant 0 : i32
    %c0_i32_1 = arith.constant 0 : i32
    return %c0_i32, %c0_i32_0 : i32, i32
  }
  func.func @transform_4(%arg0: i32) -> (i32, i32) {
    %c0_i32 = arith.constant 0 : i32
    %c0_i32_0 = arith.constant 0 : i32
    %c0_i32_1 = arith.constant 0 : i32
    return %c0_i32, %c0_i32_0 : i32, i32
  }
  func.func @transform_5(%arg0: i32) -> (i32, i32, i32, i32) {
    %c0_i32 = arith.constant 0 : i32
    %c0_i32_0 = arith.constant 0 : i32
    %c0_i32_1 = arith.constant 0 : i32
    %c0_i32_2 = arith.constant 0 : i32
    return %arg0, %c0_i32, %c0_i32_0, %c0_i32_1 : i32, i32, i32, i32
  }
}

</mosaic_0001>

<bundles_post_ra>
// kernel: tpu_custom_call.1
= control target key start
LH: loop header
LB: loop body
LE: loop exit
PB: predicated region body
PF: predicated region fallthrough
CT: control target
= control target key end

     0   :  { %10 = vsyncpa [#allocation6], 0  ;;  %s13495_s0 = inlined_call_operand.hbm [shape: f32[2,16,16,128], index: 0, kind: input, shape index: {}]   ;;  %s13496_s1 = inlined_call_operand.hbm [shape: bf16[1152,128], index: 1, kind: input, shape index: {}]   ;;  %s13497_s2 = inlined_call_operand.vmem [shape: f32[1,128], index: 2, kind: input, shape index: {}]   ;;  %s13498_s3 = inlined_call_operand.hbm [shape: bf16[1152,128], index: 3, kind: input, shape index: {}]   ;;  %s13499_s4 = inlined_call_operand.vmem [shape: f32[1,128], index: 4, kind: input, shape index: {}]   ;;  %s13500_s5 = inlined_call_operand.hbm [shape: f32[2,16,16,128], index: 5, kind: output, shape index: {}]  }
   0x1   :  { %12 = vsyncpa [#allocation6 + $0x1], 0 }
   0x2   :  { %13 = vsyncpa [#allocation9], 0 }
   0x3   :  { %14 = vsyncpa [#allocation7], 0 }
   0x4   :  { %16 = vsyncpa [#allocation7 + $0x1], 0  ;;  %s10920_s18 = smov 0   ;;  %s10922_s19 = smov 0  }
   0x5   :  { %s10924_s20 = smov 0   ;;  %s10926_s21 = smov 0  }
   0x6 LB: > { %s10941_s22 = sadd.s32 4294967295, %s10877_s21   ;;  %s8406_s23 = sadd.s32 4294967294, %s10877_s21   ;;  %s10877_s21 = sphi %s10926_s21, %s13688_s21   ;;  %s10873_s20 = sphi %s10924_s20, %s13687_s20   ;;  %s10869_s19 = sphi %s10922_s19, %s13686_s19   ;;  %s10865_s18 = sphi %s10920_s18, %s13685_s18  }
   0x7   : > { %p42_p0 = scmp.ne.s32.totalorder %s10869_s19, %s10865_s18  ;;  %p13501_p1 = scmp.eq.s32.totalorder %s10941_s22, 0 }
   0x8   : > { %p156_p3 = scmp.eq.s32.totalorder %s8406_s23, 1  ;;  %p8407_p5 = scmp.ge.s32.totalorder %s10877_s21, 1 }
   0x9   : > { %p10950_p4 = por %p13501_p1, %p42_p0  ;;  %p163_p7 = scmp.lt.s32.totalorder %s10877_s21, 3 }
   0xa   : > { %p10955_p6 = por %p156_p3, %p42_p0  ;;  %s10879_s27 = smov [#allocation8]  }
   0xb   : > { %s13515_s24 = scalar_select %p10950_p4, 1, 0 }
   0xc   : > { %s13516_s25 = scalar_select %p10955_p6, 1, 0 }
   0xd   : > { %p10960_p8 = pnand %p8407_p5, %p163_p7  ;;  %s175_s28 = sshll.u32 %s10879_s27, 4  ;;  %s176_s28 = int_to_ptr.vmem [resolvable:$true] %s175_s28 }
   0xe   : > { %s10880_s30 = smov [#allocation10]   ;;  %s10740_s7 = scalar_lea.vmem %s176_s28, 9216 }
   0xf   : > { %s13517_s26 = scalar_select %p10960_p8, 1, 0 }
  0x10   : > { %p10076_p9 = pneg %p10960_p8  ;;  %s191_s6 = sshll.u32 %s10880_s30, 4  ;;  %s192_s6 = int_to_ptr.vmem [resolvable:$true] %s191_s6 }
  0x11   : > { %p10741_p13 = scmp.ne.s32.totalorder %s176_s28, %s10740_s7  ;;  %p10748_p5 = scmp.lt.s32.totalorder %s176_s28, %s176_s28 }
  0x12   : > { %p10969_p11 = pnand %p10076_p9, %p13501_p1  ;;  %p10749_p7 = scmp.lt.s32.totalorder %s10740_s7, %s10740_s7 }
  0x14   : > { %p10731_p12 = pneg %p10969_p11  ;;  %p10750_p10 = por %p10749_p7, %p10748_p5 }
  0x16   : > { %p10743_p0 = pnand %p10741_p13, %p10731_p12 }
  0x18   : > { %p10744_p3 = pneg %p10743_p0 }
  0x1a   : > { %p10751_p9 = pnand %p10750_p10, %p10744_p3 }
  0x1c   : > { %10754 = shalt.err (!%p10751_p9)
}
  0x1d   : > { %s10881_s8 = smov 64   ;;  %s10882_s9 = smov 4  }
  0x1e   : > { %10079 = dma.hbm_to_vmem [thread:$0]  (!%p10969_p11), %s13496_s1, 9216, %s176_s28, [#allocation9], %s10881_s8, %s10881_s8, %s10882_s9  }
  0x1f   : > { %s10766_s12 = scalar_lea.vmem %s192_s6, 9216  ;;  %p10774_p2 = scmp.lt.s32.totalorder %s192_s6, %s192_s6 }
  0x20   : > { %p10767_p1 = scmp.ne.s32.totalorder %s192_s6, %s10766_s12  ;;  %p10775_p6 = scmp.lt.s32.totalorder %s10766_s12, %s10766_s12 }
  0x22   : > { %p10769_p13 = pnand %p10767_p1, %p10731_p12  ;;  %p10776_p5 = por %p10775_p6, %p10774_p2 }
  0x24   : > { %p10770_p0 = pneg %p10769_p13 }
  0x26   : > { %p10777_p10 = pnand %p10776_p5, %p10770_p0 }
  0x28   : > { %10780 = shalt.err (!%p10777_p10)
}
  0x29   : > { %10082 = dma.hbm_to_vmem [thread:$0]  (!%p10969_p11), %s13498_s3, 9216, %s192_s6, [#allocation9], %s10881_s8, %s10881_s8, %s10882_s9  }
  0x2a   : > { %s10992_s15 = sadd.s32 1, %s10877_s21   ;;  %s29_s16 = sadd.s32 1, %s10873_s20 }
  0x2b   : > { %s26_s17 = ssub.s32 %s10877_s21, %s10992_s15  ;;  %p36_p1 = scmp.ne.s32.totalorder %s10873_s20, %s10869_s19 }
  0x2c   : > { %p27_p2 = scmp.eq.s32.totalorder %s26_s17, 0  ;;  %p37_p6 = scmp.eq.s32.totalorder %s10877_s21, 0 }
  0x2d   : > { %p13519_p12 = scmp.eq.s32.totalorder %s10941_s22, 1  ;;  %p10093_p7 = scmp.lt.s32.totalorder %s10877_s21, 2 }
  0x2e   : > { %s11008_s27 = scalar_select %p27_p2, %s10873_s20, %s29_s16  }
  0x2f   : > { %p11002_p3 = por %p13519_p12, %p36_p1  ;;  %p38_p9 = por %p37_p6, %p36_p1 }
  0x30   : > { %s208_s28 = sand.u32 1, %s10873_s20   ;;  %s8958_s30 = sshll.u32 %s10877_s21, 12 }
  0x31   : > { %s13520_s23 = scalar_select %p11002_p3, 1, 0 }
  0x32   : > { %s8411_s29 = sshll.u32 %s208_s28, 8  ;;  %s11015_s8 = scalar_lea.hbm %s13495_s0, %s8958_s30 }
  0x33   : > { %s212_s9 = scalar_lea.vmem [#allocation5], %s8411_s29  ;;  %p11019_p11 = pnand %p10093_p7, %p38_p9 }
  0x34   : > { %s219_s10 = sshll.u32 %s212_s9, 4  ;;  %s11023_s12 = scalar_lea.sflag [#allocation6], %s208_s28  ;;  %s11017_s10 = int_to_ptr.vmem [resolvable:$true] %s219_s10 }
  0x35   : > { %s10781_s13 = scalar_lea.hbm %s11015_s8, 4096  ;;  %p10783_p0 = pneg %p11019_p11 }
  0x36   : > { %p10782_p13 = scmp.ne.s32.totalorder %s11015_s8, %s10781_s13  ;;  %s10786_s17 = scalar_lea.hbm %s13495_s0, 8192 }
  0x37   : > { %p10787_p1 = scmp.lt.s32.totalorder %s11015_s8, %s13495_s0  ;;  %p10788_p2 = scmp.lt.s32.totalorder %s10786_s17, %s10781_s13 }
  0x38   : > { %p10784_p5 = pnand %p10783_p0, %p10782_p13 }
  0x39   : > { %p10789_p6 = por %p10788_p2, %p10787_p1 }
  0x3a   : > { %p10785_p10 = pneg %p10784_p5 }
  0x3c   : > { %p10790_p12 = pnand %p10789_p6, %p10785_p10 }
  0x3e   : > { %10793 = shalt.err (!%p10790_p12)
}
  0x3f   : > { %s10794_s28 = scalar_lea.vmem %s11017_s10, 4096  ;;  %s10883_s6 = smov [#allocation5]  }
  0x40   : > { %p10795_p7 = scmp.ne.s32.totalorder %s11017_s10, %s10794_s28  ;;  %s10799_s7 = sshll.u32 %s10883_s6, 4  ;;  %s10800_s7 = int_to_ptr.vmem [resolvable:$false] %s10799_s7 }
  0x41   : > { %s10801_s9 = scalar_lea.vmem %s10800_s7, 8192  ;;  %p10802_p5 = scmp.lt.s32.totalorder %s11017_s10, %s10800_s7 }
  0x42   : > { %p10797_p9 = pnand %p10795_p7, %p10783_p0  ;;  %p10803_p3 = scmp.lt.s32.totalorder %s10801_s9, %s10794_s28 }
  0x44   : > { %p10798_p13 = pneg %p10797_p9  ;;  %p10804_p4 = por %p10803_p3, %p10802_p5 }
  0x46   : > { %p10805_p8 = pnand %p10804_p4, %p10798_p13 }
  0x48   : > { %10808 = shalt.err (!%p10805_p8)
}
  0x49   : > { %s10884_s13 = smov 128   ;;  %s10885_s14 = smov 8  }
  0x4a   : > { %10086 = dma.hbm_to_vmem [thread:$0]  (!%p11019_p11), %s11015_s8, 4096, %s11017_s10, %s11023_s12, %s10884_s13, %s10884_s13, %s10885_s14  }
  0x4b   : > { %p13522_p0 = scmp.ne.s32.totalorder %s13517_s26, 0 }
  0x4d   : > { %231 = sbr.rel (%p13522_p0) target bundleno = 1369 (0x559), region = 40 }
  0x52   : > { %s11047_s16 = sand.u32 1, %s10869_s19   ;;  %p13523_p4 = scmp.ne.s32.totalorder %s13515_s24, 0 }
  0x53   : > { %s8415_s17 = sshll.u32 %s11047_s16, 8  ;;  %s234_s29 = scalar_lea.sflag [#allocation6], %s11047_s16 }
  0x54   : > { %s11053_s30 = scalar_lea.vmem [#allocation5], %s8415_s17 }
  0x55   : > { %10852 = dma.done.wait (%p13523_p4), %s234_s29, 4096  }
  0x56   : > { %10854 = vsyncadd (%p13523_p4), %s234_s29, 4294963200  ;;  %p13524_p8 = scmp.eq.s32.totalorder %s10941_s22, 0 }
  0x58   : > { %10856 = dma.done.wait (%p13524_p8), [#allocation9], 18432   ;;  %p13525_p3 = pmov %p13524_p8 }
  0x59   : > { %v10886_v0 = vmov 0   ;;  %v10138_v1 = vld [vmem:[#allocation8 + $0x78] sm:$0xff]   ;;  %v10142_v5 = vld [vmem:[#allocation8 + $0x70] sm:$0xff]   ;;  %v10146_v9 = vld [vmem:[#allocation8 + $0x68] sm:$0xff]   ;;  %vm282_vm0 = vsmask.f32 256 }
  0x5a   : > { %10858 = vsyncadd (%p13525_p3), [#allocation9], 4294948864  ;;  %273 = vst [vmem:[#allocation2] sm:$0xf] %v10886_v0  ;;  %v10139_v2 = vld [vmem:[#allocation8 + $0x38] sm:$0xff]   ;;  %9024 = vmatprep.subr.bf16.mxu0 %v10138_v1  ;;  %v10143_v6 = vld [vmem:[#allocation8 + $0x30] sm:$0xff]  }
  0x5b   : > { %274 = vst [vmem:[#allocation2 + $0x4] sm:$0xf] %v10886_v0  ;;  %275 = vst [vmem:[#allocation2 + $0x8] sm:$0x1] %v10886_v0  ;;  %v10140_v3 = vld [vmem:[#allocation8 + $0xf8] sm:$0xff]   ;;  %9025 = vmatpush3.bf16.msra.mxu0 %v10139_v2  ;;  %v10144_v7 = vld [vmem:[#allocation8 + $0xf0] sm:$0xff]  }
  0x5c   : > { %382 = vst [vmem:[#allocation3] sm:$0xf] %v10886_v0  ;;  %383 = vst [vmem:[#allocation3 + $0x4] sm:$0xf] %v10886_v0  ;;  %v10141_v4 = vld [vmem:[#allocation8 + $0xb8] sm:$0xff]   ;;  %9136 = vmatprep.subr.bf16.mxu1 %v10140_v3  ;;  %9026 = vmatprep.subr.bf16.mxu0 %v10142_v5  ;;  %v10145_v8 = vld [vmem:[#allocation8 + $0xb0] sm:$0xff]  }
  0x5d   : > { %384 = vst [vmem:[#allocation3 + $0x8] sm:$0x1] %v10886_v0  ;;  %277 = vst [vmem:[#allocation2 + $0xcc] sm:$0xf] %v10886_v0  ;;  %9137 = vmatpush3.bf16.msra.mxu1 %v10141_v4  ;;  %v10147_v10 = vld [vmem:[#allocation8 + $0x28] sm:$0xff]   ;;  %v10150_v13 = vld [vmem:[#allocation8 + $0x60] sm:$0xff]  }
  0x5e   : > { %278 = vst [vmem:[#allocation2 + $0xd0] sm:$0xf] %v10886_v0  ;;  %279 = vst [vmem:[#allocation2 + $0xd4] sm:$0x1] %v10886_v0  ;;  %9138 = vmatprep.subr.bf16.mxu1 %v10144_v7  ;;  %v10148_v11 = vld [vmem:[#allocation8 + $0xe8] sm:$0xff]   ;;  %v10151_v14 = vld [vmem:[#allocation8 + $0x20] sm:$0xff]  }
  0x5f   : > { %386 = vst [vmem:[#allocation3 + $0xcc] sm:$0xf] %v10886_v0  ;;  %387 = vst [vmem:[#allocation3 + $0xd0] sm:$0xf] %v10886_v0  ;;  %9027 = vmatpush3.bf16.msra.mxu0 %v10143_v6  ;;  %v10149_v12 = vld [vmem:[#allocation8 + $0xa8] sm:$0xff]   ;;  %v10152_v15 = vld [vmem:[#allocation8 + $0xe0] sm:$0xff]  }
  0x60   : > { %388 = vst [vmem:[#allocation3 + $0xd4] sm:$0x1] %v10886_v0  ;;  %9028 = vmatprep.subr.bf16.mxu0 %v10146_v9  ;;  %v10153_v16 = vld [vmem:[#allocation8 + $0xa0] sm:$0xff]   ;;  %v10154_v17 = vld [vmem:[#allocation8 + $0x58] sm:$0xff]   ;;  %v10158_v21 = vld [vmem:[#allocation8 + $0x50] sm:$0xff]   ;;  %vm281_vm3 = vcmask 1040384  }
  0x61   : > { %9139 = vmatpush3.bf16.msra.mxu1 %v10145_v8  ;;  %v10155_v18 = vld [vmem:[#allocation8 + $0x18] sm:$0xff]   ;;  %v10159_v22 = vld [vmem:[#allocation8 + $0x10] sm:$0xff]   ;;  %v10162_v25 = vld [vmem:[#allocation8 + $0x48] sm:$0xff]   ;;  %vm1136_vm1 = vsmask.f32 3328  ;;  %vm1635_vm4 = vcmask 1042432  }
  0x62   : > { %9140 = vmatprep.subr.bf16.mxu1 %v10148_v11  ;;  %v10156_v19 = vld [vmem:[#allocation8 + $0xd8] sm:$0xff]   ;;  %v10160_v23 = vld [vmem:[#allocation8 + $0xd0] sm:$0xff]   ;;  %v10163_v26 = vld [vmem:[#allocation8 + $0x8] sm:$0xff]   ;;  %vm1137_vm2 = vsmask.f32 7440  ;;  %vm1636_vm5 = vcmask 1046532  }
  0x63   : > { %9029 = vmatpush3.bf16.msra.mxu0 %v10147_v10  ;;  %v10157_v20 = vld [vmem:[#allocation8 + $0x98] sm:$0xff]   ;;  %v10161_v24 = vld [vmem:[#allocation8 + $0x90] sm:$0xff]   ;;  %v10164_v27 = vld [vmem:[#allocation8 + $0xc8] sm:$0xff]   ;;  %vm332_vm6 = vsmask.f32 7938  ;;  %vm936_vm8 = vcmask 1043456  }
  0x64   : > { %9030 = vmatprep.subr.bf16.mxu0 %v10150_v13  ;;  %v10165_v28 = vld [vmem:[#allocation8 + $0x88] sm:$0xff]   ;;  %v10166_v29 = vld [vmem:[#allocation8 + $0x40] sm:$0xff]   ;;  %v11063_v32 = vld [vmem:[#allocation2] sm:$0xf]  ;;  %vm614_vm7 = vsmask.f32 4368 }
  0x65   : > { %9141 = vmatpush3.bf16.msra.mxu1 %v10149_v12  ;;  %v10167_v30 = vld [vmem:[#allocation8] sm:$0xff]   ;;  %v1051_v33 = vld [vmem:[#allocation2 + $0x4] sm:$0xf]  ;;  %v11065_v34 = vld [vmem:[#allocation2 + $0x8] sm:$0x1]  ;;  %v1140_v35 = vshrl.u32 %v11063_v32, 16 }
  0x66   : > { %9142 = vmatprep.subr.bf16.mxu1 %v10152_v15  ;;  %v10168_v31 = vld [vmem:[#allocation8 + $0xc0] sm:$0xff]   ;;  %1104 = vst [vmem:[#allocation4] sm:$0xf] %v11063_v32  ;;  %1105 = vst [vmem:[#allocation4 + $0x24] sm:$0xf] %v1051_v33  ;;  %v1143_v36 = vshll.u32 %v11063_v32, 16 }
  0x67   : > { %9031 = vmatpush3.bf16.msra.mxu0 %v10151_v14  ;;  %v1149_v37 = vshll.u32 %v1051_v33, 16  ;;  %v1153_v38 = vshrl.u32 %v1051_v33, 16  ;;  %v11070_v39 = vld [vmem:[#allocation3] sm:$0xf]  ;;  %v1159_v40 = vshll.u32 %v11065_v34, 16  ;;  %v1142_v44 = vrot.slane %v1140_v35, 4  ;;  %vm11082_vm9 = vmand %vm281_vm3, %vm282_vm0 }
  0x68   : > { %9032 = vmatprep.subr.bf16.mxu0 %v10154_v17  ;;  %v11073_v41 = vld [vmem:[#allocation3 + $0x4] sm:$0xf]  ;;  %v11075_v42 = vld [vmem:[#allocation3 + $0x8] sm:$0x1]  ;;  %v5013_v43 = vshrl.u32 %v11070_v39, 16  ;;  %v1145_v45 = vrot.slane %v1143_v36, 5  ;;  %vm11090_vm10 = vmor %vm1136_vm1, %vm1137_vm2 }
  0x69   : > { %9143 = vmatpush3.bf16.msra.mxu1 %v10153_v16  ;;  %v1151_v46 = vrot.slane %v1149_v37, 5  ;;  %v1155_v47 = vrot.slane %v1153_v38, 4  ;;  %v1161_v48 = vrot.slane %v1159_v40, 5  ;;  %v5016_v50 = vshll.u32 %v11070_v39, 16  ;;  %v10171_v57 = vld [vmem:[#allocation8 + $0x80] sm:$0xff]   ;;  %v10172_v58 = vld [vmem:[#allocation8 + $0x178] sm:$0xff]   ;;  %vm11102_vm11 = vmor %vm1635_vm4, %vm1636_vm5 }
  0x6a   : > { %9144 = vmatprep.subr.bf16.mxu1 %v10156_v19  ;;  %v5015_v49 = vrot.slane %v5013_v43, 4  ;;  %v5022_v51 = vshll.u32 %v11073_v41, 16  ;;  %v13526_v52 = vmov 0  ;;  %v1146_v53 = vor.u32 %v1145_v45, %v1142_v44  ;;  %v284_v4 = vld [vmem:[#allocation2 + $0xc] sm:$0x1]  ;;  %v486_v8 = vld [vmem:[%s11053_s30] sm:$0xff]  ;;  %vm11120_vm12 = vmand %vm281_vm3, %vm332_vm6 }
  0x6b   : > { %9033 = vmatpush3.bf16.msra.mxu0 %v10155_v18  ;;  %v13527_v52 = vsel %vm11082_vm9, 4294967295, %v13526_v52  ;;  %v1156_v54 = vor.u32 %v1155_v47, %v1151_v46  ;;  %v5026_v55 = vshrl.u32 %v11073_v41, 16  ;;  %v5032_v56 = vshll.u32 %v11075_v42, 16  ;;  %v487_v9 = vld [vmem:[%s11053_s30 + $0x8] sm:$0xff]  ;;  %vm11132_vm13 = vmor %vm282_vm0, %vm614_vm7  ;;  %v337_v36 = vld [vmem:[#allocation2 + $0x20] sm:$0x1] }
  0x6c   : > { %9034 = vmatprep.subr.bf16.mxu0 %v10158_v21  ;;  %13528 = vst [vmem:[#allocation15_spill] sm:$0xff] %v13527_v52  ;;  %v13529_v59 = vmov 0  ;;  %v5018_v60 = vrot.slane %v5016_v50, 5  ;;  %v11094_v61 = vrot.slane %v5022_v51, 5  ;;  %v8718_v62 = vrot.slane %v11070_v39, 9  ;;  %vm11149_vm14 = vmand %vm936_vm8, %vm332_vm6  ;;  %s13281_s28 = scalar_lea.vmem [#allocation11], %s8415_s17 }
  0x6d   : > { %9145 = vmatpush3.bf16.msra.mxu1 %v10157_v20  ;;  %v13530_v59 = vsel %vm11090_vm10, 4294967295, %v13529_v59  ;;  %v5510_v63 = vrot.slane %v11073_v41, 5  ;;  %v1147_v0 = vrot.slane %v1146_v53, 4  ;;  %v1157_v1 = vrot.slane %v1156_v54, 4  ;;  %v334_v20 = vld [vmem:[#allocation2 + $0x14] sm:$0x1] }
  0x6e   : > { %9146 = vmatprep.subr.bf16.mxu1 %v10160_v23  ;;  %13531 = vst [vmem:[#allocation16_spill] sm:$0xff] %v13530_v59  ;;  %v5028_v2 = vrot.slane %v5026_v55, 4  ;;  %v11098_v3 = vrot.slane %v5032_v56, 5  ;;  %v13532_v5 = vmov 0  ;;  %v5019_v6 = vor.u32 %v5018_v60, %v5015_v49  ;;  %v287_v21 = vld [vmem:[#allocation2 + $0x18] sm:$0x1] }
  0x6f   : > { %9035 = vmatpush3.bf16.msra.mxu0 %v10159_v22  ;;  %v13533_v5 = vsel %vm11102_vm11, 4294967295, %v13532_v5  ;;  %v285_v7 = vsel %vm11082_vm9, 0, %v284_v4  ;;  %v8451_v10 = vrot.slane %v11063_v32, 9  ;;  %v1640_v11 = vrot.slane %v1051_v33, 5  ;;  %v290_v45 = vld [vmem:[#allocation2 + $0x24] sm:$0x1] }
  0x70   : > { %9036 = vmatprep.subr.bf16.mxu0 %v10162_v25  ;;  %13534 = vst [vmem:[#allocation17_spill] sm:$0xff] %v13533_v5  ;;  %v1152_v12 = vsel %vm11090_vm10, %v1147_v0, %v1151_v46  ;;  %v1162_v13 = vsel %vm11090_vm10, %v1157_v1, %v1161_v48  ;;  %v5029_v14 = vor.u32 %v5028_v2, %v11094_v61  ;;  %286 = vst [vmem:[#allocation2 + $0xc] sm:$0x1] %v285_v7  ;;  %v13537_v32 = vmov 0  ;;  %v490_v46 = vld [vmem:[%s11053_s30 + $0x20] sm:$0xff]  ;;  %v10175_v49 = vld [vmem:[#allocation8 + $0x138] sm:$0xff]  }
  0x71   : > { %9147 = vmatpush3.bf16.msra.mxu1 %v10161_v24  ;;  %v8959_v15 = vpack.c.bf16 %v486_v8, %v486_v8  ;;  %1555 = vst [vmem:[#allocation4 + $0x4] sm:$0xf] %v1152_v12  ;;  %1556 = vst [vmem:[#allocation4 + $0x28] sm:$0xf] %v1162_v13  ;;  %v5020_v16 = vrot.slane %v5019_v6, 4  ;;  %v8960_v17 = vpack.c.bf16 %v487_v9, %v487_v9  ;;  %v1642_v19 = vrot.slane %v1640_v11, 4 }
  0x72   : > { %9148 = vmatprep.subr.bf16.mxu1 %v10164_v27  ;;  %v1641_v18 = vsel %vm11102_vm11, %v8451_v10, %v1640_v11  ;;  %v5030_v22 = vrot.slane %v5029_v14, 4  ;;  %v488_v27 = vld [vmem:[%s11053_s30 + $0x10] sm:$0xff]  ;;  %v13538_v32 = vsel %vm11132_vm13, 4294967295, %v13537_v32  ;;  %v11140_v35 = vrot.slane %v5510_v63, 4  ;;  %v491_v53 = vld [vmem:[%s11053_s30 + $0x28] sm:$0xff]  ;;  %s9023_s6 = sshll.u32 %s10941_s22, 12 }
  0x73   : > { %9037 = vmatpush3.bf16.msra.mxu0 %v10163_v26  ;;  %v617_v24 = vshrl.u32 %v8959_v15, 16  ;;  %v620_v25 = vshll.u32 %v8959_v15, 16  ;;  %v1643_v26 = vrot.slane %v11065_v34, 5  ;;  %1782 = vst [vmem:[#allocation4 + $0x8] sm:$0xf] %v1641_v18  ;;  %13539 = vst [vmem:[#allocation18_spill] sm:$0xff] %v13538_v32  ;;  %v8961_v50 = vpack.c.bf16 %v488_v27, %v488_v27  ;;  %s13447_s14 = scalar_lea.hbm %s13500_s5, %s9023_s6 }
  0x74   : > { %9038 = vmatprep.subr.bf16.mxu0 %v10166_v29  ;;  %v625_v29 = vshrl.u32 %v8960_v17, 16  ;;  %v5035_v37 = vsel %vm11090_vm10, %v5030_v22, %v11098_v3  ;;  %v13540_v40 = vmov 0  ;;  %v335_v43 = vsel %vm11120_vm12, 0, %v334_v20  ;;  %v340_v60 = vld [vmem:[#allocation2 + $0x2c] sm:$0x1]  ;;  %v10185_v9 = vld [vmem:[#allocation8 + $0x170] sm:$0xff]  }
  0x75   : > { %9149 = vmatpush3.bf16.msra.mxu1 %v10165_v28  ;;  %v489_v28 = vld [vmem:[%s11053_s30 + $0x18] sm:$0xff]  ;;  %v619_v33 = vrot.slane %v617_v24, 7  ;;  %v1644_v34 = vsel %vm11102_vm11, %v1642_v19, %v1643_v26  ;;  %v13541_v40 = vsel %vm11149_vm14, 4294967295, %v13540_v40  ;;  %v288_v44 = vsel %vm11082_vm9, 0, %v287_v21  ;;  %336 = vst [vmem:[#allocation2 + $0x14] sm:$0x1] %v335_v43 }
  0x76   : > { %9150 = vmatprep.subr.bf16.mxu1 %v10168_v31  ;;  %v5025_v31 = vsel %vm11090_vm10, %v5020_v16, %v11094_v61  ;;  %v11145_v38 = vrot.slane %v625_v29, 7  ;;  %13542 = vst [vmem:[#allocation19_spill] sm:$0xff] %v13541_v40  ;;  %1783 = vst [vmem:[#allocation4 + $0x2c] sm:$0xf] %v1644_v34  ;;  %v8962_v51 = vpack.c.bf16 %v489_v28, %v489_v28  ;;  %v634_v3 = vshrl.u32 %v8961_v50, 16  ;;  %v10188_v13 = vld [vmem:[#allocation8 + $0x130] sm:$0xff]  }
  0x77   : > { %9039 = vmatpush3.bf16.msra.mxu0 %v10167_v30  ;;  %v628_v30 = vshll.u32 %v8960_v17, 16  ;;  %v622_v47 = vor.u32 %v620_v25, %v619_v33  ;;  %v623_v48 = vrot.slane %v619_v33, 4  ;;  %289 = vst [vmem:[#allocation2 + $0x18] sm:$0x1] %v288_v44  ;;  %v938_v56 = vld [vmem:[#allocation2 + $0xc] sm:$0xf]  ;;  %v8963_v6 = vpack.c.bf16 %v490_v46, %v490_v46 }
  0x78   : > { %9248 = vmatprep.subr.bf16.mxu0 %v10172_v58  ;;  %v632_v55 = vrot.slane %v11145_v38, 4  ;;  %v338_v58 = vsel %vm11120_vm12, 0, %v337_v36  ;;  %v2082_v61 = vld [vmem:[#allocation4] sm:$0xff]  ;;  %v637_v4 = vshll.u32 %v8961_v50, 16  ;;  %v642_v7 = vshrl.u32 %v8962_v51, 16  ;;  %v492_v14 = vld [vmem:[%s11053_s30 + $0x30] sm:$0xff] }
  0x79   : > { %9151 = vmatpush3.bf16.msra.mxu1 %v10171_v57  ;;  %v630_v54 = vor.u32 %v628_v30, %v11145_v38  ;;  %v11167_v57 = vsel %vm11102_vm11, %v8718_v62, %v5510_v63  ;;  %v2087_v0 = vld [vmem:[#allocation4 + $0x24] sm:$0xff]  ;;  %v939_v2 = vsel %vm11149_vm14, %v622_v47, %v938_v56  ;;  %339 = vst [vmem:[#allocation2 + $0x20] sm:$0x1] %v338_v58  ;;  %4980 = vst [vmem:[#allocation4] sm:$0xf] %v11070_v39  ;;  %v493_v15 = vld [vmem:[%s11053_s30 + $0x38] sm:$0xff] }
  0x7a   : > { %v10169_v1 = vld [vmem:[#allocation4 + $0x4] ss:$36 sps:$4 sm:$0xff]   ;;  %4981 = vst [vmem:[#allocation4 + $0x24] sm:$0xf] %v11073_v41  ;;  %v8470_v62 = vcombine.low %v2082_v61, %v2087_v0  ;;  %940 = vst [vmem:[#allocation2 + $0xc] sm:$0xf] %v939_v2  ;;  %v8964_v41 = vpack.c.bf16 %v491_v53, %v491_v53  ;;  %v11185_v33 = vpack.c.bf16 %v492_v14, %v492_v14 }
  0x7b   : > { %5428 = vst [vmem:[#allocation4 + $0x4] sm:$0xf] %v5025_v31  ;;  %5429 = vst [vmem:[#allocation4 + $0x28] sm:$0xf] %v5035_v37  ;;  %v631_v63 = vsel %vm11132_vm13, %v623_v48, %v630_v54  ;;  %v645_v8 = vshll.u32 %v8962_v51, 16  ;;  %3593 = vmatprep.mubr.bf16.mxu0 %v10169_v1  ;;  %v636_v11 = vrot.slane %v634_v3, 7  ;;  %v11194_v48 = vpack.c.bf16 %v493_v15, %v493_v15 }
  0x7c   : > { %v293_v10 = vld [vmem:[#allocation2 + $0x30] sm:$0x1]  ;;  %941 = vst [vmem:[#allocation2 + $0x10] sm:$0xf] %v631_v63  ;;  %v291_v39 = vsel %vm11082_vm9, 0, %v290_v45  ;;  %v651_v12 = vshrl.u32 %v8963_v6, 16  ;;  %3594 = vmatmul.mubr.bf16.vlgmr.msra.gmra.mxu0 %v8470_v62 }
  0x7d   : > { %v644_v16 = vrot.slane %v642_v7, 7  ;;  %292 = vst [vmem:[#allocation2 + $0x24] sm:$0x1] %v291_v39  ;;  %v654_v17 = vshll.u32 %v8963_v6, 16  ;;  %v341_v18 = vsel %vm11120_vm12, 0, %v340_v60  ;;  %v294_v19 = vsel %vm11082_vm9, 0, %v293_v10  ;;  %9249 = vmatpush3.bf16.msra.mxu0 %v10175_v49 }
  0x7e   : > { %v343_v20 = vld [vmem:[#allocation2 + $0x38] sm:$0x1]  ;;  %v639_v21 = vor.u32 %v637_v4, %v636_v11  ;;  %v640_v22 = vrot.slane %v636_v11, 4  ;;  %v653_v24 = vrot.slane %v651_v12, 7  ;;  %v659_v25 = vshrl.u32 %v8964_v41, 16  ;;  %9250 = vmatprep.subr.bf16.mxu0 %v10185_v9  ;;  %s8314_s7 = sshll.u32 %s13281_s28, 4  ;;  %s13449_s7 = int_to_ptr.vmem [resolvable:$true] %s8314_s7 }
  0x7f   : > { %342 = vst [vmem:[#allocation2 + $0x2c] sm:$0x1] %v341_v18  ;;  %295 = vst [vmem:[#allocation2 + $0x30] sm:$0x1] %v294_v19  ;;  %v10199_v26 = vld [vmem:[#allocation8 + $0x168] sm:$0xff]   ;;  %v647_v28 = vor.u32 %v645_v8, %v644_v16  ;;  %v649_v29 = vrot.slane %v644_v16, 4 }
  0x80   : > { %v942_v27 = vld [vmem:[#allocation2 + $0x14] sm:$0x1]  ;;  %v945_v30 = vld [vmem:[#allocation2 + $0x18] sm:$0xf]  ;;  %v662_v31 = vshll.u32 %v8964_v41, 16  ;;  %v5513_v34 = vrot.slane %v11075_v42, 5  ;;  %v656_v38 = vor.u32 %v654_v17, %v653_v24 }
  0x81   : > { %v943_v36 = vsel %vm11082_vm9, %v632_v55, %v942_v27  ;;  %v946_v37 = vsel %vm11149_vm14, %v639_v21, %v945_v30  ;;  %v296_v43 = vld [vmem:[#allocation2 + $0x3c] sm:$0x1]  ;;  %v648_v44 = vsel %vm11132_vm13, %v640_v22, %v647_v28  ;;  %v949_v45 = vld [vmem:[#allocation2 + $0x20] sm:$0x1]  ;;  %v657_v46 = vrot.slane %v653_v24, 4  ;;  %9251 = vmatpush3.bf16.msra.mxu0 %v10188_v13  ;;  %v10213_v41 = vld [vmem:[#allocation8 + $0x160] sm:$0xff]  }
  0x82   : > { %944 = vst [vmem:[#allocation2 + $0x14] sm:$0x1] %v943_v36  ;;  %947 = vst [vmem:[#allocation2 + $0x18] sm:$0xf] %v946_v37  ;;  %v661_v47 = vrot.slane %v659_v25, 7  ;;  %v950_v42 = vsel %vm11082_vm9, %v649_v29, %v949_v45  ;;  %v668_v50 = vshrl.u32 %v11185_v33, 16  ;;  %9252 = vmatprep.subr.bf16.mxu0 %v10199_v26  ;;  %v5514_v16 = vsel %vm11102_vm11, %v11140_v35, %v5513_v34 }
  0x83   : > { %v1053_v49 = vld [vmem:[#allocation2 + $0xc] sm:$0xf]  ;;  %948 = vst [vmem:[#allocation2 + $0x1c] sm:$0xf] %v648_v44  ;;  %v344_v51 = vsel %vm11120_vm12, 0, %v343_v20  ;;  %v297_v53 = vsel %vm11082_vm9, 0, %v296_v43 }
  0x84   : > { %v10202_v54 = vld [vmem:[#allocation8 + $0x128] sm:$0xff]   ;;  %v1054_v55 = vld [vmem:[#allocation2 + $0x10] sm:$0xf]  ;;  %1814 = vst [vmem:[#allocation4 + $0xc] sm:$0xf] %v1053_v49  ;;  %v1164_v56 = vshrl.u32 %v1053_v49, 16  ;;  %v664_v61 = vor.u32 %v662_v31, %v661_v47 }
  0x85   : > { %1106 = vst [vmem:[#allocation4 + $0x48] sm:$0xf] %v1053_v49  ;;  %v1167_v58 = vshll.u32 %v1053_v49, 16  ;;  %v8452_v60 = vrot.slane %v1053_v49, 9  ;;  %951 = vst [vmem:[#allocation2 + $0x20] sm:$0x1] %v950_v42  ;;  %9253 = vmatpush3.bf16.msra.mxu0 %v10202_v54 }
  0x86   : > { %345 = vst [vmem:[#allocation2 + $0x38] sm:$0x1] %v344_v51  ;;  %298 = vst [vmem:[#allocation2 + $0x3c] sm:$0x1] %v297_v53  ;;  %v1173_v0 = vshll.u32 %v1054_v55, 16  ;;  %v1177_v1 = vshrl.u32 %v1054_v55, 16  ;;  %v665_v63 = vsel %vm11132_vm13, %v657_v46, %v664_v61  ;;  %9254 = vmatprep.subr.bf16.mxu0 %v10213_v41 }
  0x87   : > { %1815 = vst [vmem:[#allocation4 + $0x30] sm:$0xf] %v1054_v55  ;;  %1107 = vst [vmem:[#allocation4 + $0x6c] sm:$0xf] %v1054_v55  ;;  %v1647_v2 = vrot.slane %v1054_v55, 5  ;;  %v666_v3 = vrot.slane %v661_v47, 4 }
  0x88   : > { %v952_v4 = vld [vmem:[#allocation2 + $0x24] sm:$0xf]  ;;  %v1166_v6 = vrot.slane %v1164_v56, 4  ;;  %v1169_v62 = vrot.slane %v1167_v58, 5  ;;  %v956_v8 = vld [vmem:[#allocation2 + $0x2c] sm:$0x1] }
  0x89   : > { %v953_v7 = vsel %vm11149_vm14, %v656_v38, %v952_v4  ;;  %v1175_v9 = vrot.slane %v1173_v0, 5  ;;  %v1179_v10 = vrot.slane %v1177_v1, 4  ;;  %v1648_v11 = vsel %vm11102_vm11, %v8452_v60, %v1647_v2  ;;  %955 = vst [vmem:[#allocation2 + $0x28] sm:$0xf] %v665_v63  ;;  %v1055_v17 = vld [vmem:[#allocation2 + $0x14] sm:$0x1] }
  0x8a   : > { %954 = vst [vmem:[#allocation2 + $0x24] sm:$0xf] %v953_v7  ;;  %v671_v39 = vshll.u32 %v11185_v33, 16  ;;  %v1170_v12 = vor.u32 %v1169_v62, %v1166_v6  ;;  %v1649_v13 = vrot.slane %v1647_v2, 4  ;;  %1784 = vst [vmem:[#allocation4 + $0x50] sm:$0xf] %v1648_v11  ;;  %v957_v14 = vsel %vm11082_vm9, %v666_v3, %v956_v8 }
  0x8b   : > { %1916 = vst [vmem:[#allocation4 + $0x14] sm:$0xf] %v1648_v11  ;;  %v11212_v15 = vrot.slane %v668_v50, 7  ;;  %v1180_v18 = vor.u32 %v1179_v10, %v1175_v9  ;;  %v11217_v19 = vld [vmem:[#allocation2 + $0x18] sm:$0xf]  ;;  %v676_v20 = vshrl.u32 %v11194_v48, 16 }
  0x8c   : > { %958 = vst [vmem:[#allocation2 + $0x2c] sm:$0x1] %v957_v14  ;;  %v679_v21 = vshll.u32 %v11194_v48, 16  ;;  %v959_v22 = vld [vmem:[#allocation2 + $0x30] sm:$0xf]  ;;  %v1171_v24 = vrot.slane %v1170_v12, 4 }
  0x8d   : > { %v1183_v25 = vshll.u32 %v1055_v17, 16  ;;  %v11221_v26 = vld [vmem:[#allocation2 + $0x1c] sm:$0xf]  ;;  %v1650_v27 = vrot.slane %v1055_v17, 5  ;;  %1816 = vst [vmem:[#allocation4 + $0x54] sm:$0xf] %v11217_v19  ;;  %v673_v34 = vor.u32 %v671_v39, %v11212_v15 }
  0x8e   : > { %1108 = vst [vmem:[#allocation4 + $0x90] sm:$0xf] %v11217_v19  ;;  %1948 = vst [vmem:[#allocation4 + $0x18] sm:$0xf] %v11217_v19  ;;  %v1188_v35 = vshrl.u32 %v11217_v19, 16  ;;  %v2083_v28 = vld [vmem:[#allocation4 + $0x8] sm:$0xff]  ;;  %v1176_v38 = vsel %vm11090_vm10, %v1171_v24, %v1175_v9 }
  0x8f   : > { %v1181_v29 = vrot.slane %v1180_v18, 4  ;;  %1817 = vst [vmem:[#allocation4 + $0x78] sm:$0xf] %v11221_v26  ;;  %1109 = vst [vmem:[#allocation4 + $0xb4] sm:$0xf] %v11221_v26  ;;  %v1191_v31 = vshll.u32 %v11217_v19, 16  ;;  %v1651_v44 = vsel %vm11102_vm11, %v1649_v13, %v1650_v27  ;;  %v960_v56 = vsel %vm11149_vm14, %v673_v34, %v959_v22 }
  0x90   : > { %1949 = vst [vmem:[#allocation4 + $0x3c] sm:$0xf] %v11221_v26  ;;  %v11230_v30 = vld [vmem:[#allocation2 + $0x20] sm:$0x1]  ;;  %v1197_v33 = vshll.u32 %v11221_v26, 16  ;;  %v1185_v43 = vrot.slane %v1183_v25, 5 }
  0x91   : > { %v2088_v36 = vld [vmem:[#allocation4 + $0x2c] sm:$0xff]  ;;  %v1190_v45 = vrot.slane %v1188_v35, 4  ;;  %5652 = vst [vmem:[#allocation4 + $0x8] sm:$0xf] %v11167_v57  ;;  %1557 = vst [vmem:[#allocation4 + $0x4c] sm:$0xf] %v1176_v38 }
  0x92   : > { %v10173_v37 = vld [vmem:[#allocation4 + $0xc] ss:$36 sps:$4 sm:$0xff]   ;;  %5653 = vst [vmem:[#allocation4 + $0x2c] sm:$0xf] %v5514_v16  ;;  %v8472_v46 = vcombine.low %v2083_v28, %v2088_v36  ;;  %1872 = vst [vmem:[#allocation4 + $0x10] sm:$0xf] %v1176_v38  ;;  %v1186_v51 = vsel %vm11090_vm10, %v1181_v29, %v1185_v43 }
  0x93   : > { %1785 = vst [vmem:[#allocation4 + $0x74] sm:$0xf] %v1651_v44  ;;  %1917 = vst [vmem:[#allocation4 + $0x38] sm:$0xf] %v1651_v44  ;;  %v1193_v47 = vrot.slane %v1191_v31, 5  ;;  %v1199_v49 = vrot.slane %v1197_v33, 5  ;;  %3754 = vmatprep.mubr.bf16.mxu1 %v10173_v37 }
  0x94   : > { %v1201_v42 = vshrl.u32 %v11221_v26, 16  ;;  %v10216_v50 = vld [vmem:[#allocation8 + $0x120] sm:$0xff]   ;;  %v1207_v53 = vshll.u32 %v11230_v30, 16  ;;  %v11244_v54 = vld [vmem:[#allocation2 + $0x24] sm:$0xf]  ;;  %v8453_v55 = vrot.slane %v11217_v19, 9  ;;  %3755 = vmatmul.mubr.bf16.vlgmr.msra.gmra.mxu1 %v8472_v46 }
  0x95   : > { %v11246_v57 = vld [vmem:[#allocation2 + $0x28] sm:$0xf]  ;;  %1558 = vst [vmem:[#allocation4 + $0x70] sm:$0xf] %v1186_v51  ;;  %1873 = vst [vmem:[#allocation4 + $0x34] sm:$0xf] %v1186_v51  ;;  %v1194_v58 = vor.u32 %v1193_v47, %v1190_v45  ;;  %9255 = vmatpush3.bf16.msra.mxu0 %v10216_v50 }
  0x96   : > { %v1203_v60 = vrot.slane %v1201_v42, 4  ;;  %v1654_v61 = vrot.slane %v11221_v26, 5  ;;  %v1657_v0 = vrot.slane %v11230_v30, 5  ;;  %1818 = vst [vmem:[#allocation4 + $0x9c] sm:$0xf] %v11244_v54  ;;  %v1209_v1 = vrot.slane %v1207_v53, 5 }
  0x97   : > { %1819 = vst [vmem:[#allocation4 + $0xc0] sm:$0xf] %v11246_v57  ;;  %1110 = vst [vmem:[#allocation4 + $0xd8] sm:$0xf] %v11244_v54  ;;  %v11259_v2 = vld [vmem:[#allocation2 + $0x2c] sm:$0x1] }
  0x98   : > { %1111 = vst [vmem:[#allocation4 + $0xfc] sm:$0xf] %v11246_v57  ;;  %1950 = vst [vmem:[#allocation4 + $0x60] sm:$0xf] %v11244_v54  ;;  %v1212_v3 = vshrl.u32 %v11244_v54, 16  ;;  %v1215_v4 = vshll.u32 %v11244_v54, 16  ;;  %v1204_v63 = vor.u32 %v1203_v60, %v1199_v49  ;;  %v1655_v7 = vsel %vm11102_vm11, %v8453_v55, %v1654_v61 }
  0x99   : > { %1951 = vst [vmem:[#allocation4 + $0x84] sm:$0xf] %v11246_v57  ;;  %961 = vst [vmem:[#allocation2 + $0x30] sm:$0xf] %v960_v56  ;;  %v1221_v6 = vshll.u32 %v11246_v57, 16  ;;  %v1195_v62 = vrot.slane %v1194_v58, 4 }
  0x9a   : > { %v1656_v8 = vrot.slane %v1654_v61, 4  ;;  %1786 = vst [vmem:[#allocation4 + $0x98] sm:$0xf] %v1655_v7  ;;  %1918 = vst [vmem:[#allocation4 + $0x5c] sm:$0xf] %v1655_v7  ;;  %v1214_v9 = vrot.slane %v1212_v3, 4 }
  0x9b   : > { %2050 = vst [vmem:[#allocation4 + $0x20] sm:$0xf] %v1655_v7  ;;  %v1217_v10 = vrot.slane %v1215_v4, 5  ;;  %v1223_v11 = vrot.slane %v1221_v6, 5  ;;  %v1225_v39 = vshrl.u32 %v11246_v57, 16  ;;  %v1200_v41 = vsel %vm11090_vm10, %v1195_v62, %v1199_v49  ;;  %v494_v16 = vld [vmem:[%s11053_s30 + $0x40] sm:$0xff] }
  0x9c   : > { %v1205_v12 = vrot.slane %v1204_v63, 4  ;;  %v1658_v13 = vsel %vm11102_vm11, %v1656_v8, %v1657_v0  ;;  %v1231_v14 = vshll.u32 %v11259_v2, 16  ;;  %v495_v17 = vld [vmem:[%s11053_s30 + $0x48] sm:$0xff]  ;;  %v10179_v18 = vld [vmem:[#allocation4 + $0x54] ss:$36 sps:$4 sm:$0xff]   ;;  %v674_v24 = vrot.slane %v11212_v15, 4 }
  0x9d   : > { %1559 = vst [vmem:[#allocation4 + $0x94] sm:$0xf] %v1200_v41  ;;  %1874 = vst [vmem:[#allocation4 + $0x58] sm:$0xf] %v1200_v41  ;;  %v1218_v19 = vor.u32 %v1217_v10, %v1214_v9  ;;  %v1227_v22 = vrot.slane %v1225_v39, 4  ;;  %v678_v28 = vrot.slane %v676_v20, 7  ;;  %3762 = vmatprep.mubr.bf16.mxu1 %v10179_v18  ;;  %v8967_v36 = vpack.c.bf16 %v494_v16, %v494_v16 }
  0x9e   : > { %2006 = vst [vmem:[#allocation4 + $0x1c] sm:$0xf] %v1200_v41  ;;  %1787 = vst [vmem:[#allocation4 + $0xbc] sm:$0xf] %v1658_v13  ;;  %v963_v25 = vld [vmem:[#allocation2 + $0x38] sm:$0x1]  ;;  %v1210_v27 = vsel %vm11090_vm10, %v1205_v12, %v1209_v1  ;;  %v11280_v37 = vpack.c.bf16 %v495_v17, %v495_v17 }
  0x9f   : > { %1919 = vst [vmem:[#allocation4 + $0x80] sm:$0xf] %v1658_v13  ;;  %2051 = vst [vmem:[#allocation4 + $0x44] sm:$0xf] %v1658_v13  ;;  %v10181_v26 = vld [vmem:[#allocation4 + $0x50] ss:$36 sps:$4 sm:$0xff]   ;;  %v1228_v15 = vor.u32 %v1227_v22, %v1223_v11  ;;  %v681_v38 = vor.u32 %v679_v21, %v678_v28 }
  0xa0   : > { %v1233_v35 = vrot.slane %v1231_v14, 5  ;;  %v8454_v29 = vrot.slane %v11244_v54, 9  ;;  %v10227_v30 = vld [vmem:[#allocation8 + $0x158] sm:$0xff]   ;;  %v10176_v31 = vld [vmem:[#allocation4 + $0x4c] ss:$36 sps:$4 sm:$0xff]   ;;  %v1219_v34 = vrot.slane %v1218_v19, 4  ;;  %3763 = vmatmul.mubr.bf16.gmra.mxu1 %v10181_v26 }
  0xa1   : > { %v10178_v33 = vld [vmem:[#allocation4 + $0x48] ss:$36 sps:$4 sm:$0xff]   ;;  %1560 = vst [vmem:[#allocation4 + $0xb8] sm:$0xf] %v1210_v27  ;;  %1875 = vst [vmem:[#allocation4 + $0x7c] sm:$0xf] %v1210_v27  ;;  %9256 = vmatprep.subr.bf16.mxu0 %v10227_v30  ;;  %3601 = vmatprep.mubr.bf16.mxu0 %v10176_v31  ;;  %v682_v42 = vsel %vm11132_vm13, %v674_v24, %v681_v38 }
  0xa2   : > { %2007 = vst [vmem:[#allocation4 + $0x40] sm:$0xf] %v1210_v27  ;;  %v683_v20 = vrot.slane %v678_v28, 4  ;;  %v11284_v43 = vld [vmem:[#allocation2 + $0x30] sm:$0xf]  ;;  %v1661_v44 = vrot.slane %v11246_v57, 5  ;;  %v1224_v46 = vsel %vm11090_vm10, %v1219_v34, %v1223_v11  ;;  %3602 = vmatmul.mubr.bf16.gmra.mxu0 %v10178_v33 }
  0xa3   : > { %v1664_v45 = vrot.slane %v11259_v2, 5  ;;  %v1229_v47 = vrot.slane %v1228_v15, 4  ;;  %1820 = vst [vmem:[#allocation4 + $0xe4] sm:$0xf] %v11284_v43  ;;  %1112 = vst [vmem:[#allocation4 + $0x120] sm:$0xf] %v11284_v43 }
  0xa4   : > { %1952 = vst [vmem:[#allocation4 + $0xa8] sm:$0xf] %v11284_v43  ;;  %v1236_v48 = vshrl.u32 %v11284_v43, 16  ;;  %v1239_v21 = vshll.u32 %v11284_v43, 16  ;;  %v496_v49 = vld [vmem:[%s11053_s30 + $0x50] sm:$0xff]  ;;  %v1662_v50 = vsel %vm11102_vm11, %v8454_v29, %v1661_v44  ;;  %v1663_v51 = vrot.slane %v1661_v44, 4 }
  0xa5   : > { %1561 = vst [vmem:[#allocation4 + $0xdc] sm:$0xf] %v1224_v46  ;;  %1876 = vst [vmem:[#allocation4 + $0xa0] sm:$0xf] %v1224_v46  ;;  %v964_v53 = vsel %vm11082_vm9, %v683_v20, %v963_v25  ;;  %v346_v54 = vld [vmem:[#allocation2 + $0x44] sm:$0x1]  ;;  %v1234_v55 = vsel %vm11090_vm10, %v1229_v47, %v1233_v35  ;;  %v8969_v6 = vpack.c.bf16 %v496_v49, %v496_v49 }
  0xa6   : > { %2008 = vst [vmem:[#allocation4 + $0x64] sm:$0xf] %v1224_v46  ;;  %v497_v57 = vld [vmem:[%s11053_s30 + $0x58] sm:$0xff]  ;;  %962 = vst [vmem:[#allocation2 + $0x34] sm:$0xf] %v682_v42  ;;  %v1238_v56 = vrot.slane %v1236_v48, 4  ;;  %v1665_v2 = vsel %vm11102_vm11, %v1663_v51, %v1664_v45 }
  0xa7   : > { %1788 = vst [vmem:[#allocation4 + $0xe0] sm:$0xf] %v1662_v50  ;;  %2052 = vst [vmem:[#allocation4 + $0x68] sm:$0xf] %v1662_v50  ;;  %v1241_v58 = vrot.slane %v1239_v21, 5  ;;  %v685_v60 = vshrl.u32 %v8967_v36, 16  ;;  %v8970_v10 = vpack.c.bf16 %v497_v57, %v497_v57 }
  0xa8   : > { %1920 = vst [vmem:[#allocation4 + $0xa4] sm:$0xf] %v1662_v50  ;;  %965 = vst [vmem:[#allocation2 + $0x38] sm:$0x1] %v964_v53  ;;  %v299_v61 = vld [vmem:[#allocation2 + $0x48] sm:$0x1] }
  0xa9   : > { %v10230_v0 = vld [vmem:[#allocation8 + $0x118] sm:$0xff]   ;;  %1562 = vst [vmem:[#allocation4 + $0x100] sm:$0xf] %v1234_v55  ;;  %1877 = vst [vmem:[#allocation4 + $0xc4] sm:$0xf] %v1234_v55  ;;  %v688_v3 = vshll.u32 %v8967_v36, 16  ;;  %v1242_v63 = vor.u32 %v1241_v58, %v1238_v56 }
  0xaa   : > { %v10186_v1 = vld [vmem:[#allocation4 + $0x9c] ss:$36 sps:$4 sm:$0xff]   ;;  %2009 = vst [vmem:[#allocation4 + $0x88] sm:$0xf] %v1234_v55  ;;  %v693_v4 = vshrl.u32 %v11280_v37, 16  ;;  %v687_v7 = vrot.slane %v685_v60, 7  ;;  %9257 = vmatpush3.bf16.msra.mxu0 %v10230_v0 }
  0xab   : > { %v10189_v62 = vld [vmem:[#allocation4 + $0x98] ss:$36 sps:$4 sm:$0xff]   ;;  %1789 = vst [vmem:[#allocation4 + $0x104] sm:$0xf] %v1665_v2  ;;  %2053 = vst [vmem:[#allocation4 + $0x8c] sm:$0xf] %v1665_v2  ;;  %3770 = vmatprep.mubr.bf16.mxu1 %v10186_v1 }
  0xac   : > { %1921 = vst [vmem:[#allocation4 + $0xc8] sm:$0xf] %v1665_v2  ;;  %v696_v8 = vshll.u32 %v11280_v37, 16  ;;  %v966_v9 = vld [vmem:[#allocation2 + $0x3c] sm:$0xf]  ;;  %v11309_v41 = vrot.slane %v693_v4, 7  ;;  %v690_v12 = vor.u32 %v688_v3, %v687_v7  ;;  %3771 = vmatmul.mubr.bf16.gmra.mxu1 %v10189_v62 }
  0xad   : > { %v10182_v11 = vld [vmem:[#allocation4 + $0x94] ss:$36 sps:$4 sm:$0xff]   ;;  %v691_v13 = vrot.slane %v687_v7, 4  ;;  %v347_v14 = vsel %vm11120_vm12, 0, %v346_v54  ;;  %v498_v16 = vld [vmem:[%s11053_s30 + $0x60] sm:$0xff]  ;;  %v8455_v18 = vrot.slane %v11284_v43, 9 }
  0xae   : > { %v10184_v39 = vld [vmem:[#allocation4 + $0x90] ss:$36 sps:$4 sm:$0xff]   ;;  %3609 = vmatprep.mubr.bf16.mxu0 %v10182_v11  ;;  %v698_v17 = vor.u32 %v696_v8, %v11309_v41  ;;  %348 = vst [vmem:[#allocation2 + $0x44] sm:$0x1] %v347_v14  ;;  %v300_v19 = vsel %vm11082_vm9, 0, %v299_v61  ;;  %v702_v22 = vshrl.u32 %v8969_v6, 16  ;;  %v967_v26 = vsel %vm11149_vm14, %v690_v12, %v966_v9 }
  0xaf   : > { %v10241_v24 = vld [vmem:[#allocation8 + $0x150] sm:$0xff]   ;;  %v1243_v25 = vrot.slane %v1242_v63, 4  ;;  %301 = vst [vmem:[#allocation2 + $0x48] sm:$0x1] %v300_v19  ;;  %v705_v27 = vshll.u32 %v8969_v6, 16  ;;  %v710_v35 = vshrl.u32 %v8970_v10, 16  ;;  %3610 = vmatmul.mubr.bf16.gmra.mxu0 %v10184_v39  ;;  %v11323_v20 = vpack.c.bf16 %v498_v16, %v498_v16 }
  0xb0   : > { %v1063_v28 = vld [vmem:[#allocation2 + $0x34] sm:$0xf]  ;;  %v1064_v29 = vld [vmem:[#allocation2 + $0x38] sm:$0x1]  ;;  %v699_v30 = vsel %vm11132_vm13, %v691_v13, %v698_v17  ;;  %968 = vst [vmem:[#allocation2 + $0x3c] sm:$0xf] %v967_v26  ;;  %9258 = vmatprep.subr.bf16.mxu0 %v10241_v24 }
  0xb1   : > { %v704_v31 = vrot.slane %v702_v22, 7  ;;  %v349_v33 = vld [vmem:[#allocation2 + $0x50] sm:$0x1]  ;;  %1821 = vst [vmem:[#allocation4 + $0x108] sm:$0xf] %v1063_v28  ;;  %v1245_v15 = vshll.u32 %v1063_v28, 16 }
  0xb2   : > { %v10190_v34 = vld [vmem:[#allocation4 + $0xdc] ss:$36 sps:$4 sm:$0xff]   ;;  %1113 = vst [vmem:[#allocation4 + $0x144] sm:$0xf] %v1063_v28  ;;  %1953 = vst [vmem:[#allocation4 + $0xcc] sm:$0xf] %v1063_v28 }
  0xb3   : > { %v700_v36 = vrot.slane %v11309_v41, 4  ;;  %969 = vst [vmem:[#allocation2 + $0x40] sm:$0xf] %v699_v30  ;;  %v713_v37 = vshll.u32 %v8970_v10, 16  ;;  %v302_v38 = vld [vmem:[#allocation2 + $0x54] sm:$0x1]  ;;  %3617 = vmatprep.mubr.bf16.mxu0 %v10190_v34  ;;  %v707_v48 = vor.u32 %v705_v27, %v704_v31 }
  0xb4   : > { %v1249_v43 = vshrl.u32 %v1063_v28, 16  ;;  %v1255_v44 = vshll.u32 %v1064_v29, 16  ;;  %v1668_v45 = vrot.slane %v1063_v28, 5  ;;  %v1671_v46 = vrot.slane %v1064_v29, 5  ;;  %v10192_v42 = vld [vmem:[#allocation4 + $0xd8] ss:$36 sps:$4 sm:$0xff]  }
  0xb5   : > { %v1247_v47 = vrot.slane %v1245_v15, 5  ;;  %v708_v21 = vrot.slane %v704_v31, 4  ;;  %v11325_v49 = vrot.slane %v710_v35, 7  ;;  %v970_v55 = vld [vmem:[#allocation2 + $0x44] sm:$0x1]  ;;  %v350_v60 = vsel %vm11120_vm12, 0, %v349_v33 }
  0xb6   : > { %v1251_v50 = vrot.slane %v1249_v43, 4  ;;  %v1257_v51 = vrot.slane %v1255_v44, 5  ;;  %v1669_v53 = vsel %vm11102_vm11, %v8455_v18, %v1668_v45  ;;  %v1670_v54 = vrot.slane %v1668_v45, 4  ;;  %v499_v61 = vld [vmem:[%s11053_s30 + $0x68] sm:$0xff]  ;;  %v500_v0 = vld [vmem:[%s11053_s30 + $0x70] sm:$0xff]  ;;  %s8301_s22 = scalar_lea.sflag [#allocation7], %s11047_s16 }
  0xb7   : > { %v1248_v57 = vsel %vm11090_vm10, %v1243_v25, %v1247_v47  ;;  %1790 = vst [vmem:[#allocation4 + $0x128] sm:$0xf] %v1669_v53  ;;  %1922 = vst [vmem:[#allocation4 + $0xec] sm:$0xf] %v1669_v53  ;;  %v715_v56 = vor.u32 %v713_v37, %v11325_v49  ;;  %v717_v58 = vrot.slane %v11325_v49, 4  ;;  %v971_v3 = vsel %vm11082_vm9, %v700_v36, %v970_v55  ;;  %v10244_v62 = vld [vmem:[#allocation8 + $0x110] sm:$0xff]  }
  0xb8   : > { %2054 = vst [vmem:[#allocation4 + $0xb0] sm:$0xf] %v1669_v53  ;;  %v1252_v1 = vor.u32 %v1251_v50, %v1247_v47  ;;  %1563 = vst [vmem:[#allocation4 + $0x124] sm:$0xf] %v1248_v57  ;;  %v1672_v2 = vsel %vm11102_vm11, %v1670_v54, %v1671_v46  ;;  %v973_v4 = vld [vmem:[#allocation2 + $0x48] sm:$0xf]  ;;  %3618 = vmatmul.mubr.bf16.gmra.mxu0 %v10192_v42  ;;  %v11349_v12 = vpack.c.bf16 %v499_v61, %v499_v61 }
  0xb9   : > { %1878 = vst [vmem:[#allocation4 + $0xe8] sm:$0xf] %v1248_v57  ;;  %2010 = vst [vmem:[#allocation4 + $0xac] sm:$0xf] %v1248_v57  ;;  %v303_v6 = vsel %vm11082_vm9, 0, %v302_v38  ;;  %v716_v7 = vsel %vm11132_vm13, %v708_v21, %v715_v56  ;;  %v974_v8 = vsel %vm11149_vm14, %v707_v48, %v973_v4  ;;  %v719_v9 = vshrl.u32 %v11323_v20, 16  ;;  %9259 = vmatpush3.bf16.msra.mxu0 %v10244_v62 }
  0xba   : > { %351 = vst [vmem:[#allocation2 + $0x50] sm:$0x1] %v350_v60  ;;  %v1065_v63 = vld [vmem:[#allocation2 + $0x3c] sm:$0xf]  ;;  %1791 = vst [vmem:[#allocation4 + $0x14c] sm:$0xf] %v1672_v2  ;;  %v11351_v14 = vpack.c.bf16 %v500_v0, %v500_v0 }
  0xbb   : > { %1923 = vst [vmem:[#allocation4 + $0x110] sm:$0xf] %v1672_v2  ;;  %2055 = vst [vmem:[#allocation4 + $0xd4] sm:$0xf] %v1672_v2  ;;  %v722_v10 = vshll.u32 %v11323_v20, 16  ;;  %v1253_v41 = vrot.slane %v1252_v1, 4 }
  0xbc   : > { %972 = vst [vmem:[#allocation2 + $0x44] sm:$0x1] %v971_v3  ;;  %304 = vst [vmem:[#allocation2 + $0x54] sm:$0x1] %v303_v6  ;;  %v10193_v11 = vld [vmem:[#allocation4 + $0xe4] ss:$36 sps:$4 sm:$0xff]  }
  0xbd   : > { %v10195_v39 = vld [vmem:[#allocation4 + $0xe0] ss:$36 sps:$4 sm:$0xff]   ;;  %1822 = vst [vmem:[#allocation4 + $0x12c] sm:$0xf] %v1065_v63  ;;  %1114 = vst [vmem:[#allocation4 + $0x168] sm:$0xf] %v1065_v63  ;;  %3778 = vmatprep.mubr.bf16.mxu1 %v10193_v11  ;;  %v1258_v24 = vsel %vm11090_vm10, %v1253_v41, %v1257_v51 }
  0xbe   : > { %1954 = vst [vmem:[#allocation4 + $0xf0] sm:$0xf] %v1065_v63  ;;  %975 = vst [vmem:[#allocation2 + $0x48] sm:$0xf] %v974_v8  ;;  %v352_v13 = vld [vmem:[#allocation2 + $0x5c] sm:$0x1]  ;;  %3779 = vmatmul.mubr.bf16.gmra.mxu1 %v10195_v39 }
  0xbf   : > { %976 = vst [vmem:[#allocation2 + $0x4c] sm:$0xf] %v716_v7  ;;  %v1066_v16 = vld [vmem:[#allocation2 + $0x40] sm:$0xf]  ;;  %v1260_v17 = vshrl.u32 %v1065_v63, 16  ;;  %v1263_v18 = vshll.u32 %v1065_v63, 16 }
  0xc0   : > { %v8456_v19 = vrot.slane %v1065_v63, 9  ;;  %v11353_v22 = vrot.slane %v719_v9, 7  ;;  %1823 = vst [vmem:[#allocation4 + $0x150] sm:$0xf] %v1066_v16  ;;  %1115 = vst [vmem:[#allocation4 + $0x18c] sm:$0xf] %v1066_v16 }
  0xc1   : > { %1955 = vst [vmem:[#allocation4 + $0x114] sm:$0xf] %v1066_v16  ;;  %v1269_v25 = vshll.u32 %v1066_v16, 16  ;;  %v1273_v26 = vshrl.u32 %v1066_v16, 16  ;;  %v1675_v27 = vrot.slane %v1066_v16, 5  ;;  %v1262_v35 = vrot.slane %v1260_v17, 4 }
  0xc2   : > { %1564 = vst [vmem:[#allocation4 + $0x148] sm:$0xf] %v1258_v24  ;;  %1879 = vst [vmem:[#allocation4 + $0x10c] sm:$0xf] %v1258_v24  ;;  %v1265_v28 = vrot.slane %v1263_v18, 5  ;;  %v724_v29 = vor.u32 %v722_v10, %v11353_v22  ;;  %v725_v30 = vrot.slane %v11353_v22, 4 }
  0xc3   : > { %2011 = vst [vmem:[#allocation4 + $0xd0] sm:$0xf] %v1258_v24  ;;  %v305_v31 = vld [vmem:[#allocation2 + $0x60] sm:$0x1]  ;;  %v1271_v33 = vrot.slane %v1269_v25, 5  ;;  %v1275_v34 = vrot.slane %v1273_v26, 4  ;;  %v1676_v15 = vsel %vm11102_vm11, %v8456_v19, %v1675_v27 }
  0xc4   : > { %v1677_v36 = vrot.slane %v1675_v27, 4  ;;  %v10255_v37 = vld [vmem:[#allocation8 + $0x148] sm:$0xff]   ;;  %v1266_v38 = vor.u32 %v1265_v28, %v1262_v35  ;;  %1792 = vst [vmem:[#allocation4 + $0x170] sm:$0xf] %v1676_v15  ;;  %1924 = vst [vmem:[#allocation4 + $0x134] sm:$0xf] %v1676_v15 }
  0xc5   : > { %2056 = vst [vmem:[#allocation4 + $0xf8] sm:$0xf] %v1676_v15  ;;  %v977_v20 = vld [vmem:[#allocation2 + $0x50] sm:$0x1]  ;;  %v727_v43 = vshrl.u32 %v11349_v12, 16  ;;  %v730_v44 = vshll.u32 %v11349_v12, 16  ;;  %v1276_v21 = vor.u32 %v1275_v34, %v1271_v33  ;;  %9260 = vmatprep.subr.bf16.mxu0 %v10255_v37 }
  0xc6   : > { %v353_v45 = vsel %vm11120_vm12, 0, %v352_v13  ;;  %v501_v46 = vld [vmem:[%s11053_s30 + $0x78] sm:$0xff]  ;;  %v502_v47 = vld [vmem:[%s11053_s30 + $0x80] sm:$0xff]  ;;  %v1067_v48 = vld [vmem:[#allocation2 + $0x44] sm:$0x1]  ;;  %v978_v42 = vsel %vm11082_vm9, %v717_v58, %v977_v20  ;;  %v306_v51 = vsel %vm11082_vm9, 0, %v305_v31 }
  0xc7   : > { %v980_v50 = vld [vmem:[#allocation2 + $0x54] sm:$0xf]  ;;  %354 = vst [vmem:[#allocation2 + $0x5c] sm:$0x1] %v353_v45  ;;  %v736_v53 = vshrl.u32 %v11351_v14, 16  ;;  %v1267_v54 = vrot.slane %v1266_v38, 4  ;;  %v11380_v10 = vpack.c.bf16 %v501_v46, %v501_v46  ;;  %v11382_v11 = vpack.c.bf16 %v502_v47, %v502_v47 }
  0xc8   : > { %v1279_v57 = vshll.u32 %v1067_v48, 16  ;;  %v1068_v55 = vld [vmem:[#allocation2 + $0x48] sm:$0xf]  ;;  %v1678_v56 = vrot.slane %v1067_v48, 5  ;;  %979 = vst [vmem:[#allocation2 + $0x50] sm:$0x1] %v978_v42  ;;  %v981_v60 = vsel %vm11149_vm14, %v724_v29, %v980_v50 }
  0xc9   : > { %307 = vst [vmem:[#allocation2 + $0x60] sm:$0x1] %v306_v51  ;;  %v1277_v49 = vrot.slane %v1276_v21, 4  ;;  %v1069_v61 = vld [vmem:[#allocation2 + $0x4c] sm:$0xf]  ;;  %v1284_v58 = vshrl.u32 %v1068_v55, 16  ;;  %v1272_v4 = vsel %vm11090_vm10, %v1267_v54, %v1271_v33 }
  0xca   : > { %1824 = vst [vmem:[#allocation4 + $0x174] sm:$0xf] %v1068_v55  ;;  %1116 = vst [vmem:[#allocation4 + $0x1b0] sm:$0xf] %v1068_v55  ;;  %v1287_v0 = vshll.u32 %v1068_v55, 16  ;;  %v729_v1 = vrot.slane %v727_v43, 7  ;;  %v1679_v62 = vsel %vm11102_vm11, %v1677_v36, %v1678_v56 }
  0xcb   : > { %1956 = vst [vmem:[#allocation4 + $0x138] sm:$0xf] %v1068_v55  ;;  %982 = vst [vmem:[#allocation2 + $0x54] sm:$0xf] %v981_v60  ;;  %v10200_v2 = vld [vmem:[#allocation4 + $0x12c] ss:$36 sps:$4 sm:$0xff]  }
  0xcc   : > { %v10203_v3 = vld [vmem:[#allocation4 + $0x128] ss:$36 sps:$4 sm:$0xff]   ;;  %v1281_v6 = vrot.slane %v1279_v57, 5  ;;  %1825 = vst [vmem:[#allocation4 + $0x198] sm:$0xf] %v1069_v61  ;;  %v1286_v8 = vrot.slane %v1284_v58, 4  ;;  %v732_v9 = vor.u32 %v730_v44, %v729_v1  ;;  %3786 = vmatprep.mubr.bf16.mxu1 %v10200_v2 }
  0xcd   : > { %1117 = vst [vmem:[#allocation4 + $0x1d4] sm:$0xf] %v1069_v61  ;;  %1957 = vst [vmem:[#allocation4 + $0x15c] sm:$0xf] %v1069_v61  ;;  %v10196_v63 = vld [vmem:[#allocation4 + $0x124] ss:$36 sps:$4 sm:$0xff]   ;;  %3787 = vmatmul.mubr.bf16.gmra.mxu1 %v10203_v3 }
  0xce   : > { %v10198_v7 = vld [vmem:[#allocation4 + $0x120] ss:$36 sps:$4 sm:$0xff]   ;;  %1565 = vst [vmem:[#allocation4 + $0x16c] sm:$0xf] %v1272_v4  ;;  %1880 = vst [vmem:[#allocation4 + $0x130] sm:$0xf] %v1272_v4  ;;  %v1282_v39 = vsel %vm11090_vm10, %v1277_v49, %v1281_v6  ;;  %3625 = vmatprep.mubr.bf16.mxu0 %v10196_v63  ;;  %v733_v16 = vsel %vm11132_vm13, %v725_v30, %v732_v9 }
  0xcf   : > { %2012 = vst [vmem:[#allocation4 + $0xf4] sm:$0xf] %v1272_v4  ;;  %1793 = vst [vmem:[#allocation4 + $0x194] sm:$0xf] %v1679_v62  ;;  %v1289_v41 = vrot.slane %v1287_v0, 5  ;;  %v1293_v12 = vshll.u32 %v1069_v61, 16  ;;  %3626 = vmatmul.mubr.bf16.gmra.mxu0 %v10198_v7 }
  0xd0   : > { %1925 = vst [vmem:[#allocation4 + $0x158] sm:$0xf] %v1679_v62  ;;  %2057 = vst [vmem:[#allocation4 + $0x11c] sm:$0xf] %v1679_v62  ;;  %v1297_v13 = vshrl.u32 %v1069_v61, 16  ;;  %v734_v17 = vrot.slane %v729_v1, 4 }
  0xd1   : > { %1566 = vst [vmem:[#allocation4 + $0x190] sm:$0xf] %v1282_v39  ;;  %1881 = vst [vmem:[#allocation4 + $0x154] sm:$0xf] %v1282_v39  ;;  %v8457_v18 = vrot.slane %v1068_v55, 9  ;;  %v1682_v19 = vrot.slane %v1069_v61, 5  ;;  %v1290_v24 = vor.u32 %v1289_v41, %v1286_v8 }
  0xd2   : > { %2013 = vst [vmem:[#allocation4 + $0x118] sm:$0xf] %v1282_v39  ;;  %v1295_v25 = vrot.slane %v1293_v12, 5  ;;  %v1299_v26 = vrot.slane %v1297_v13, 4  ;;  %983 = vst [vmem:[#allocation2 + $0x58] sm:$0xf] %v733_v16 }
  0xd3   : > { %v984_v27 = vld [vmem:[#allocation2 + $0x5c] sm:$0x1]  ;;  %v11390_v35 = vrot.slane %v736_v53, 7  ;;  %v1070_v29 = vld [vmem:[#allocation2 + $0x50] sm:$0x1]  ;;  %v1683_v22 = vsel %vm11102_vm11, %v8457_v18, %v1682_v19  ;;  %v1684_v31 = vrot.slane %v1682_v19, 4 }
  0xd4   : > { %v10258_v28 = vld [vmem:[#allocation8 + $0x108] sm:$0xff]   ;;  %v985_v30 = vsel %vm11082_vm9, %v734_v17, %v984_v27  ;;  %v739_v33 = vshll.u32 %v11351_v14, 16  ;;  %v1291_v15 = vrot.slane %v1290_v24, 4  ;;  %v1300_v36 = vor.u32 %v1299_v26, %v1295_v25  ;;  %v11398_v38 = vld [vmem:[#allocation2 + $0x54] sm:$0xf]  ;;  %v10260_v21 = vld [vmem:[#allocation8 + $0x1f8] sm:$0xff]  }
  0xd5   : > { %v503_v34 = vld [vmem:[%s11053_s30 + $0x88] sm:$0xff]  ;;  %v1303_v37 = vshll.u32 %v1070_v29, 16  ;;  %v1685_v20 = vrot.slane %v1070_v29, 5  ;;  %1794 = vst [vmem:[#allocation4 + $0x1b8] sm:$0xf] %v1683_v22  ;;  %9261 = vmatpush3.bf16.msra.mxu0 %v10258_v28  ;;  %v1308_v14 = vshrl.u32 %v11398_v38, 16  ;;  %9360 = vmatprep.subr.bf16.mxu1 %v10260_v21 }
  0xd6   : > { %1926 = vst [vmem:[#allocation4 + $0x17c] sm:$0xf] %v1683_v22  ;;  %2058 = vst [vmem:[#allocation4 + $0x140] sm:$0xf] %v1683_v22  ;;  %v355_v43 = vld [vmem:[#allocation2 + $0x68] sm:$0x1]  ;;  %v741_v46 = vor.u32 %v739_v33, %v11390_v35  ;;  %v1296_v50 = vsel %vm11090_vm10, %v1291_v15, %v1295_v25  ;;  %v11418_v3 = vpack.c.bf16 %v503_v34, %v503_v34 }
  0xd7   : > { %986 = vst [vmem:[#allocation2 + $0x5c] sm:$0x1] %v985_v30  ;;  %v308_v44 = vld [vmem:[#allocation2 + $0x6c] sm:$0x1]  ;;  %1826 = vst [vmem:[#allocation4 + $0x1bc] sm:$0xf] %v11398_v38  ;;  %v1686_v54 = vsel %vm11102_vm11, %v1684_v31, %v1685_v20 }
  0xd8   : > { %1118 = vst [vmem:[#allocation4 + $0x1f8] sm:$0xf] %v11398_v38  ;;  %1958 = vst [vmem:[#allocation4 + $0x180] sm:$0xf] %v11398_v38  ;;  %v1311_v45 = vshll.u32 %v11398_v38, 16  ;;  %v742_v47 = vrot.slane %v11390_v35, 4 }
  0xd9   : > { %v987_v48 = vld [vmem:[#allocation2 + $0x60] sm:$0xf]  ;;  %v10207_v42 = vld [vmem:[#allocation4 + $0x174] ss:$36 sps:$4 sm:$0xff]   ;;  %v1301_v51 = vrot.slane %v1300_v36, 4  ;;  %v1305_v53 = vrot.slane %v1303_v37, 5 }
  0xda   : > { %v10209_v57 = vld [vmem:[#allocation4 + $0x170] ss:$36 sps:$4 sm:$0xff]   ;;  %1567 = vst [vmem:[#allocation4 + $0x1b4] sm:$0xf] %v1296_v50  ;;  %1882 = vst [vmem:[#allocation4 + $0x178] sm:$0xf] %v1296_v50  ;;  %3794 = vmatprep.mubr.bf16.mxu1 %v10207_v42  ;;  %v988_v1 = vsel %vm11149_vm14, %v741_v46, %v987_v48 }
  0xdb   : > { %2014 = vst [vmem:[#allocation4 + $0x13c] sm:$0xf] %v1296_v50  ;;  %1795 = vst [vmem:[#allocation4 + $0x1dc] sm:$0xf] %v1686_v54  ;;  %v1310_v55 = vrot.slane %v1308_v14, 4  ;;  %v1313_v56 = vrot.slane %v1311_v45, 5  ;;  %v1306_v0 = vsel %vm11090_vm10, %v1301_v51, %v1305_v53  ;;  %3795 = vmatmul.mubr.bf16.gmra.mxu1 %v10209_v57 }
  0xdc   : > { %1927 = vst [vmem:[#allocation4 + $0x1a0] sm:$0xf] %v1686_v54  ;;  %2059 = vst [vmem:[#allocation4 + $0x164] sm:$0xf] %v1686_v54  ;;  %v744_v60 = vshrl.u32 %v11380_v10, 16  ;;  %v747_v49 = vshll.u32 %v11380_v10, 16 }
  0xdd   : > { %v10204_v61 = vld [vmem:[#allocation4 + $0x16c] ss:$36 sps:$4 sm:$0xff]   ;;  %v8458_v2 = vrot.slane %v11398_v38, 9  ;;  %1568 = vst [vmem:[#allocation4 + $0x1d8] sm:$0xf] %v1306_v0  ;;  %v1314_v6 = vor.u32 %v1313_v56, %v1310_v55  ;;  %v356_v63 = vsel %vm11120_vm12, 0, %v355_v43 }
  0xde   : > { %v10206_v58 = vld [vmem:[#allocation4 + $0x168] ss:$36 sps:$4 sm:$0xff]   ;;  %1883 = vst [vmem:[#allocation4 + $0x19c] sm:$0xf] %v1306_v0  ;;  %2015 = vst [vmem:[#allocation4 + $0x160] sm:$0xf] %v1306_v0  ;;  %3633 = vmatprep.mubr.bf16.mxu0 %v10204_v61 }
  0xdf   : > { %v1072_v4 = vld [vmem:[#allocation2 + $0x58] sm:$0xf]  ;;  %v11420_v62 = vrot.slane %v744_v60, 7  ;;  %989 = vst [vmem:[#allocation2 + $0x60] sm:$0xf] %v988_v1  ;;  %v309_v7 = vsel %vm11082_vm9, 0, %v308_v44  ;;  %3634 = vmatmul.mubr.bf16.gmra.mxu0 %v10206_v58 }
  0xe0   : > { %v10261_v8 = vld [vmem:[#allocation8 + $0x1b8] sm:$0xff]   ;;  %1827 = vst [vmem:[#allocation4 + $0x1e0] sm:$0xf] %v1072_v4  ;;  %1119 = vst [vmem:[#allocation4 + $0x21c] sm:$0xf] %v1072_v4  ;;  %v1317_v9 = vshll.u32 %v1072_v4, 16 }
  0xe1   : > { %1959 = vst [vmem:[#allocation4 + $0x1a4] sm:$0xf] %v1072_v4  ;;  %v1321_v10 = vshrl.u32 %v1072_v4, 16  ;;  %v1689_v39 = vrot.slane %v1072_v4, 5  ;;  %357 = vst [vmem:[#allocation2 + $0x68] sm:$0x1] %v356_v63  ;;  %v749_v16 = vor.u32 %v747_v49, %v11420_v62  ;;  %9361 = vmatpush3.bf16.msra.mxu1 %v10261_v8 }
  0xe2   : > { %310 = vst [vmem:[#allocation2 + $0x6c] sm:$0x1] %v309_v7  ;;  %v753_v41 = vshrl.u32 %v11382_v11, 16  ;;  %v1073_v12 = vld [vmem:[#allocation2 + $0x5c] sm:$0x1]  ;;  %v1315_v13 = vrot.slane %v1314_v6, 4 }
  0xe3   : > { %v751_v17 = vrot.slane %v11420_v62, 4  ;;  %v756_v18 = vshll.u32 %v11382_v11, 16  ;;  %v10262_v19 = vld [vmem:[#allocation8 + $0x1f0] sm:$0xff]   ;;  %v1319_v24 = vrot.slane %v1317_v9, 5  ;;  %v1323_v25 = vrot.slane %v1321_v10, 4  ;;  %v505_v36 = vld [vmem:[%s11053_s30 + $0x98] sm:$0xff] }
  0xe4   : > { %v1327_v26 = vshll.u32 %v1073_v12, 16  ;;  %v1690_v27 = vsel %vm11102_vm11, %v8458_v2, %v1689_v39  ;;  %v750_v35 = vsel %vm11132_vm13, %v742_v47, %v749_v16  ;;  %v1691_v28 = vrot.slane %v1689_v39, 4  ;;  %9362 = vmatprep.subr.bf16.mxu1 %v10262_v19  ;;  %v10265_v11 = vld [vmem:[#allocation8 + $0x1b0] sm:$0xff]   ;;  %v358_v43 = vld [vmem:[#allocation2 + $0x74] sm:$0x1]  ;;  %v10270_v9 = vld [vmem:[#allocation8 + $0x1e8] sm:$0xff]  }
  0xe5   : > { %v1692_v29 = vrot.slane %v1073_v12, 5  ;;  %1796 = vst [vmem:[#allocation4 + $0x200] sm:$0xf] %v1690_v27  ;;  %1928 = vst [vmem:[#allocation4 + $0x1c4] sm:$0xf] %v1690_v27  ;;  %v755_v22 = vrot.slane %v753_v41, 7  ;;  %v1320_v31 = vsel %vm11090_vm10, %v1315_v13, %v1319_v24  ;;  %v1324_v30 = vor.u32 %v1323_v25, %v1319_v24  ;;  %9363 = vmatpush3.bf16.msra.mxu1 %v10265_v11 }
  0xe6   : > { %2060 = vst [vmem:[#allocation4 + $0x188] sm:$0xf] %v1690_v27  ;;  %v1329_v33 = vrot.slane %v1327_v26, 5  ;;  %990 = vst [vmem:[#allocation2 + $0x64] sm:$0xf] %v750_v35  ;;  %v761_v34 = vshrl.u32 %v11418_v3, 16  ;;  %v11448_v55 = vpack.c.bf16 %v505_v36, %v505_v36  ;;  %9364 = vmatprep.subr.bf16.mxu1 %v10270_v9 }
  0xe7   : > { %v504_v15 = vld [vmem:[%s11053_s30 + $0x90] sm:$0xff]  ;;  %1569 = vst [vmem:[#allocation4 + $0x1fc] sm:$0xf] %v1320_v31  ;;  %1884 = vst [vmem:[#allocation4 + $0x1c0] sm:$0xf] %v1320_v31  ;;  %v1693_v37 = vsel %vm11102_vm11, %v1691_v28, %v1692_v29  ;;  %v759_v38 = vrot.slane %v755_v22, 4  ;;  %v758_v46 = vor.u32 %v756_v18, %v755_v22 }
  0xe8   : > { %2016 = vst [vmem:[#allocation4 + $0x184] sm:$0xf] %v1320_v31  ;;  %v764_v20 = vshll.u32 %v11418_v3, 16  ;;  %v10210_v44 = vld [vmem:[#allocation4 + $0x1b4] ss:$36 sps:$4 sm:$0xff]   ;;  %v1325_v45 = vrot.slane %v1324_v30, 4  ;;  %v11446_v57 = vpack.c.bf16 %v504_v15, %v504_v15 }
  0xe9   : > { %v10212_v14 = vld [vmem:[#allocation4 + $0x1b0] ss:$36 sps:$4 sm:$0xff]   ;;  %1797 = vst [vmem:[#allocation4 + $0x224] sm:$0xf] %v1693_v37  ;;  %1929 = vst [vmem:[#allocation4 + $0x1e8] sm:$0xf] %v1693_v37  ;;  %3641 = vmatprep.mubr.bf16.mxu0 %v10210_v44 }
  0xea   : > { %2061 = vst [vmem:[#allocation4 + $0x1ac] sm:$0xf] %v1693_v37  ;;  %v311_v47 = vld [vmem:[#allocation2 + $0x78] sm:$0x1]  ;;  %v10214_v48 = vld [vmem:[#allocation4 + $0x1bc] ss:$36 sps:$4 sm:$0xff]   ;;  %v1330_v50 = vsel %vm11090_vm10, %v1325_v45, %v1329_v33  ;;  %3642 = vmatmul.mubr.bf16.gmra.mxu0 %v10212_v14 }
  0xeb   : > { %v10217_v21 = vld [vmem:[#allocation4 + $0x1b8] ss:$36 sps:$4 sm:$0xff]   ;;  %v11442_v42 = vrot.slane %v761_v34, 7  ;;  %v1074_v51 = vld [vmem:[#allocation2 + $0x60] sm:$0xf]  ;;  %3802 = vmatprep.mubr.bf16.mxu1 %v10214_v48  ;;  %v359_v2 = vsel %vm11120_vm12, 0, %v358_v43 }
  0xec   : > { %v991_v53 = vld [vmem:[#allocation2 + $0x68] sm:$0x1]  ;;  %v994_v54 = vld [vmem:[#allocation2 + $0x6c] sm:$0xf]  ;;  %1570 = vst [vmem:[#allocation4 + $0x220] sm:$0xf] %v1330_v50  ;;  %3803 = vmatmul.mubr.bf16.gmra.mxu1 %v10217_v21 }
  0xed   : > { %1885 = vst [vmem:[#allocation4 + $0x1e4] sm:$0xf] %v1330_v50  ;;  %2017 = vst [vmem:[#allocation4 + $0x1a8] sm:$0xf] %v1330_v50  ;;  %v992_v56 = vsel %vm11082_vm9, %v751_v17, %v991_v53  ;;  %v1332_v60 = vshrl.u32 %v1074_v51, 16  ;;  %v1335_v49 = vshll.u32 %v1074_v51, 16  ;;  %v766_v61 = vor.u32 %v764_v20, %v11442_v42 }
  0xee   : > { %1828 = vst [vmem:[#allocation4 + $0x204] sm:$0xf] %v1074_v51  ;;  %1120 = vst [vmem:[#allocation4 + $0x240] sm:$0xf] %v1074_v51  ;;  %v768_v58 = vrot.slane %v11442_v42, 4  ;;  %v995_v0 = vsel %vm11149_vm14, %v758_v46, %v994_v54  ;;  %v8459_v1 = vrot.slane %v1074_v51, 9 }
  0xef   : > { %1960 = vst [vmem:[#allocation4 + $0x1c8] sm:$0xf] %v1074_v51  ;;  %993 = vst [vmem:[#allocation2 + $0x68] sm:$0x1] %v992_v56  ;;  %v361_v3 = vld [vmem:[#allocation2 + $0x80] sm:$0x1]  ;;  %v767_v63 = vsel %vm11132_vm13, %v759_v38, %v766_v61 }
  0xf0   : > { %v1075_v4 = vld [vmem:[#allocation2 + $0x64] sm:$0xf]  ;;  %v1334_v6 = vrot.slane %v1332_v60, 4  ;;  %v1337_v62 = vrot.slane %v1335_v49, 5  ;;  %996 = vst [vmem:[#allocation2 + $0x6c] sm:$0xf] %v995_v0 }
  0xf1   : > { %360 = vst [vmem:[#allocation2 + $0x74] sm:$0x1] %v359_v2  ;;  %v312_v7 = vsel %vm11082_vm9, 0, %v311_v47  ;;  %v314_v8 = vld [vmem:[#allocation2 + $0x84] sm:$0x1]  ;;  %v1341_v10 = vshll.u32 %v1075_v4, 16 }
  0xf2   : > { %1829 = vst [vmem:[#allocation4 + $0x228] sm:$0xf] %v1075_v4  ;;  %1121 = vst [vmem:[#allocation4 + $0x264] sm:$0xf] %v1075_v4  ;;  %v1345_v39 = vshrl.u32 %v1075_v4, 16  ;;  %v1696_v41 = vrot.slane %v1075_v4, 5  ;;  %v1338_v16 = vor.u32 %v1337_v62, %v1334_v6 }
  0xf3   : > { %1961 = vst [vmem:[#allocation4 + $0x1ec] sm:$0xf] %v1075_v4  ;;  %997 = vst [vmem:[#allocation2 + $0x70] sm:$0xf] %v767_v63  ;;  %v770_v12 = vshrl.u32 %v11446_v57, 16  ;;  %v10271_v13 = vld [vmem:[#allocation8 + $0x1a8] sm:$0xff]  }
  0xf4   : > { %313 = vst [vmem:[#allocation2 + $0x78] sm:$0x1] %v312_v7  ;;  %v773_v17 = vshll.u32 %v11446_v57, 16  ;;  %v778_v18 = vshrl.u32 %v11448_v55, 16  ;;  %v781_v19 = vshll.u32 %v11448_v55, 16  ;;  %v10272_v24 = vld [vmem:[#allocation8 + $0x1e0] sm:$0xff]   ;;  %v1697_v27 = vsel %vm11102_vm11, %v8459_v1, %v1696_v41  ;;  %9365 = vmatpush3.bf16.msra.mxu1 %v10271_v13 }
  0xf5   : > { %v1343_v25 = vrot.slane %v1341_v10, 5  ;;  %v1347_v26 = vrot.slane %v1345_v39, 4  ;;  %v1698_v35 = vrot.slane %v1696_v41, 4  ;;  %v506_v28 = vld [vmem:[%s11053_s30 + $0xa0] sm:$0xff]  ;;  %v1339_v22 = vrot.slane %v1338_v16, 4  ;;  %9366 = vmatprep.subr.bf16.mxu1 %v10272_v24  ;;  %v507_v14 = vld [vmem:[%s11053_s30 + $0xa8] sm:$0xff] }
  0xf6   : > { %v10275_v29 = vld [vmem:[#allocation8 + $0x1a0] sm:$0xff]   ;;  %1798 = vst [vmem:[#allocation4 + $0x248] sm:$0xf] %v1697_v27  ;;  %1930 = vst [vmem:[#allocation4 + $0x20c] sm:$0xf] %v1697_v27  ;;  %v772_v11 = vrot.slane %v770_v12, 7  ;;  %v8979_v57 = vpack.c.bf16 %v506_v28, %v506_v28  ;;  %v11484_v0 = vpack.c.bf16 %v507_v14, %v507_v14 }
  0xf7   : > { %2062 = vst [vmem:[#allocation4 + $0x1d0] sm:$0xf] %v1697_v27  ;;  %v11469_v31 = vrot.slane %v778_v18, 7  ;;  %v362_v30 = vsel %vm11120_vm12, 0, %v361_v3  ;;  %v10218_v33 = vld [vmem:[#allocation4 + $0x1fc] ss:$36 sps:$4 sm:$0xff]   ;;  %v1348_v15 = vor.u32 %v1347_v26, %v1343_v25  ;;  %v1344_v38 = vsel %vm11090_vm10, %v1339_v22, %v1343_v25 }
  0xf8   : > { %v10220_v34 = vld [vmem:[#allocation4 + $0x1f8] ss:$36 sps:$4 sm:$0xff]   ;;  %363 = vst [vmem:[#allocation2 + $0x80] sm:$0x1] %v362_v30  ;;  %v315_v36 = vsel %vm11082_vm9, 0, %v314_v8  ;;  %v775_v20 = vor.u32 %v773_v17, %v772_v11  ;;  %v776_v43 = vrot.slane %v772_v11, 4  ;;  %3649 = vmatprep.mubr.bf16.mxu0 %v10218_v33  ;;  %9367 = vmatpush3.bf16.msra.mxu1 %v10275_v29 }
  0xf9   : > { %v1076_v37 = vld [vmem:[#allocation2 + $0x68] sm:$0x1]  ;;  %v783_v44 = vor.u32 %v781_v19, %v11469_v31  ;;  %316 = vst [vmem:[#allocation2 + $0x84] sm:$0x1] %v315_v36  ;;  %v1349_v45 = vrot.slane %v1348_v15, 4  ;;  %v785_v21 = vrot.slane %v11469_v31, 4  ;;  %3650 = vmatmul.mubr.bf16.gmra.mxu0 %v10220_v34 }
  0xfa   : > { %v1351_v46 = vshll.u32 %v1076_v37, 16  ;;  %1571 = vst [vmem:[#allocation4 + $0x244] sm:$0xf] %v1344_v38  ;;  %1886 = vst [vmem:[#allocation4 + $0x208] sm:$0xf] %v1344_v38  ;;  %v1699_v48 = vrot.slane %v1076_v37, 5 }
  0xfb   : > { %2018 = vst [vmem:[#allocation4 + $0x1cc] sm:$0xf] %v1344_v38  ;;  %v1077_v47 = vld [vmem:[#allocation2 + $0x6c] sm:$0xf]  ;;  %v10221_v50 = vld [vmem:[#allocation4 + $0x204] ss:$36 sps:$4 sm:$0xff]   ;;  %v784_v54 = vsel %vm11132_vm13, %v776_v43, %v783_v44 }
  0xfc   : > { %v10223_v51 = vld [vmem:[#allocation4 + $0x200] ss:$36 sps:$4 sm:$0xff]   ;;  %1830 = vst [vmem:[#allocation4 + $0x24c] sm:$0xf] %v1077_v47  ;;  %1122 = vst [vmem:[#allocation4 + $0x288] sm:$0xf] %v1077_v47  ;;  %v1700_v60 = vsel %vm11102_vm11, %v1698_v35, %v1699_v48  ;;  %3810 = vmatprep.mubr.bf16.mxu1 %v10221_v50 }
  0xfd   : > { %1962 = vst [vmem:[#allocation4 + $0x210] sm:$0xf] %v1077_v47  ;;  %v1356_v53 = vshrl.u32 %v1077_v47, 16  ;;  %v1353_v55 = vrot.slane %v1351_v46, 5  ;;  %v1078_v56 = vld [vmem:[#allocation2 + $0x70] sm:$0xf]  ;;  %3811 = vmatmul.mubr.bf16.gmra.mxu1 %v10223_v51 }
  0xfe   : > { %v998_v49 = vld [vmem:[#allocation2 + $0x74] sm:$0x1]  ;;  %v1359_v61 = vshll.u32 %v1077_v47, 16  ;;  %1004 = vst [vmem:[#allocation2 + $0x7c] sm:$0xf] %v784_v54  ;;  %v1365_v3 = vshll.u32 %v1078_v56, 16 }
  0xff   : > { %1799 = vst [vmem:[#allocation4 + $0x26c] sm:$0xf] %v1700_v60  ;;  %1831 = vst [vmem:[#allocation4 + $0x270] sm:$0xf] %v1078_v56  ;;  %v999_v1 = vsel %vm11082_vm9, %v768_v58, %v998_v49  ;;  %v1358_v2 = vrot.slane %v1356_v53, 4  ;;  %v1369_v4 = vshrl.u32 %v1078_v56, 16  ;;  %v1354_v7 = vsel %vm11090_vm10, %v1349_v45, %v1353_v55 }
 0x100   : > { %1123 = vst [vmem:[#allocation4 + $0x2ac] sm:$0xf] %v1078_v56  ;;  %1931 = vst [vmem:[#allocation4 + $0x230] sm:$0xf] %v1700_v60  ;;  %v1001_v6 = vld [vmem:[#allocation2 + $0x78] sm:$0xf] }
 0x101   : > { %1963 = vst [vmem:[#allocation4 + $0x234] sm:$0xf] %v1078_v56  ;;  %2063 = vst [vmem:[#allocation4 + $0x1f4] sm:$0xf] %v1700_v60  ;;  %v364_v62 = vld [vmem:[#allocation2 + $0x8c] sm:$0x1]  ;;  %v1002_v9 = vsel %vm11149_vm14, %v775_v20, %v1001_v6 }
 0x102   : > { %v10277_v63 = vld [vmem:[#allocation8 + $0x140] sm:$0xff]   ;;  %1000 = vst [vmem:[#allocation2 + $0x74] sm:$0x1] %v999_v1  ;;  %v1361_v8 = vrot.slane %v1359_v61, 5  ;;  %v8460_v42 = vrot.slane %v1077_v47, 9  ;;  %v1367_v58 = vrot.slane %v1365_v3, 5 }
 0x103   : > { %1572 = vst [vmem:[#allocation4 + $0x268] sm:$0xf] %v1354_v7  ;;  %1887 = vst [vmem:[#allocation4 + $0x22c] sm:$0xf] %v1354_v7  ;;  %v1371_v10 = vrot.slane %v1369_v4, 4  ;;  %v1703_v39 = vrot.slane %v1078_v56, 5  ;;  %9262 = vmatprep.subr.bf16.mxu0 %v10277_v63 }
 0x104   : > { %2019 = vst [vmem:[#allocation4 + $0x1f0] sm:$0xf] %v1354_v7  ;;  %1003 = vst [vmem:[#allocation2 + $0x78] sm:$0xf] %v1002_v9  ;;  %v1005_v41 = vld [vmem:[#allocation2 + $0x80] sm:$0x1]  ;;  %v1362_v16 = vor.u32 %v1361_v8, %v1358_v2 }
 0x105   : > { %v787_v12 = vshrl.u32 %v8979_v57, 16  ;;  %v508_v13 = vld [vmem:[%s11053_s30 + $0xb0] sm:$0xff]  ;;  %v1006_v17 = vsel %vm11082_vm9, %v785_v21, %v1005_v41  ;;  %v790_v18 = vshll.u32 %v8979_v57, 16  ;;  %v795_v19 = vshrl.u32 %v11484_v0, 16  ;;  %v317_v25 = vld [vmem:[#allocation2 + $0x90] sm:$0x1] }
 0x106   : > { %v1008_v24 = vld [vmem:[#allocation2 + $0x84] sm:$0xf]  ;;  %v1372_v26 = vor.u32 %v1371_v10, %v1367_v58  ;;  %v1704_v27 = vsel %vm11102_vm11, %v8460_v42, %v1703_v39  ;;  %v11500_v35 = vrot.slane %v1703_v39, 4  ;;  %1007 = vst [vmem:[#allocation2 + $0x80] sm:$0x1] %v1006_v17  ;;  %v509_v29 = vld [vmem:[%s11053_s30 + $0xb8] sm:$0xff]  ;;  %v11520_v47 = vpack.c.bf16 %v508_v13, %v508_v13 }
 0x107   : > { %v789_v28 = vrot.slane %v787_v12, 7  ;;  %v1363_v22 = vrot.slane %v1362_v16, 4  ;;  %1800 = vst [vmem:[#allocation4 + $0x290] sm:$0xf] %v1704_v27  ;;  %1932 = vst [vmem:[#allocation4 + $0x254] sm:$0xf] %v1704_v27  ;;  %v11529_v49 = vpack.c.bf16 %v509_v29, %v509_v29 }
 0x108   : > { %2064 = vst [vmem:[#allocation4 + $0x218] sm:$0xf] %v1704_v27  ;;  %v11503_v11 = vrot.slane %v795_v19, 7  ;;  %v798_v31 = vshll.u32 %v11484_v0, 16  ;;  %v365_v30 = vsel %vm11120_vm12, 0, %v364_v62  ;;  %v510_v33 = vld [vmem:[%s11053_s30 + $0xc0] sm:$0xff] }
 0x109   : > { %v1373_v34 = vrot.slane %v1372_v26, 4  ;;  %v11509_v15 = vld [vmem:[#allocation2 + $0x7c] sm:$0xf]  ;;  %v792_v36 = vor.u32 %v790_v18, %v789_v28  ;;  %v793_v37 = vrot.slane %v789_v28, 4  ;;  %366 = vst [vmem:[#allocation2 + $0x8c] sm:$0x1] %v365_v30  ;;  %v1368_v14 = vsel %vm11090_vm10, %v1363_v22, %v1367_v58 }
 0x10a   : > { %v318_v38 = vsel %vm11082_vm9, 0, %v317_v25  ;;  %v10280_v20 = vld [vmem:[#allocation8 + $0x100] sm:$0xff]   ;;  %v10228_v43 = vld [vmem:[#allocation4 + $0x24c] ss:$36 sps:$4 sm:$0xff]   ;;  %1833 = vst [vmem:[#allocation4 + $0x2b8] sm:$0xf] %v11509_v15  ;;  %v800_v46 = vor.u32 %v798_v31, %v11503_v11  ;;  %v11531_v61 = vpack.c.bf16 %v510_v33, %v510_v33 }
 0x10b   : > { %v10231_v44 = vld [vmem:[#allocation4 + $0x248] ss:$36 sps:$4 sm:$0xff]   ;;  %1125 = vst [vmem:[#allocation4 + $0x2f4] sm:$0xf] %v11509_v15  ;;  %1965 = vst [vmem:[#allocation4 + $0x27c] sm:$0xf] %v11509_v15  ;;  %v1009_v51 = vsel %vm11149_vm14, %v792_v36, %v1008_v24  ;;  %9263 = vmatpush3.bf16.msra.mxu0 %v10280_v20  ;;  %3818 = vmatprep.mubr.bf16.mxu1 %v10228_v43 }
 0x10c   : > { %v1389_v45 = vshll.u32 %v11509_v15, 16  ;;  %319 = vst [vmem:[#allocation2 + $0x90] sm:$0x1] %v318_v38  ;;  %v1079_v48 = vld [vmem:[#allocation2 + $0x74] sm:$0x1]  ;;  %v1393_v21 = vshrl.u32 %v11509_v15, 16  ;;  %v801_v60 = vsel %vm11132_vm13, %v793_v37, %v800_v46  ;;  %3819 = vmatmul.mubr.bf16.gmra.mxu1 %v10231_v44 }
 0x10d   : > { %1573 = vst [vmem:[#allocation4 + $0x28c] sm:$0xf] %v1368_v14  ;;  %1888 = vst [vmem:[#allocation4 + $0x250] sm:$0xf] %v1368_v14  ;;  %v802_v50 = vrot.slane %v11503_v11, 4  ;;  %v1710_v53 = vrot.slane %v11509_v15, 5 }
 0x10e   : > { %2020 = vst [vmem:[#allocation4 + $0x214] sm:$0xf] %v1368_v14  ;;  %v10282_v54 = vld [vmem:[#allocation8 + $0x1d8] sm:$0xff]   ;;  %v10224_v57 = vld [vmem:[#allocation4 + $0x244] ss:$36 sps:$4 sm:$0xff]   ;;  %v1375_v56 = vshll.u32 %v1079_v48, 16 }
 0x10f   : > { %v10226_v55 = vld [vmem:[#allocation4 + $0x240] ss:$36 sps:$4 sm:$0xff]   ;;  %1010 = vst [vmem:[#allocation2 + $0x84] sm:$0xf] %v1009_v51  ;;  %v1080_v0 = vld [vmem:[#allocation2 + $0x78] sm:$0xf]  ;;  %9368 = vmatprep.subr.bf16.mxu1 %v10282_v54  ;;  %3657 = vmatprep.mubr.bf16.mxu0 %v10224_v57 }
 0x110   : > { %v1706_v1 = vrot.slane %v1079_v48, 5  ;;  %v11533_v2 = vrot.slane %v1389_v45, 5  ;;  %v1395_v3 = vrot.slane %v1393_v21, 4  ;;  %1011 = vst [vmem:[#allocation2 + $0x88] sm:$0xf] %v801_v60  ;;  %v1712_v4 = vrot.slane %v1710_v53, 4  ;;  %3658 = vmatmul.mubr.bf16.gmra.mxu0 %v10226_v55 }
 0x111   : > { %v1377_v6 = vrot.slane %v1375_v56, 5  ;;  %1832 = vst [vmem:[#allocation4 + $0x294] sm:$0xf] %v1080_v0  ;;  %1124 = vst [vmem:[#allocation4 + $0x2d0] sm:$0xf] %v1080_v0  ;;  %v1380_v63 = vshrl.u32 %v1080_v0, 16 }
 0x112   : > { %1964 = vst [vmem:[#allocation4 + $0x258] sm:$0xf] %v1080_v0  ;;  %v1082_v62 = vld [vmem:[#allocation2 + $0x80] sm:$0x1]  ;;  %v1383_v7 = vshll.u32 %v1080_v0, 16  ;;  %v8461_v8 = vrot.slane %v1080_v0, 9  ;;  %v1707_v58 = vsel %vm11102_vm11, %v11500_v35, %v1706_v1  ;;  %v1396_v10 = vor.u32 %v1395_v3, %v11533_v2 }
 0x113   : > { %v367_v9 = vld [vmem:[#allocation2 + $0x98] sm:$0x1]  ;;  %v320_v42 = vld [vmem:[#allocation2 + $0x9c] sm:$0x1]  ;;  %v1399_v39 = vshll.u32 %v1082_v62, 16  ;;  %v1713_v41 = vrot.slane %v1082_v62, 5  ;;  %v1378_v12 = vsel %vm11090_vm10, %v1373_v34, %v1377_v6 }
 0x114   : > { %1801 = vst [vmem:[#allocation4 + $0x2b4] sm:$0xf] %v1707_v58  ;;  %1933 = vst [vmem:[#allocation4 + $0x278] sm:$0xf] %v1707_v58  ;;  %v1382_v13 = vrot.slane %v1380_v63, 4  ;;  %v1385_v16 = vrot.slane %v1383_v7, 5  ;;  %v1711_v17 = vsel %vm11102_vm11, %v8461_v8, %v1710_v53 }
 0x115   : > { %2065 = vst [vmem:[#allocation4 + $0x23c] sm:$0xf] %v1707_v58  ;;  %v1012_v18 = vld [vmem:[#allocation2 + $0x8c] sm:$0x1]  ;;  %1574 = vst [vmem:[#allocation4 + $0x2b0] sm:$0xf] %v1378_v12  ;;  %v1714_v25 = vsel %vm11102_vm11, %v1712_v4, %v1713_v41 }
 0x116   : > { %1889 = vst [vmem:[#allocation4 + $0x274] sm:$0xf] %v1378_v12  ;;  %2021 = vst [vmem:[#allocation4 + $0x238] sm:$0xf] %v1378_v12  ;;  %v1397_v19 = vrot.slane %v1396_v10, 4  ;;  %v1401_v24 = vrot.slane %v1399_v39, 5  ;;  %v1013_v26 = vsel %vm11082_vm9, %v802_v50, %v1012_v18  ;;  %v1386_v27 = vor.u32 %v1385_v16, %v1382_v13 }
 0x117   : > { %1802 = vst [vmem:[#allocation4 + $0x2d8] sm:$0xf] %v1711_v17  ;;  %1934 = vst [vmem:[#allocation4 + $0x29c] sm:$0xf] %v1711_v17  ;;  %v804_v35 = vshrl.u32 %v11520_v47, 16  ;;  %v807_v28 = vshll.u32 %v11520_v47, 16 }
 0x118   : > { %2066 = vst [vmem:[#allocation4 + $0x260] sm:$0xf] %v1711_v17  ;;  %1803 = vst [vmem:[#allocation4 + $0x2fc] sm:$0xf] %v1714_v25  ;;  %v812_v29 = vshrl.u32 %v11529_v49, 16  ;;  %v1402_v22 = vsel %vm11090_vm10, %v1397_v19, %v1401_v24  ;;  %v815_v31 = vshll.u32 %v11529_v49, 16 }
 0x119   : > { %1935 = vst [vmem:[#allocation4 + $0x2c0] sm:$0xf] %v1714_v25  ;;  %2067 = vst [vmem:[#allocation4 + $0x284] sm:$0xf] %v1714_v25  ;;  %v11552_v11 = vld [vmem:[#allocation2 + $0x84] sm:$0xf] }
 0x11a   : > { %1014 = vst [vmem:[#allocation2 + $0x8c] sm:$0x1] %v1013_v26  ;;  %v1015_v30 = vld [vmem:[#allocation2 + $0x90] sm:$0xf]  ;;  %v368_v33 = vsel %vm11120_vm12, 0, %v367_v9  ;;  %v321_v34 = vsel %vm11082_vm9, 0, %v320_v42 }
 0x11b   : > { %v511_v15 = vld [vmem:[%s11053_s30 + $0xc8] sm:$0xff]  ;;  %v10283_v36 = vld [vmem:[#allocation8 + $0x198] sm:$0xff]   ;;  %v1387_v37 = vrot.slane %v1386_v27, 4  ;;  %1576 = vst [vmem:[#allocation4 + $0x2f8] sm:$0xf] %v1402_v22  ;;  %v1404_v20 = vshrl.u32 %v11552_v11, 16 }
 0x11c   : > { %1891 = vst [vmem:[#allocation4 + $0x2bc] sm:$0xf] %v1402_v22  ;;  %2023 = vst [vmem:[#allocation4 + $0x280] sm:$0xf] %v1402_v22  ;;  %v1084_v38 = vld [vmem:[#allocation2 + $0x88] sm:$0xf]  ;;  %9369 = vmatpush3.bf16.msra.mxu1 %v10283_v36  ;;  %v11572_v4 = vpack.c.bf16 %v511_v15, %v511_v15 }
 0x11d   : > { %1834 = vst [vmem:[#allocation4 + $0x2dc] sm:$0xf] %v11552_v11  ;;  %1126 = vst [vmem:[#allocation4 + $0x318] sm:$0xf] %v11552_v11  ;;  %v1407_v43 = vshll.u32 %v11552_v11, 16  ;;  %v806_v44 = vrot.slane %v804_v35, 7  ;;  %v1392_v21 = vsel %vm11090_vm10, %v1387_v37, %v11533_v2 }
 0x11e   : > { %1966 = vst [vmem:[#allocation4 + $0x2a0] sm:$0xf] %v11552_v11  ;;  %369 = vst [vmem:[#allocation2 + $0x98] sm:$0x1] %v368_v33  ;;  %v1413_v14 = vshll.u32 %v1084_v38, 16  ;;  %v1417_v45 = vshrl.u32 %v1084_v38, 16 }
 0x11f   : > { %322 = vst [vmem:[#allocation2 + $0x9c] sm:$0x1] %v321_v34  ;;  %1835 = vst [vmem:[#allocation4 + $0x300] sm:$0xf] %v1084_v38  ;;  %v814_v46 = vrot.slane %v812_v29, 7  ;;  %v8462_v47 = vrot.slane %v11552_v11, 9  ;;  %v809_v53 = vor.u32 %v807_v28, %v806_v44 }
 0x120   : > { %1127 = vst [vmem:[#allocation4 + $0x33c] sm:$0xf] %v1084_v38  ;;  %1967 = vst [vmem:[#allocation4 + $0x2c4] sm:$0xf] %v1084_v38  ;;  %v10284_v48 = vld [vmem:[#allocation8 + $0x1d0] sm:$0xff]   ;;  %v1406_v50 = vrot.slane %v1404_v20, 4 }
 0x121   : > { %v1409_v51 = vrot.slane %v1407_v43, 5  ;;  %v10235_v54 = vld [vmem:[#allocation4 + $0x294] ss:$36 sps:$4 sm:$0xff]   ;;  %1575 = vst [vmem:[#allocation4 + $0x2d4] sm:$0xf] %v1392_v21  ;;  %v1415_v55 = vrot.slane %v1413_v14, 5  ;;  %v817_v56 = vor.u32 %v815_v31, %v814_v46  ;;  %9370 = vmatprep.subr.bf16.mxu1 %v10284_v48  ;;  %v1016_v2 = vsel %vm11149_vm14, %v809_v53, %v1015_v30 }
 0x122   : > { %v10237_v57 = vld [vmem:[#allocation4 + $0x290] ss:$36 sps:$4 sm:$0xff]   ;;  %1890 = vst [vmem:[#allocation4 + $0x298] sm:$0xf] %v1392_v21  ;;  %2022 = vst [vmem:[#allocation4 + $0x25c] sm:$0xf] %v1392_v21  ;;  %3826 = vmatprep.mubr.bf16.mxu1 %v10235_v54 }
 0x123   : > { %v512_v60 = vld [vmem:[%s11053_s30 + $0xd0] sm:$0xff]  ;;  %v10234_v0 = vld [vmem:[#allocation4 + $0x288] ss:$36 sps:$4 sm:$0xff]   ;;  %v1410_v1 = vor.u32 %v1409_v51, %v1406_v50  ;;  %v1419_v3 = vrot.slane %v1417_v45, 4  ;;  %v1085_v6 = vld [vmem:[#allocation2 + $0x8c] sm:$0x1]  ;;  %3827 = vmatmul.mubr.bf16.gmra.mxu1 %v10237_v57 }
 0x124   : > { %v10232_v49 = vld [vmem:[#allocation4 + $0x28c] ss:$36 sps:$4 sm:$0xff]   ;;  %v810_v62 = vrot.slane %v806_v44, 4  ;;  %v819_v63 = vrot.slane %v814_v46, 4  ;;  %1017 = vst [vmem:[#allocation2 + $0x90] sm:$0xf] %v1016_v2  ;;  %v11586_v29 = vpack.c.bf16 %v512_v60, %v512_v60 }
 0x125   : > { %v1717_v7 = vrot.slane %v1084_v38, 5  ;;  %v821_v8 = vshrl.u32 %v11531_v61, 16  ;;  %v513_v9 = vld [vmem:[%s11053_s30 + $0xd8] sm:$0xff]  ;;  %3665 = vmatprep.mubr.bf16.mxu0 %v10232_v49  ;;  %v1411_v42 = vrot.slane %v1410_v1, 4  ;;  %v1420_v58 = vor.u32 %v1419_v3, %v1415_v55  ;;  %v370_v41 = vld [vmem:[#allocation2 + $0xa4] sm:$0x1] }
 0x126   : > { %v1423_v10 = vshll.u32 %v1085_v6, 16  ;;  %v1720_v39 = vrot.slane %v1085_v6, 5  ;;  %v10287_v12 = vld [vmem:[#allocation8 + $0x190] sm:$0xff]   ;;  %3666 = vmatmul.mubr.bf16.gmra.mxu0 %v10234_v0  ;;  %v818_v13 = vsel %vm11132_vm13, %v810_v62, %v817_v56  ;;  %v1019_v18 = vld [vmem:[#allocation2 + $0x98] sm:$0x1]  ;;  %v824_v31 = vshll.u32 %v11531_v61, 16 }
 0x127   : > { %v1718_v16 = vsel %vm11102_vm11, %v8462_v47, %v1717_v7  ;;  %v1719_v17 = vrot.slane %v1717_v7, 4  ;;  %v11580_v19 = vrot.slane %v821_v8, 7  ;;  %v323_v24 = vld [vmem:[#allocation2 + $0xa8] sm:$0x1]  ;;  %v10242_v25 = vld [vmem:[#allocation4 + $0x2dc] ss:$36 sps:$4 sm:$0xff]   ;;  %v1416_v27 = vsel %vm11090_vm10, %v1411_v42, %v1415_v55  ;;  %9371 = vmatpush3.bf16.msra.mxu1 %v10287_v12 }
 0x128   : > { %v10245_v26 = vld [vmem:[#allocation4 + $0x2d8] ss:$36 sps:$4 sm:$0xff]   ;;  %v1421_v35 = vrot.slane %v1420_v58, 4  ;;  %1018 = vst [vmem:[#allocation2 + $0x94] sm:$0xf] %v818_v13  ;;  %v1020_v28 = vsel %vm11082_vm9, %v819_v63, %v1019_v18  ;;  %v1425_v22 = vrot.slane %v1423_v10, 5  ;;  %3834 = vmatprep.mubr.bf16.mxu1 %v10242_v25  ;;  %v11593_v37 = vpack.c.bf16 %v513_v9, %v513_v9 }
 0x129   : > { %1804 = vst [vmem:[#allocation4 + $0x320] sm:$0xf] %v1718_v16  ;;  %1936 = vst [vmem:[#allocation4 + $0x2e4] sm:$0xf] %v1718_v16  ;;  %v1721_v11 = vsel %vm11102_vm11, %v1719_v17, %v1720_v39  ;;  %v827_v30 = vrot.slane %v11580_v19, 4  ;;  %v829_v36 = vshrl.u32 %v11572_v4, 16  ;;  %v826_v43 = vor.u32 %v824_v31, %v11580_v19 }
 0x12a   : > { %2068 = vst [vmem:[#allocation4 + $0x2a8] sm:$0xf] %v1718_v16  ;;  %1577 = vst [vmem:[#allocation4 + $0x31c] sm:$0xf] %v1416_v27  ;;  %v1022_v33 = vld [vmem:[#allocation2 + $0x9c] sm:$0xf]  ;;  %v1426_v20 = vsel %vm11090_vm10, %v1421_v35, %v1425_v22 }
 0x12b   : > { %1892 = vst [vmem:[#allocation4 + $0x2e0] sm:$0xf] %v1416_v27  ;;  %2024 = vst [vmem:[#allocation4 + $0x2a4] sm:$0xf] %v1416_v27  ;;  %v10238_v34 = vld [vmem:[#allocation4 + $0x2d4] ss:$36 sps:$4 sm:$0xff]   ;;  %v1023_v51 = vsel %vm11149_vm14, %v826_v43, %v1022_v33  ;;  %3835 = vmatmul.mubr.bf16.gmra.mxu1 %v10245_v26 }
 0x12c   : > { %1021 = vst [vmem:[#allocation2 + $0x98] sm:$0x1] %v1020_v28  ;;  %v10240_v15 = vld [vmem:[#allocation4 + $0x2d0] ss:$36 sps:$4 sm:$0xff]   ;;  %1805 = vst [vmem:[#allocation4 + $0x344] sm:$0xf] %v1721_v11  ;;  %3673 = vmatprep.mubr.bf16.mxu0 %v10238_v34 }
 0x12d   : > { %1937 = vst [vmem:[#allocation4 + $0x308] sm:$0xf] %v1721_v11  ;;  %2069 = vst [vmem:[#allocation4 + $0x2cc] sm:$0xf] %v1721_v11  ;;  %v373_v38 = vld [vmem:[#allocation2 + $0xb0] sm:$0x1] }
 0x12e   : > { %v832_v61 = vshll.u32 %v11572_v4, 16  ;;  %v371_v44 = vsel %vm11120_vm12, 0, %v370_v41  ;;  %1578 = vst [vmem:[#allocation4 + $0x340] sm:$0xf] %v1426_v20  ;;  %1893 = vst [vmem:[#allocation4 + $0x304] sm:$0xf] %v1426_v20  ;;  %3674 = vmatmul.mubr.bf16.gmra.mxu0 %v10240_v15 }
 0x12f   : > { %2025 = vst [vmem:[#allocation4 + $0x2c8] sm:$0xf] %v1426_v20  ;;  %v1086_v14 = vld [vmem:[#allocation2 + $0x90] sm:$0xf]  ;;  %v11601_v45 = vrot.slane %v829_v36, 7  ;;  %v324_v46 = vsel %vm11082_vm9, 0, %v323_v24 }
 0x130   : > { %372 = vst [vmem:[#allocation2 + $0xa4] sm:$0x1] %v371_v44  ;;  %v838_v47 = vshrl.u32 %v11586_v29, 16  ;;  %v841_v48 = vshll.u32 %v11586_v29, 16  ;;  %1836 = vst [vmem:[#allocation4 + $0x324] sm:$0xf] %v1086_v14 }
 0x131   : > { %1128 = vst [vmem:[#allocation4 + $0x360] sm:$0xf] %v1086_v14  ;;  %1968 = vst [vmem:[#allocation4 + $0x2e8] sm:$0xf] %v1086_v14  ;;  %v1428_v21 = vshrl.u32 %v1086_v14, 16  ;;  %v1431_v50 = vshll.u32 %v1086_v14, 16  ;;  %v834_v54 = vor.u32 %v832_v61, %v11601_v45 }
 0x132   : > { %v8463_v53 = vrot.slane %v1086_v14, 9  ;;  %325 = vst [vmem:[#allocation2 + $0xa8] sm:$0x1] %v324_v46  ;;  %v836_v57 = vrot.slane %v11601_v45, 4  ;;  %1024 = vst [vmem:[#allocation2 + $0x9c] sm:$0xf] %v1023_v51 }
 0x133   : > { %v11611_v55 = vrot.slane %v838_v47, 7  ;;  %v846_v56 = vshrl.u32 %v11593_v37, 16  ;;  %v514_v60 = vld [vmem:[%s11053_s30 + $0xe0] sm:$0xff]  ;;  %v10292_v49 = vld [vmem:[#allocation8 + $0x1c8] sm:$0xff]   ;;  %v1430_v1 = vrot.slane %v1428_v21, 4  ;;  %v1433_v3 = vrot.slane %v1431_v50, 5 }
 0x134   : > { %v1087_v0 = vld [vmem:[#allocation2 + $0x94] sm:$0xf]  ;;  %v849_v2 = vshll.u32 %v11593_v37, 16  ;;  %v374_v4 = vsel %vm11120_vm12, 0, %v373_v38  ;;  %v1088_v6 = vld [vmem:[#allocation2 + $0x98] sm:$0x1]  ;;  %v835_v7 = vsel %vm11132_vm13, %v827_v30, %v834_v54  ;;  %9372 = vmatprep.subr.bf16.mxu1 %v10292_v49  ;;  %v11625_v27 = vpack.c.bf16 %v514_v60, %v514_v60 }
 0x135   : > { %1837 = vst [vmem:[#allocation4 + $0x348] sm:$0xf] %v1087_v0  ;;  %1129 = vst [vmem:[#allocation4 + $0x384] sm:$0xf] %v1087_v0  ;;  %v1437_v62 = vshll.u32 %v1087_v0, 16  ;;  %v1441_v63 = vshrl.u32 %v1087_v0, 16  ;;  %v1434_v42 = vor.u32 %v1433_v3, %v1430_v1  ;;  %v843_v39 = vor.u32 %v841_v48, %v11611_v55 }
 0x136   : > { %1969 = vst [vmem:[#allocation4 + $0x30c] sm:$0xf] %v1087_v0  ;;  %v1724_v8 = vrot.slane %v1087_v0, 5  ;;  %375 = vst [vmem:[#allocation2 + $0xb0] sm:$0x1] %v374_v4  ;;  %v1447_v58 = vshll.u32 %v1088_v6, 16 }
 0x137   : > { %v326_v9 = vld [vmem:[#allocation2 + $0xb4] sm:$0x1]  ;;  %1025 = vst [vmem:[#allocation2 + $0xa0] sm:$0xf] %v835_v7  ;;  %v1727_v10 = vrot.slane %v1088_v6, 5  ;;  %v1439_v41 = vrot.slane %v1437_v62, 5 }
 0x138   : > { %v1443_v12 = vrot.slane %v1441_v63, 4  ;;  %v1725_v13 = vsel %vm11102_vm11, %v8463_v53, %v1724_v8  ;;  %v1726_v16 = vrot.slane %v1724_v8, 4  ;;  %v515_v17 = vld [vmem:[%s11053_s30 + $0xe8] sm:$0xff]  ;;  %v516_v18 = vld [vmem:[%s11053_s30 + $0xf0] sm:$0xff]  ;;  %v10246_v24 = vld [vmem:[#allocation4 + $0x31c] ss:$36 sps:$4 sm:$0xff]  }
 0x139   : > { %v10293_v19 = vld [vmem:[#allocation8 + $0x188] sm:$0xff]   ;;  %v10248_v25 = vld [vmem:[#allocation4 + $0x318] ss:$36 sps:$4 sm:$0xff]   ;;  %v1435_v26 = vrot.slane %v1434_v42, 4  ;;  %1806 = vst [vmem:[#allocation4 + $0x368] sm:$0xf] %v1725_v13  ;;  %3681 = vmatprep.mubr.bf16.mxu0 %v10246_v24  ;;  %v11640_v48 = vpack.c.bf16 %v515_v17, %v515_v17  ;;  %v11642_v21 = vpack.c.bf16 %v516_v18, %v516_v18 }
 0x13a   : > { %1938 = vst [vmem:[#allocation4 + $0x32c] sm:$0xf] %v1725_v13  ;;  %2070 = vst [vmem:[#allocation4 + $0x2f0] sm:$0xf] %v1725_v13  ;;  %v1444_v35 = vor.u32 %v1443_v12, %v1439_v41  ;;  %v1449_v28 = vrot.slane %v1447_v58, 5  ;;  %v1728_v29 = vsel %vm11102_vm11, %v1726_v16, %v1727_v10  ;;  %v844_v11 = vrot.slane %v11611_v55, 4  ;;  %9373 = vmatpush3.bf16.msra.mxu1 %v10293_v19 }
 0x13b   : > { %v1026_v22 = vld [vmem:[#allocation2 + $0xa4] sm:$0x1]  ;;  %v10294_v31 = vld [vmem:[#allocation8 + $0x1c0] sm:$0xff]   ;;  %v1440_v30 = vsel %vm11090_vm10, %v1435_v26, %v1439_v41  ;;  %v1089_v33 = vld [vmem:[#allocation2 + $0x9c] sm:$0xf]  ;;  %v848_v15 = vrot.slane %v846_v56, 7  ;;  %3682 = vmatmul.mubr.bf16.gmra.mxu0 %v10248_v25 }
 0x13c   : > { %1807 = vst [vmem:[#allocation4 + $0x38c] sm:$0xf] %v1728_v29  ;;  %1939 = vst [vmem:[#allocation4 + $0x350] sm:$0xf] %v1728_v29  ;;  %v1027_v34 = vsel %vm11082_vm9, %v836_v57, %v1026_v22  ;;  %v1029_v36 = vld [vmem:[#allocation2 + $0xa8] sm:$0xf]  ;;  %9374 = vmatprep.subr.bf16.mxu1 %v10294_v31 }
 0x13d   : > { %2071 = vst [vmem:[#allocation4 + $0x314] sm:$0xf] %v1728_v29  ;;  %v327_v38 = vsel %vm11082_vm9, 0, %v326_v9  ;;  %v1445_v20 = vrot.slane %v1444_v35, 4  ;;  %1579 = vst [vmem:[#allocation4 + $0x364] sm:$0xf] %v1440_v30  ;;  %v1030_v44 = vsel %vm11149_vm14, %v843_v39, %v1029_v36  ;;  %v851_v46 = vor.u32 %v849_v2, %v848_v15 }
 0x13e   : > { %1894 = vst [vmem:[#allocation4 + $0x328] sm:$0xf] %v1440_v30  ;;  %2026 = vst [vmem:[#allocation4 + $0x2ec] sm:$0xf] %v1440_v30  ;;  %v1452_v43 = vshrl.u32 %v1089_v33, 16  ;;  %v1455_v61 = vshll.u32 %v1089_v33, 16 }
 0x13f   : > { %1838 = vst [vmem:[#allocation4 + $0x36c] sm:$0xf] %v1089_v33  ;;  %1130 = vst [vmem:[#allocation4 + $0x3a8] sm:$0xf] %v1089_v33  ;;  %v10249_v14 = vld [vmem:[#allocation4 + $0x324] ss:$36 sps:$4 sm:$0xff]   ;;  %v1450_v50 = vsel %vm11090_vm10, %v1445_v20, %v1449_v28  ;;  %v852_v56 = vsel %vm11132_vm13, %v844_v11, %v851_v46 }
 0x140   : > { %1970 = vst [vmem:[#allocation4 + $0x330] sm:$0xf] %v1089_v33  ;;  %1028 = vst [vmem:[#allocation2 + $0xa4] sm:$0x1] %v1027_v34  ;;  %v10251_v45 = vld [vmem:[#allocation4 + $0x320] ss:$36 sps:$4 sm:$0xff]   ;;  %3842 = vmatprep.mubr.bf16.mxu1 %v10249_v14 }
 0x141   : > { %328 = vst [vmem:[#allocation2 + $0xb4] sm:$0x1] %v327_v38  ;;  %v853_v47 = vrot.slane %v848_v15, 4  ;;  %1031 = vst [vmem:[#allocation2 + $0xa8] sm:$0xf] %v1030_v44  ;;  %v1454_v53 = vrot.slane %v1452_v43, 4  ;;  %3843 = vmatmul.mubr.bf16.gmra.mxu1 %v10251_v45 }
 0x142   : > { %v1090_v51 = vld [vmem:[#allocation2 + $0xa0] sm:$0xf]  ;;  %v1457_v54 = vrot.slane %v1455_v61, 5  ;;  %v8464_v57 = vrot.slane %v1089_v33, 9  ;;  %1580 = vst [vmem:[#allocation4 + $0x388] sm:$0xf] %v1450_v50 }
 0x143   : > { %1895 = vst [vmem:[#allocation4 + $0x34c] sm:$0xf] %v1450_v50  ;;  %2027 = vst [vmem:[#allocation4 + $0x310] sm:$0xf] %v1450_v50  ;;  %v1461_v37 = vshll.u32 %v1090_v51, 16  ;;  %v1465_v55 = vshrl.u32 %v1090_v51, 16 }
 0x144   : > { %1839 = vst [vmem:[#allocation4 + $0x390] sm:$0xf] %v1090_v51  ;;  %1131 = vst [vmem:[#allocation4 + $0x3cc] sm:$0xf] %v1090_v51  ;;  %v1731_v60 = vrot.slane %v1090_v51, 5  ;;  %v10297_v0 = vld [vmem:[#allocation8 + $0x180] sm:$0xff]   ;;  %v1458_v1 = vor.u32 %v1457_v54, %v1454_v53 }
 0x145   : > { %1971 = vst [vmem:[#allocation4 + $0x354] sm:$0xf] %v1090_v51  ;;  %v1033_v49 = vld [vmem:[#allocation2 + $0xb0] sm:$0x1]  ;;  %1032 = vst [vmem:[#allocation2 + $0xac] sm:$0xf] %v852_v56  ;;  %9375 = vmatpush3.bf16.msra.mxu1 %v10297_v0 }
 0x146   : > { %v1034_v3 = vsel %vm11082_vm9, %v853_v47, %v1033_v49  ;;  %v855_v2 = vshrl.u32 %v11625_v27, 16  ;;  %v858_v4 = vshll.u32 %v11625_v27, 16  ;;  %v1463_v6 = vrot.slane %v1461_v37, 5  ;;  %v11654_v8 = vld [vmem:[#allocation8 + $0x238] sm:$0xff]   ;;  %v376_v39 = vld [vmem:[#allocation2 + $0xbc] sm:$0x1] }
 0x147   : > { %v1467_v62 = vrot.slane %v1465_v55, 4  ;;  %v1732_v63 = vsel %vm11102_vm11, %v8464_v57, %v1731_v60  ;;  %v1733_v7 = vrot.slane %v1731_v60, 4  ;;  %1035 = vst [vmem:[#allocation2 + $0xb0] sm:$0x1] %v1034_v3  ;;  %v1459_v9 = vrot.slane %v1458_v1, 4  ;;  %v517_v16 = vld [vmem:[%s11053_s30 + $0xf8] sm:$0xff]  ;;  %9968 = vmatprep.subr.bf16.mxu0 %v11654_v8 }
 0x148   : > { %1808 = vst [vmem:[#allocation4 + $0x3b0] sm:$0xf] %v1732_v63  ;;  %1940 = vst [vmem:[#allocation4 + $0x374] sm:$0xf] %v1732_v63  ;;  %v11656_v42 = vrot.slane %v855_v2, 7  ;;  %v863_v58 = vshrl.u32 %v11640_v48, 16  ;;  %v11675_v45 = vpack.c.bf16 %v517_v16, %v517_v16 }
 0x149   : > { %2072 = vst [vmem:[#allocation4 + $0x338] sm:$0xf] %v1732_v63  ;;  %v866_v10 = vshll.u32 %v11640_v48, 16  ;;  %v1091_v41 = vld [vmem:[#allocation2 + $0xa4] sm:$0x1]  ;;  %v1468_v12 = vor.u32 %v1467_v62, %v1463_v6  ;;  %v377_v13 = vsel %vm11120_vm12, 0, %v376_v39  ;;  %v1464_v18 = vsel %vm11090_vm10, %v1459_v9, %v1463_v6 }
 0x14a   : > { %v872_v17 = vshrl.u32 %v11642_v21, 16  ;;  %v1471_v19 = vshll.u32 %v1091_v41, 16  ;;  %v1092_v24 = vld [vmem:[#allocation2 + $0xa8] sm:$0xf]  ;;  %v1734_v25 = vrot.slane %v1091_v41, 5  ;;  %v860_v26 = vor.u32 %v858_v4, %v11656_v42  ;;  %s10809_s17 = scalar_lea.vmem %s13449_s7, 4096 }
 0x14b   : > { %v1036_v27 = vld [vmem:[#allocation2 + $0xb4] sm:$0xf]  ;;  %378 = vst [vmem:[#allocation2 + $0xbc] sm:$0x1] %v377_v13  ;;  %v1469_v35 = vrot.slane %v1468_v12, 4  ;;  %v1476_v28 = vshrl.u32 %v1092_v24, 16  ;;  %p10810_p11 = scmp.ne.s32.totalorder %s13449_s7, %s10809_s17 }
 0x14c   : > { %1581 = vst [vmem:[#allocation4 + $0x3ac] sm:$0xf] %v1464_v18  ;;  %1896 = vst [vmem:[#allocation4 + $0x370] sm:$0xf] %v1464_v18  ;;  %v1479_v29 = vshll.u32 %v1092_v24, 16  ;;  %v861_v22 = vrot.slane %v11656_v42, 4  ;;  %v1735_v33 = vsel %vm11102_vm11, %v1733_v7, %v1734_v25  ;;  %v1037_v34 = vsel %vm11149_vm14, %v860_v26, %v1036_v27 }
 0x14d   : > { %2028 = vst [vmem:[#allocation4 + $0x334] sm:$0xf] %v1464_v18  ;;  %1840 = vst [vmem:[#allocation4 + $0x3b4] sm:$0xf] %v1092_v24  ;;  %v10252_v11 = vld [vmem:[#allocation4 + $0x364] ss:$36 sps:$4 sm:$0xff]  }
 0x14e   : > { %1132 = vst [vmem:[#allocation4 + $0x3f0] sm:$0xf] %v1092_v24  ;;  %1972 = vst [vmem:[#allocation4 + $0x378] sm:$0xf] %v1092_v24  ;;  %v10254_v31 = vld [vmem:[#allocation4 + $0x360] ss:$36 sps:$4 sm:$0xff]   ;;  %3689 = vmatprep.mubr.bf16.mxu0 %v10252_v11 }
 0x14f   : > { %v1473_v30 = vrot.slane %v1471_v19, 5  ;;  %v10256_v15 = vld [vmem:[#allocation4 + $0x36c] ss:$36 sps:$4 sm:$0xff]   ;;  %1809 = vst [vmem:[#allocation4 + $0x3d4] sm:$0xf] %v1735_v33  ;;  %v1478_v38 = vrot.slane %v1476_v28, 4  ;;  %3690 = vmatmul.mubr.bf16.gmra.mxu0 %v10254_v31 }
 0x150   : > { %v10259_v36 = vld [vmem:[#allocation4 + $0x368] ss:$36 sps:$4 sm:$0xff]   ;;  %1941 = vst [vmem:[#allocation4 + $0x398] sm:$0xf] %v1735_v33  ;;  %2073 = vst [vmem:[#allocation4 + $0x35c] sm:$0xf] %v1735_v33  ;;  %3850 = vmatprep.mubr.bf16.mxu1 %v10256_v15 }
 0x151   : > { %1038 = vst [vmem:[#allocation2 + $0xb4] sm:$0xf] %v1037_v34  ;;  %v1474_v20 = vsel %vm11090_vm10, %v1469_v35, %v1473_v30  ;;  %v1093_v43 = vld [vmem:[#allocation2 + $0xac] sm:$0xf]  ;;  %v1094_v61 = vld [vmem:[#allocation2 + $0xb0] sm:$0x1]  ;;  %3851 = vmatmul.mubr.bf16.gmra.mxu1 %v10259_v36 }
 0x152   : > { %v1481_v44 = vrot.slane %v1479_v29, 5  ;;  %v865_v14 = vrot.slane %v863_v58, 7  ;;  %1582 = vst [vmem:[#allocation4 + $0x3d0] sm:$0xf] %v1474_v20  ;;  %1897 = vst [vmem:[#allocation4 + $0x394] sm:$0xf] %v1474_v20 }
 0x153   : > { %2029 = vst [vmem:[#allocation4 + $0x358] sm:$0xf] %v1474_v20  ;;  %1841 = vst [vmem:[#allocation4 + $0x3d8] sm:$0xf] %v1093_v43  ;;  %v1485_v46 = vshll.u32 %v1093_v43, 16  ;;  %v1489_v47 = vshrl.u32 %v1093_v43, 16 }
 0x154   : > { %1133 = vst [vmem:[#allocation4 + $0x414] sm:$0xf] %v1093_v43  ;;  %1973 = vst [vmem:[#allocation4 + $0x39c] sm:$0xf] %v1093_v43  ;;  %v1495_v48 = vshll.u32 %v1094_v61, 16  ;;  %v8465_v50 = vrot.slane %v1092_v24, 9  ;;  %v1482_v51 = vor.u32 %v1481_v44, %v1478_v38  ;;  %v868_v53 = vor.u32 %v866_v10, %v865_v14 }
 0x155   : > { %v870_v54 = vrot.slane %v865_v14, 4  ;;  %v1738_v57 = vrot.slane %v1093_v43, 5  ;;  %v329_v37 = vld [vmem:[#allocation2 + $0xc0] sm:$0x1]  ;;  %v1487_v55 = vrot.slane %v1485_v46, 5  ;;  %v1491_v56 = vrot.slane %v1489_v47, 4 }
 0x156   : > { %v1497_v60 = vrot.slane %v1495_v48, 5  ;;  %v1741_v49 = vrot.slane %v1094_v61, 5  ;;  %v1040_v0 = vld [vmem:[#allocation2 + $0xbc] sm:$0x1]  ;;  %v1483_v1 = vrot.slane %v1482_v51, 4  ;;  %v869_v3 = vsel %vm11132_vm13, %v861_v22, %v868_v53  ;;  %p13682_p10 = scmp.ne.s32.totalorder %s13520_s23, 0 }
 0x157   : > { %v1739_v2 = vsel %vm11102_vm11, %v8465_v50, %v1738_v57  ;;  %v1740_v4 = vrot.slane %v1738_v57, 4  ;;  %v1492_v6 = vor.u32 %v1491_v56, %v1487_v55  ;;  %1039 = vst [vmem:[#allocation2 + $0xb8] sm:$0xf] %v869_v3  ;;  %v1041_v62 = vsel %vm11082_vm9, %v870_v54, %v1040_v0  ;;  %v10266_v16 = vld [vmem:[#allocation4 + $0x3a8] ss:$36 sps:$4 sm:$0xff]   ;;  %s10887_s29 = smov [#allocation11]  }
 0x158   : > { %1810 = vst [vmem:[#allocation4 + $0x3f8] sm:$0xf] %v1739_v2  ;;  %1942 = vst [vmem:[#allocation4 + $0x3bc] sm:$0xf] %v1739_v2  ;;  %v330_v63 = vsel %vm11082_vm9, 0, %v329_v37  ;;  %v874_v7 = vrot.slane %v872_v17, 7  ;;  %v1488_v9 = vsel %vm11090_vm10, %v1483_v1, %v1487_v55  ;;  %p10811_p1 = pnand %p10810_p11, %p13682_p10 }
 0x159   : > { %2074 = vst [vmem:[#allocation4 + $0x380] sm:$0xf] %v1739_v2  ;;  %v11689_v42 = vld [vmem:[#allocation2 + $0xb4] sm:$0xf]  ;;  %v1742_v58 = vsel %vm11102_vm11, %v1740_v4, %v1741_v49  ;;  %1042 = vst [vmem:[#allocation2 + $0xbc] sm:$0x1] %v1041_v62 }
 0x15a   : > { %331 = vst [vmem:[#allocation2 + $0xc0] sm:$0x1] %v330_v63  ;;  %v875_v10 = vshll.u32 %v11642_v21, 16  ;;  %v880_v39 = vshrl.u32 %v11675_v45, 16  ;;  %v1493_v41 = vrot.slane %v1492_v6, 4  ;;  %v1500_v12 = vshrl.u32 %v11689_v42, 16  ;;  %p10812_p2 = pneg %p10811_p1 }
 0x15b   : > { %1583 = vst [vmem:[#allocation4 + $0x3f4] sm:$0xf] %v1488_v9  ;;  %1898 = vst [vmem:[#allocation4 + $0x3b8] sm:$0xf] %v1488_v9  ;;  %v1503_v13 = vshll.u32 %v11689_v42, 16  ;;  %v878_v35 = vrot.slane %v874_v7, 4 }
 0x15c   : > { %2030 = vst [vmem:[#allocation4 + $0x37c] sm:$0xf] %v1488_v9  ;;  %1811 = vst [vmem:[#allocation4 + $0x41c] sm:$0xf] %v1742_v58  ;;  %v10263_v21 = vld [vmem:[#allocation4 + $0x3ac] ss:$36 sps:$4 sm:$0xff]   ;;  %v1498_v24 = vsel %vm11090_vm10, %v1493_v41, %v1497_v60  ;;  %v877_v27 = vor.u32 %v875_v10, %v874_v7 }
 0x15d   : > { %1842 = vst [vmem:[#allocation4 + $0x3fc] sm:$0xf] %v11689_v42  ;;  %1134 = vst [vmem:[#allocation4 + $0x438] sm:$0xf] %v11689_v42  ;;  %v11700_v17 = vrot.slane %v880_v39, 7  ;;  %v1502_v25 = vrot.slane %v1500_v12, 4  ;;  %3697 = vmatprep.mubr.bf16.mxu0 %v10263_v21 }
 0x15e   : > { %1943 = vst [vmem:[#allocation4 + $0x3e0] sm:$0xf] %v1742_v58  ;;  %1974 = vst [vmem:[#allocation4 + $0x3c0] sm:$0xf] %v11689_v42  ;;  %v10267_v18 = vld [vmem:[#allocation4 + $0x3b4] ss:$36 sps:$4 sm:$0xff]   ;;  %3698 = vmatmul.mubr.bf16.gmra.mxu0 %v10266_v16 }
 0x15f   : > { %2075 = vst [vmem:[#allocation4 + $0x3a4] sm:$0xf] %v1742_v58  ;;  %v10269_v19 = vld [vmem:[#allocation4 + $0x3b0] ss:$36 sps:$4 sm:$0xff]   ;;  %1584 = vst [vmem:[#allocation4 + $0x418] sm:$0xf] %v1498_v24  ;;  %3858 = vmatprep.mubr.bf16.mxu1 %v10267_v18 }
 0x160   : > { %1899 = vst [vmem:[#allocation4 + $0x3dc] sm:$0xf] %v1498_v24  ;;  %2031 = vst [vmem:[#allocation4 + $0x3a0] sm:$0xf] %v1498_v24  ;;  %v1505_v26 = vrot.slane %v1503_v13, 5  ;;  %v883_v28 = vshll.u32 %v11675_v45, 16  ;;  %3859 = vmatmul.mubr.bf16.gmra.mxu1 %v10269_v19 }
 0x161   : > { %v8466_v29 = vrot.slane %v11689_v42, 9  ;;  %v1096_v22 = vld [vmem:[#allocation2 + $0xb8] sm:$0xf]  ;;  %v1097_v30 = vld [vmem:[#allocation2 + $0xbc] sm:$0x1]  ;;  %s10813_s24 = sshll.u32 %s10887_s29, 4  ;;  %s10814_s24 = int_to_ptr.vmem [resolvable:$false] %s10813_s24 }
 0x162   : > { %v1506_v11 = vor.u32 %v1505_v26, %v1502_v25  ;;  %v885_v31 = vor.u32 %v883_v28, %v11700_v17  ;;  %1843 = vst [vmem:[#allocation4 + $0x420] sm:$0xf] %v1096_v22  ;;  %1135 = vst [vmem:[#allocation4 + $0x45c] sm:$0xf] %v1096_v22  ;;  %v1509_v33 = vshll.u32 %v1096_v22, 16  ;;  %v1513_v34 = vshrl.u32 %v1096_v22, 16  ;;  %p10816_p6 = scmp.lt.s32.totalorder %s13449_s7, %s10814_s24 }
 0x163   : > { %1975 = vst [vmem:[#allocation4 + $0x3e4] sm:$0xf] %v1096_v22  ;;  %v1043_v15 = vld [vmem:[#allocation2 + $0xc0] sm:$0xf]  ;;  %v1519_v38 = vshll.u32 %v1097_v30, 16  ;;  %v1745_v14 = vrot.slane %v1096_v22, 5 }
 0x164   : > { %v1507_v36 = vrot.slane %v1506_v11, 4  ;;  %v886_v20 = vsel %vm11132_vm13, %v878_v35, %v885_v31  ;;  %v1044_v43 = vsel %vm11149_vm14, %v877_v27, %v1043_v15  ;;  %v1511_v61 = vrot.slane %v1509_v33, 5  ;;  %v10276_v48 = vld [vmem:[#allocation4 + $0x3f0] ss:$36 sps:$4 sm:$0xff]   ;;  %v10281_v56 = vld [vmem:[#allocation4 + $0x3f8] ss:$36 sps:$4 sm:$0xff]  }
 0x165   : > { %v1515_v44 = vrot.slane %v1513_v34, 4  ;;  %1045 = vst [vmem:[#allocation2 + $0xc0] sm:$0xf] %v1044_v43  ;;  %1046 = vst [vmem:[#allocation2 + $0xc4] sm:$0xf] %v886_v20  ;;  %v1748_v45 = vrot.slane %v1097_v30, 5  ;;  %v1746_v53 = vsel %vm11102_vm11, %v8466_v29, %v1745_v14 }
 0x166   : > { %v1521_v46 = vrot.slane %v1519_v38, 5  ;;  %v10273_v47 = vld [vmem:[#allocation4 + $0x3f4] ss:$36 sps:$4 sm:$0xff]   ;;  %v1512_v50 = vsel %vm11090_vm10, %v1507_v36, %v1511_v61  ;;  %v1747_v54 = vrot.slane %v1745_v14, 4  ;;  %1812 = vst [vmem:[#allocation4 + $0x440] sm:$0xf] %v1746_v53  ;;  %v9040_v36 = vpop.f32.mrf.mxu0 }
 0x167   : > { %v1516_v51 = vor.u32 %v1515_v44, %v1511_v61  ;;  %1585 = vst [vmem:[#allocation4 + $0x43c] sm:$0xf] %v1512_v50  ;;  %1900 = vst [vmem:[#allocation4 + $0x400] sm:$0xf] %v1512_v50  ;;  %3705 = vmatprep.mubr.bf16.mxu0 %v10273_v47  ;;  %v10295_v62 = vld [vmem:[#allocation4 + $0x14] ss:$36 sps:$4 sm:$0xff]  }
 0x168   : > { %2032 = vst [vmem:[#allocation4 + $0x3c4] sm:$0xf] %v1512_v50  ;;  %1944 = vst [vmem:[#allocation4 + $0x404] sm:$0xf] %v1746_v53  ;;  %v1749_v37 = vsel %vm11102_vm11, %v1747_v54, %v1748_v45  ;;  %3706 = vmatmul.mubr.bf16.gmra.mxu0 %v10276_v48  ;;  %v10300_v63 = vld [vmem:[#allocation4 + $0x1c] ss:$36 sps:$4 sm:$0xff]   ;;  %v9041_v38 = vpop.f32.mrf.mxu0 }
 0x169   : > { %2076 = vst [vmem:[#allocation4 + $0x3c8] sm:$0xf] %v1746_v53  ;;  %v1517_v57 = vrot.slane %v1516_v51, 4  ;;  %v10278_v55 = vld [vmem:[#allocation4 + $0x3fc] ss:$36 sps:$4 sm:$0xff]   ;;  %v10312_v26 = vld [vmem:[#allocation8 + $0x230] sm:$0xff]   ;;  %v11735_v43 = vadd.f32 %v9041_v38, %v9040_v36 }
 0x16a   : > { %1813 = vst [vmem:[#allocation4 + $0x464] sm:$0xf] %v1749_v37  ;;  %1945 = vst [vmem:[#allocation4 + $0x428] sm:$0xf] %v1749_v37  ;;  %3866 = vmatprep.mubr.bf16.mxu1 %v10278_v55  ;;  %v10288_v10 = vld [vmem:[#allocation4 + $0x438] ss:$36 sps:$4 sm:$0xff]   ;;  %v9043_v55 = vpop.f32.mrf.mxu0 }
 0x16b   : > { %2077 = vst [vmem:[#allocation4 + $0x3ec] sm:$0xf] %v1749_v37  ;;  %v1522_v60 = vsel %vm11090_vm10, %v1517_v57, %v1521_v46  ;;  %3867 = vmatmul.mubr.bf16.gmra.mxu1 %v10281_v56  ;;  %v10298_v18 = vld [vmem:[#allocation4 + $0x10] ss:$36 sps:$4 sm:$0xff]   ;;  %v10302_v19 = vld [vmem:[#allocation4 + $0x18] ss:$36 sps:$4 sm:$0xff]  }
 0x16c   : > { %1586 = vst [vmem:[#allocation4 + $0x460] sm:$0xf] %v1522_v60  ;;  %1901 = vst [vmem:[#allocation4 + $0x424] sm:$0xf] %v1522_v60  ;;  %v1098_v49 = vld [vmem:[#allocation2 + $0xc0] sm:$0xf] }
 0x16d   : > { %2033 = vst [vmem:[#allocation4 + $0x3e8] sm:$0xf] %v1522_v60  ;;  %v11719_v0 = vld [vmem:[#allocation2 + $0xc4] sm:$0xf]  ;;  %1844 = vst [vmem:[#allocation4 + $0x444] sm:$0xf] %v1098_v49 }
 0x16e   : > { %1845 = vst [vmem:[#allocation4 + $0x468] sm:$0xf] %v11719_v0  ;;  %1976 = vst [vmem:[#allocation4 + $0x408] sm:$0xf] %v1098_v49  ;;  %v1847_v1 = vshrl.u32 %v1098_v49, 16  ;;  %v1850_v3 = vshll.u32 %v1098_v49, 16 }
 0x16f   : > { %1977 = vst [vmem:[#allocation4 + $0x42c] sm:$0xf] %v11719_v0  ;;  %v1856_v6 = vshll.u32 %v11719_v0, 16  ;;  %v8467_v9 = vrot.slane %v1098_v49, 9  ;;  %v1909_v42 = vrot.slane %v11719_v0, 5  ;;  %v10325_v27 = vld [vmem:[#allocation8 + $0x228] sm:$0xff]  }
 0x170   : > { %v1849_v2 = vrot.slane %v1847_v1, 4  ;;  %v1852_v4 = vrot.slane %v1850_v3, 5  ;;  %v10303_v24 = vld [vmem:[#allocation4 + $0x5c] ss:$36 sps:$4 sm:$0xff]   ;;  %v10306_v25 = vld [vmem:[#allocation4 + $0x64] ss:$36 sps:$4 sm:$0xff]  }
 0x171   : > { %v11725_v12 = vrot.slane %v1856_v6, 5  ;;  %v1910_v13 = vsel %vm11102_vm11, %v8467_v9, %v1909_v42  ;;  %v10291_v21 = vld [vmem:[#allocation4 + $0x440] ss:$36 sps:$4 sm:$0xff]   ;;  %v10305_v35 = vld [vmem:[#allocation4 + $0x58] ss:$36 sps:$4 sm:$0xff]   ;;  %v10364_v15 = vld [vmem:[#allocation8 + $0x210] sm:$0xff]  }
 0x172   : > { %v1853_v7 = vor.u32 %v1852_v4, %v1849_v2  ;;  %1946 = vst [vmem:[#allocation4 + $0x44c] sm:$0xf] %v1910_v13  ;;  %2078 = vst [vmem:[#allocation4 + $0x410] sm:$0xf] %v1910_v13  ;;  %v10308_v28 = vld [vmem:[#allocation4 + $0x60] ss:$36 sps:$4 sm:$0xff]  }
 0x173   : > { %v10285_v58 = vld [vmem:[#allocation4 + $0x43c] ss:$36 sps:$4 sm:$0xff]   ;;  %v10309_v29 = vld [vmem:[#allocation4 + $0xa4] ss:$36 sps:$4 sm:$0xff]   ;;  %v10313_v22 = vld [vmem:[#allocation4 + $0xac] ss:$36 sps:$4 sm:$0xff]  }
 0x174   : > { %v1854_v41 = vrot.slane %v1853_v7, 4  ;;  %3713 = vmatprep.mubr.bf16.mxu0 %v10285_v58  ;;  %v10338_v11 = vld [vmem:[#allocation8 + $0x220] sm:$0xff]   ;;  %v10351_v31 = vld [vmem:[#allocation8 + $0x218] sm:$0xff]   ;;  %v10315_v30 = vld [vmem:[#allocation4 + $0xa8] ss:$36 sps:$4 sm:$0xff]   ;;  %v1860_v48 = vshrl.u32 %v11719_v0, 16 }
 0x175   : > { %v10289_v39 = vld [vmem:[#allocation4 + $0x444] ss:$36 sps:$4 sm:$0xff]   ;;  %3714 = vmatmul.mubr.bf16.gmra.mxu0 %v10288_v10  ;;  %v10316_v33 = vld [vmem:[#allocation4 + $0xec] ss:$36 sps:$4 sm:$0xff]   ;;  %v10319_v34 = vld [vmem:[#allocation4 + $0xf4] ss:$36 sps:$4 sm:$0xff]  }
 0x176   : > { %3874 = vmatprep.mubr.bf16.mxu1 %v10289_v39  ;;  %v1859_v16 = vsel %vm11090_vm10, %v1854_v41, %v11725_v12  ;;  %3915 = vmatprep.mubr.bf16.mxu0 %v10295_v62  ;;  %v10318_v20 = vld [vmem:[#allocation4 + $0xe8] ss:$36 sps:$4 sm:$0xff]   ;;  %v10321_v44 = vld [vmem:[#allocation4 + $0xf0] ss:$36 sps:$4 sm:$0xff]   ;;  %v10326_v45 = vld [vmem:[#allocation4 + $0x13c] ss:$36 sps:$4 sm:$0xff]  }
 0x177   : > { %3875 = vmatmul.mubr.bf16.gmra.mxu1 %v10291_v21  ;;  %2034 = vst [vmem:[#allocation4 + $0x40c] sm:$0xf] %v1859_v16  ;;  %1902 = vst [vmem:[#allocation4 + $0x448] sm:$0xf] %v1859_v16  ;;  %v10377_v61 = vld [vmem:[#allocation8 + $0x208] sm:$0xff]   ;;  %v10390_v46 = vld [vmem:[#allocation8 + $0x200] sm:$0xff]  }
 0x178   : > { %4076 = vmatprep.mubr.bf16.mxu1 %v10300_v63  ;;  %v10322_v14 = vld [vmem:[#allocation4 + $0x134] ss:$36 sps:$4 sm:$0xff]   ;;  %v11740_v53 = vld [vmem:[#allocation2 + $0xcc] sm:$0xf]  ;;  %v11742_v54 = vld [vmem:[#allocation2 + $0xd0] sm:$0xf] }
 0x179   : > { %v379_v47 = vld [vmem:[#allocation2 + $0xc8] sm:$0x1]  ;;  %v10324_v50 = vld [vmem:[#allocation4 + $0x130] ss:$36 sps:$4 sm:$0xff]   ;;  %v10329_v37 = vld [vmem:[#allocation4 + $0x17c] ss:$36 sps:$4 sm:$0xff]  }
 0x17a   : > { %v380_v51 = vsel %vm11120_vm12, 0, %v379_v47  ;;  %v10328_v57 = vld [vmem:[#allocation4 + $0x138] ss:$36 sps:$4 sm:$0xff]   ;;  %v11744_v56 = vld [vmem:[#allocation2 + $0xd4] sm:$0x1]  ;;  %v1981_v60 = vshrl.u32 %v11740_v53, 16 }
 0x17b   : > { %381 = vst [vmem:[#allocation2 + $0xc8] sm:$0x1] %v380_v51  ;;  %1978 = vst [vmem:[#allocation4 + $0x450] sm:$0xf] %v11740_v53  ;;  %v1984_v49 = vshll.u32 %v11740_v53, 16  ;;  %v1990_v1 = vshll.u32 %v11742_v54, 16 }
 0x17c   : > { %1979 = vst [vmem:[#allocation4 + $0x474] sm:$0xf] %v11742_v54  ;;  %v1994_v3 = vshrl.u32 %v11742_v54, 16  ;;  %v10332_v2 = vld [vmem:[#allocation4 + $0x184] ss:$36 sps:$4 sm:$0xff]   ;;  %v2000_v4 = vshll.u32 %v11744_v56, 16 }
 0x17d   : > { %3916 = vmatmul.mubr.bf16.vlgmr.msra.gmra.mxu0 %v10298_v18  ;;  %v11753_v6 = vld [vmem:[#allocation3 + $0xcc] sm:$0xf]  ;;  %v11755_v62 = vld [vmem:[#allocation3 + $0xd0] sm:$0xf]  ;;  %v1983_v63 = vrot.slane %v1981_v60, 4  ;;  %v1986_v7 = vrot.slane %v1984_v49, 5  ;;  %v9044_v18 = vpop.f32.mrf.mxu0 }
 0x17e   : > { %9969 = vmatpush3.bf16.msra.mxu0 %v11654_v8  ;;  %3923 = vmatprep.mubr.bf16.mxu0 %v10303_v24  ;;  %v10311_v8 = vld [vmem:[#allocation4 + $0xa0] ss:$36 sps:$4 sm:$0xff]   ;;  %v1992_v9 = vrot.slane %v1990_v1, 5  ;;  %v1996_v58 = vrot.slane %v1994_v3, 4  ;;  %v11757_v10 = vld [vmem:[#allocation3 + $0xd4] sm:$0x1] }
 0x17f   : > { %4077 = vmatmul.mubr.bf16.vlgmr.msra.gmra.mxu1 %v10302_v19  ;;  %9970 = vmatprep.subr.bf16.mxu0 %v10312_v26  ;;  %v887_v39 = vrot.slane %v11700_v17, 4  ;;  %v5851_v41 = vshrl.u32 %v11753_v6, 16  ;;  %v5854_v13 = vshll.u32 %v11753_v6, 16  ;;  %v5860_v21 = vshll.u32 %v11755_v62, 16  ;;  %v11766_v16 = vld [vmem:[%s13497_s2] ss:$0 sm:$0xff] }
 0x180   : > { %4084 = vmatprep.mubr.bf16.mxu1 %v10306_v25  ;;  %v1987_v19 = vor.u32 %v1986_v7, %v1983_v63  ;;  %v1997_v24 = vor.u32 %v1996_v58, %v1992_v9  ;;  %v2002_v25 = vrot.slane %v2000_v4, 5  ;;  %v1862_v17 = vrot.slane %v1860_v48, 4  ;;  %v10334_v38 = vld [vmem:[#allocation4 + $0x180] ss:$36 sps:$4 sm:$0xff]   ;;  %v10341_v58 = vld [vmem:[#allocation4 + $0x1c8] ss:$36 sps:$4 sm:$0xff]  }
 0x181   : > { %v1911_v4 = vrot.slane %v1909_v42, 4  ;;  %v10337_v63 = vld [vmem:[#allocation4 + $0x1c0] ss:$36 sps:$4 sm:$0xff]   ;;  %5848 = vst [vmem:[#allocation4 + $0x450] sm:$0xf] %v11753_v6  ;;  %s10815_s26 = scalar_lea.vmem %s10814_s24, 8192 }
 0x182   : > { %9971 = vmatpush3.bf16.msra.mxu0 %v10312_v26  ;;  %v5864_v26 = vshrl.u32 %v11755_v62, 16  ;;  %5849 = vst [vmem:[#allocation4 + $0x474] sm:$0xf] %v11755_v62  ;;  %v450_v59 = vld [vmem:[#allocation3 + $0x44] sm:$0x1]  ;;  %p10817_p12 = scmp.lt.s32.totalorder %s10815_s26, %s10809_s17 }
 0x183   : > { %9972 = vmatprep.subr.bf16.mxu0 %v10325_v27 }
 0x184   : > { %p10818_p7 = por %p10817_p12, %p10816_p6 }
 0x185   : > { %3924 = vmatmul.mubr.bf16.gmra.mxu0 %v10305_v35  ;;  %v5856_v35 = vrot.slane %v5854_v13, 5 }
 0x186   : > { %3931 = vmatprep.mubr.bf16.mxu0 %v10309_v29  ;;  %9973 = vmatpush3.bf16.msra.mxu0 %v10325_v27  ;;  %v5853_v27 = vrot.slane %v5851_v41, 4  ;;  %v9152_v29 = vpop.f32.mrf.mxu1  ;;  %v9046_v41 = vpop.f32.mrf.mxu0  ;;  %p10819_p9 = pnand %p10818_p7, %p10812_p2 }
 0x187   : > { %4085 = vmatmul.mubr.bf16.gmra.mxu1 %v10308_v28  ;;  %9974 = vmatprep.subr.bf16.mxu0 %v10338_v11  ;;  %v5862_v28 = vrot.slane %v5860_v21, 5 }
 0x188   : > { %4092 = vmatprep.mubr.bf16.mxu1 %v10313_v22  ;;  %v1988_v22 = vrot.slane %v1987_v19, 4  ;;  %v5857_v36 = vor.u32 %v5856_v35, %v5853_v27  ;;  %v9047_v42 = vpop.f32.mrf.mxu0 }
 0x189   : > { %v9048_v27 = vadd.f32 %v9047_v42, %v9046_v41  ;;  %v10355_v41 = vld [vmem:[#allocation4 + $0x29c] ss:$36 sps:$4 sm:$0xff]  }
 0x18a   : > { %9975 = vmatpush3.bf16.msra.mxu0 %v10338_v11  ;;  %v1998_v11 = vrot.slane %v1997_v24, 4 }
 0x18b   : > { %9976 = vmatprep.subr.bf16.mxu0 %v10351_v31 }
 0x18d   : > { %3932 = vmatmul.mubr.bf16.gmra.mxu0 %v10311_v8  ;;  %v5870_v8 = vshll.u32 %v11757_v10, 16 }
 0x18e   : > { %3939 = vmatprep.mubr.bf16.mxu0 %v10316_v33  ;;  %9977 = vmatpush3.bf16.msra.mxu0 %v10351_v31  ;;  %v5866_v31 = vrot.slane %v5864_v26, 4  ;;  %v3596_v33 = vadd.f32 %v11735_v43, %v11766_v16  ;;  %v10339_v43 = vld [vmem:[#allocation4 + $0x1cc] ss:$36 sps:$4 sm:$0xff]   ;;  %v2043_v26 = vrot.slane %v11742_v54, 5 }
 0x18f   : > { %4093 = vmatmul.mubr.bf16.gmra.mxu1 %v10315_v30  ;;  %9978 = vmatprep.subr.bf16.mxu0 %v10364_v15  ;;  %v10331_v30 = vld [vmem:[#allocation4 + $0x178] ss:$36 sps:$4 sm:$0xff]   ;;  %v5872_v51 = vrot.slane %v5870_v8, 5 }
 0x190   : > { %4100 = vmatprep.mubr.bf16.mxu1 %v10319_v34  ;;  %v9045_v34 = vadd.f32 %v9044_v18, %v9043_v55  ;;  %v5858_v55 = vrot.slane %v5857_v36, 4 }
 0x192   : > { %9979 = vmatpush3.bf16.msra.mxu0 %v10364_v15  ;;  %v1047_v15 = vld [vmem:[#allocation2 + $0xc8] sm:$0x1]  ;;  %v5863_v7 = vsel %vm11090_vm10, %v5858_v55, %v5862_v28 }
 0x193   : > { %9980 = vmatprep.subr.bf16.mxu0 %v10377_v61 }
 0x195   : > { %3940 = vmatmul.mubr.bf16.gmra.mxu0 %v10318_v20  ;;  %v9153_v20 = vpop.f32.mrf.mxu1 }
 0x196   : > { %3947 = vmatprep.mubr.bf16.mxu0 %v10322_v14  ;;  %9981 = vmatpush3.bf16.msra.mxu0 %v10377_v61  ;;  %v1048_v61 = vsel %vm11082_vm9, %v887_v39, %v1047_v15  ;;  %v2003_v14 = vsel %vm11090_vm10, %v1998_v11, %v2002_v25  ;;  %v9154_v47 = vadd.f32 %v9153_v20, %v9152_v29  ;;  %v10342_v39 = vld [vmem:[#allocation4 + $0x20c] ss:$36 sps:$4 sm:$0xff]   ;;  %v8468_v29 = vrot.slane %v11740_v53, 9 }
 0x197   : > { %4101 = vmatmul.mubr.bf16.gmra.mxu1 %v10321_v44  ;;  %9982 = vmatprep.subr.bf16.mxu0 %v10390_v46  ;;  %v1993_v44 = vsel %vm11090_vm10, %v1988_v22, %v1992_v9  ;;  %1049 = vst [vmem:[#allocation2 + $0xc8] sm:$0x1] %v1048_v61  ;;  %2037 = vst [vmem:[#allocation4 + $0x478] sm:$0xf] %v2003_v14  ;;  %v9155_v48 = vpop.f32.mrf.mxu1  ;;  %v9049_v22 = vpop.f32.mrf.mxu0  ;;  %v5913_v53 = vrot.slane %v11755_v62, 5  ;;  %v2045_v20 = vrot.slane %v2043_v26, 4 }
 0x198   : > { %4108 = vmatprep.mubr.bf16.mxu1 %v10326_v45  ;;  %v5867_v45 = vor.u32 %v5866_v31, %v5862_v28  ;;  %2036 = vst [vmem:[#allocation4 + $0x454] sm:$0xf] %v1993_v44  ;;  %v3604_v31 = vadd.f32 %v9048_v27, %v11766_v16  ;;  %v2044_v54 = vsel %vm11102_vm11, %v8468_v29, %v2043_v26  ;;  %v10344_v15 = vld [vmem:[#allocation4 + $0x208] ss:$36 sps:$4 sm:$0xff]   ;;  %v2046_v61 = vrot.slane %v11744_v56, 5 }
 0x199   : > { %v9156_v49 = vpop.f32.mrf.mxu1  ;;  %2080 = vst [vmem:[#allocation4 + $0x458] sm:$0xf] %v2044_v54  ;;  %v10347_v44 = vld [vmem:[#allocation4 + $0x210] ss:$36 sps:$4 sm:$0xff]  }
 0x19a   : > { %9983 = vmatpush3.bf16.msra.mxu0 %v10390_v46  ;;  %v10335_v46 = vld [vmem:[#allocation4 + $0x1c4] ss:$36 sps:$4 sm:$0xff]   ;;  %v5868_v60 = vrot.slane %v5867_v45, 4  ;;  %v9157_v1 = vadd.f32 %v9156_v49, %v9155_v48  ;;  %v10348_v14 = vld [vmem:[#allocation4 + $0x254] ss:$36 sps:$4 sm:$0xff]   ;;  %v2047_v62 = vsel %vm11102_vm11, %v2045_v20, %v2046_v61 }
 0x19b   : > { %v9158_v3 = vpop.f32.mrf.mxu1  ;;  %2081 = vst [vmem:[#allocation4 + $0x47c] sm:$0xf] %v2047_v62 }
 0x19c   : > { %v5873_v9 = vsel %vm11090_vm10, %v5868_v60, %v5872_v51  ;;  %v8735_v60 = vrot.slane %v11753_v6, 9 }
 0x19d   : > { %3948 = vmatmul.mubr.bf16.gmra.mxu0 %v10324_v50  ;;  %v1863_v50 = vor.u32 %v1862_v17, %v11725_v12  ;;  %v9159_v13 = vpop.f32.mrf.mxu1  ;;  %v10345_v17 = vld [vmem:[#allocation4 + $0x214] ss:$36 sps:$4 sm:$0xff]  }
 0x19e   : > { %3955 = vmatprep.mubr.bf16.mxu0 %v10329_v37  ;;  %v3599_v37 = vadd.f32 %v9045_v34, %v11766_v16  ;;  %v1100_v21 = vld [vmem:[#allocation2 + $0xc8] sm:$0x1]  ;;  %v9160_v18 = vadd.f32 %v9159_v13, %v9158_v3  ;;  %v5914_v6 = vsel %vm11102_vm11, %v8735_v60, %v5913_v53 }
 0x19f   : > { %4109 = vmatmul.mubr.bf16.gmra.mxu1 %v10328_v57  ;;  %v11779_v57 = vadd.f32 %v9154_v47, %v3596_v33  ;;  %v1866_v19 = vshll.u32 %v1100_v21, 16  ;;  %v1912_v24 = vrot.slane %v1100_v21, 5  ;;  %v11790_v0 = vld [vmem:[#allocation4 + $0x454] ss:$36 sps:$4 sm:$0xff]   ;;  %v9161_v25 = vpop.f32.mrf.mxu1  ;;  %v9050_v33 = vpop.f32.mrf.mxu0  ;;  %v10352_v47 = vld [vmem:[#allocation4 + $0x25c] ss:$36 sps:$4 sm:$0xff]  }
 0x1a0   : > { %4116 = vmatprep.mubr.bf16.mxu1 %v10332_v2  ;;  %v1864_v2 = vrot.slane %v1863_v50, 4  ;;  %v11784_v12 = vadd.f32 %v9157_v1, %v3599_v37  ;;  %5906 = vst [vmem:[#allocation4 + $0x454] sm:$0xf] %v5863_v7  ;;  %5907 = vst [vmem:[#allocation4 + $0x478] sm:$0xf] %v5873_v9  ;;  %v11804_v36 = vadd.f32 %v9160_v18, %v3604_v31 }
 0x1a1   : > { %v1868_v35 = vrot.slane %v1866_v19, 5  ;;  %v1913_v28 = vsel %vm11102_vm11, %v1911_v4, %v1912_v24  ;;  %v9162_v11 = vpop.f32.mrf.mxu1  ;;  %v9052_v45 = vpop.f32.mrf.mxu0  ;;  %v10350_v7 = vld [vmem:[#allocation4 + $0x250] ss:$36 sps:$4 sm:$0xff]   ;;  %v10358_v18 = vld [vmem:[#allocation4 + $0x2a4] ss:$36 sps:$4 sm:$0xff]  }
 0x1a2   : > { %1947 = vst [vmem:[#allocation4 + $0x470] sm:$0xf] %v1913_v28  ;;  %2079 = vst [vmem:[#allocation4 + $0x434] sm:$0xf] %v1913_v28  ;;  %v9163_v8 = vadd.f32 %v9162_v11, %v9161_v25  ;;  %v11822_v24 = vld [vmem:[#allocation4 + $0x458] ss:$36 sps:$4 sm:$0xff]  }
 0x1a3   : > { %v9164_v34 = vpop.f32.mrf.mxu1  ;;  %v9053_v50 = vpop.f32.mrf.mxu0  ;;  %5950 = vst [vmem:[#allocation4 + $0x458] sm:$0xf] %v5914_v6 }
 0x1a4   : > { %v9054_v55 = vadd.f32 %v9053_v50, %v9052_v45  ;;  %v10371_v50 = vld [vmem:[#allocation4 + $0x334] ss:$36 sps:$4 sm:$0xff]  }
 0x1a5   : > { %3956 = vmatmul.mubr.bf16.gmra.mxu0 %v10331_v30  ;;  %v1869_v30 = vsel %vm11090_vm10, %v1864_v2, %v1868_v35  ;;  %v9055_v56 = vpop.f32.mrf.mxu0  ;;  %v5915_v2 = vrot.slane %v5913_v53, 4 }
 0x1a6   : > { %3963 = vmatprep.mubr.bf16.mxu0 %v10335_v46  ;;  %2035 = vst [vmem:[#allocation4 + $0x430] sm:$0xf] %v1869_v30  ;;  %1903 = vst [vmem:[#allocation4 + $0x46c] sm:$0xf] %v1869_v30  ;;  %v9165_v46 = vpop.f32.mrf.mxu1  ;;  %v3612_v1 = vadd.f32 %v9054_v55, %v11766_v16  ;;  %v10361_v30 = vld [vmem:[#allocation4 + $0x2e4] ss:$36 sps:$4 sm:$0xff]  }
 0x1a7   : > { %4117 = vmatmul.mubr.bf16.gmra.mxu1 %v10334_v38  ;;  %v9051_v38 = vadd.f32 %v9050_v33, %v9049_v22  ;;  %v9166_v48 = vadd.f32 %v9165_v46, %v9164_v34  ;;  %v9056_v4 = vpop.f32.mrf.mxu0  ;;  %v10357_v22 = vld [vmem:[#allocation4 + $0x298] ss:$36 sps:$4 sm:$0xff]   ;;  %v10365_v33 = vld [vmem:[#allocation4 + $0x2ec] ss:$36 sps:$4 sm:$0xff]  }
 0x1a8   : > { %4124 = vmatprep.mubr.bf16.mxu1 %v10339_v43  ;;  %v9167_v51 = vpop.f32.mrf.mxu1 }
 0x1a9   : > { %v3607_v43 = vadd.f32 %v9051_v38, %v11766_v16  ;;  %v11815_v9 = vadd.f32 %v9166_v48, %v3612_v1  ;;  %v9058_v13 = vpop.f32.mrf.mxu0 }
 0x1aa   : > { %v9168_v49 = vpop.f32.mrf.mxu1 }
 0x1ab   : > { %v11810_v37 = vadd.f32 %v9163_v8, %v3607_v43  ;;  %v9169_v3 = vadd.f32 %v9168_v49, %v9167_v51  ;;  %v10360_v8 = vld [vmem:[#allocation4 + $0x2a0] ss:$36 sps:$4 sm:$0xff]   ;;  %v10368_v43 = vld [vmem:[#allocation4 + $0x32c] ss:$36 sps:$4 sm:$0xff]  }
 0x1ac   : > { %v9170_v26 = vpop.f32.mrf.mxu1 }
 0x1ad   : > { %3964 = vmatmul.mubr.bf16.gmra.mxu0 %v10337_v63  ;;  %v5916_v63 = vrot.slane %v11757_v10, 5  ;;  %v9059_v10 = vpop.f32.mrf.mxu0 }
 0x1ae   : > { %3971 = vmatprep.mubr.bf16.mxu0 %v10342_v39  ;;  %v10354_v39 = vld [vmem:[#allocation4 + $0x258] ss:$36 sps:$4 sm:$0xff]   ;;  %v9060_v25 = vadd.f32 %v9059_v10, %v9058_v13  ;;  %v9171_v35 = vpop.f32.mrf.mxu1 }
 0x1af   : > { %4125 = vmatmul.mubr.bf16.gmra.mxu1 %v10341_v58  ;;  %v9057_v58 = vadd.f32 %v9056_v4, %v9055_v56  ;;  %v5917_v21 = vsel %vm11102_vm11, %v5915_v2, %v5916_v63  ;;  %v9172_v28 = vadd.f32 %v9171_v35, %v9170_v26 }
 0x1b0   : > { %4132 = vmatprep.mubr.bf16.mxu1 %v10345_v17  ;;  %5951 = vst [vmem:[#allocation4 + $0x47c] sm:$0xf] %v5917_v21  ;;  %v9061_v17 = vpop.f32.mrf.mxu0  ;;  %v3620_v27 = vadd.f32 %v9060_v25, %v11766_v16  ;;  %v9173_v31 = vpop.f32.mrf.mxu1 }
 0x1b1   : > { %v3615_v19 = vadd.f32 %v9057_v58, %v11766_v16  ;;  %v10370_v58 = vld [vmem:[#allocation4 + $0x328] ss:$36 sps:$4 sm:$0xff]  }
 0x1b2   : > { %v9062_v29 = vpop.f32.mrf.mxu0  ;;  %v11827_v54 = vadd.f32 %v9172_v28, %v3620_v27  ;;  %v9174_v53 = vpop.f32.mrf.mxu1 }
 0x1b3   : > { %v11824_v42 = vadd.f32 %v9169_v3, %v3615_v19  ;;  %v9063_v11 = vadd.f32 %v9062_v29, %v9061_v17  ;;  %v10378_v19 = vld [vmem:[#allocation4 + $0x37c] ss:$36 sps:$4 sm:$0xff]  }
 0x1b4   : > { %v9176_v20 = vpop.f32.mrf.mxu1  ;;  %v9064_v61 = vpop.f32.mrf.mxu0 }
 0x1b5   : > { %3972 = vmatmul.mubr.bf16.gmra.mxu0 %v10344_v15  ;;  %v3623_v34 = vadd.f32 %v9063_v11, %v11766_v16  ;;  %v9175_v15 = vadd.f32 %v9174_v53, %v9173_v31  ;;  %v10376_v11 = vld [vmem:[#allocation4 + $0x370] ss:$36 sps:$4 sm:$0xff]   ;;  %v10384_v53 = vld [vmem:[#allocation4 + $0x3c4] ss:$36 sps:$4 sm:$0xff]  }
 0x1b6   : > { %3979 = vmatprep.mubr.bf16.mxu0 %v10348_v14  ;;  %v10363_v14 = vld [vmem:[#allocation4 + $0x2e0] ss:$36 sps:$4 sm:$0xff]   ;;  %v9065_v45 = vpop.f32.mrf.mxu0 }
 0x1b7   : > { %4133 = vmatmul.mubr.bf16.gmra.mxu1 %v10347_v44  ;;  %v11830_v38 = vadd.f32 %v9175_v15, %v3623_v34  ;;  %v9177_v44 = vpop.f32.mrf.mxu1  ;;  %v9066_v48 = vadd.f32 %v9065_v45, %v9064_v61 }
 0x1b8   : > { %4140 = vmatprep.mubr.bf16.mxu1 %v10352_v47  ;;  %v9178_v46 = vadd.f32 %v9177_v44, %v9176_v20  ;;  %v10367_v47 = vld [vmem:[#allocation4 + $0x2e8] ss:$36 sps:$4 sm:$0xff]   ;;  %v9067_v51 = vpop.f32.mrf.mxu0 }
 0x1b9   : > { %v9179_v62 = vpop.f32.mrf.mxu1  ;;  %v3628_v55 = vadd.f32 %v9066_v48, %v11766_v16 }
 0x1ba   : > { %v9068_v56 = vpop.f32.mrf.mxu0 }
 0x1bb   : > { %v9180_v60 = vpop.f32.mrf.mxu1  ;;  %v11833_v49 = vadd.f32 %v9178_v46, %v3628_v55  ;;  %v9069_v1 = vadd.f32 %v9068_v56, %v9067_v51  ;;  %v10383_v51 = vld [vmem:[#allocation4 + $0x3b8] ss:$36 sps:$4 sm:$0xff]   ;;  %v10387_v56 = vld [vmem:[#allocation4 + $0x404] ss:$36 sps:$4 sm:$0xff]  }
 0x1bc   : > { %v9181_v3 = vadd.f32 %v9180_v60, %v9179_v62  ;;  %v9070_v63 = vpop.f32.mrf.mxu0  ;;  %v10386_v60 = vld [vmem:[#allocation4 + $0x3c0] ss:$36 sps:$4 sm:$0xff]  }
 0x1bd   : > { %3980 = vmatmul.mubr.bf16.gmra.mxu0 %v10350_v7  ;;  %v9182_v2 = vpop.f32.mrf.mxu1  ;;  %v3631_v4 = vadd.f32 %v9069_v1, %v11766_v16 }
 0x1be   : > { %3987 = vmatprep.mubr.bf16.mxu0 %v10355_v41  ;;  %v10374_v41 = vld [vmem:[#allocation4 + $0x374] ss:$36 sps:$4 sm:$0xff]   ;;  %v9071_v21 = vpop.f32.mrf.mxu0 }
 0x1bf   : > { %4141 = vmatmul.mubr.bf16.gmra.mxu1 %v10354_v39  ;;  %v9183_v7 = vpop.f32.mrf.mxu1  ;;  %v10373_v39 = vld [vmem:[#allocation4 + $0x330] ss:$36 sps:$4 sm:$0xff]   ;;  %v11836_v13 = vadd.f32 %v9181_v3, %v3631_v4  ;;  %v9072_v10 = vadd.f32 %v9071_v21, %v9070_v63 }
 0x1c0   : > { %4148 = vmatprep.mubr.bf16.mxu1 %v10358_v18  ;;  %v9184_v6 = vadd.f32 %v9183_v7, %v9182_v2  ;;  %v9073_v25 = vpop.f32.mrf.mxu0  ;;  %v10391_v3 = vld [vmem:[#allocation4 + $0x40c] ss:$36 sps:$4 sm:$0xff]  }
 0x1c1   : > { %v9185_v18 = vpop.f32.mrf.mxu1  ;;  %v3636_v17 = vadd.f32 %v9072_v10, %v11766_v16 }
 0x1c2   : > { %v9074_v27 = vpop.f32.mrf.mxu0 }
 0x1c3   : > { %v9186_v26 = vpop.f32.mrf.mxu1  ;;  %v11839_v35 = vadd.f32 %v9184_v6, %v3636_v17  ;;  %v9075_v28 = vadd.f32 %v9074_v27, %v9073_v25  ;;  %v10389_v17 = vld [vmem:[#allocation4 + $0x400] ss:$36 sps:$4 sm:$0xff]  }
 0x1c4   : > { %v9187_v29 = vadd.f32 %v9186_v26, %v9185_v18  ;;  %v10415_v18 = vld [vmem:[#allocation10 + $0x78] sm:$0xff]  }
 0x1c5   : > { %3988 = vmatmul.mubr.bf16.gmra.mxu0 %v10357_v22  ;;  %v9076_v22 = vpop.f32.mrf.mxu0  ;;  %v3639_v31 = vadd.f32 %v9075_v28, %v11766_v16  ;;  %9496 = vmatprep.subr.bf16.mxu1 %v10415_v18 }
 0x1c6   : > { %3995 = vmatprep.mubr.bf16.mxu0 %v10361_v30  ;;  %v10380_v30 = vld [vmem:[#allocation4 + $0x378] ss:$36 sps:$4 sm:$0xff]  }
 0x1c7   : > { %4149 = vmatmul.mubr.bf16.gmra.mxu1 %v10360_v8  ;;  %v9188_v8 = vpop.f32.mrf.mxu1  ;;  %v9077_v34 = vpop.f32.mrf.mxu0  ;;  %v11842_v15 = vadd.f32 %v9187_v29, %v3639_v31  ;;  %v10393_v29 = vld [vmem:[#allocation4 + $0x408] ss:$36 sps:$4 sm:$0xff]  }
 0x1c8   : > { %4156 = vmatprep.mubr.bf16.mxu1 %v10365_v33  ;;  %v10381_v33 = vld [vmem:[#allocation4 + $0x3bc] ss:$36 sps:$4 sm:$0xff]   ;;  %v9078_v20 = vadd.f32 %v9077_v34, %v9076_v22  ;;  %v10394_v22 = vld [vmem:[#allocation4 + $0x44c] ss:$36 sps:$4 sm:$0xff]  }
 0x1c9   : > { %v9189_v61 = vpop.f32.mrf.mxu1  ;;  %v9079_v44 = vpop.f32.mrf.mxu0  ;;  %v2235_v34 = vld [vmem:[#allocation4 + $0x450] sm:$0xff] }
 0x1ca   : > { %v3644_v45 = vadd.f32 %v9078_v20, %v11766_v16 }
 0x1cb   : > { %v9191_v46 = vpop.f32.mrf.mxu1 }
 0x1cd   : > { %3996 = vmatmul.mubr.bf16.gmra.mxu0 %v10363_v14  ;;  %v9190_v14 = vadd.f32 %v9189_v61, %v9188_v8  ;;  %v9192_v62 = vpop.f32.mrf.mxu1 }
 0x1ce   : > { %4003 = vmatprep.mubr.bf16.mxu0 %v10368_v43 }
 0x1cf   : > { %4157 = vmatmul.mubr.bf16.gmra.mxu1 %v10367_v47  ;;  %v9080_v47 = vpop.f32.mrf.mxu0  ;;  %v11845_v43 = vadd.f32 %v9190_v14, %v3644_v45  ;;  %v9194_v7 = vpop.f32.mrf.mxu1  ;;  %v10396_v14 = vld [vmem:[#allocation4 + $0x448] ss:$36 sps:$4 sm:$0xff]  }
 0x1d0   : > { %4164 = vmatprep.mubr.bf16.mxu1 %v10371_v50  ;;  %v9081_v48 = vadd.f32 %v9080_v47, %v9079_v44  ;;  %v9193_v50 = vadd.f32 %v9192_v62, %v9191_v46  ;;  %v10399_v47 = vld [vmem:[#allocation4 + $0x20] ss:$36 sps:$4 sm:$0xff]  }
 0x1d1   : > { %v9082_v1 = vpop.f32.mrf.mxu0 }
 0x1d2   : > { %v3647_v55 = vadd.f32 %v9081_v48, %v11766_v16 }
 0x1d3   : > { %v9083_v4 = vpop.f32.mrf.mxu0 }
 0x1d4   : > { %v11848_v2 = vadd.f32 %v9193_v50, %v3647_v55  ;;  %v9084_v63 = vadd.f32 %v9083_v4, %v9082_v1  ;;  %v10418_v1 = vld [vmem:[#allocation10 + $0x30] sm:$0xff]   ;;  %v10400_v4 = vld [vmem:[#allocation4 + $0x68] ss:$36 sps:$4 sm:$0xff]  }
 0x1d5   : > { %4004 = vmatmul.mubr.bf16.gmra.mxu0 %v10370_v58  ;;  %v9085_v58 = vpop.f32.mrf.mxu0 }
 0x1d6   : > { %4011 = vmatprep.mubr.bf16.mxu0 %v10374_v41  ;;  %v3652_v6 = vadd.f32 %v9084_v63, %v11766_v16 }
 0x1d7   : > { %4165 = vmatmul.mubr.bf16.gmra.mxu1 %v10373_v39  ;;  %v9195_v39 = vpop.f32.mrf.mxu1  ;;  %v9086_v21 = vpop.f32.mrf.mxu0 }
 0x1d8   : > { %4172 = vmatprep.mubr.bf16.mxu1 %v10378_v19  ;;  %v9196_v41 = vadd.f32 %v9195_v39, %v9194_v7  ;;  %v10416_v19 = vld [vmem:[#allocation10 + $0x38] sm:$0xff]   ;;  %v9087_v10 = vadd.f32 %v9086_v21, %v9085_v58  ;;  %v10401_v58 = vld [vmem:[#allocation4 + $0xb0] ss:$36 sps:$4 sm:$0xff]  }
 0x1d9   : > { %v9197_v25 = vpop.f32.mrf.mxu1  ;;  %9497 = vmatpush3.bf16.msra.mxu1 %v10416_v19 }
 0x1da   : > { %v11851_v26 = vadd.f32 %v9196_v41, %v3652_v6  ;;  %v3655_v27 = vadd.f32 %v9087_v10, %v11766_v16 }
 0x1db   : > { %v9198_v28 = vpop.f32.mrf.mxu1 }
 0x1dd   : > { %4012 = vmatmul.mubr.bf16.gmra.mxu0 %v10376_v11  ;;  %v9199_v11 = vadd.f32 %v9198_v28, %v9197_v25  ;;  %v9200_v8 = vpop.f32.mrf.mxu1  ;;  %v10402_v28 = vld [vmem:[#allocation4 + $0xf8] ss:$36 sps:$4 sm:$0xff]  }
 0x1de   : > { %4019 = vmatprep.mubr.bf16.mxu0 %v10381_v33 }
 0x1df   : > { %4173 = vmatmul.mubr.bf16.gmra.mxu1 %v10380_v30  ;;  %v11854_v31 = vadd.f32 %v9199_v11, %v3655_v27  ;;  %v9088_v30 = vpop.f32.mrf.mxu0  ;;  %v9201_v33 = vpop.f32.mrf.mxu1 }
 0x1e0   : > { %4180 = vmatprep.mubr.bf16.mxu1 %v10384_v53  ;;  %v2240_v53 = vld [vmem:[#allocation4 + $0x474] sm:$0xff]  ;;  %v9202_v20 = vadd.f32 %v9201_v33, %v9200_v8 }
 0x1e1   : > { %v9089_v61 = vpop.f32.mrf.mxu0  ;;  %v9203_v44 = vpop.f32.mrf.mxu1  ;;  %v8611_v46 = vcombine.low %v2235_v34, %v2240_v53 }
 0x1e2   : > { %v9090_v45 = vadd.f32 %v9089_v61, %v9088_v30  ;;  %v10403_v30 = vld [vmem:[#allocation4 + $0x140] ss:$36 sps:$4 sm:$0xff]  }
 0x1e3   : > { %v9091_v48 = vpop.f32.mrf.mxu0  ;;  %v9204_v62 = vpop.f32.mrf.mxu1 }
 0x1e4   : > { %v3660_v50 = vadd.f32 %v9090_v45, %v11766_v16 }
 0x1e5   : > { %4020 = vmatmul.mubr.bf16.gmra.mxu0 %v10383_v51  ;;  %v9092_v51 = vpop.f32.mrf.mxu0  ;;  %v9206_v7 = vpop.f32.mrf.mxu1 }
 0x1e6   : > { %4027 = vmatprep.mubr.bf16.mxu0 %v10387_v56  ;;  %v11858_v55 = vadd.f32 %v9202_v20, %v3660_v50  ;;  %v9205_v56 = vadd.f32 %v9204_v62, %v9203_v44  ;;  %v11872_v62 = vld [vmem:[%s13497_s2] ss:$0 sm:$0xff] }
 0x1e7   : > { %4181 = vmatmul.mubr.bf16.gmra.mxu1 %v10386_v60  ;;  %v9093_v60 = vadd.f32 %v9092_v51, %v9091_v48  ;;  %v9094_v6 = vpop.f32.mrf.mxu0  ;;  %v9207_v39 = vpop.f32.mrf.mxu1  ;;  %v10420_v48 = vld [vmem:[#allocation10 + $0x28] sm:$0xff]  }
 0x1e8   : > { %4188 = vmatprep.mubr.bf16.mxu1 %v10391_v3  ;;  %v9208_v21 = vadd.f32 %v9207_v39, %v9206_v7 }
 0x1e9   : > { %v3663_v3 = vadd.f32 %v9093_v60, %v11766_v16  ;;  %v9095_v41 = vpop.f32.mrf.mxu0  ;;  %v9209_v19 = vpop.f32.mrf.mxu1  ;;  %v10404_v60 = vld [vmem:[#allocation4 + $0x188] ss:$36 sps:$4 sm:$0xff]  }
 0x1ea   : > { %v9096_v18 = vadd.f32 %v9095_v41, %v9094_v6 }
 0x1eb   : > { %v11861_v63 = vadd.f32 %v9205_v56, %v3663_v3  ;;  %v9097_v10 = vpop.f32.mrf.mxu0  ;;  %v10405_v3 = vld [vmem:[#allocation4 + $0x1d0] ss:$36 sps:$4 sm:$0xff]  }
 0x1ec   : > { %v3668_v25 = vadd.f32 %v9096_v18, %v11766_v16 }
 0x1ed   : > { %4028 = vmatmul.mubr.bf16.gmra.mxu0 %v10389_v17  ;;  %v9210_v17 = vpop.f32.mrf.mxu1  ;;  %v9098_v27 = vpop.f32.mrf.mxu0 }
 0x1ee   : > { %4035 = vmatprep.mubr.bf16.mxu0 %v10394_v22  ;;  %v9099_v22 = vadd.f32 %v9098_v27, %v9097_v10  ;;  %v9211_v11 = vadd.f32 %v9210_v17, %v9209_v19  ;;  %v10406_v17 = vld [vmem:[#allocation4 + $0x218] ss:$36 sps:$4 sm:$0xff]  }
 0x1ef   : > { %4189 = vmatmul.mubr.bf16.gmra.mxu1 %v10393_v29  ;;  %v11864_v29 = vadd.f32 %v9208_v21, %v3668_v25  ;;  %v9212_v8 = vpop.f32.mrf.mxu1  ;;  %v9100_v33 = vpop.f32.mrf.mxu0 }
 0x1f0   : > { %4196 = vmatprep.mubr.bf16.mxu1 %v11790_v0  ;;  %v10417_v0 = vld [vmem:[#allocation10 + $0x70] sm:$0xff]   ;;  %v3671_v34 = vadd.f32 %v9099_v22, %v11766_v16 }
 0x1f1   : > { %9498 = vmatprep.subr.bf16.mxu1 %v10417_v0  ;;  %v9213_v53 = vpop.f32.mrf.mxu1  ;;  %v9101_v20 = vpop.f32.mrf.mxu0 }
 0x1f2   : > { %9499 = vmatpush3.bf16.msra.mxu1 %v10418_v1  ;;  %v9214_v61 = vadd.f32 %v9213_v53, %v9212_v8  ;;  %v11867_v44 = vadd.f32 %v9211_v11, %v3671_v34  ;;  %v10407_v11 = vld [vmem:[#allocation4 + $0x260] ss:$36 sps:$4 sm:$0xff]  }
 0x1f3   : > { %v9215_v45 = vpop.f32.mrf.mxu1 }
 0x1f5   : > { %4036 = vmatmul.mubr.bf16.gmra.mxu0 %v10396_v14  ;;  %v9102_v14 = vadd.f32 %v9101_v20, %v9100_v33  ;;  %v9216_v16 = vpop.f32.mrf.mxu1  ;;  %v10421_v20 = vld [vmem:[#allocation10 + $0x60] sm:$0xff]  }
 0x1f6   : > { %9984 = vmatprep.mubr.bf16.mxu0 %v10399_v47  ;;  %v10419_v47 = vld [vmem:[#allocation10 + $0x68] sm:$0xff]   ;;  %v9217_v1 = vadd.f32 %v9216_v16, %v9215_v45 }
 0x1f7   : > { %4197 = vmatmul.mubr.bf16.gmra.mxu1 %v8611_v46  ;;  %v9103_v46 = vpop.f32.mrf.mxu0  ;;  %v3676_v50 = vadd.f32 %v11872_v62, %v9102_v14  ;;  %9500 = vmatprep.subr.bf16.mxu1 %v10419_v47 }
 0x1f8   : > { %9501 = vmatpush3.bf16.msra.mxu1 %v10420_v48 }
 0x1f9   : > { %v9104_v51 = vpop.f32.mrf.mxu0  ;;  %v11875_v56 = vadd.f32 %v9214_v61, %v3676_v50  ;;  %v10422_v61 = vld [vmem:[#allocation10 + $0x20] sm:$0xff]   ;;  %9502 = vmatprep.subr.bf16.mxu1 %v10421_v20  ;;  %v10424_v20 = vld [vmem:[#allocation10 + $0x18] sm:$0xff]  }
 0x1fa   : > { %v9105_v0 = vadd.f32 %v9104_v51, %v9103_v46  ;;  %v10408_v46 = vld [vmem:[#allocation4 + $0x2a8] ss:$36 sps:$4 sm:$0xff]   ;;  %v10409_v51 = vld [vmem:[#allocation4 + $0x2f0] ss:$36 sps:$4 sm:$0xff]  }
 0x1fc   : > { %v3679_v7 = vadd.f32 %v11872_v62, %v9105_v0  ;;  %9503 = vmatpush3.bf16.msra.mxu1 %v10422_v61 }
 0x1fd   : > { %9985 = vmatmul.mubr.bf16.vlgmr.msra.gmra.mxu0 %v10400_v4  ;;  %v9106_v4 = vpop.f32.mrf.mxu0 }
 0x1fe   : > { %9988 = vmatprep.mubr.bf16.mxu0 %v10401_v58  ;;  %v11878_v6 = vadd.f32 %v9217_v1, %v3679_v7 }
 0x1ff   : > { %v9107_v58 = vpop.f32.mrf.mxu0 }
 0x200   : > { %v9108_v39 = vadd.f32 %v9107_v58, %v9106_v4 }
 0x201   : > { %v9218_v41 = vpop.f32.mrf.mxu1  ;;  %v9109_v21 = vpop.f32.mrf.mxu0 }
 0x202   : > { %v3684_v18 = vadd.f32 %v11872_v62, %v9108_v39 }
 0x203   : > { %v9219_v19 = vpop.f32.mrf.mxu1  ;;  %v9110_v25 = vpop.f32.mrf.mxu0 }
 0x204   : > { %v9220_v10 = vadd.f32 %v9219_v19, %v9218_v41  ;;  %v9111_v27 = vadd.f32 %v9110_v25, %v9109_v21  ;;  %v10411_v25 = vld [vmem:[#allocation4 + $0x380] ss:$36 sps:$4 sm:$0xff]  }
 0x205   : > { %9989 = vmatmul.mubr.bf16.gmra.mxu0 %v10402_v28  ;;  %v9221_v28 = vpop.f32.mrf.mxu1 }
 0x206   : > { %9992 = vmatprep.mubr.bf16.mxu0 %v10403_v30  ;;  %v11881_v22 = vadd.f32 %v9220_v10, %v3684_v18  ;;  %v3687_v8 = vadd.f32 %v11872_v62, %v9111_v27  ;;  %v10410_v18 = vld [vmem:[#allocation4 + $0x338] ss:$36 sps:$4 sm:$0xff]  }
 0x207   : > { %v9222_v30 = vpop.f32.mrf.mxu1 }
 0x208   : > { %v9223_v33 = vadd.f32 %v9222_v30, %v9221_v28 }
 0x20a   : > { %v11884_v53 = vadd.f32 %v9223_v33, %v3687_v8 }
 0x20d   : > { %9993 = vmatmul.mubr.bf16.gmra.mxu0 %v10404_v60 }
 0x20e   : > { %9996 = vmatprep.mubr.bf16.mxu0 %v10405_v3 }
 0x20f   : > { %v9112_v34 = vpop.f32.mrf.mxu0 }
 0x211   : > { %v9224_v14 = vpop.f32.mrf.mxu1  ;;  %v9113_v45 = vpop.f32.mrf.mxu0 }
 0x212   : > { %v9114_v47 = vadd.f32 %v9113_v45, %v9112_v34  ;;  %v10423_v34 = vld [vmem:[#allocation10 + $0x58] sm:$0xff]  }
 0x213   : > { %v9225_v48 = vpop.f32.mrf.mxu1  ;;  %v9115_v50 = vpop.f32.mrf.mxu0  ;;  %9504 = vmatprep.subr.bf16.mxu1 %v10423_v34 }
 0x214   : > { %v9226_v16 = vadd.f32 %v9225_v48, %v9224_v14  ;;  %v3692_v60 = vadd.f32 %v11872_v62, %v9114_v47  ;;  %9505 = vmatpush3.bf16.msra.mxu1 %v10424_v20 }
 0x215   : > { %9997 = vmatmul.mubr.bf16.gmra.mxu0 %v10406_v17  ;;  %v9227_v0 = vpop.f32.mrf.mxu1  ;;  %v9116_v1 = vpop.f32.mrf.mxu0 }
 0x216   : > { %10000 = vmatprep.mubr.bf16.mxu0 %v10407_v11  ;;  %v11887_v3 = vadd.f32 %v9226_v16, %v3692_v60  ;;  %v9117_v4 = vadd.f32 %v9116_v1, %v9115_v50  ;;  %v10412_v50 = vld [vmem:[#allocation4 + $0x3c8] ss:$36 sps:$4 sm:$0xff]   ;;  %v10413_v16 = vld [vmem:[#allocation4 + $0x410] ss:$36 sps:$4 sm:$0xff]  }
 0x217   : > { %v9228_v7 = vpop.f32.mrf.mxu1 }
 0x218   : > { %v9229_v58 = vadd.f32 %v9228_v7, %v9227_v0  ;;  %v3695_v39 = vadd.f32 %v11872_v62, %v9117_v4 }
 0x21a   : > { %v11890_v21 = vadd.f32 %v9229_v58, %v3695_v39 }
 0x21d   : > { %10001 = vmatmul.mubr.bf16.gmra.mxu0 %v10408_v46 }
 0x21e   : > { %10004 = vmatprep.mubr.bf16.mxu0 %v10409_v51  ;;  %v9118_v41 = vpop.f32.mrf.mxu0 }
 0x220   : > { %v9230_v19 = vpop.f32.mrf.mxu1  ;;  %v9119_v10 = vpop.f32.mrf.mxu0 }
 0x221   : > { %v9120_v17 = vadd.f32 %v9119_v10, %v9118_v41 }
 0x222   : > { %v9231_v27 = vpop.f32.mrf.mxu1  ;;  %v9121_v28 = vpop.f32.mrf.mxu0 }
 0x223   : > { %v9232_v11 = vadd.f32 %v9231_v27, %v9230_v19  ;;  %v3700_v8 = vadd.f32 %v11872_v62, %v9120_v17 }
 0x224   : > { %v9233_v30 = vpop.f32.mrf.mxu1  ;;  %v9122_v33 = vpop.f32.mrf.mxu0 }
 0x225   : > { %10005 = vmatmul.mubr.bf16.gmra.mxu0 %v10410_v18  ;;  %v11893_v61 = vadd.f32 %v9232_v11, %v3700_v8  ;;  %v9123_v14 = vadd.f32 %v9122_v33, %v9121_v28  ;;  %v10426_v33 = vld [vmem:[#allocation10 + $0x10] sm:$0xff]  }
 0x226   : > { %10008 = vmatprep.mubr.bf16.mxu0 %v10411_v25  ;;  %v9234_v45 = vpop.f32.mrf.mxu1 }
 0x227   : > { %v9235_v46 = vadd.f32 %v9234_v45, %v9233_v30  ;;  %v3703_v47 = vadd.f32 %v11872_v62, %v9123_v14  ;;  %v10425_v30 = vld [vmem:[#allocation10 + $0x50] sm:$0xff]  }
 0x228   : > { %v9124_v48 = vpop.f32.mrf.mxu0  ;;  %9506 = vmatprep.subr.bf16.mxu1 %v10425_v30 }
 0x229   : > { %v11896_v51 = vadd.f32 %v9235_v46, %v3703_v47  ;;  %9507 = vmatpush3.bf16.msra.mxu1 %v10426_v33 }
 0x22a   : > { %v9125_v60 = vpop.f32.mrf.mxu0 }
 0x22b   : > { %v9126_v0 = vadd.f32 %v9125_v60, %v9124_v48  ;;  %v9236_v1 = vpop.f32.mrf.mxu1 }
 0x22c   : > { %v9127_v4 = vpop.f32.mrf.mxu0 }
 0x22d   : > { %10009 = vmatmul.mubr.bf16.gmra.mxu0 %v10412_v50  ;;  %v3708_v7 = vadd.f32 %v11872_v62, %v9126_v0  ;;  %v9237_v58 = vpop.f32.mrf.mxu1 }
 0x22e   : > { %10012 = vmatprep.mubr.bf16.mxu0 %v10413_v16  ;;  %v9238_v39 = vadd.f32 %v9237_v58, %v9236_v1  ;;  %v9128_v41 = vpop.f32.mrf.mxu0  ;;  %v393_v58 = vld [vmem:[#allocation3 + $0x18] sm:$0x1] }
 0x22f   : > { %v9129_v18 = vadd.f32 %v9128_v41, %v9127_v4  ;;  %v9239_v19 = vpop.f32.mrf.mxu1  ;;  %v394_v41 = vsel %vm11082_vm9, 0, %v393_v58  ;;  %v10432_v58 = vld [vmem:[#allocation10 + $0xb0] sm:$0xff]  }
 0x230   : > { %v11899_v10 = vadd.f32 %v9238_v39, %v3708_v7  ;;  %395 = vst [vmem:[#allocation3 + $0x18] sm:$0x1] %v394_v41  ;;  %v399_v41 = vld [vmem:[#allocation3 + $0x30] sm:$0x1] }
 0x231   : > { %v3711_v25 = vadd.f32 %v11872_v62, %v9129_v18  ;;  %v9240_v17 = vpop.f32.mrf.mxu1 }
 0x232   : > { %v9241_v27 = vadd.f32 %v9240_v17, %v9239_v19 }
 0x234   : > { %v11902_v11 = vadd.f32 %v9241_v27, %v3711_v25 }
 0x235   : > { %v9130_v28 = vpop.f32.mrf.mxu0  ;;  %10013 = vmatmul.mubr.bf16.gmra.mxu0 %v11822_v24 }
 0x237   : > { %v9242_v8 = vpop.f32.mrf.mxu1  ;;  %v9131_v34 = vpop.f32.mrf.mxu0 }
 0x238   : > { %v9132_v20 = vadd.f32 %v9131_v34, %v9130_v28  ;;  %v10429_v34 = vld [vmem:[#allocation10 + $0xb8] sm:$0xff]  }
 0x239   : > { %v9243_v14 = vpop.f32.mrf.mxu1  ;;  %v9133_v45 = vpop.f32.mrf.mxu0 }
 0x23a   : > { %v9244_v46 = vadd.f32 %v9243_v14, %v9242_v8  ;;  %v3716_v47 = vadd.f32 %v11872_v62, %v9132_v20  ;;  %v10427_v8 = vld [vmem:[#allocation10 + $0xf8] sm:$0xff]  }
 0x23b   : > { %v9245_v48 = vpop.f32.mrf.mxu1  ;;  %v9134_v50 = vpop.f32.mrf.mxu0  ;;  %9608 = vmatprep.subr.bf16.mxu0 %v10427_v8  ;;  %v396_v8 = vld [vmem:[#allocation3 + $0x24] sm:$0x1] }
 0x23c   : > { %v11906_v16 = vadd.f32 %v9244_v46, %v3716_v47  ;;  %v9135_v60 = vadd.f32 %v9134_v50, %v9133_v45  ;;  %v441_v45 = vld [vmem:[#allocation3 + $0x20] sm:$0x1]  ;;  %9609 = vmatpush3.bf16.msra.mxu0 %v10429_v34  ;;  %v397_v34 = vsel %vm11082_vm9, 0, %v396_v8 }
 0x23d   : > { %v9246_v0 = vpop.f32.mrf.mxu1  ;;  %v9264_v24 = vpop.f32.mrf.mxu0  ;;  %398 = vst [vmem:[#allocation3 + $0x24] sm:$0x1] %v397_v34  ;;  %v405_v34 = vld [vmem:[#allocation3 + $0x48] sm:$0x1] }
 0x23e   : > { %13543 = vst [vmem:[#allocation20_spill] sm:$0xff] %v11906_v16  ;;  %v9247_v1 = vadd.f32 %v9246_v0, %v9245_v48  ;;  %v3719_v4 = vadd.f32 %v11872_v62, %v9135_v60  ;;  %v390_v62 = vld [vmem:[#allocation3 + $0xc] sm:$0x1]  ;;  %v438_v60 = vld [vmem:[#allocation3 + $0x14] sm:$0x1] }
 0x23f   : > { %v11909_v7 = vpop.f32.mrf.mxu1  ;;  %v9265_v39 = vpop.f32.mrf.mxu0  ;;  %v391_v33 = vsel %vm11082_vm9, 0, %v390_v62  ;;  %v10431_v0 = vld [vmem:[#allocation10 + $0xf0] sm:$0xff]  }
 0x240   : > { %v11913_v18 = vadd.f32 %v9247_v1, %v3719_v4  ;;  %v9266_v19 = vadd.f32 %v9265_v39, %v9264_v24  ;;  %392 = vst [vmem:[#allocation3 + $0xc] sm:$0x1] %v391_v33  ;;  %v439_v4 = vsel %vm11120_vm12, 0, %v438_v60  ;;  %9610 = vmatprep.subr.bf16.mxu0 %v10431_v0 }
 0x241   : > { %v11915_v25 = vpop.f32.mrf.mxu1  ;;  %v9267_v17 = vpop.f32.mrf.mxu0  ;;  %440 = vst [vmem:[#allocation3 + $0x14] sm:$0x1] %v439_v4  ;;  %9611 = vmatpush3.bf16.msra.mxu0 %v10432_v58  ;;  %v444_v58 = vld [vmem:[#allocation3 + $0x2c] sm:$0x1] }
 0x242   : > { %13544 = vst [vmem:[#allocation21_spill] sm:$0xff] %v11913_v18  ;;  %v11918_v27 = vadd.f32 %v9266_v19, %v11779_v57  ;;  %v442_v57 = vsel %vm11120_vm12, 0, %v441_v45  ;;  %v10444_v18 = vld [vmem:[#allocation10 + $0x88] sm:$0xff]  }
 0x243   : > { %v11920_v28 = vpop.f32.mrf.mxu1  ;;  %v9268_v30 = vpop.f32.mrf.mxu0  ;;  %443 = vst [vmem:[#allocation3 + $0x20] sm:$0x1] %v442_v57 }
 0x244   : > { %v9269_v20 = vadd.f32 %v9268_v30, %v9267_v17  ;;  %v400_v17 = vsel %vm11082_vm9, 0, %v399_v41 }
 0x245   : > { %v11924_v14 = vpop.f32.mrf.mxu1  ;;  %v9270_v46 = vpop.f32.mrf.mxu0  ;;  %401 = vst [vmem:[#allocation3 + $0x30] sm:$0x1] %v400_v17  ;;  %v10436_v17 = vld [vmem:[#allocation10 + $0xa0] sm:$0xff]  }
 0x246   : > { %v11929_v47 = vadd.f32 %v9269_v20, %v11784_v12  ;;  %v10433_v20 = vld [vmem:[#allocation10 + $0xe8] sm:$0xff]  }
 0x247   : > { %v11931_v48 = vpop.f32.mrf.mxu1  ;;  %v9271_v50 = vpop.f32.mrf.mxu0  ;;  %9612 = vmatprep.subr.bf16.mxu0 %v10433_v20 }
 0x248   : > { %v9272_v1 = vadd.f32 %v9271_v50, %v9270_v46  ;;  %v447_v50 = vld [vmem:[#allocation3 + $0x38] sm:$0x1] }
 0x249   : > { %v11933_v24 = vpop.f32.mrf.mxu1  ;;  %v9273_v39 = vpop.f32.mrf.mxu0  ;;  %v448_v0 = vsel %vm11120_vm12, 0, %v447_v50 }
 0x24a   : > { %v11938_v12 = vadd.f32 %v9272_v1, %v11804_v36  ;;  %v10434_v36 = vld [vmem:[#allocation10 + $0xa8] sm:$0xff]   ;;  %449 = vst [vmem:[#allocation3 + $0x38] sm:$0x1] %v448_v0  ;;  %v402_v0 = vld [vmem:[#allocation3 + $0x3c] sm:$0x1]  ;;  %v9384_v23 = vadd.f32 %v11933_v24, %v11931_v48 }
 0x24b   : > { %v11940_v19 = vpop.f32.mrf.mxu1  ;;  %v9274_v62 = vpop.f32.mrf.mxu0  ;;  %9613 = vmatpush3.bf16.msra.mxu0 %v10434_v36  ;;  %v406_v36 = vsel %vm11082_vm9, 0, %v405_v34 }
 0x24c   : > { %v9275_v30 = vadd.f32 %v9274_v62, %v9273_v39  ;;  %v10435_v39 = vld [vmem:[#allocation10 + $0xe0] sm:$0xff]   ;;  %407 = vst [vmem:[#allocation3 + $0x48] sm:$0x1] %v406_v36 }
 0x24d   : > { %v11944_v33 = vpop.f32.mrf.mxu1  ;;  %v9276_v45 = vpop.f32.mrf.mxu0  ;;  %9614 = vmatprep.subr.bf16.mxu0 %v10435_v39  ;;  %v403_v39 = vsel %vm11082_vm9, 0, %v402_v0 }
 0x24e   : > { %v11949_v46 = vadd.f32 %v9275_v30, %v11810_v37  ;;  %v445_v37 = vsel %vm11120_vm12, 0, %v444_v58  ;;  %v10430_v58 = vld [vmem:[#allocation10 + $0x8] sm:$0xff]   ;;  %404 = vst [vmem:[#allocation3 + $0x3c] sm:$0x1] %v403_v39 }
 0x24f   : > { %v11951_v57 = vpop.f32.mrf.mxu1  ;;  %v9277_v60 = vpop.f32.mrf.mxu0  ;;  %446 = vst [vmem:[#allocation3 + $0x2c] sm:$0x1] %v445_v37  ;;  %9615 = vmatpush3.bf16.msra.mxu0 %v10436_v17  ;;  %v10437_v17 = vld [vmem:[#allocation10 + $0xd8] sm:$0xff]  }
 0x250   : > { %v9278_v1 = vadd.f32 %v9277_v60, %v9276_v45  ;;  %v10428_v60 = vld [vmem:[#allocation10 + $0x48] sm:$0xff]   ;;  %9616 = vmatprep.subr.bf16.mxu0 %v10437_v17 }
 0x251   : > { %v11955_v4 = vpop.f32.mrf.mxu1  ;;  %v9279_v41 = vpop.f32.mrf.mxu0  ;;  %9508 = vmatprep.subr.bf16.mxu1 %v10428_v60  ;;  %v451_v60 = vsel %vm11120_vm12, 0, %v450_v59 }
 0x252   : > { %v11960_v62 = vadd.f32 %v9278_v1, %v11815_v9  ;;  %9509 = vmatpush3.bf16.msra.mxu1 %v10430_v58  ;;  %452 = vst [vmem:[#allocation3 + $0x44] sm:$0x1] %v451_v60  ;;  %v10441_v58 = vld [vmem:[#allocation10 + $0xd0] sm:$0xff]   ;;  %v10443_v60 = vld [vmem:[#allocation10 + $0xc8] sm:$0xff]  }
 0x253   : > { %v11962_v8 = vpop.f32.mrf.mxu1  ;;  %v9280_v30 = vpop.f32.mrf.mxu0 }
 0x254   : > { %v9281_v20 = vadd.f32 %v9280_v30, %v9279_v41  ;;  %v453_v41 = vld [vmem:[#allocation3 + $0x50] sm:$0x1] }
 0x255   : > { %v11964_v45 = vpop.f32.mrf.mxu1  ;;  %v9282_v50 = vpop.f32.mrf.mxu0  ;;  %v454_v36 = vsel %vm11120_vm12, 0, %v453_v41  ;;  %v10442_v41 = vld [vmem:[#allocation10 + $0x90] sm:$0xff]  }
 0x256   : > { %v11969_v9 = vadd.f32 %v9281_v20, %v11824_v42  ;;  %v10439_v42 = vld [vmem:[#allocation10 + $0x98] sm:$0xff]   ;;  %455 = vst [vmem:[#allocation3 + $0x50] sm:$0x1] %v454_v36  ;;  %v10438_v36 = vld [vmem:[#allocation10 + $0x40] sm:$0xff]  }
 0x257   : > { %v11971_v1 = vpop.f32.mrf.mxu1  ;;  %v9283_v37 = vpop.f32.mrf.mxu0  ;;  %9617 = vmatpush3.bf16.msra.mxu0 %v10439_v42  ;;  %v10440_v42 = vld [vmem:[#allocation10] sm:$0xff]   ;;  %9510 = vmatprep.subr.bf16.mxu1 %v10438_v36 }
 0x258   : > { %v9284_v30 = vadd.f32 %v9283_v37, %v9282_v50  ;;  %9618 = vmatprep.subr.bf16.mxu0 %v10441_v58  ;;  %v408_v58 = vld [vmem:[#allocation3 + $0x54] sm:$0x1]  ;;  %9511 = vmatpush3.bf16.msra.mxu1 %v10440_v42  ;;  %v10448_v42 = vld [vmem:[#allocation10 + $0xc0] sm:$0xff]  }
 0x259   : > { %v11975_v34 = vpop.f32.mrf.mxu1  ;;  %v9285_v20 = vpop.f32.mrf.mxu0 }
 0x25a   : > { %v11980_v5 = vadd.f32 %v9284_v30, %v11827_v54  ;;  %v411_v30 = vld [vmem:[#allocation3 + $0x60] sm:$0x1] }
 0x25b   : > { %v11982_v0 = vpop.f32.mrf.mxu1  ;;  %v9286_v50 = vpop.f32.mrf.mxu0  ;;  %9619 = vmatpush3.bf16.msra.mxu0 %v10442_v41  ;;  %v412_v59 = vsel %vm11082_vm9, 0, %v411_v30  ;;  %v10447_v41 = vld [vmem:[#allocation4 + $0x4] ss:$36 sps:$4 sm:$0xff]  }
 0x25c   : > { %13545 = vst [vmem:[#allocation22_spill] sm:$0xff] %v11980_v5  ;;  %v9287_v39 = vadd.f32 %v9286_v50, %v9285_v20  ;;  %413 = vst [vmem:[#allocation3 + $0x60] sm:$0x1] %v412_v59  ;;  %9620 = vmatprep.subr.bf16.mxu0 %v10443_v60  ;;  %7463 = vmatprep.mubr.bf16.mxu1 %v10447_v41  ;;  %v456_v60 = vld [vmem:[#allocation3 + $0x5c] sm:$0x1] }
 0x25d   : > { %v11986_v37 = vpop.f32.mrf.mxu1  ;;  %v9288_v32 = vpop.f32.mrf.mxu0 }
 0x25e   : > { %v11989_v17 = vadd.f32 %v9287_v39, %v11830_v38  ;;  %v409_v39 = vsel %vm11082_vm9, 0, %v408_v58 }
 0x25f   : > { %v11991_v54 = vpop.f32.mrf.mxu1  ;;  %v9289_v40 = vpop.f32.mrf.mxu0  ;;  %410 = vst [vmem:[#allocation3 + $0x54] sm:$0x1] %v409_v39  ;;  %9621 = vmatpush3.bf16.msra.mxu0 %v10444_v18  ;;  %v417_v39 = vld [vmem:[#allocation3 + $0x78] sm:$0x1] }
 0x260   : > { %13546 = vst [vmem:[#allocation23_spill] sm:$0xff] %v11989_v17  ;;  %v9290_v20 = vadd.f32 %v9289_v40, %v9288_v32  ;;  %v459_v32 = vld [vmem:[#allocation3 + $0x68] sm:$0x1]  ;;  %v10445_v40 = vld [vmem:[#allocation4] ss:$36 sps:$4 sm:$0xff]   ;;  %9622 = vmatprep.subr.bf16.mxu0 %v10448_v42 }
 0x261   : > { %v11995_v50 = vpop.f32.mrf.mxu1  ;;  %v9291_v38 = vpop.f32.mrf.mxu0  ;;  %v460_v36 = vsel %vm11120_vm12, 0, %v459_v32  ;;  %7464 = vmatmul.mubr.bf16.vlgmr.msra.gmra.mxu1 %v10445_v40  ;;  %v10449_v32 = vld [vmem:[#allocation10 + $0x80] sm:$0xff]   ;;  %v414_v40 = vld [vmem:[#allocation3 + $0x6c] sm:$0x1] }
 0x262   : > { %v12000_v16 = vadd.f32 %v9290_v20, %v11833_v49  ;;  %461 = vst [vmem:[#allocation3 + $0x68] sm:$0x1] %v460_v36  ;;  %v457_v20 = vsel %vm11120_vm12, 0, %v456_v60  ;;  %v415_v42 = vsel %vm11082_vm9, 0, %v414_v40  ;;  %v465_v60 = vld [vmem:[#allocation3 + $0x80] sm:$0x1] }
 0x263   : > { %v12002_v30 = vpop.f32.mrf.mxu1  ;;  %v9292_v59 = vpop.f32.mrf.mxu0  ;;  %458 = vst [vmem:[#allocation3 + $0x5c] sm:$0x1] %v457_v20  ;;  %9623 = vmatpush3.bf16.msra.mxu0 %v10449_v32  ;;  %416 = vst [vmem:[#allocation3 + $0x6c] sm:$0x1] %v415_v42 }
 0x264   : > { %13547 = vst [vmem:[#allocation24_spill] sm:$0xff] %v12000_v16  ;;  %v9293_v17 = vadd.f32 %v9292_v59, %v9291_v38  ;;  %v418_v38 = vsel %vm11082_vm9, 0, %v417_v39 }
 0x265   : > { %v12006_v5 = vpop.f32.mrf.mxu1  ;;  %v9294_v49 = vpop.f32.mrf.mxu0  ;;  %419 = vst [vmem:[#allocation3 + $0x78] sm:$0x1] %v418_v38 }
 0x266   : > { %v12011_v18 = vadd.f32 %v9293_v17, %v11836_v13 }
 0x267   : > { %v12013_v58 = vpop.f32.mrf.mxu1  ;;  %v9295_v41 = vpop.f32.mrf.mxu0 }
 0x268   : > { %13548 = vst [vmem:[#allocation25_spill] sm:$0xff] %v12011_v18  ;;  %v9296_v59 = vadd.f32 %v9295_v41, %v9294_v49  ;;  %v466_v49 = vsel %vm11120_vm12, 0, %v465_v60 }
 0x269   : > { %v12017_v36 = vpop.f32.mrf.mxu1  ;;  %v9297_v16 = vpop.f32.mrf.mxu0  ;;  %467 = vst [vmem:[#allocation3 + $0x80] sm:$0x1] %v466_v49 }
 0x26a   : > { %v12022_v13 = vadd.f32 %v9296_v59, %v11839_v35  ;;  %v462_v59 = vld [vmem:[#allocation3 + $0x74] sm:$0x1] }
 0x26b   : > { %v12024_v17 = vpop.f32.mrf.mxu1  ;;  %v9298_v20 = vpop.f32.mrf.mxu0  ;;  %v463_v42 = vsel %vm11120_vm12, 0, %v462_v59 }
 0x26c   : > { %13549 = vst [vmem:[#allocation26_spill] sm:$0xff] %v12022_v13  ;;  %13550 = vst [vmem:[#allocation27_spill] sm:$0xff] %v12024_v17  ;;  %v9299_v39 = vadd.f32 %v9298_v20, %v9297_v16  ;;  %v423_v16 = vld [vmem:[#allocation3 + $0x90] sm:$0x1] }
 0x26d   : > { %v12028_v41 = vpop.f32.mrf.mxu1  ;;  %v9300_v38 = vpop.f32.mrf.mxu0  ;;  %464 = vst [vmem:[#allocation3 + $0x74] sm:$0x1] %v463_v42 }
 0x26e   : > { %v12031_v18 = vadd.f32 %v9299_v39, %v11842_v15  ;;  %v424_v15 = vsel %vm11082_vm9, 0, %v423_v16  ;;  %v420_v39 = vld [vmem:[#allocation3 + $0x84] sm:$0x1] }
 0x26f   : > { %v12033_v32 = vpop.f32.mrf.mxu1  ;;  %v9301_v35 = vpop.f32.mrf.mxu0  ;;  %425 = vst [vmem:[#allocation3 + $0x90] sm:$0x1] %v424_v15  ;;  %v421_v59 = vsel %vm11082_vm9, 0, %v420_v39 }
 0x270   : > { %13551 = vst [vmem:[#allocation28_spill] sm:$0xff] %v12031_v18  ;;  %v9302_v40 = vadd.f32 %v9301_v35, %v9300_v38  ;;  %422 = vst [vmem:[#allocation3 + $0x84] sm:$0x1] %v421_v59 }
 0x271   : > { %v12035_v13 = vpop.f32.mrf.mxu1  ;;  %v9303_v17 = vpop.f32.mrf.mxu0 }
 0x272   : > { %v12040_v60 = vadd.f32 %v9302_v40, %v11845_v43 }
 0x273   : > { %v12042_v20 = vpop.f32.mrf.mxu1  ;;  %v9304_v49 = vpop.f32.mrf.mxu0 }
 0x274   : > { %13552 = vst [vmem:[#allocation29_spill] sm:$0xff] %v12040_v60  ;;  %13553 = vst [vmem:[#allocation30_spill] sm:$0xff] %v12042_v20  ;;  %v9305_v38 = vadd.f32 %v9304_v49, %v9303_v17 }
 0x275   : > { %v12046_v35 = vpop.f32.mrf.mxu1  ;;  %v9306_v18 = vpop.f32.mrf.mxu0 }
 0x276   : > { %13554 = vst [vmem:[#allocation31_spill] sm:$0xff] %v12046_v35  ;;  %v12051_v42 = vadd.f32 %v9305_v38, %v11848_v2 }
 0x277   : > { %v12053_v43 = vpop.f32.mrf.mxu1  ;;  %v9307_v40 = vpop.f32.mrf.mxu0 }
 0x278   : > { %13555 = vst [vmem:[#allocation32_spill] sm:$0xff] %v12051_v42  ;;  %13556 = vst [vmem:[#allocation33_spill] sm:$0xff] %v12053_v43  ;;  %v9308_v60 = vadd.f32 %v9307_v40, %v9306_v18  ;;  %v10454_v43 = vld [vmem:[#allocation10 + $0x138] sm:$0xff]  }
 0x279   : > { %v12055_v20 = vpop.f32.mrf.mxu1  ;;  %v9309_v16 = vpop.f32.mrf.mxu0 }
 0x27a   : > { %13557 = vst [vmem:[#allocation34_spill] sm:$0xff] %v12055_v20  ;;  %v12058_v15 = vadd.f32 %v9308_v60, %v11851_v26  ;;  %v10453_v20 = vld [vmem:[#allocation10 + $0x178] sm:$0xff]  }
 0x27b   : > { %v12060_v17 = vpop.f32.mrf.mxu1  ;;  %v9310_v49 = vpop.f32.mrf.mxu0  ;;  %9720 = vmatprep.subr.bf16.mxu1 %v10453_v20 }
 0x27c   : > { %13558 = vst [vmem:[#allocation35_spill] sm:$0xff] %v12058_v15  ;;  %v9311_v35 = vadd.f32 %v9310_v49, %v9309_v16  ;;  %9721 = vmatpush3.bf16.msra.mxu1 %v10454_v43 }
 0x27d   : > { %v12062_v39 = vpop.f32.mrf.mxu1  ;;  %v9312_v59 = vpop.f32.mrf.mxu0 }
 0x27e   : > { %v12065_v2 = vadd.f32 %v9311_v35, %v11854_v31  ;;  %v471_v35 = vld [vmem:[#allocation3 + $0x98] sm:$0x1] }
 0x27f   : > { %v12067_v38 = vpop.f32.mrf.mxu1  ;;  %v9313_v42 = vpop.f32.mrf.mxu0 }
 0x280   : > { %13559 = vst [vmem:[#allocation36_spill] sm:$0xff] %v12065_v2  ;;  %v9314_v18 = vadd.f32 %v9313_v42, %v9312_v59  ;;  %v472_v42 = vsel %vm11120_vm12, 0, %v471_v35 }
 0x281   : > { %v12069_v40 = vpop.f32.mrf.mxu1  ;;  %v9315_v26 = vpop.f32.mrf.mxu0  ;;  %473 = vst [vmem:[#allocation3 + $0x98] sm:$0x1] %v472_v42 }
 0x282   : > { %13560 = vst [vmem:[#allocation37_spill] sm:$0xff] %v12069_v40  ;;  %v12072_v60 = vadd.f32 %v9314_v18, %v11858_v55 }
 0x283   : > { %v12074_v15 = vpop.f32.mrf.mxu1  ;;  %v9316_v16 = vpop.f32.mrf.mxu0 }
 0x284   : > { %13561 = vst [vmem:[#allocation38_spill] sm:$0xff] %v12072_v60  ;;  %13562 = vst [vmem:[#allocation39_spill] sm:$0xff] %v12074_v15  ;;  %v9317_v49 = vadd.f32 %v9316_v16, %v9315_v26 }
 0x285   : > { %v12076_v31 = vpop.f32.mrf.mxu1  ;;  %v9318_v2 = vpop.f32.mrf.mxu0 }
 0x286   : > { %13563 = vst [vmem:[#allocation40_spill] sm:$0xff] %v12076_v31  ;;  %v12081_v59 = vadd.f32 %v9317_v49, %v11861_v63  ;;  %v468_v31 = vld [vmem:[#allocation3 + $0x8c] sm:$0x1] }
 0x287   : > { %v12083_v40 = vpop.f32.mrf.mxu1  ;;  %v9319_v55 = vpop.f32.mrf.mxu0  ;;  %v469_v63 = vsel %vm11120_vm12, 0, %v468_v31 }
 0x288   : > { %13564 = vst [vmem:[#allocation41_spill] sm:$0xff] %v12081_v59  ;;  %v9320_v18 = vadd.f32 %v9319_v55, %v9318_v2  ;;  %470 = vst [vmem:[#allocation3 + $0x8c] sm:$0x1] %v469_v63  ;;  %v429_v55 = vld [vmem:[#allocation3 + $0xa8] sm:$0x1] }
 0x289   : > { %v12085_v60 = vpop.f32.mrf.mxu1  ;;  %v9321_v20 = vpop.f32.mrf.mxu0 }
 0x28a   : > { %v12088_v43 = vadd.f32 %v9320_v18, %v11864_v29  ;;  %v430_v18 = vsel %vm11082_vm9, 0, %v429_v55 }
 0x28b   : > { %v12090_v26 = vpop.f32.mrf.mxu1  ;;  %v9322_v16 = vpop.f32.mrf.mxu0  ;;  %431 = vst [vmem:[#allocation3 + $0xa8] sm:$0x1] %v430_v18 }
 0x28c   : > { %13565 = vst [vmem:[#allocation42_spill] sm:$0xff] %v12088_v43  ;;  %v9323_v15 = vadd.f32 %v9322_v16, %v9321_v20 }
 0x28d   : > { %v12092_v35 = vpop.f32.mrf.mxu1  ;;  %v9324_v49 = vpop.f32.mrf.mxu0 }
 0x28e   : > { %13566 = vst [vmem:[#allocation43_spill] sm:$0xff] %v12092_v35  ;;  %v12097_v2 = vadd.f32 %v9323_v15, %v11867_v44 }
 0x28f   : > { %v12099_v42 = vpop.f32.mrf.mxu1  ;;  %v9325_v29 = vpop.f32.mrf.mxu0 }
 0x290   : > { %13567 = vst [vmem:[#allocation44_spill] sm:$0xff] %v12097_v2  ;;  %13568 = vst [vmem:[#allocation45_spill] sm:$0xff] %v12099_v42  ;;  %v9326_v59 = vadd.f32 %v9325_v29, %v9324_v49 }
 0x291   : > { %v12103_v43 = vpop.f32.mrf.mxu1  ;;  %v9327_v20 = vpop.f32.mrf.mxu0 }
 0x292   : > { %13569 = vst [vmem:[#allocation46_spill] sm:$0xff] %v12103_v43  ;;  %v12106_v16 = vadd.f32 %v9326_v59, %v11875_v56  ;;  %v426_v43 = vld [vmem:[#allocation3 + $0x9c] sm:$0x1]  ;;  %v477_v56 = vld [vmem:[#allocation3 + $0xb0] sm:$0x1] }
 0x293   : > { %v12108_v31 = vpop.f32.mrf.mxu1  ;;  %v9328_v63 = vpop.f32.mrf.mxu0 }
 0x294   : > { %13570 = vst [vmem:[#allocation47_spill] sm:$0xff] %v12106_v16  ;;  %v9329_v44 = vadd.f32 %v9328_v63, %v9327_v20  ;;  %v427_v20 = vsel %vm11082_vm9, 0, %v426_v43 }
 0x295   : > { %v12110_v15 = vpop.f32.mrf.mxu1  ;;  %v9330_v2 = vpop.f32.mrf.mxu0  ;;  %428 = vst [vmem:[#allocation3 + $0x9c] sm:$0x1] %v427_v20 }
 0x296   : > { %v12113_v42 = vadd.f32 %v9329_v44, %v11878_v6  ;;  %v478_v6 = vsel %vm11120_vm12, 0, %v477_v56 }
 0x297   : > { %v12115_v35 = vpop.f32.mrf.mxu1  ;;  %v9331_v49 = vpop.f32.mrf.mxu0  ;;  %479 = vst [vmem:[#allocation3 + $0xb0] sm:$0x1] %v478_v6 }
 0x298   : > { %13571 = vst [vmem:[#allocation48_spill] sm:$0xff] %v12113_v42  ;;  %v9332_v55 = vadd.f32 %v9331_v49, %v9330_v2  ;;  %v474_v49 = vld [vmem:[#allocation3 + $0xa4] sm:$0x1] }
 0x299   : > { %v12117_v29 = vpop.f32.mrf.mxu1  ;;  %v9333_v18 = vpop.f32.mrf.mxu0 }
 0x29a   : > { %v12120_v59 = vadd.f32 %v9332_v55, %v11881_v22  ;;  %v475_v22 = vsel %vm11120_vm12, 0, %v474_v49  ;;  %v435_v55 = vld [vmem:[#allocation3 + $0xc0] sm:$0x1] }
 0x29b   : > { %v12122_v16 = vpop.f32.mrf.mxu1  ;;  %v9334_v63 = vpop.f32.mrf.mxu0  ;;  %476 = vst [vmem:[#allocation3 + $0xa4] sm:$0x1] %v475_v22  ;;  %v436_v43 = vsel %vm11082_vm9, 0, %v435_v55 }
 0x29c   : > { %13572 = vst [vmem:[#allocation49_spill] sm:$0xff] %v12120_v59  ;;  %13573 = vst [vmem:[#allocation50_spill] sm:$0xff] %v12122_v16  ;;  %v9335_v2 = vadd.f32 %v9334_v63, %v9333_v18  ;;  %v10470_v18 = vld [vmem:[#allocation10 + $0x170] sm:$0xff]  }
 0x29d   : > { %v12128_v44 = vpop.f32.mrf.mxu1  ;;  %v9336_v42 = vpop.f32.mrf.mxu0  ;;  %437 = vst [vmem:[#allocation3 + $0xc0] sm:$0x1] %v436_v43  ;;  %9722 = vmatprep.subr.bf16.mxu1 %v10470_v18  ;;  %v10474_v18 = vld [vmem:[#allocation10 + $0x130] sm:$0xff]  }
 0x29e   : > { %13574 = vst [vmem:[#allocation51_spill] sm:$0xff] %v12128_v44  ;;  %v12133_v59 = vadd.f32 %v9335_v2, %v11884_v53  ;;  %9723 = vmatpush3.bf16.msra.mxu1 %v10474_v18 }
 0x29f   : > { %v12135_v16 = vpop.f32.mrf.mxu1  ;;  %v9337_v56 = vpop.f32.mrf.mxu0 }
 0x2a0   : > { %13575 = vst [vmem:[#allocation52_spill] sm:$0xff] %v12133_v59  ;;  %13576 = vst [vmem:[#allocation53_spill] sm:$0xff] %v12135_v16  ;;  %v9338_v20 = vadd.f32 %v9337_v56, %v9336_v42  ;;  %v432_v16 = vld [vmem:[#allocation3 + $0xb4] sm:$0x1] }
 0x2a1   : > { %v12139_v6 = vpop.f32.mrf.mxu1  ;;  %v9339_v63 = vpop.f32.mrf.mxu0 }
 0x2a2   : > { %13577 = vst [vmem:[#allocation54_spill] sm:$0xff] %v12139_v6  ;;  %v12142_v49 = vadd.f32 %v9338_v20, %v11887_v3  ;;  %v483_v3 = vld [vmem:[#allocation3 + $0xc8] sm:$0x1] }
 0x2a3   : > { %v12144_v44 = vpop.f32.mrf.mxu1  ;;  %v9340_v53 = vpop.f32.mrf.mxu0 }
 0x2a4   : > { %13578 = vst [vmem:[#allocation55_spill] sm:$0xff] %v12142_v49  ;;  %v9341_v2 = vadd.f32 %v9340_v53, %v9339_v63  ;;  %v433_v49 = vsel %vm11082_vm9, 0, %v432_v16  ;;  %v484_v63 = vsel %vm11120_vm12, 0, %v483_v3 }
 0x2a5   : > { %v12146_v59 = vpop.f32.mrf.mxu1  ;;  %v9342_v22 = vpop.f32.mrf.mxu0  ;;  %434 = vst [vmem:[#allocation3 + $0xb4] sm:$0x1] %v433_v49  ;;  %485 = vst [vmem:[#allocation3 + $0xc8] sm:$0x1] %v484_v63  ;;  %v9378_v49 = vadd.f32 %v11915_v25, %v11909_v7 }
 0x2a6   : > { %v12149_v55 = vadd.f32 %v9341_v2, %v11890_v21 }
 0x2a7   : > { %v12151_v43 = vpop.f32.mrf.mxu1  ;;  %v9343_v42 = vpop.f32.mrf.mxu0 }
 0x2a8   : > { %13579 = vst [vmem:[#allocation56_spill] sm:$0xff] %v12149_v55  ;;  %v9344_v56 = vadd.f32 %v9343_v42, %v9342_v22  ;;  %v480_v55 = vld [vmem:[#allocation3 + $0xbc] sm:$0x1] }
 0x2a9   : > { %v12153_v6 = vpop.f32.mrf.mxu1  ;;  %v9345_v20 = vpop.f32.mrf.mxu0  ;;  %v481_v16 = vsel %vm11120_vm12, 0, %v480_v55  ;;  %v9390_v55 = vadd.f32 %v11955_v4, %v11951_v57  ;;  %v9399_v57 = vadd.f32 %v11986_v37, %v11982_v0  ;;  %v9414_v37 = vadd.f32 %v12035_v13, %v12033_v32  ;;  %v13588_v13 = vld [vmem:[#allocation39_spill] sm:$0xff]  ;;  %v13589_v32 = vld [vmem:[#allocation40_spill] sm:$0xff] }
 0x2aa   : > { %13580 = vst [vmem:[#allocation57_spill] sm:$0xff] %v12153_v6  ;;  %v12160_v53 = vadd.f32 %v9344_v56, %v11893_v61  ;;  %482 = vst [vmem:[#allocation3 + $0xbc] sm:$0x1] %v481_v16  ;;  %v9381_v56 = vadd.f32 %v11924_v14, %v11920_v28  ;;  %v9396_v14 = vadd.f32 %v11975_v34, %v11971_v1  ;;  %v10484_v1 = vld [vmem:[#allocation10 + $0x168] sm:$0xff]  }
 0x2ab   : > { %v12162_v21 = vpop.f32.mrf.mxu1  ;;  %v9346_v2 = vpop.f32.mrf.mxu0  ;;  %v9402_v34 = vadd.f32 %v11995_v50, %v11991_v54  ;;  %v13583_v54 = vld [vmem:[#allocation31_spill] sm:$0xff]  ;;  %9724 = vmatprep.subr.bf16.mxu1 %v10484_v1  ;;  %v13595_v1 = vld [vmem:[#allocation26_spill] sm:$0xff] }
 0x2ac   : > { %v9347_v22 = vadd.f32 %v9346_v2, %v9345_v20  ;;  %v9393_v2 = vadd.f32 %v11964_v45, %v11962_v8  ;;  %v12207_v45 = vadd.f32 %v9390_v55, %v11960_v62 }
 0x2ad   : > { %v12164_v42 = vpop.f32.mrf.mxu1  ;;  %v9348_v6 = vpop.f32.mrf.mxu0 }
 0x2ae   : > { %v12169_v52 = vadd.f32 %v9347_v22, %v11896_v51  ;;  %v9387_v51 = vadd.f32 %v11944_v33, %v11940_v19  ;;  %v4079_v19 = vadd.f32 %v9378_v49, %v11918_v27  ;;  %v12198_v33 = vadd.f32 %v9381_v56, %v11929_v47 }
 0x2af   : > { %v12171_v3 = vpop.f32.mrf.mxu1  ;;  %v9349_v61 = vpop.f32.mrf.mxu0  ;;  %v9405_v27 = vadd.f32 %v12006_v5, %v12002_v30  ;;  %v12217_v0 = vadd.f32 %v9393_v2, %v11969_v9  ;;  %v13584_v5 = vld [vmem:[#allocation33_spill] sm:$0xff]  ;;  %v9423_v9 = vadd.f32 %v12062_v39, %v12060_v17  ;;  %v9429_v56 = vadd.f32 %v13589_v32, %v13588_v13  ;;  %v13591_v17 = vld [vmem:[#allocation43_spill] sm:$0xff]  ;;  %v13603_v32 = vld [vmem:[#allocation42_spill] sm:$0xff] }
 0x2b0   : > { %v9350_v18 = vadd.f32 %v9349_v61, %v9348_v6  ;;  %v12204_v8 = vadd.f32 %v9387_v51, %v11949_v46  ;;  %v13581_v46 = vld [vmem:[#allocation27_spill] sm:$0xff]  ;;  %v13582_v6 = vld [vmem:[#allocation30_spill] sm:$0xff]  ;;  %v9435_v39 = vadd.f32 %v13591_v17, %v12090_v26 }
 0x2b1   : > { %v12177_v20 = vpop.f32.mrf.mxu1  ;;  %v9351_v63 = vpop.f32.mrf.mxu0  ;;  %v9411_v62 = vadd.f32 %v12028_v41, %v13581_v46  ;;  %v9417_v50 = vadd.f32 %v13583_v54, %v13582_v6  ;;  %v13587_v41 = vld [vmem:[#allocation37_spill] sm:$0xff]  ;;  %v13590_v51 = vld [vmem:[#allocation23_spill] sm:$0xff]  ;;  %v13598_v54 = vld [vmem:[#allocation32_spill] sm:$0xff] }
 0x2b2   : > { %v12188_v7 = vadd.f32 %v9350_v18, %v11899_v10  ;;  %v4087_v10 = vadd.f32 %v9384_v23, %v11938_v12  ;;  %v9408_v12 = vadd.f32 %v12017_v36, %v12013_v58  ;;  %v13586_v58 = vld [vmem:[#allocation22_spill] sm:$0xff]  ;;  %v9426_v49 = vadd.f32 %v13587_v41, %v12067_v38 }
 0x2b3   : > { %v12190_v25 = vpop.f32.mrf.mxu1  ;;  %v9352_v28 = vpop.f32.mrf.mxu0  ;;  %v12232_v36 = vadd.f32 %v9396_v14, %v13586_v58  ;;  %v9432_v18 = vadd.f32 %v12085_v60, %v12083_v40  ;;  %v12241_v55 = vadd.f32 %v9399_v57, %v13590_v51  ;;  %v13596_v40 = vld [vmem:[#allocation28_spill] sm:$0xff]  ;;  %v13597_v57 = vld [vmem:[#allocation29_spill] sm:$0xff]  ;;  %v12262_v26 = vadd.f32 %v9417_v50, %v13598_v54  ;;  %v13601_v58 = vld [vmem:[#allocation35_spill] sm:$0xff] }
 0x2b4   : > { %v9353_v48 = vadd.f32 %v9352_v28, %v9351_v63  ;;  %v13592_v63 = vld [vmem:[#allocation20_spill] sm:$0xff]  ;;  %v12253_v46 = vadd.f32 %v9408_v12, %v13595_v1  ;;  %v12256_v60 = vadd.f32 %v9411_v62, %v13596_v40  ;;  %v12259_v6 = vadd.f32 %v9414_v37, %v13597_v57  ;;  %v13604_v50 = vld [vmem:[#allocation38_spill] sm:$0xff]  ;;  %v13610_v40 = vld [vmem:[#allocation53_spill] sm:$0xff] }
 0x2b5   : > { %v12194_v24 = vpop.f32.mrf.mxu1  ;;  %v9354_v4 = vpop.f32.mrf.mxu0  ;;  %v13593_v28 = vld [vmem:[#allocation24_spill] sm:$0xff]  ;;  %v9441_v62 = vadd.f32 %v12110_v15, %v12108_v31  ;;  %v12275_v51 = vadd.f32 %v9432_v18, %v13603_v32  ;;  %v12278_v17 = vadd.f32 %v9426_v49, %v13604_v50  ;;  %v13608_v15 = vld [vmem:[#allocation50_spill] sm:$0xff]  ;;  %v13609_v18 = vld [vmem:[#allocation51_spill] sm:$0xff] }
 0x2b6   : > { %v12214_v47 = vadd.f32 %v9353_v48, %v11902_v11  ;;  %v13585_v11 = vld [vmem:[#allocation34_spill] sm:$0xff]  ;;  %v12247_v14 = vadd.f32 %v9402_v34, %v13593_v28  ;;  %v13594_v48 = vld [vmem:[#allocation25_spill] sm:$0xff]  ;;  %v13602_v12 = vld [vmem:[#allocation36_spill] sm:$0xff]  ;;  %v9447_v1 = vadd.f32 %v13609_v18, %v13608_v15 }
 0x2b7   : > { %v9355_v22 = vpop.f32.mrf.mxu0  ;;  %v9420_v30 = vadd.f32 %v13585_v11, %v13584_v5  ;;  %v9466_v61 = vpop.f32.mrf.mxu1  ;;  %v12250_v38 = vadd.f32 %v9405_v27, %v13594_v48  ;;  %v13599_v5 = vld [vmem:[#allocation45_spill] sm:$0xff]  ;;  %v13600_v34 = vld [vmem:[#allocation46_spill] sm:$0xff]  ;;  %v12270_v13 = vadd.f32 %v9423_v9, %v13602_v12  ;;  %v9465_v12 = vadd.f32 %v12194_v24, %v12190_v25  ;;  %v13618_v24 = vld [vmem:[#allocation56_spill] sm:$0xff] }
 0x2b8   : > { %v9356_v16 = vadd.f32 %v9355_v22, %v9354_v4  ;;  %v10488_v22 = vld [vmem:[#allocation10 + $0x128] sm:$0xff]   ;;  %v9438_v11 = vadd.f32 %v13600_v34, %v13599_v5  ;;  %v13611_v49 = vld [vmem:[#allocation54_spill] sm:$0xff]  ;;  %v13612_v54 = vld [vmem:[#allocation57_spill] sm:$0xff] }
 0x2b9   : > { %v9357_v23 = vpop.f32.mrf.mxu0  ;;  %v12267_v41 = vadd.f32 %v9420_v30, %v13601_v58  ;;  %9725 = vmatpush3.bf16.msra.mxu1 %v10488_v22  ;;  %v9444_v30 = vadd.f32 %v12117_v29, %v12115_v35  ;;  %v9450_v57 = vadd.f32 %v13611_v49, %v13610_v40  ;;  %v9456_v22 = vadd.f32 %v13612_v54, %v12151_v43  ;;  %v13613_v34 = vld [vmem:[#allocation47_spill] sm:$0xff] }
 0x2ba   : > { %v4038_v2 = vadd.f32 %v9356_v16, %v13592_v63  ;;  %v9467_v16 = vpop.f32.mrf.mxu1  ;;  %v13605_v63 = vld [vmem:[#allocation41_spill] sm:$0xff]  ;;  %v9459_v29 = vadd.f32 %v12164_v42, %v12162_v21  ;;  %v9462_v58 = vadd.f32 %v12177_v20, %v12171_v3  ;;  %v13617_v20 = vld [vmem:[#allocation55_spill] sm:$0xff] }
 0x2bb   : > { %v9358_v4 = vpop.f32.mrf.mxu0  ;;  %v12281_v28 = vadd.f32 %v9429_v56, %v13605_v63  ;;  %v9453_v56 = vadd.f32 %v12146_v59, %v12144_v44  ;;  %v9468_v59 = vadd.f32 %v9467_v16, %v9466_v61  ;;  %v13615_v42 = vld [vmem:[#allocation49_spill] sm:$0xff]  ;;  %v13616_v63 = vld [vmem:[#allocation52_spill] sm:$0xff]  ;;  %v12319_v3 = vadd.f32 %v9456_v22, %v12160_v53  ;;  %v10498_v40 = vld [vmem:[#allocation10 + $0x160] sm:$0xff]  }
 0x2bc   : > { %v9359_v27 = vadd.f32 %v9358_v4, %v9357_v23  ;;  %v13606_v23 = vld [vmem:[#allocation21_spill] sm:$0xff]  ;;  %v13607_v4 = vld [vmem:[#allocation44_spill] sm:$0xff]  ;;  %v12322_v25 = vadd.f32 %v9450_v57, %v13617_v20  ;;  %v12334_v53 = vadd.f32 %v9462_v58, %v12188_v7  ;;  %v10502_v22 = vld [vmem:[#allocation10 + $0x120] sm:$0xff]   ;;  %9726 = vmatprep.subr.bf16.mxu1 %v10498_v40 }
 0x2bd   : > { %v9986_v37 = vpop.f32.mrf.mxu0  ;;  %v12289_v31 = vadd.f32 %v9435_v39, %v13607_v4  ;;  %v12325_v61 = vadd.f32 %v9453_v56, %v13618_v24  ;;  %v12331_v18 = vadd.f32 %v9468_v59, %v4038_v2  ;;  %9727 = vmatpush3.bf16.msra.mxu1 %v10502_v22  ;;  %v4814_v58 = vld [vmem:[#allocation3 + $0xc] sm:$0xf] }
 0x2be   : > { %v12286_v9 = vadd.f32 %v9359_v27, %v13606_v23  ;;  %v4248_v48 = vadd.f32 %v9986_v37, %v4087_v10  ;;  %v9469_v10 = vpop.f32.mrf.mxu1  ;;  %v12302_v27 = vadd.f32 %v9438_v11, %v13613_v34  ;;  %v13614_v37 = vld [vmem:[#allocation48_spill] sm:$0xff]  ;;  %v12316_v23 = vadd.f32 %v9447_v1, %v13616_v63 }
 0x2bf   : > { %v4239_v35 = vpop.f32.mrf.mxu0  ;;  %v12309_v43 = vadd.f32 %v9441_v62, %v13614_v37  ;;  %v12337_v1 = vadd.f32 %v9465_v12, %v12214_v47 }
 0x2c0   : > { %v4368_v5 = vmax.f32 %v4248_v48, 0.0  ;;  %v4240_v39 = vadd.f32 %v4239_v35, %v4079_v19  ;;  %v12313_v19 = vadd.f32 %v9444_v30, %v13615_v42  ;;  %v9470_v16 = vpop.f32.mrf.mxu1  ;;  %v12328_v30 = vadd.f32 %v9459_v29, %v12169_v52  ;;  %v4821_v52 = vld [vmem:[#allocation3 + $0x18] sm:$0xf] }
 0x2c1   : > { %v9987_v44 = vpop.f32.mrf.mxu0  ;;  %v12339_v35 = vadd.f32 %v9470_v16, %v9469_v10 }
 0x2c2   : > { %v8993_v32 = vpack.c.bf16 %v4368_v5, %v4368_v5  ;;  %v4366_v50 = vmax.f32 %v4240_v39, 0.0  ;;  %v4251_v21 = vadd.f32 %v9987_v44, %v12204_v8 }
 0x2c3   : > { %v4242_v11 = vpop.f32.mrf.mxu0 }
 0x2c4   : > { %v4512_v62 = vshrl.u32 %v8993_v32, 16  ;;  %v8991_v48 = vpack.c.bf16 %v4366_v50, %v4366_v50  ;;  %v4369_v8 = vmax.f32 %v4251_v21, 0.0  ;;  %v4243_v4 = vadd.f32 %v4242_v11, %v12198_v33  ;;  %v4825_v11 = vld [vmem:[#allocation3 + $0x20] sm:$0x1] }
 0x2c5   : > { %v9990_v15 = vpop.f32.mrf.mxu0  ;;  %v4515_v57 = vshll.u32 %v8993_v32, 16 }
 0x2c6   : > { %v4514_v49 = vrot.slane %v4512_v62, 7  ;;  %v4495_v56 = vshrl.u32 %v8991_v48, 16  ;;  %v8994_v54 = vpack.c.bf16 %v4369_v8, %v4369_v8  ;;  %v4498_v29 = vshll.u32 %v8991_v48, 16 }
 0x2c7   : > { %v4367_v33 = vmax.f32 %v4243_v4, 0.0  ;;  %v4264_v2 = vadd.f32 %v9990_v15, %v12232_v36  ;;  %v4255_v5 = vpop.f32.mrf.mxu0 }
 0x2c8   : > { %v4517_v7 = vor.u32 %v4515_v57, %v4514_v49  ;;  %v4518_v39 = vrot.slane %v4514_v49, 4  ;;  %v4497_v34 = vrot.slane %v4495_v56, 7  ;;  %v4520_v47 = vshrl.u32 %v8994_v54, 16 }
 0x2c9   : > { %v4523_v12 = vshll.u32 %v8994_v54, 16  ;;  %v8992_v59 = vpack.c.bf16 %v4367_v33, %v4367_v33  ;;  %v4372_v44 = vmax.f32 %v4264_v2, 0.0  ;;  %v4256_v37 = vadd.f32 %v4255_v5, %v12207_v45  ;;  %v9991_v10 = vpop.f32.mrf.mxu0  ;;  %v4818_v33 = vld [vmem:[#allocation3 + $0x14] sm:$0x1] }
 0x2ca   : > { %v4822_v50 = vsel %vm11149_vm14, %v4517_v7, %v4821_v52  ;;  %v4500_v21 = vor.u32 %v4498_v29, %v4497_v34  ;;  %v4501_v42 = vrot.slane %v4497_v34, 4  ;;  %v4522_v36 = vrot.slane %v4520_v47, 7  ;;  %v10509_v7 = vld [vmem:[#allocation10 + $0x1f8] sm:$0xff]  }
 0x2cb   : > { %4823 = vst [vmem:[#allocation3 + $0x18] sm:$0xf] %v4822_v50  ;;  %v4503_v63 = vshrl.u32 %v8992_v59, 16  ;;  %v4506_v20 = vshll.u32 %v8992_v59, 16  ;;  %v8997_v24 = vpack.c.bf16 %v4372_v44, %v4372_v44  ;;  %v4370_v16 = vmax.f32 %v4256_v37, 0.0  ;;  %v4258_v62 = vpop.f32.mrf.mxu0  ;;  %9832 = vmatprep.subr.bf16.mxu0 %v10509_v7 }
 0x2cc   : > { %v4815_v48 = vsel %vm11149_vm14, %v4500_v21, %v4814_v58  ;;  %v4525_v8 = vor.u32 %v4523_v12, %v4522_v36  ;;  %v4527_v4 = vrot.slane %v4522_v36, 4  ;;  %v4267_v45 = vadd.f32 %v9991_v10, %v12241_v55  ;;  %v4835_v59 = vld [vmem:[#allocation3 + $0x30] sm:$0xf] }
 0x2cd   : > { %4816 = vst [vmem:[#allocation3 + $0xc] sm:$0xf] %v4815_v48  ;;  %v4505_v15 = vrot.slane %v4503_v63, 7  ;;  %v4546_v40 = vshrl.u32 %v8997_v24, 16  ;;  %v4549_v49 = vshll.u32 %v8997_v24, 16  ;;  %v8995_v57 = vpack.c.bf16 %v4370_v16, %v4370_v16  ;;  %v9994_v56 = vpop.f32.mrf.mxu0 }
 0x2ce   : > { %v4526_v22 = vsel %vm11132_vm13, %v4518_v39, %v4525_v8  ;;  %v4826_v29 = vsel %vm11082_vm9, %v4527_v4, %v4825_v11  ;;  %v4373_v2 = vmax.f32 %v4267_v45, 0.0  ;;  %v4259_v5 = vadd.f32 %v4258_v62, %v12217_v0 }
 0x2cf   : > { %4824 = vst [vmem:[#allocation3 + $0x1c] sm:$0xf] %v4526_v22  ;;  %4827 = vst [vmem:[#allocation3 + $0x20] sm:$0x1] %v4826_v29  ;;  %v4508_v55 = vor.u32 %v4506_v20, %v4505_v15  ;;  %v4510_v34 = vrot.slane %v4505_v15, 4  ;;  %v12353_v47 = vrot.slane %v4546_v40, 7  ;;  %v4271_v12 = vpop.f32.mrf.mxu0  ;;  %v4280_v10 = vadd.f32 %v9994_v56, %v12253_v46 }
 0x2d0   : > { %v4529_v58 = vshrl.u32 %v8995_v57, 16  ;;  %v4532_v44 = vshll.u32 %v8995_v57, 16  ;;  %v8998_v37 = vpack.c.bf16 %v4373_v2, %v4373_v2  ;;  %v4371_v39 = vmax.f32 %v4259_v5, 0.0  ;;  %v4839_v22 = vld [vmem:[#allocation3 + $0x38] sm:$0x1]  ;;  %v10514_v5 = vld [vmem:[#allocation10 + $0x158] sm:$0xff]  }
 0x2d1   : > { %v4509_v50 = vsel %vm11132_vm13, %v4501_v42, %v4508_v55  ;;  %v4819_v0 = vsel %vm11082_vm9, %v4510_v34, %v4818_v33  ;;  %v4551_v21 = vor.u32 %v4549_v49, %v12353_v47  ;;  %v4552_v36 = vrot.slane %v12353_v47, 4  ;;  %v9995_v11 = vpop.f32.mrf.mxu0  ;;  %v4828_v42 = vld [vmem:[#allocation3 + $0x24] sm:$0xf]  ;;  %9728 = vmatprep.subr.bf16.mxu1 %v10514_v5 }
 0x2d2   : > { %4817 = vst [vmem:[#allocation3 + $0x10] sm:$0xf] %v4509_v50  ;;  %4820 = vst [vmem:[#allocation3 + $0x14] sm:$0x1] %v4819_v0  ;;  %v4531_v63 = vrot.slane %v4529_v58, 7  ;;  %v4554_v20 = vshrl.u32 %v8998_v37, 16  ;;  %v8996_v16 = vpack.c.bf16 %v4371_v39, %v4371_v39  ;;  %v4272_v8 = vadd.f32 %v4271_v12, %v12247_v14 }
 0x2d3   : > { %v4557_v24 = vshll.u32 %v8998_v37, 16  ;;  %v12362_v62 = vld [vmem:[#allocation3 + $0x18] sm:$0xf]  ;;  %v4836_v46 = vsel %vm11149_vm14, %v4551_v21, %v4835_v59  ;;  %v4376_v48 = vmax.f32 %v4280_v10, 0.0  ;;  %v4283_v4 = vadd.f32 %v9995_v11, %v12256_v60  ;;  %v4274_v45 = vpop.f32.mrf.mxu0  ;;  %v4832_v12 = vld [vmem:[#allocation3 + $0x2c] sm:$0x1] }
 0x2d4   : > { %5686 = vst [vmem:[#allocation4 + $0x54] sm:$0xf] %v12362_v62  ;;  %4984 = vst [vmem:[#allocation4 + $0x90] sm:$0xf] %v12362_v62  ;;  %v4534_v15 = vor.u32 %v4532_v44, %v4531_v63  ;;  %v4535_v40 = vrot.slane %v4531_v63, 4  ;;  %v4556_v49 = vrot.slane %v4554_v20, 7 }
 0x2d5   : > { %5818 = vst [vmem:[#allocation4 + $0x18] sm:$0xf] %v12362_v62  ;;  %4837 = vst [vmem:[#allocation3 + $0x30] sm:$0xf] %v4836_v46  ;;  %v4537_v57 = vshrl.u32 %v8996_v16, 16  ;;  %v4540_v29 = vshll.u32 %v8996_v16, 16  ;;  %v9001_v33 = vpack.c.bf16 %v4376_v48, %v4376_v48  ;;  %v9998_v60 = vpop.f32.mrf.mxu0 }
 0x2d6   : > { %v12371_v56 = vld [vmem:[#allocation3 + $0xc] sm:$0xf]  ;;  %v4374_v14 = vmax.f32 %v4272_v8, 0.0  ;;  %v4377_v2 = vmax.f32 %v4283_v4, 0.0  ;;  %v12375_v7 = vld [vmem:[#allocation3 + $0x1c] sm:$0xf]  ;;  %v4829_v55 = vsel %vm11149_vm14, %v4534_v15, %v4828_v42  ;;  %v4559_v34 = vor.u32 %v4557_v24, %v4556_v49 }
 0x2d7   : > { %5684 = vst [vmem:[#allocation4 + $0xc] sm:$0xf] %v12371_v56  ;;  %4982 = vst [vmem:[#allocation4 + $0x48] sm:$0xf] %v12371_v56  ;;  %v4561_v47 = vrot.slane %v4556_v49, 4  ;;  %v4539_v58 = vrot.slane %v4537_v57, 7  ;;  %v4287_v10 = vpop.f32.mrf.mxu0  ;;  %v4275_v49 = vadd.f32 %v4274_v45, %v12250_v38 }
 0x2d8   : > { %4985 = vst [vmem:[#allocation4 + $0xb4] sm:$0xf] %v12375_v7  ;;  %5687 = vst [vmem:[#allocation4 + $0x78] sm:$0xf] %v12375_v7  ;;  %v4580_v59 = vshrl.u32 %v9001_v33, 16  ;;  %v4583_v44 = vshll.u32 %v9001_v33, 16  ;;  %v8999_v37 = vpack.c.bf16 %v4374_v14, %v4374_v14  ;;  %v9002_v39 = vpack.c.bf16 %v4377_v2, %v4377_v2 }
 0x2d9   : > { %5819 = vst [vmem:[#allocation4 + $0x3c] sm:$0xf] %v12375_v7  ;;  %4830 = vst [vmem:[#allocation3 + $0x24] sm:$0xf] %v4829_v55  ;;  %v10518_v50 = vld [vmem:[#allocation10 + $0x118] sm:$0xff]   ;;  %v4560_v0 = vsel %vm11132_vm13, %v4552_v36, %v4559_v34  ;;  %v4840_v21 = vsel %vm11082_vm9, %v4561_v47, %v4839_v22  ;;  %v4542_v11 = vor.u32 %v4540_v29, %v4539_v58  ;;  %v4544_v63 = vrot.slane %v4539_v58, 4  ;;  %v9999_v42 = vpop.f32.mrf.mxu0 }
 0x2da   : > { %4838 = vst [vmem:[#allocation3 + $0x34] sm:$0xf] %v4560_v0  ;;  %4841 = vst [vmem:[#allocation3 + $0x38] sm:$0x1] %v4840_v21  ;;  %v4582_v20 = vrot.slane %v4580_v59, 7  ;;  %v4563_v24 = vshrl.u32 %v8999_v37, 16  ;;  %9729 = vmatpush3.bf16.msra.mxu1 %v10518_v50  ;;  %v4296_v55 = vadd.f32 %v9998_v60, %v12267_v41  ;;  %v4288_v38 = vadd.f32 %v4287_v10, %v12259_v6 }
 0x2db   : > { %v4566_v16 = vshll.u32 %v8999_v37, 16  ;;  %v4588_v46 = vshrl.u32 %v9002_v39, 16  ;;  %v12386_v48 = vld [vmem:[#allocation3 + $0x10] sm:$0xf]  ;;  %v4543_v8 = vsel %vm11132_vm13, %v4535_v40, %v4542_v11  ;;  %v4833_v36 = vsel %vm11082_vm9, %v4544_v63, %v4832_v12  ;;  %v4849_v4 = vld [vmem:[#allocation3 + $0x48] sm:$0xf]  ;;  %v4290_v14 = vpop.f32.mrf.mxu0 }
 0x2dc   : > { %v4591_v15 = vshll.u32 %v9002_v39, 16  ;;  %5685 = vst [vmem:[#allocation4 + $0x30] sm:$0xf] %v12386_v48  ;;  %4983 = vst [vmem:[#allocation4 + $0x6c] sm:$0xf] %v12386_v48  ;;  %v4585_v57 = vor.u32 %v4583_v44, %v4582_v20  ;;  %v4586_v22 = vrot.slane %v4582_v20, 4  ;;  %v4299_v45 = vadd.f32 %v9999_v42, %v12270_v13 }
 0x2dd   : > { %4831 = vst [vmem:[#allocation3 + $0x28] sm:$0xf] %v4543_v8  ;;  %4834 = vst [vmem:[#allocation3 + $0x2c] sm:$0x1] %v4833_v36  ;;  %v12395_v29 = vrot.slane %v4563_v24, 7  ;;  %v4590_v33 = vrot.slane %v4588_v46, 7  ;;  %v10002_v41 = vpop.f32.mrf.mxu0  ;;  %v4291_v0 = vadd.f32 %v4290_v14, %v12262_v26 }
 0x2de   : > { %v12397_v40 = vld [vmem:[#allocation3 + $0x30] sm:$0xf]  ;;  %v4842_v2 = vld [vmem:[#allocation3 + $0x3c] sm:$0xf]  ;;  %v4375_v5 = vmax.f32 %v4275_v49, 0.0  ;;  %v4850_v34 = vsel %vm11149_vm14, %v4585_v57, %v4849_v4  ;;  %v4380_v13 = vmax.f32 %v4296_v55, 0.0  ;;  %v4312_v4 = vadd.f32 %v10002_v41, %v12275_v51 }
 0x2df   : > { %5690 = vst [vmem:[#allocation4 + $0xe4] sm:$0xf] %v12397_v40  ;;  %4988 = vst [vmem:[#allocation4 + $0x120] sm:$0xf] %v12397_v40  ;;  %v4568_v47 = vor.u32 %v4566_v16, %v12395_v29  ;;  %v4569_v58 = vrot.slane %v12395_v29, 4  ;;  %v4593_v12 = vor.u32 %v4591_v15, %v4590_v33  ;;  %v4595_v6 = vrot.slane %v4590_v33, 4  ;;  %v4303_v21 = vpop.f32.mrf.mxu0 }
 0x2e0   : > { %5822 = vst [vmem:[#allocation4 + $0xa8] sm:$0xf] %v12397_v40  ;;  %v4853_v59 = vld [vmem:[#allocation3 + $0x50] sm:$0x1]  ;;  %4851 = vst [vmem:[#allocation3 + $0x48] sm:$0xf] %v4850_v34  ;;  %v9000_v60 = vpack.c.bf16 %v4375_v5, %v4375_v5  ;;  %v9005_v16 = vpack.c.bf16 %v4380_v13, %v4380_v13  ;;  %v4304_v5 = vadd.f32 %v4303_v21, %v12278_v17 }
 0x2e1   : > { %v4378_v44 = vmax.f32 %v4288_v38, 0.0  ;;  %v12409_v37 = vld [vmem:[#allocation3 + $0x24] sm:$0xf]  ;;  %v4843_v39 = vsel %vm11149_vm14, %v4568_v47, %v4842_v2  ;;  %v4594_v10 = vsel %vm11132_vm13, %v4586_v22, %v4593_v12  ;;  %v4381_v50 = vmax.f32 %v4299_v45, 0.0  ;;  %v12419_v11 = vld [vmem:[#allocation3 + $0x34] sm:$0xf]  ;;  %v12427_v15 = vpop.f32.mrf.mxu0 }
 0x2e2   : > { %5688 = vst [vmem:[#allocation4 + $0x9c] sm:$0xf] %v12409_v37  ;;  %4986 = vst [vmem:[#allocation4 + $0xd8] sm:$0xf] %v12409_v37  ;;  %v4854_v63 = vsel %vm11082_vm9, %v4595_v6, %v4853_v59  ;;  %v4571_v20 = vshrl.u32 %v9000_v60, 16  ;;  %v4574_v24 = vshll.u32 %v9000_v60, 16 }
 0x2e3   : > { %5820 = vst [vmem:[#allocation4 + $0x60] sm:$0xf] %v12409_v37  ;;  %4844 = vst [vmem:[#allocation3 + $0x3c] sm:$0xf] %v4843_v39  ;;  %v10510_v46 = vld [vmem:[#allocation10 + $0x1b8] sm:$0xff]   ;;  %v9003_v42 = vpack.c.bf16 %v4378_v44, %v4378_v44  ;;  %v9006_v8 = vpack.c.bf16 %v4381_v50, %v4381_v50  ;;  %v4379_v36 = vmax.f32 %v4291_v0, 0.0  ;;  %v12435_v12 = vpop.f32.mrf.mxu0 }
 0x2e4   : > { %4852 = vst [vmem:[#allocation3 + $0x4c] sm:$0xf] %v4594_v10  ;;  %4989 = vst [vmem:[#allocation4 + $0x144] sm:$0xf] %v12419_v11  ;;  %v4846_v26 = vld [vmem:[#allocation3 + $0x44] sm:$0x1] }
 0x2e5   : > { %5691 = vst [vmem:[#allocation4 + $0x108] sm:$0xf] %v12419_v11  ;;  %5823 = vst [vmem:[#allocation4 + $0xcc] sm:$0xf] %v12419_v11  ;;  %v10450_v49 = vld [vmem:[#allocation4 + $0x8] ss:$36 sps:$4 sm:$0xff]   ;;  %v9004_v17 = vpack.c.bf16 %v4379_v36, %v4379_v36  ;;  %v10006_v0 = vpop.f32.mrf.mxu0 }
 0x2e6   : > { %4855 = vst [vmem:[#allocation3 + $0x50] sm:$0x1] %v4854_v63  ;;  %v10452_v57 = vld [vmem:[#allocation4 + $0xc] ss:$36 sps:$4 sm:$0xff]   ;;  %v4573_v33 = vrot.slane %v4571_v20, 7  ;;  %v4614_v14 = vshrl.u32 %v9005_v16, 16 }
 0x2e7   : > { %v12429_v22 = vld [vmem:[#allocation3 + $0x28] sm:$0xf]  ;;  %v4617_v2 = vshll.u32 %v9005_v16, 16  ;;  %v4863_v38 = vld [vmem:[#allocation3 + $0x60] sm:$0xf]  ;;  %v4597_v51 = vshrl.u32 %v9003_v42, 16  ;;  %7624 = vmatprep.mubr.bf16.mxu0 %v10452_v57 }
 0x2e8   : > { %v10525_v55 = vld [vmem:[#allocation10 + $0x1f0] sm:$0xff]   ;;  %4987 = vst [vmem:[#allocation4 + $0xfc] sm:$0xf] %v12429_v22  ;;  %5689 = vst [vmem:[#allocation4 + $0xc0] sm:$0xf] %v12429_v22  ;;  %v4600_v45 = vshll.u32 %v9003_v42, 16  ;;  %v4576_v59 = vor.u32 %v4574_v24, %v4573_v33  ;;  %7625 = vmatmul.mubr.bf16.vlgmr.msra.gmra.mxu0 %v10450_v49  ;;  %v4319_v49 = vpop.f32.mrf.mxu0 }
 0x2e9   : > { %5821 = vst [vmem:[#allocation4 + $0x84] sm:$0xf] %v12429_v22  ;;  %v4622_v34 = vshrl.u32 %v9006_v8, 16  ;;  %v4625_v47 = vshll.u32 %v9006_v8, 16  ;;  %v4578_v41 = vrot.slane %v4573_v33, 4  ;;  %v4616_v6 = vrot.slane %v4614_v14, 7  ;;  %9833 = vmatpush3.bf16.msra.mxu0 %v10510_v46 }
 0x2ea   : > { %v4856_v60 = vld [vmem:[#allocation3 + $0x54] sm:$0xf]  ;;  %v10526_v13 = vld [vmem:[#allocation10 + $0x1b0] sm:$0xff]   ;;  %v12437_v44 = vrot.slane %v4597_v51, 7  ;;  %v4384_v10 = vmax.f32 %v4312_v4, 0.0  ;;  %v4382_v50 = vmax.f32 %v4304_v5, 0.0  ;;  %v4577_v63 = vsel %vm11132_vm13, %v4569_v58, %v4576_v59  ;;  %9834 = vmatprep.subr.bf16.mxu0 %v10525_v55 }
 0x2eb   : > { %v4624_v39 = vrot.slane %v4622_v34, 7  ;;  %v12439_v21 = vld [vmem:[#allocation3 + $0x48] sm:$0xf]  ;;  %v4847_v20 = vsel %vm11082_vm9, %v4578_v41, %v4846_v26  ;;  %v4619_v24 = vor.u32 %v4617_v2, %v4616_v6  ;;  %v4620_v16 = vrot.slane %v4616_v6, 4  ;;  %v12450_v36 = vld [vmem:[#allocation3 + $0x4c] sm:$0xf] }
 0x2ec   : > { %v4867_v42 = vld [vmem:[#allocation3 + $0x68] sm:$0x1]  ;;  %5694 = vst [vmem:[#allocation4 + $0x174] sm:$0xf] %v12439_v21  ;;  %4992 = vst [vmem:[#allocation4 + $0x1b0] sm:$0xf] %v12439_v21  ;;  %v4602_v29 = vor.u32 %v4600_v45, %v12437_v44  ;;  %v9009_v5 = vpack.c.bf16 %v4384_v10, %v4384_v10  ;;  %v9007_v45 = vpack.c.bf16 %v4382_v50, %v4382_v50  ;;  %v12475_v10 = vpop.f32.mrf.mxu0 }
 0x2ed   : > { %5826 = vst [vmem:[#allocation4 + $0x138] sm:$0xf] %v12439_v21  ;;  %v10530_v8 = vld [vmem:[#allocation10 + $0x150] sm:$0xff]   ;;  %4845 = vst [vmem:[#allocation3 + $0x40] sm:$0xf] %v4577_v63  ;;  %v4603_v58 = vrot.slane %v12437_v44, 4  ;;  %v4627_v26 = vor.u32 %v4625_v47, %v4624_v39  ;;  %v4864_v33 = vsel %vm11149_vm14, %v4619_v24, %v4863_v38  ;;  %9835 = vmatpush3.bf16.msra.mxu0 %v10526_v13 }
 0x2ee   : > { %v10534_v46 = vld [vmem:[#allocation10 + $0x110] sm:$0xff]   ;;  %4848 = vst [vmem:[#allocation3 + $0x44] sm:$0x1] %v4847_v20  ;;  %v4629_v4 = vrot.slane %v4624_v39, 4  ;;  %v12454_v57 = vld [vmem:[#allocation3 + $0x3c] sm:$0xf]  ;;  %9730 = vmatprep.subr.bf16.mxu1 %v10530_v8  ;;  %v4857_v55 = vsel %vm11149_vm14, %v4602_v29, %v4856_v60  ;;  %v4315_v41 = vadd.f32 %v12427_v15, %v12289_v31  ;;  %v4307_v44 = vadd.f32 %v12435_v12, %v12281_v28 }
 0x2ef   : > { %4993 = vst [vmem:[#allocation4 + $0x1d4] sm:$0xf] %v12450_v36  ;;  %5695 = vst [vmem:[#allocation4 + $0x198] sm:$0xf] %v12450_v36  ;;  %v4605_v14 = vshrl.u32 %v9004_v17, 16  ;;  %v4608_v2 = vshll.u32 %v9004_v17, 16  ;;  %v4628_v51 = vsel %vm11132_vm13, %v4620_v16, %v4627_v26  ;;  %9731 = vmatpush3.bf16.msra.mxu1 %v10534_v46  ;;  %v4328_v39 = vadd.f32 %v10006_v0, %v12313_v19 }
 0x2f0   : > { %5827 = vst [vmem:[#allocation4 + $0x15c] sm:$0xf] %v12450_v36  ;;  %5692 = vst [vmem:[#allocation4 + $0x12c] sm:$0xf] %v12454_v57  ;;  %v4868_v38 = vsel %vm11082_vm9, %v4629_v4, %v4867_v42  ;;  %v4648_v47 = vshrl.u32 %v9009_v5, 16  ;;  %v4651_v59 = vshll.u32 %v9009_v5, 16  ;;  %v4320_v42 = vadd.f32 %v4319_v49, %v12302_v27  ;;  %v12495_v49 = vpop.f32.mrf.mxu0 }
 0x2f1   : > { %4990 = vst [vmem:[#allocation4 + $0x168] sm:$0xf] %v12454_v57  ;;  %5824 = vst [vmem:[#allocation4 + $0xf0] sm:$0xf] %v12454_v57  ;;  %v4607_v34 = vrot.slane %v4605_v14, 7  ;;  %v4631_v60 = vshrl.u32 %v9007_v45, 16 }
 0x2f2   : > { %4865 = vst [vmem:[#allocation3 + $0x60] sm:$0xf] %v4864_v33  ;;  %4858 = vst [vmem:[#allocation3 + $0x54] sm:$0xf] %v4857_v55  ;;  %v4860_v6 = vld [vmem:[#allocation3 + $0x5c] sm:$0x1] }
 0x2f3   : > { %4866 = vst [vmem:[#allocation3 + $0x64] sm:$0xf] %v4628_v51  ;;  %4869 = vst [vmem:[#allocation3 + $0x68] sm:$0x1] %v4868_v38  ;;  %v4634_v17 = vshll.u32 %v9007_v45, 16  ;;  %v4610_v13 = vor.u32 %v4608_v2, %v4607_v34  ;;  %v4612_v50 = vrot.slane %v4607_v34, 4 }
 0x2f4   : > { %v12477_v63 = vrot.slane %v4648_v47, 7  ;;  %v4385_v20 = vmax.f32 %v4315_v41, 0.0  ;;  %v4877_v24 = vld [vmem:[#allocation3 + $0x78] sm:$0xf]  ;;  %v12479_v16 = vrot.slane %v4631_v60, 7  ;;  %v4383_v31 = vmax.f32 %v4307_v44, 0.0 }
 0x2f5   : > { %v4388_v15 = vmax.f32 %v4328_v39, 0.0  ;;  %v12482_v8 = vld [vmem:[#allocation3 + $0x40] sm:$0xf]  ;;  %v4611_v28 = vsel %vm11132_vm13, %v4603_v58, %v4610_v13  ;;  %v4861_v19 = vsel %vm11082_vm9, %v4612_v50, %v4860_v6  ;;  %v4870_v46 = vld [vmem:[#allocation3 + $0x6c] sm:$0xf]  ;;  %v4386_v5 = vmax.f32 %v4320_v42, 0.0 }
 0x2f6   : > { %v4653_v12 = vor.u32 %v4651_v59, %v12477_v63  ;;  %v4654_v0 = vrot.slane %v12477_v63, 4  ;;  %v10541_v29 = vld [vmem:[#allocation10 + $0x1e8] sm:$0xff]   ;;  %4991 = vst [vmem:[#allocation4 + $0x18c] sm:$0xf] %v12482_v8  ;;  %5693 = vst [vmem:[#allocation4 + $0x150] sm:$0xf] %v12482_v8  ;;  %v4636_v27 = vor.u32 %v4634_v17, %v12479_v16  ;;  %v9010_v26 = vpack.c.bf16 %v4385_v20, %v4385_v20 }
 0x2f7   : > { %5825 = vst [vmem:[#allocation4 + $0x114] sm:$0xf] %v12482_v8  ;;  %4859 = vst [vmem:[#allocation3 + $0x58] sm:$0xf] %v4611_v28  ;;  %v4637_v58 = vrot.slane %v12479_v16, 4  ;;  %v9008_v4 = vpack.c.bf16 %v4383_v31, %v4383_v31  ;;  %v10542_v33 = vld [vmem:[#allocation10 + $0x1a8] sm:$0xff]   ;;  %v9013_v2 = vpack.c.bf16 %v4388_v15, %v4388_v15  ;;  %9836 = vmatprep.subr.bf16.mxu0 %v10541_v29  ;;  %v12518_v31 = vpop.f32.mrf.mxu0 }
 0x2f8   : > { %4862 = vst [vmem:[#allocation3 + $0x5c] sm:$0x1] %v4861_v19  ;;  %v4878_v14 = vsel %vm11149_vm14, %v4653_v12, %v4877_v24  ;;  %v12499_v55 = vld [vmem:[#allocation3 + $0x14] sm:$0x1]  ;;  %v8719_v51 = vrot.slane %v12371_v56, 9  ;;  %v4871_v34 = vsel %vm11149_vm14, %v4636_v27, %v4870_v46  ;;  %v4656_v47 = vshrl.u32 %v9010_v26, 16  ;;  %9837 = vmatpush3.bf16.msra.mxu0 %v10542_v33 }
 0x2f9   : > { %v12502_v38 = vld [vmem:[#allocation3 + $0x60] sm:$0xf]  ;;  %4879 = vst [vmem:[#allocation3 + $0x78] sm:$0xf] %v4878_v14  ;;  %v4659_v59 = vshll.u32 %v9010_v26, 16  ;;  %v4639_v41 = vshrl.u32 %v9008_v4, 16  ;;  %v9011_v44 = vpack.c.bf16 %v4386_v5, %v4386_v5  ;;  %v4331_v12 = vadd.f32 %v12475_v10, %v12316_v23 }
 0x2fa   : > { %v12504_v45 = vld [vmem:[#allocation3 + $0x64] sm:$0xf]  ;;  %5698 = vst [vmem:[#allocation4 + $0x204] sm:$0xf] %v12502_v38  ;;  %4996 = vst [vmem:[#allocation4 + $0x240] sm:$0xf] %v12502_v38 }
 0x2fb   : > { %5830 = vst [vmem:[#allocation4 + $0x1c8] sm:$0xf] %v12502_v38  ;;  %4997 = vst [vmem:[#allocation4 + $0x264] sm:$0xf] %v12504_v45  ;;  %v4642_v6 = vshll.u32 %v9008_v4, 16  ;;  %v4682_v60 = vshrl.u32 %v9013_v2, 16 }
 0x2fc   : > { %5699 = vst [vmem:[#allocation4 + $0x228] sm:$0xf] %v12504_v45  ;;  %5831 = vst [vmem:[#allocation4 + $0x1ec] sm:$0xf] %v12504_v45  ;;  %v4685_v17 = vshll.u32 %v9013_v2, 16  ;;  %v4658_v13 = vrot.slane %v4656_v47, 7 }
 0x2fd   : > { %4872 = vst [vmem:[#allocation3 + $0x6c] sm:$0xf] %v4871_v34  ;;  %v12514_v39 = vld [vmem:[#allocation3 + $0x54] sm:$0xf]  ;;  %v4881_v50 = vld [vmem:[#allocation3 + $0x80] sm:$0x1] }
 0x2fe   : > { %v4641_v20 = vrot.slane %v4639_v41, 7  ;;  %v5517_v24 = vrot.slane %v12386_v48, 5  ;;  %v5520_v16 = vrot.slane %v12499_v55, 5  ;;  %5696 = vst [vmem:[#allocation4 + $0x1bc] sm:$0xf] %v12514_v39  ;;  %v12523_v42 = vrot.slane %v4682_v60, 7  ;;  %v4335_v60 = vpop.f32.mrf.mxu0 }
 0x2ff   : > { %4994 = vst [vmem:[#allocation4 + $0x1f8] sm:$0xf] %v12514_v39  ;;  %5828 = vst [vmem:[#allocation4 + $0x180] sm:$0xf] %v12514_v39  ;;  %v4874_v15 = vld [vmem:[#allocation3 + $0x74] sm:$0x1]  ;;  %v4661_v46 = vor.u32 %v4659_v59, %v4658_v13 }
 0x300   : > { %v4665_v28 = vshrl.u32 %v9011_v44, 16  ;;  %v4668_v19 = vshll.u32 %v9011_v44, 16  ;;  %v4663_v29 = vrot.slane %v4658_v13, 4  ;;  %v4644_v27 = vor.u32 %v4642_v6, %v4641_v20  ;;  %v4891_v4 = vld [vmem:[#allocation3 + $0x90] sm:$0xf]  ;;  %v10546_v33 = vld [vmem:[#allocation10 + $0x148] sm:$0xff]  }
 0x301   : > { %v4646_v26 = vrot.slane %v4641_v20, 4  ;;  %v12527_v14 = vld [vmem:[#allocation3 + $0x58] sm:$0xf]  ;;  %v4687_v2 = vor.u32 %v4685_v17, %v12523_v42  ;;  %v4688_v5 = vrot.slane %v12523_v42, 4  ;;  %v5518_v41 = vsel %vm11102_vm11, %v8719_v51, %v5517_v24  ;;  %v4884_v6 = vld [vmem:[#allocation3 + $0x84] sm:$0xf]  ;;  %9732 = vmatprep.subr.bf16.mxu1 %v10546_v33 }
 0x302   : > { %v12531_v34 = vrot.slane %v4665_v28, 7  ;;  %4995 = vst [vmem:[#allocation4 + $0x21c] sm:$0xf] %v12527_v14  ;;  %5697 = vst [vmem:[#allocation4 + $0x1e0] sm:$0xf] %v12527_v14  ;;  %v4662_v23 = vsel %vm11132_vm13, %v4654_v0, %v4661_v46  ;;  %v4882_v10 = vsel %vm11082_vm9, %v4663_v29, %v4881_v50  ;;  %v4645_v59 = vsel %vm11132_vm13, %v4637_v58, %v4644_v27  ;;  %v10550_v17 = vld [vmem:[#allocation10 + $0x108] sm:$0xff]  }
 0x303   : > { %5829 = vst [vmem:[#allocation4 + $0x1a4] sm:$0xf] %v12527_v14  ;;  %v4875_v51 = vsel %vm11082_vm9, %v4646_v26, %v4874_v15  ;;  %5654 = vst [vmem:[#allocation4 + $0x50] sm:$0xf] %v5518_v41  ;;  %v4892_v63 = vsel %vm11149_vm14, %v4687_v2, %v4891_v4  ;;  %v5519_v44 = vrot.slane %v5517_v24, 4  ;;  %v4389_v50 = vmax.f32 %v4331_v12, 0.0  ;;  %9733 = vmatpush3.bf16.msra.mxu1 %v10550_v17  ;;  %v10011_v26 = vpop.f32.mrf.mxu0 }
 0x304   : > { %5786 = vst [vmem:[#allocation4 + $0x14] sm:$0xf] %v5518_v41  ;;  %4880 = vst [vmem:[#allocation3 + $0x7c] sm:$0xf] %v4662_v23  ;;  %v4670_v0 = vor.u32 %v4668_v19, %v12531_v34  ;;  %v4671_v58 = vrot.slane %v12531_v34, 4  ;;  %v4323_v20 = vadd.f32 %v12495_v49, %v12309_v43  ;;  %v5037_v15 = vshrl.u32 %v12371_v56, 16 }
 0x305   : > { %4883 = vst [vmem:[#allocation3 + $0x80] sm:$0x1] %v4882_v10  ;;  %4873 = vst [vmem:[#allocation3 + $0x70] sm:$0xf] %v4645_v59  ;;  %v12552_v13 = vld [vmem:[#allocation3 + $0x78] sm:$0xf]  ;;  %v5521_v19 = vsel %vm11102_vm11, %v5519_v44, %v5520_v16 }
 0x306   : > { %4876 = vst [vmem:[#allocation3 + $0x74] sm:$0x1] %v4875_v51  ;;  %4893 = vst [vmem:[#allocation3 + $0x90] sm:$0xf] %v4892_v63  ;;  %v5040_v28 = vshll.u32 %v12371_v56, 16  ;;  %v4885_v24 = vsel %vm11149_vm14, %v4670_v0, %v4884_v6  ;;  %v5046_v43 = vshll.u32 %v12386_v48, 16  ;;  %v9014_v56 = vpack.c.bf16 %v4389_v50, %v4389_v50 }
 0x307   : > { %v12558_v46 = vld [vmem:[#allocation3 + $0x6c] sm:$0xf]  ;;  %5702 = vst [vmem:[#allocation4 + $0x294] sm:$0xf] %v12552_v13  ;;  %5000 = vst [vmem:[#allocation4 + $0x2d0] sm:$0xf] %v12552_v13 }
 0x308   : > { %5834 = vst [vmem:[#allocation4 + $0x258] sm:$0xf] %v12552_v13  ;;  %v5050_v49 = vshrl.u32 %v12386_v48, 16  ;;  %5700 = vst [vmem:[#allocation4 + $0x24c] sm:$0xf] %v12558_v46  ;;  %v4387_v12 = vmax.f32 %v4323_v20, 0.0  ;;  %v4344_v48 = vadd.f32 %v12518_v31, %v12319_v3  ;;  %v12581_v3 = vadd.f32 %v4335_v60, %v12322_v25 }
 0x309   : > { %4998 = vst [vmem:[#allocation4 + $0x288] sm:$0xf] %v12558_v46  ;;  %5832 = vst [vmem:[#allocation4 + $0x210] sm:$0xf] %v12558_v46  ;;  %v5039_v29 = vrot.slane %v5037_v15, 4  ;;  %v5042_v27 = vrot.slane %v5040_v28, 5  ;;  %v12584_v31 = vadd.f32 %v10011_v26, %v12328_v30  ;;  %v4338_v28 = vpop.f32.mrf.mxu0 }
 0x30a   : > { %4886 = vst [vmem:[#allocation3 + $0x84] sm:$0xf] %v4885_v24  ;;  %5655 = vst [vmem:[#allocation4 + $0x74] sm:$0xf] %v5521_v19  ;;  %v5048_v4 = vrot.slane %v5046_v43, 5  ;;  %v5052_v16 = vrot.slane %v5050_v49, 4  ;;  %v9012_v23 = vpack.c.bf16 %v4387_v12, %v4387_v12 }
 0x30b   : > { %5787 = vst [vmem:[#allocation4 + $0x38] sm:$0xf] %v5521_v19  ;;  %v5056_v33 = vshll.u32 %v12499_v55, 16  ;;  %v4690_v2 = vshrl.u32 %v9014_v56, 16  ;;  %v4693_v41 = vshll.u32 %v9014_v56, 16  ;;  %v5043_v10 = vor.u32 %v5042_v27, %v5039_v29  ;;  %v10557_v0 = vld [vmem:[#allocation10 + $0x1e0] sm:$0xff]  }
 0x30c   : > { %v4895_v59 = vld [vmem:[#allocation3 + $0x98] sm:$0x1]  ;;  %v5053_v51 = vor.u32 %v5052_v16, %v5048_v4  ;;  %v4392_v17 = vmax.f32 %v4344_v48, 0.0  ;;  %v8720_v63 = vrot.slane %v12362_v62, 9  ;;  %v12576_v50 = vld [vmem:[#allocation3 + $0x7c] sm:$0xf]  ;;  %9838 = vmatprep.subr.bf16.mxu0 %v10557_v0 }
 0x30d   : > { %v5058_v6 = vrot.slane %v5056_v33, 5  ;;  %v10558_v44 = vld [vmem:[#allocation10 + $0x1a0] sm:$0xff]   ;;  %v12578_v20 = vld [vmem:[#allocation3 + $0x70] sm:$0xf]  ;;  %v4692_v55 = vrot.slane %v4690_v2, 7  ;;  %v4673_v15 = vshrl.u32 %v9012_v23, 16 }
 0x30e   : > { %5001 = vst [vmem:[#allocation4 + $0x2f4] sm:$0xf] %v12576_v50  ;;  %5703 = vst [vmem:[#allocation4 + $0x2b8] sm:$0xf] %v12576_v50  ;;  %v4676_v24 = vshll.u32 %v9012_v23, 16  ;;  %v5044_v25 = vrot.slane %v5043_v10, 4  ;;  %v9017_v43 = vpack.c.bf16 %v4392_v17, %v4392_v17  ;;  %9839 = vmatpush3.bf16.msra.mxu0 %v10558_v44  ;;  %v12600_v10 = vadd.f32 %v4338_v28, %v12325_v61 }
 0x30f   : > { %5835 = vst [vmem:[#allocation4 + $0x27c] sm:$0xf] %v12576_v50  ;;  %4999 = vst [vmem:[#allocation4 + $0x2ac] sm:$0xf] %v12578_v20  ;;  %v4888_v19 = vld [vmem:[#allocation3 + $0x8c] sm:$0x1]  ;;  %v4695_v49 = vor.u32 %v4693_v41, %v4692_v55 }
 0x310   : > { %5701 = vst [vmem:[#allocation4 + $0x270] sm:$0xf] %v12578_v20  ;;  %5833 = vst [vmem:[#allocation4 + $0x234] sm:$0xf] %v12578_v20  ;;  %v5054_v60 = vrot.slane %v5053_v51, 4  ;;  %v10559_v30 = vld [vmem:[#allocation10 + $0x1d8] sm:$0xff]   ;;  %v5049_v48 = vsel %vm11090_vm10, %v5044_v25, %v5048_v4 }
 0x311   : > { %v4697_v56 = vrot.slane %v4692_v55, 4  ;;  %v4675_v12 = vrot.slane %v4673_v15, 7  ;;  %v12592_v29 = vld [vmem:[#allocation3 + $0x20] sm:$0x1]  ;;  %v5524_v27 = vrot.slane %v12375_v7, 5  ;;  %v4716_v23 = vshrl.u32 %v9017_v43, 16  ;;  %9840 = vmatprep.subr.bf16.mxu0 %v10559_v30 }
 0x312   : > { %v10455_v26 = vld [vmem:[#allocation4 + $0x50] ss:$36 sps:$4 sm:$0xff]   ;;  %v5059_v2 = vsel %vm11090_vm10, %v5054_v60, %v5058_v6  ;;  %v4696_v41 = vsel %vm11132_vm13, %v4688_v5, %v4695_v49  ;;  %5430 = vst [vmem:[#allocation4 + $0x4c] sm:$0xf] %v5049_v48  ;;  %5742 = vst [vmem:[#allocation4 + $0x10] sm:$0xf] %v5049_v48 }
 0x313   : > { %v10457_v16 = vld [vmem:[#allocation4 + $0x54] ss:$36 sps:$4 sm:$0xff]   ;;  %v4896_v51 = vsel %vm11082_vm9, %v4697_v56, %v4895_v59  ;;  %v4678_v17 = vor.u32 %v4676_v24, %v4675_v12  ;;  %v4680_v0 = vrot.slane %v4675_v12, 4  ;;  %5431 = vst [vmem:[#allocation4 + $0x70] sm:$0xf] %v5059_v2  ;;  %v12612_v61 = vrot.slane %v4716_v23, 7 }
 0x314   : > { %5743 = vst [vmem:[#allocation4 + $0x34] sm:$0xf] %v5059_v2  ;;  %v12608_v4 = vld [vmem:[#allocation3 + $0x84] sm:$0xf]  ;;  %v12610_v6 = vld [vmem:[#allocation3 + $0x90] sm:$0xf]  ;;  %7632 = vmatprep.mubr.bf16.mxu0 %v10457_v16  ;;  %v5525_v5 = vsel %vm11102_vm11, %v8720_v63, %v5524_v27 }
 0x315   : > { %4894 = vst [vmem:[#allocation3 + $0x94] sm:$0xf] %v4696_v41  ;;  %4897 = vst [vmem:[#allocation3 + $0x98] sm:$0x1] %v4896_v51  ;;  %v4719_v42 = vshll.u32 %v9017_v43, 16  ;;  %v5526_v59 = vrot.slane %v5524_v27, 4  ;;  %v4679_v44 = vsel %vm11132_vm13, %v4671_v58, %v4678_v17  ;;  %v4889_v63 = vsel %vm11082_vm9, %v4680_v0, %v4888_v19  ;;  %7633 = vmatmul.mubr.bf16.gmra.mxu0 %v10455_v26  ;;  %v10014_v26 = vpop.f32.mrf.mxu0 }
 0x316   : > { %5704 = vst [vmem:[#allocation4 + $0x2dc] sm:$0xf] %v12608_v4  ;;  %5002 = vst [vmem:[#allocation4 + $0x318] sm:$0xf] %v12608_v4  ;;  %v4905_v55 = vld [vmem:[#allocation3 + $0xa8] sm:$0xf] }
 0x317   : > { %5836 = vst [vmem:[#allocation4 + $0x2a0] sm:$0xf] %v12608_v4  ;;  %5706 = vst [vmem:[#allocation4 + $0x324] sm:$0xf] %v12610_v6  ;;  %v5527_v15 = vrot.slane %v12592_v29, 5  ;;  %v5061_v28 = vshrl.u32 %v12362_v62, 16  ;;  %v4721_v34 = vor.u32 %v4719_v42, %v12612_v61 }
 0x318   : > { %5004 = vst [vmem:[#allocation4 + $0x360] sm:$0xf] %v12610_v6  ;;  %5838 = vst [vmem:[#allocation4 + $0x2e8] sm:$0xf] %v12610_v6  ;;  %v10563_v24 = vld [vmem:[#allocation10 + $0x140] sm:$0xff]   ;;  %v10564_v25 = vld [vmem:[#allocation10 + $0x198] sm:$0xff]  }
 0x319   : > { %5656 = vst [vmem:[#allocation4 + $0x98] sm:$0xf] %v5525_v5  ;;  %5788 = vst [vmem:[#allocation4 + $0x5c] sm:$0xf] %v5525_v5  ;;  %v4722_v58 = vrot.slane %v12612_v61, 4  ;;  %v5064_v60 = vshll.u32 %v12362_v62, 16  ;;  %v5528_v49 = vsel %vm11102_vm11, %v5526_v59, %v5527_v15  ;;  %9734 = vmatprep.subr.bf16.mxu1 %v10563_v24  ;;  %9841 = vmatpush3.bf16.msra.mxu0 %v10564_v25 }
 0x31a   : > { %5920 = vst [vmem:[#allocation4 + $0x20] sm:$0xf] %v5525_v5  ;;  %4887 = vst [vmem:[#allocation3 + $0x88] sm:$0xf] %v4679_v44  ;;  %v5070_v19 = vshll.u32 %v12375_v7, 16  ;;  %v10568_v43 = vld [vmem:[#allocation10 + $0x100] sm:$0xff]   ;;  %v4906_v48 = vsel %vm11149_vm14, %v4721_v34, %v4905_v55  ;;  %v4360_v59 = vadd.f32 %v10014_v26, %v12331_v18  ;;  %v4351_v34 = vpop.f32.mrf.mxu0 }
 0x31b   : > { %4890 = vst [vmem:[#allocation3 + $0x8c] sm:$0x1] %v4889_v63  ;;  %v10569_v30 = vld [vmem:[#allocation10 + $0x1d0] sm:$0xff]   ;;  %v5063_v56 = vrot.slane %v5061_v28, 4  ;;  %v5074_v12 = vshrl.u32 %v12375_v7, 16  ;;  %v5080_v27 = vshll.u32 %v12592_v29, 16  ;;  %9735 = vmatpush3.bf16.msra.mxu1 %v10568_v43 }
 0x31c   : > { %v10570_v16 = vld [vmem:[#allocation10 + $0x190] sm:$0xff]   ;;  %5657 = vst [vmem:[#allocation4 + $0xbc] sm:$0xf] %v5528_v49  ;;  %5789 = vst [vmem:[#allocation4 + $0x80] sm:$0xf] %v5528_v49  ;;  %v5066_v62 = vrot.slane %v5064_v60, 5  ;;  %9842 = vmatprep.subr.bf16.mxu0 %v10569_v30 }
 0x31d   : > { %5921 = vst [vmem:[#allocation4 + $0x44] sm:$0xf] %v5528_v49  ;;  %v5072_v2 = vrot.slane %v5070_v19, 5  ;;  %v4390_v23 = vmax.f32 %v12581_v3, 0.0  ;;  %v10571_v41 = vld [vmem:[#allocation10 + $0x1c8] sm:$0xff]   ;;  %v5076_v7 = vrot.slane %v5074_v12, 4  ;;  %9843 = vmatpush3.bf16.msra.mxu0 %v10570_v16 }
 0x31e   : > { %4907 = vst [vmem:[#allocation3 + $0xa8] sm:$0xf] %v4906_v48  ;;  %v5082_v29 = vrot.slane %v5080_v27, 5  ;;  %v4393_v51 = vmax.f32 %v12584_v31, 0.0  ;;  %v4391_v17 = vmax.f32 %v12600_v10, 0.0  ;;  %v5067_v42 = vor.u32 %v5066_v62, %v5063_v56  ;;  %9844 = vmatprep.subr.bf16.mxu0 %v10571_v41 }
 0x31f   : > { %v10458_v0 = vld [vmem:[#allocation4 + $0x48] ss:$36 sps:$4 sm:$0xff]   ;;  %v9015_v5 = vpack.c.bf16 %v4390_v23, %v4390_v23  ;;  %v8721_v44 = vrot.slane %v12409_v37, 9  ;;  %v12645_v63 = vld [vmem:[#allocation3 + $0x94] sm:$0xf]  ;;  %v5077_v55 = vor.u32 %v5076_v7, %v5072_v2  ;;  %v5531_v24 = vrot.slane %v12429_v22, 5 }
 0x320   : > { %v10460_v3 = vld [vmem:[#allocation4 + $0x4c] ss:$36 sps:$4 sm:$0xff]   ;;  %v9018_v15 = vpack.c.bf16 %v4393_v51, %v4393_v51  ;;  %v12647_v28 = vpack.c.bf16 %v4391_v17, %v4391_v17  ;;  %5005 = vst [vmem:[#allocation4 + $0x384] sm:$0xf] %v12645_v63  ;;  %5707 = vst [vmem:[#allocation4 + $0x348] sm:$0xf] %v12645_v63 }
 0x321   : > { %5839 = vst [vmem:[#allocation4 + $0x30c] sm:$0xf] %v12645_v63  ;;  %v5068_v31 = vrot.slane %v5067_v42, 4  ;;  %v4699_v18 = vshrl.u32 %v9015_v5, 16  ;;  %v4702_v10 = vshll.u32 %v9015_v5, 16  ;;  %v4396_v25 = vmax.f32 %v4360_v59, 0.0  ;;  %7471 = vmatprep.mubr.bf16.mxu1 %v10460_v3 }
 0x322   : > { %v12653_v60 = vld [vmem:[#allocation3 + $0x88] sm:$0xf]  ;;  %v5078_v19 = vrot.slane %v5077_v55, 4  ;;  %v4898_v43 = vld [vmem:[#allocation3 + $0x9c] sm:$0xf]  ;;  %v4724_v30 = vshrl.u32 %v9018_v15, 16  ;;  %7472 = vmatmul.mubr.bf16.gmra.mxu1 %v10458_v0  ;;  %v5532_v17 = vsel %vm11102_vm11, %v8721_v44, %v5531_v24 }
 0x323   : > { %v4727_v49 = vshll.u32 %v9018_v15, 16  ;;  %v4707_v56 = vshrl.u32 %v12647_v28, 16  ;;  %5003 = vst [vmem:[#allocation4 + $0x33c] sm:$0xf] %v12653_v60  ;;  %5705 = vst [vmem:[#allocation4 + $0x300] sm:$0xf] %v12653_v60  ;;  %v5073_v12 = vsel %vm11090_vm10, %v5068_v31, %v5072_v2  ;;  %v9021_v48 = vpack.c.bf16 %v4396_v25, %v4396_v25 }
 0x324   : > { %5837 = vst [vmem:[#allocation4 + $0x2c4] sm:$0xf] %v12653_v60  ;;  %v4701_v27 = vrot.slane %v4699_v18, 7  ;;  %v4909_v26 = vld [vmem:[#allocation3 + $0xb0] sm:$0x1]  ;;  %v4710_v16 = vshll.u32 %v12647_v28, 16  ;;  %v5083_v7 = vsel %vm11090_vm10, %v5078_v19, %v5082_v29  ;;  %v12669_v2 = vadd.f32 %v4351_v34, %v12334_v53  ;;  %v10015_v29 = vpop.f32.mrf.mxu0 }
 0x325   : > { %v12662_v62 = vld [vmem:[#allocation3 + $0x2c] sm:$0x1]  ;;  %v10461_v23 = vld [vmem:[#allocation4 + $0x98] ss:$36 sps:$4 sm:$0xff]   ;;  %5432 = vst [vmem:[#allocation4 + $0x94] sm:$0xf] %v5073_v12 }
 0x326   : > { %v10463_v41 = vld [vmem:[#allocation4 + $0x9c] ss:$36 sps:$4 sm:$0xff]   ;;  %5744 = vst [vmem:[#allocation4 + $0x58] sm:$0xf] %v5073_v12  ;;  %5876 = vst [vmem:[#allocation4 + $0x1c] sm:$0xf] %v5073_v12  ;;  %v4704_v0 = vor.u32 %v4702_v10, %v4701_v27 }
 0x327   : > { %v4726_v51 = vrot.slane %v4724_v30, 7  ;;  %5433 = vst [vmem:[#allocation4 + $0xb8] sm:$0xf] %v5083_v7  ;;  %5745 = vst [vmem:[#allocation4 + $0x7c] sm:$0xf] %v5083_v7  ;;  %v4705_v42 = vrot.slane %v4701_v27, 4  ;;  %7640 = vmatprep.mubr.bf16.mxu0 %v10463_v41 }
 0x328   : > { %5877 = vst [vmem:[#allocation4 + $0x40] sm:$0xf] %v5083_v7  ;;  %v4709_v5 = vrot.slane %v4707_v56, 7  ;;  %v4750_v59 = vshrl.u32 %v9021_v48, 16  ;;  %5658 = vst [vmem:[#allocation4 + $0xe0] sm:$0xf] %v5532_v17  ;;  %v4899_v10 = vsel %vm11149_vm14, %v4704_v0, %v4898_v43  ;;  %7641 = vmatmul.mubr.bf16.gmra.mxu0 %v10461_v23 }
 0x329   : > { %5922 = vst [vmem:[#allocation4 + $0x68] sm:$0xf] %v5532_v17  ;;  %5790 = vst [vmem:[#allocation4 + $0xa4] sm:$0xf] %v5532_v17  ;;  %v12671_v3 = vld [vmem:[#allocation3 + $0xa8] sm:$0xf]  ;;  %v4729_v15 = vor.u32 %v4727_v49, %v4726_v51 }
 0x32a   : > { %v10572_v55 = vld [vmem:[#allocation10 + $0x188] sm:$0xff]   ;;  %v4731_v44 = vrot.slane %v4726_v51, 4  ;;  %v4753_v53 = vshll.u32 %v9021_v48, 16  ;;  %v5533_v31 = vrot.slane %v5531_v24, 4  ;;  %5710 = vst [vmem:[#allocation4 + $0x3b4] sm:$0xf] %v12671_v3  ;;  %v4712_v25 = vor.u32 %v4710_v16, %v4709_v5  ;;  %v4354_v48 = vpop.f32.mrf.mxu0 }
 0x32b   : > { %v4902_v28 = vld [vmem:[#allocation3 + $0xa4] sm:$0x1]  ;;  %5008 = vst [vmem:[#allocation4 + $0x3f0] sm:$0xf] %v12671_v3  ;;  %5842 = vst [vmem:[#allocation4 + $0x378] sm:$0xf] %v12671_v3  ;;  %v4730_v24 = vsel %vm11132_vm13, %v4722_v58, %v4729_v15  ;;  %9845 = vmatpush3.bf16.msra.mxu0 %v10572_v55  ;;  %v4202_v58 = vadd.f32 %v12339_v35, %v12286_v9  ;;  %v4355_v55 = vadd.f32 %v4354_v48, %v12337_v1 }
 0x32c   : > { %v10579_v18 = vld [vmem:[#allocation10 + $0x1c0] sm:$0xff]   ;;  %v4714_v34 = vrot.slane %v4709_v5, 4  ;;  %v12678_v19 = vrot.slane %v4750_v59, 7  ;;  %v4919_v30 = vld [vmem:[#allocation3 + $0xc0] sm:$0xf]  ;;  %v4910_v56 = vsel %vm11082_vm9, %v4731_v44, %v4909_v26  ;;  %v5534_v12 = vrot.slane %v12662_v62, 5 }
 0x32d   : > { %v10580_v49 = vld [vmem:[#allocation10 + $0x180] sm:$0xff]   ;;  %4900 = vst [vmem:[#allocation3 + $0x9c] sm:$0xf] %v4899_v10  ;;  %v5085_v43 = vshrl.u32 %v12409_v37, 16  ;;  %4908 = vst [vmem:[#allocation3 + $0xac] sm:$0xf] %v4730_v24  ;;  %v4713_v27 = vsel %vm11132_vm13, %v4705_v42, %v4712_v25  ;;  %9846 = vmatprep.subr.bf16.mxu0 %v10579_v18 }
 0x32e   : > { %4911 = vst [vmem:[#allocation3 + $0xb0] sm:$0x1] %v4910_v56  ;;  %v4903_v16 = vsel %vm11082_vm9, %v4714_v34, %v4902_v28  ;;  %v4755_v61 = vor.u32 %v4753_v53, %v12678_v19  ;;  %4901 = vst [vmem:[#allocation3 + $0xa0] sm:$0xf] %v4713_v27  ;;  %v5535_v26 = vsel %vm11102_vm11, %v5533_v31, %v5534_v12  ;;  %v5088_v41 = vshll.u32 %v12409_v37, 16  ;;  %v10584_v51 = vld [vmem:[#allocation10 + $0x238] sm:$0xff]  }
 0x32f   : > { %4904 = vst [vmem:[#allocation3 + $0xa4] sm:$0x1] %v4903_v16  ;;  %v5087_v23 = vrot.slane %v5085_v43, 4  ;;  %v5094_v7 = vshll.u32 %v12429_v22, 16  ;;  %5659 = vst [vmem:[#allocation4 + $0x104] sm:$0xf] %v5535_v26  ;;  %v4363_v37 = vadd.f32 %v10015_v29, %v4202_v58  ;;  %9847 = vmatpush3.bf16.msra.mxu0 %v10580_v49  ;;  %10016 = vmatprep.subr.bf16.mxu1 %v10584_v51 }
 0x330   : > { %v4920_v17 = vsel %vm11149_vm14, %v4755_v61, %v4919_v30  ;;  %5923 = vst [vmem:[#allocation4 + $0x8c] sm:$0xf] %v5535_v26  ;;  %5791 = vst [vmem:[#allocation4 + $0xc8] sm:$0xf] %v5535_v26  ;;  %v5098_v9 = vshrl.u32 %v12429_v22, 16  ;;  %v5104_v35 = vshll.u32 %v12662_v62, 16 }
 0x331   : > { %v4394_v0 = vmax.f32 %v12669_v2, 0.0  ;;  %v10464_v42 = vld [vmem:[#allocation4 + $0x90] ss:$36 sps:$4 sm:$0xff]   ;;  %4921 = vst [vmem:[#allocation3 + $0xc0] sm:$0xf] %v4920_v17  ;;  %v5090_v59 = vrot.slane %v5088_v41, 5 }
 0x332   : > { %v10466_v5 = vld [vmem:[#allocation4 + $0x94] ss:$36 sps:$4 sm:$0xff]   ;;  %v5096_v15 = vrot.slane %v5094_v7, 5  ;;  %v5100_v44 = vrot.slane %v5098_v9, 4  ;;  %v5106_v31 = vrot.slane %v5104_v35, 5  ;;  %v4397_v22 = vmax.f32 %v4363_v37, 0.0 }
 0x333   : > { %v9019_v28 = vpack.c.bf16 %v4394_v0, %v4394_v0  ;;  %7479 = vmatprep.mubr.bf16.mxu1 %v10466_v5  ;;  %v5091_v53 = vor.u32 %v5090_v59, %v5087_v23  ;;  %v4395_v18 = vmax.f32 %v4355_v55, 0.0  ;;  %v12705_v62 = vld [vmem:[#allocation3 + $0x38] sm:$0x1]  ;;  %v8722_v25 = vrot.slane %v12397_v40, 9  ;;  %v4912_v24 = vld [vmem:[#allocation3 + $0xb4] sm:$0xf] }
 0x334   : > { %7480 = vmatmul.mubr.bf16.gmra.mxu1 %v10464_v42  ;;  %v5101_v2 = vor.u32 %v5100_v44, %v5096_v15  ;;  %v5538_v29 = vrot.slane %v12419_v11, 5  ;;  %v12709_v1 = vld [vmem:[#allocation3 + $0x9c] sm:$0xf]  ;;  %v12711_v34 = vld [vmem:[#allocation3 + $0xac] sm:$0xf]  ;;  %v9022_v56 = vpack.c.bf16 %v4397_v22, %v4397_v22  ;;  %v4756_v48 = vrot.slane %v12678_v19, 4 }
 0x335   : > { %v4733_v10 = vshrl.u32 %v9019_v28, 16  ;;  %v5092_v30 = vrot.slane %v5091_v53, 4  ;;  %v4736_v49 = vshll.u32 %v9019_v28, 16  ;;  %v12713_v12 = vpack.c.bf16 %v4395_v18, %v4395_v18  ;;  %5708 = vst [vmem:[#allocation4 + $0x36c] sm:$0xf] %v12709_v1 }
 0x336   : > { %5006 = vst [vmem:[#allocation4 + $0x3a8] sm:$0xf] %v12709_v1  ;;  %5840 = vst [vmem:[#allocation4 + $0x330] sm:$0xf] %v12709_v1  ;;  %v12721_v43 = vld [vmem:[#allocation3 + $0xa0] sm:$0xf]  ;;  %v5539_v61 = vsel %vm11102_vm11, %v8722_v25, %v5538_v29 }
 0x337   : > { %5009 = vst [vmem:[#allocation4 + $0x414] sm:$0xf] %v12711_v34  ;;  %5711 = vst [vmem:[#allocation4 + $0x3d8] sm:$0xf] %v12711_v34  ;;  %v5102_v27 = vrot.slane %v5101_v2, 4  ;;  %v12723_v16 = vrot.slane %v4733_v10, 7  ;;  %v5097_v23 = vsel %vm11090_vm10, %v5092_v30, %v5096_v15 }
 0x338   : > { %5843 = vst [vmem:[#allocation4 + $0x39c] sm:$0xf] %v12711_v34  ;;  %v5540_v58 = vrot.slane %v5538_v29, 4  ;;  %5007 = vst [vmem:[#allocation4 + $0x3cc] sm:$0xf] %v12721_v43  ;;  %v4758_v41 = vshrl.u32 %v9022_v56, 16 }
 0x339   : > { %5709 = vst [vmem:[#allocation4 + $0x390] sm:$0xf] %v12721_v43  ;;  %5841 = vst [vmem:[#allocation4 + $0x354] sm:$0xf] %v12721_v43  ;;  %v10469_v26 = vld [vmem:[#allocation4 + $0xe4] ss:$36 sps:$4 sm:$0xff]   ;;  %v5107_v17 = vsel %vm11090_vm10, %v5102_v27, %v5106_v31  ;;  %v4738_v9 = vor.u32 %v4736_v49, %v12723_v16 }
 0x33a   : > { %v5541_v7 = vrot.slane %v12705_v62, 5  ;;  %5660 = vst [vmem:[#allocation4 + $0x128] sm:$0xf] %v5539_v61  ;;  %5792 = vst [vmem:[#allocation4 + $0xec] sm:$0xf] %v5539_v61  ;;  %v4739_v19 = vrot.slane %v12723_v16, 4  ;;  %7648 = vmatprep.mubr.bf16.mxu0 %v10469_v26 }
 0x33b   : > { %5924 = vst [vmem:[#allocation4 + $0xb0] sm:$0xf] %v5539_v61  ;;  %v10467_v51 = vld [vmem:[#allocation4 + $0xe0] ss:$36 sps:$4 sm:$0xff]   ;;  %5434 = vst [vmem:[#allocation4 + $0xdc] sm:$0xf] %v5097_v23  ;;  %v4913_v15 = vsel %vm11149_vm14, %v4738_v9, %v4912_v24 }
 0x33c   : > { %5746 = vst [vmem:[#allocation4 + $0xa0] sm:$0xf] %v5097_v23  ;;  %5878 = vst [vmem:[#allocation4 + $0x64] sm:$0xf] %v5097_v23  ;;  %v4761_v35 = vshll.u32 %v9022_v56, 16  ;;  %v4760_v42 = vrot.slane %v4758_v41, 7  ;;  %v5542_v55 = vsel %vm11102_vm11, %v5540_v58, %v5541_v7  ;;  %7649 = vmatmul.mubr.bf16.gmra.mxu0 %v10467_v51 }
 0x33d   : > { %v12738_v0 = vld [vmem:[#allocation3 + $0xc0] sm:$0xf]  ;;  %5435 = vst [vmem:[#allocation4 + $0x100] sm:$0xf] %v5107_v17  ;;  %5747 = vst [vmem:[#allocation4 + $0xc4] sm:$0xf] %v5107_v17 }
 0x33e   : > { %5879 = vst [vmem:[#allocation4 + $0x88] sm:$0xf] %v5107_v17  ;;  %v4923_v5 = vld [vmem:[#allocation3 + $0xc8] sm:$0x1]  ;;  %v4741_v59 = vshrl.u32 %v12713_v12, 16  ;;  %v4744_v37 = vshll.u32 %v12713_v12, 16  ;;  %v4763_v22 = vor.u32 %v4761_v35, %v4760_v42 }
 0x33f   : > { %5714 = vst [vmem:[#allocation4 + $0x444] sm:$0xf] %v12738_v0  ;;  %5846 = vst [vmem:[#allocation4 + $0x408] sm:$0xf] %v12738_v0  ;;  %v4916_v44 = vld [vmem:[#allocation3 + $0xbc] sm:$0x1] }
 0x340   : > { %5661 = vst [vmem:[#allocation4 + $0x14c] sm:$0xf] %v5542_v55  ;;  %5793 = vst [vmem:[#allocation4 + $0x110] sm:$0xf] %v5542_v55  ;;  %v5109_v28 = vshrl.u32 %v12397_v40, 16  ;;  %v5112_v53 = vshll.u32 %v12397_v40, 16  ;;  %v4764_v24 = vsel %vm11132_vm13, %v4756_v48, %v4763_v22 }
 0x341   : > { %5925 = vst [vmem:[#allocation4 + $0xd4] sm:$0xf] %v5542_v55  ;;  %v5118_v31 = vshll.u32 %v12419_v11, 16  ;;  %4914 = vst [vmem:[#allocation3 + $0xb4] sm:$0xf] %v4913_v15  ;;  %v4765_v18 = vrot.slane %v4760_v42, 4 }
 0x342   : > { %v4743_v2 = vrot.slane %v4741_v59, 7  ;;  %v5122_v10 = vshrl.u32 %v12419_v11, 16  ;;  %v12752_v25 = vld [vmem:[#allocation3 + $0x44] sm:$0x1]  ;;  %v5111_v32 = vrot.slane %v5109_v28, 4  ;;  %v5114_v29 = vrot.slane %v5112_v53, 5 }
 0x343   : > { %v5120_v30 = vrot.slane %v5118_v31, 5  ;;  %v5128_v49 = vshll.u32 %v12705_v62, 16  ;;  %v4924_v40 = vsel %vm11082_vm9, %v4765_v18, %v4923_v5  ;;  %4922 = vst [vmem:[#allocation3 + $0xc4] sm:$0xf] %v4764_v24  ;;  %v8723_v61 = vrot.slane %v12454_v57, 9 }
 0x344   : > { %v4746_v56 = vor.u32 %v4744_v37, %v4743_v2  ;;  %v4748_v12 = vrot.slane %v4743_v2, 4  ;;  %4925 = vst [vmem:[#allocation3 + $0xc8] sm:$0x1] %v4924_v40  ;;  %v5115_v27 = vor.u32 %v5114_v29, %v5111_v32  ;;  %v5124_v16 = vrot.slane %v5122_v10, 4  ;;  %v10471_v23 = vld [vmem:[#allocation4 + $0xd8] ss:$36 sps:$4 sm:$0xff]  }
 0x345   : > { %v5130_v11 = vrot.slane %v5128_v49, 5  ;;  %v5545_v48 = vrot.slane %v12482_v8, 5  ;;  %v5548_v26 = vrot.slane %v12752_v25, 5  ;;  %v10473_v41 = vld [vmem:[#allocation4 + $0xdc] ss:$36 sps:$4 sm:$0xff]   ;;  %v5133_v42 = vshrl.u32 %v12454_v57, 16 }
 0x346   : > { %v4747_v58 = vsel %vm11132_vm13, %v4739_v19, %v4746_v56  ;;  %v4917_v62 = vsel %vm11082_vm9, %v4748_v12, %v4916_v44  ;;  %v5116_v7 = vrot.slane %v5115_v27, 4  ;;  %v5125_v51 = vor.u32 %v5124_v16, %v5120_v30  ;;  %v10477_v9 = vld [vmem:[#allocation4 + $0x12c] ss:$36 sps:$4 sm:$0xff]   ;;  %7487 = vmatprep.mubr.bf16.mxu1 %v10473_v41  ;;  %v4946_v28 = vld [vmem:[#allocation3 + $0x50] sm:$0x1] }
 0x347   : > { %4915 = vst [vmem:[#allocation3 + $0xb8] sm:$0xf] %v4747_v58  ;;  %4918 = vst [vmem:[#allocation3 + $0xbc] sm:$0x1] %v4917_v62  ;;  %v10475_v17 = vld [vmem:[#allocation4 + $0x128] ss:$36 sps:$4 sm:$0xff]   ;;  %v5546_v35 = vsel %vm11102_vm11, %v8723_v61, %v5545_v48  ;;  %7488 = vmatmul.mubr.bf16.gmra.mxu1 %v10471_v23  ;;  %7656 = vmatprep.mubr.bf16.mxu0 %v10477_v9 }
 0x348   : > { %v5547_v54 = vrot.slane %v5545_v48, 4  ;;  %v5121_v52 = vsel %vm11090_vm10, %v5116_v7, %v5120_v30  ;;  %v5126_v19 = vrot.slane %v5125_v51, 4  ;;  %5662 = vst [vmem:[#allocation4 + $0x170] sm:$0xf] %v5546_v35  ;;  %5794 = vst [vmem:[#allocation4 + $0x134] sm:$0xf] %v5546_v35  ;;  %7657 = vmatmul.mubr.bf16.gmra.mxu0 %v10475_v17 }
 0x349   : > { %5926 = vst [vmem:[#allocation4 + $0xf8] sm:$0xf] %v5546_v35  ;;  %v5136_v5 = vshll.u32 %v12454_v57, 16  ;;  %v12772_v59 = vld [vmem:[#allocation3 + $0xb4] sm:$0xf]  ;;  %v5142_v55 = vshll.u32 %v12482_v8, 16 }
 0x34a   : > { %5436 = vst [vmem:[#allocation4 + $0x124] sm:$0xf] %v5121_v52  ;;  %5748 = vst [vmem:[#allocation4 + $0xe8] sm:$0xf] %v5121_v52  ;;  %v5549_v37 = vsel %vm11102_vm11, %v5547_v54, %v5548_v26  ;;  %v5146_v15 = vshrl.u32 %v12482_v8, 16  ;;  %v5152_v44 = vshll.u32 %v12752_v25, 16  ;;  %v5131_v57 = vsel %vm11090_vm10, %v5126_v19, %v5130_v11 }
 0x34b   : > { %5880 = vst [vmem:[#allocation4 + $0xac] sm:$0xf] %v5121_v52  ;;  %5712 = vst [vmem:[#allocation4 + $0x3fc] sm:$0xf] %v12772_v59  ;;  %v5135_v53 = vrot.slane %v5133_v42, 4  ;;  %v5138_v31 = vrot.slane %v5136_v5, 5 }
 0x34c   : > { %5010 = vst [vmem:[#allocation4 + $0x438] sm:$0xf] %v12772_v59  ;;  %5844 = vst [vmem:[#allocation4 + $0x3c0] sm:$0xf] %v12772_v59  ;;  %v8724_v8 = vrot.slane %v12439_v21, 9  ;;  %v5144_v18 = vrot.slane %v5142_v55, 5 }
 0x34d   : > { %5663 = vst [vmem:[#allocation4 + $0x194] sm:$0xf] %v5549_v37  ;;  %5795 = vst [vmem:[#allocation4 + $0x158] sm:$0xf] %v5549_v37  ;;  %v12785_v22 = vld [vmem:[#allocation3 + $0xc4] sm:$0xf]  ;;  %v5139_v32 = vor.u32 %v5138_v31, %v5135_v53 }
 0x34e   : > { %5927 = vst [vmem:[#allocation4 + $0x11c] sm:$0xf] %v5549_v37  ;;  %5437 = vst [vmem:[#allocation4 + $0x148] sm:$0xf] %v5131_v57  ;;  %v5148_v2 = vrot.slane %v5146_v15, 4  ;;  %v5154_v10 = vrot.slane %v5152_v44, 5 }
 0x34f   : > { %5749 = vst [vmem:[#allocation4 + $0x10c] sm:$0xf] %v5131_v57  ;;  %5881 = vst [vmem:[#allocation4 + $0xd0] sm:$0xf] %v5131_v57  ;;  %v5552_v25 = vrot.slane %v12450_v36, 5  ;;  %v5555_v29 = vrot.slane %v4946_v28, 5 }
 0x350   : > { %5715 = vst [vmem:[#allocation4 + $0x468] sm:$0xf] %v12785_v22  ;;  %5847 = vst [vmem:[#allocation4 + $0x42c] sm:$0xf] %v12785_v22  ;;  %v5157_v30 = vshrl.u32 %v12439_v21, 16  ;;  %v5160_v49 = vshll.u32 %v12439_v21, 16  ;;  %v5149_v40 = vor.u32 %v5148_v2, %v5144_v18 }
 0x351   : > { %v12792_v24 = vld [vmem:[#allocation3 + $0xb8] sm:$0xf]  ;;  %v5553_v56 = vsel %vm11102_vm11, %v8724_v8, %v5552_v25  ;;  %v5554_v12 = vrot.slane %v5552_v25, 4  ;;  %v5166_v27 = vshll.u32 %v12450_v36, 16  ;;  %v5140_v16 = vrot.slane %v5139_v32, 4 }
 0x352   : > { %5011 = vst [vmem:[#allocation4 + $0x45c] sm:$0xf] %v12792_v24  ;;  %5713 = vst [vmem:[#allocation4 + $0x420] sm:$0xf] %v12792_v24  ;;  %v5159_v21 = vrot.slane %v5157_v30, 4  ;;  %v5162_v11 = vrot.slane %v5160_v49, 5 }
 0x353   : > { %5845 = vst [vmem:[#allocation4 + $0x3e4] sm:$0xf] %v12792_v24  ;;  %5664 = vst [vmem:[#allocation4 + $0x1b8] sm:$0xf] %v5553_v56  ;;  %v5170_v61 = vshrl.u32 %v12450_v36, 16  ;;  %v5150_v58 = vrot.slane %v5149_v40, 4  ;;  %v5556_v62 = vsel %vm11102_vm11, %v5554_v12, %v5555_v29  ;;  %v5145_v41 = vsel %vm11090_vm10, %v5140_v16, %v5144_v18 }
 0x354   : > { %5796 = vst [vmem:[#allocation4 + $0x17c] sm:$0xf] %v5553_v56  ;;  %5928 = vst [vmem:[#allocation4 + $0x140] sm:$0xf] %v5553_v56  ;;  %v5168_v48 = vrot.slane %v5166_v27, 5  ;;  %v5176_v26 = vshll.u32 %v4946_v28, 16  ;;  %v5163_v7 = vor.u32 %v5162_v11, %v5159_v21 }
 0x355   : > { %v12803_v23 = vld [vmem:[#allocation3 + $0x5c] sm:$0x1]  ;;  %5665 = vst [vmem:[#allocation4 + $0x1dc] sm:$0xf] %v5556_v62  ;;  %5797 = vst [vmem:[#allocation4 + $0x1a0] sm:$0xf] %v5556_v62  ;;  %v5155_v35 = vsel %vm11090_vm10, %v5150_v58, %v5154_v10 }
 0x356   : > { %5929 = vst [vmem:[#allocation4 + $0x164] sm:$0xf] %v5556_v62  ;;  %v5172_v51 = vrot.slane %v5170_v61, 4  ;;  %v8725_v17 = vrot.slane %v12514_v39, 9  ;;  %v10481_v9 = vld [vmem:[#allocation4 + $0x170] ss:$36 sps:$4 sm:$0xff]  }
 0x357   : > { %v10483_v36 = vld [vmem:[#allocation4 + $0x174] ss:$36 sps:$4 sm:$0xff]   ;;  %5438 = vst [vmem:[#allocation4 + $0x16c] sm:$0xf] %v5145_v41  ;;  %5750 = vst [vmem:[#allocation4 + $0x130] sm:$0xf] %v5145_v41 }
 0x358   : > { %5882 = vst [vmem:[#allocation4 + $0xf4] sm:$0xf] %v5145_v41  ;;  %v5178_v54 = vrot.slane %v5176_v26, 5  ;;  %v10478_v52 = vld [vmem:[#allocation4 + $0x120] ss:$36 sps:$4 sm:$0xff]   ;;  %v5164_v42 = vrot.slane %v5163_v7, 4  ;;  %v5173_v5 = vor.u32 %v5172_v51, %v5168_v48  ;;  %7664 = vmatprep.mubr.bf16.mxu0 %v10483_v36 }
 0x359   : > { %v10480_v19 = vld [vmem:[#allocation4 + $0x124] ss:$36 sps:$4 sm:$0xff]   ;;  %5439 = vst [vmem:[#allocation4 + $0x190] sm:$0xf] %v5155_v35  ;;  %5751 = vst [vmem:[#allocation4 + $0x154] sm:$0xf] %v5155_v35  ;;  %7665 = vmatmul.mubr.bf16.gmra.mxu0 %v10481_v9 }
 0x35a   : > { %5883 = vst [vmem:[#allocation4 + $0x118] sm:$0xf] %v5155_v35  ;;  %v5559_v37 = vrot.slane %v12527_v14, 5  ;;  %v5562_v55 = vrot.slane %v12803_v23, 5  ;;  %v5181_v15 = vshrl.u32 %v12514_v39, 16  ;;  %v5184_v44 = vshll.u32 %v12514_v39, 16  ;;  %7495 = vmatprep.mubr.bf16.mxu1 %v10480_v19 }
 0x35b   : > { %v5169_v28 = vsel %vm11090_vm10, %v5164_v42, %v5168_v48  ;;  %v5174_v57 = vrot.slane %v5173_v5, 4  ;;  %v5190_v53 = vshll.u32 %v12527_v14, 16  ;;  %v5194_v31 = vshrl.u32 %v12527_v14, 16  ;;  %7496 = vmatmul.mubr.bf16.gmra.mxu1 %v10478_v52  ;;  %v4952_v29 = vld [vmem:[#allocation3 + $0x68] sm:$0x1] }
 0x35c   : > { %5440 = vst [vmem:[#allocation4 + $0x1b4] sm:$0xf] %v5169_v28  ;;  %5752 = vst [vmem:[#allocation4 + $0x178] sm:$0xf] %v5169_v28  ;;  %v5560_v8 = vsel %vm11102_vm11, %v8725_v17, %v5559_v37  ;;  %v5561_v18 = vrot.slane %v5559_v37, 4  ;;  %v5183_v2 = vrot.slane %v5181_v15, 4 }
 0x35d   : > { %5884 = vst [vmem:[#allocation4 + $0x13c] sm:$0xf] %v5169_v28  ;;  %v5186_v39 = vrot.slane %v5184_v44, 5  ;;  %v5179_v10 = vsel %vm11090_vm10, %v5174_v57, %v5178_v54  ;;  %5666 = vst [vmem:[#allocation4 + $0x200] sm:$0xf] %v5560_v8  ;;  %v5192_v25 = vrot.slane %v5190_v53, 5 }
 0x35e   : > { %5798 = vst [vmem:[#allocation4 + $0x1c4] sm:$0xf] %v5560_v8  ;;  %5930 = vst [vmem:[#allocation4 + $0x188] sm:$0xf] %v5560_v8  ;;  %v5196_v32 = vrot.slane %v5194_v31, 4  ;;  %v5200_v14 = vshll.u32 %v12803_v23, 16  ;;  %v5563_v49 = vsel %vm11102_vm11, %v5561_v18, %v5562_v55 }
 0x35f   : > { %v10491_v30 = vld [vmem:[#allocation4 + $0x1bc] ss:$36 sps:$4 sm:$0xff]   ;;  %5441 = vst [vmem:[#allocation4 + $0x1d8] sm:$0xf] %v5179_v10  ;;  %5753 = vst [vmem:[#allocation4 + $0x19c] sm:$0xf] %v5179_v10  ;;  %v5187_v40 = vor.u32 %v5186_v39, %v5183_v2 }
 0x360   : > { %5885 = vst [vmem:[#allocation4 + $0x160] sm:$0xf] %v5179_v10  ;;  %5667 = vst [vmem:[#allocation4 + $0x224] sm:$0xf] %v5563_v49  ;;  %v5197_v56 = vor.u32 %v5196_v32, %v5192_v25  ;;  %v8726_v12 = vrot.slane %v12502_v38, 9  ;;  %v5566_v27 = vrot.slane %v12504_v45, 5  ;;  %7672 = vmatprep.mubr.bf16.mxu0 %v10491_v30 }
 0x361   : > { %5799 = vst [vmem:[#allocation4 + $0x1e8] sm:$0xf] %v5563_v49  ;;  %5931 = vst [vmem:[#allocation4 + $0x1ac] sm:$0xf] %v5563_v49  ;;  %v10487_v16 = vld [vmem:[#allocation4 + $0x16c] ss:$36 sps:$4 sm:$0xff]  }
 0x362   : > { %v5188_v21 = vrot.slane %v5187_v40, 4  ;;  %v5202_v11 = vrot.slane %v5200_v14, 5  ;;  %v5569_v61 = vrot.slane %v4952_v29, 5  ;;  %v10489_v58 = vld [vmem:[#allocation4 + $0x1b8] ss:$36 sps:$4 sm:$0xff]   ;;  %v5198_v62 = vrot.slane %v5197_v56, 4  ;;  %7503 = vmatprep.mubr.bf16.mxu1 %v10487_v16 }
 0x363   : > { %v5567_v48 = vsel %vm11102_vm11, %v8726_v12, %v5566_v27  ;;  %v5568_v26 = vrot.slane %v5566_v27, 4  ;;  %v5205_v23 = vshrl.u32 %v12502_v38, 16  ;;  %v10485_v41 = vld [vmem:[#allocation4 + $0x168] ss:$36 sps:$4 sm:$0xff]   ;;  %v5208_v51 = vshll.u32 %v12502_v38, 16  ;;  %7673 = vmatmul.mubr.bf16.gmra.mxu0 %v10489_v58 }
 0x364   : > { %v5193_v7 = vsel %vm11090_vm10, %v5188_v21, %v5192_v25  ;;  %5668 = vst [vmem:[#allocation4 + $0x248] sm:$0xf] %v5567_v48  ;;  %5800 = vst [vmem:[#allocation4 + $0x20c] sm:$0xf] %v5567_v48  ;;  %v5214_v17 = vshll.u32 %v12504_v45, 16  ;;  %v5218_v9 = vshrl.u32 %v12504_v45, 16  ;;  %v5203_v36 = vsel %vm11090_vm10, %v5198_v62, %v5202_v11  ;;  %7504 = vmatmul.mubr.bf16.gmra.mxu1 %v10485_v41 }
 0x365   : > { %5932 = vst [vmem:[#allocation4 + $0x1d0] sm:$0xf] %v5567_v48  ;;  %5442 = vst [vmem:[#allocation4 + $0x1fc] sm:$0xf] %v5193_v7  ;;  %v5570_v35 = vsel %vm11102_vm11, %v5568_v26, %v5569_v61  ;;  %v5207_v54 = vrot.slane %v5205_v23, 4  ;;  %v5224_v52 = vshll.u32 %v4952_v29, 16 }
 0x366   : > { %5754 = vst [vmem:[#allocation4 + $0x1c0] sm:$0xf] %v5193_v7  ;;  %5886 = vst [vmem:[#allocation4 + $0x184] sm:$0xf] %v5193_v7  ;;  %v4955_v19 = vld [vmem:[#allocation3 + $0x74] sm:$0x1] }
 0x367   : > { %5443 = vst [vmem:[#allocation4 + $0x220] sm:$0xf] %v5203_v36  ;;  %5755 = vst [vmem:[#allocation4 + $0x1e4] sm:$0xf] %v5203_v36  ;;  %v5210_v38 = vrot.slane %v5208_v51, 5  ;;  %v5216_v45 = vrot.slane %v5214_v17, 5 }
 0x368   : > { %5887 = vst [vmem:[#allocation4 + $0x1a8] sm:$0xf] %v5203_v36  ;;  %5669 = vst [vmem:[#allocation4 + $0x26c] sm:$0xf] %v5570_v35  ;;  %v5220_v42 = vrot.slane %v5218_v9, 4  ;;  %v8727_v37 = vrot.slane %v12558_v46, 9 }
 0x369   : > { %5801 = vst [vmem:[#allocation4 + $0x230] sm:$0xf] %v5570_v35  ;;  %5933 = vst [vmem:[#allocation4 + $0x1f4] sm:$0xf] %v5570_v35  ;;  %v10494_v5 = vld [vmem:[#allocation4 + $0x1b4] ss:$36 sps:$4 sm:$0xff]   ;;  %v5211_v15 = vor.u32 %v5210_v38, %v5207_v54 }
 0x36a   : > { %v10497_v55 = vld [vmem:[#allocation4 + $0x204] ss:$36 sps:$4 sm:$0xff]   ;;  %v5221_v44 = vor.u32 %v5220_v42, %v5216_v45  ;;  %v5226_v28 = vrot.slane %v5224_v52, 5  ;;  %v5573_v57 = vrot.slane %v12578_v20, 5  ;;  %7511 = vmatprep.mubr.bf16.mxu1 %v10494_v5  ;;  %v5576_v53 = vrot.slane %v4955_v19, 5 }
 0x36b   : > { %v5229_v31 = vshrl.u32 %v12558_v46, 16  ;;  %v5232_v8 = vshll.u32 %v12558_v46, 16  ;;  %v5238_v18 = vshll.u32 %v12578_v20, 16  ;;  %v10495_v2 = vld [vmem:[#allocation4 + $0x200] ss:$36 sps:$4 sm:$0xff]   ;;  %7680 = vmatprep.mubr.bf16.mxu0 %v10497_v55  ;;  %v5212_v39 = vrot.slane %v5211_v15, 4 }
 0x36c   : > { %v5222_v10 = vrot.slane %v5221_v44, 4  ;;  %v5574_v25 = vsel %vm11102_vm11, %v8727_v37, %v5573_v57  ;;  %v5575_v32 = vrot.slane %v5573_v57, 4  ;;  %v5242_v49 = vshrl.u32 %v12578_v20, 16  ;;  %v10492_v40 = vld [vmem:[#allocation4 + $0x1b0] ss:$36 sps:$4 sm:$0xff]   ;;  %7681 = vmatmul.mubr.bf16.gmra.mxu0 %v10495_v2 }
 0x36d   : > { %5670 = vst [vmem:[#allocation4 + $0x290] sm:$0xf] %v5574_v25  ;;  %5802 = vst [vmem:[#allocation4 + $0x254] sm:$0xf] %v5574_v25  ;;  %v5231_v14 = vrot.slane %v5229_v31, 4  ;;  %v5234_v29 = vrot.slane %v5232_v8, 5  ;;  %v5217_v46 = vsel %vm11090_vm10, %v5212_v39, %v5216_v45  ;;  %7512 = vmatmul.mubr.bf16.gmra.mxu1 %v10492_v40 }
 0x36e   : > { %5934 = vst [vmem:[#allocation4 + $0x218] sm:$0xf] %v5574_v25  ;;  %v5240_v30 = vrot.slane %v5238_v18, 5  ;;  %v5227_v56 = vsel %vm11090_vm10, %v5222_v10, %v5226_v28  ;;  %v5577_v12 = vsel %vm11102_vm11, %v5575_v32, %v5576_v53  ;;  %v5248_v27 = vshll.u32 %v4955_v19, 16  ;;  %v10501_v16 = vld [vmem:[#allocation4 + $0x1fc] ss:$36 sps:$4 sm:$0xff]  }
 0x36f   : > { %5444 = vst [vmem:[#allocation4 + $0x244] sm:$0xf] %v5217_v46  ;;  %5445 = vst [vmem:[#allocation4 + $0x268] sm:$0xf] %v5227_v56  ;;  %v5235_v20 = vor.u32 %v5234_v29, %v5231_v14  ;;  %v5244_v21 = vrot.slane %v5242_v49, 4  ;;  %7519 = vmatprep.mubr.bf16.mxu1 %v10501_v16  ;;  %v8728_v26 = vrot.slane %v12552_v13, 9 }
 0x370   : > { %5756 = vst [vmem:[#allocation4 + $0x208] sm:$0xf] %v5217_v46  ;;  %5757 = vst [vmem:[#allocation4 + $0x22c] sm:$0xf] %v5227_v56  ;;  %v4958_v11 = vld [vmem:[#allocation3 + $0x80] sm:$0x1] }
 0x371   : > { %5888 = vst [vmem:[#allocation4 + $0x1cc] sm:$0xf] %v5217_v46  ;;  %5889 = vst [vmem:[#allocation4 + $0x1f0] sm:$0xf] %v5227_v56  ;;  %v10505_v61 = vld [vmem:[#allocation4 + $0x24c] ss:$36 sps:$4 sm:$0xff]   ;;  %v5245_v48 = vor.u32 %v5244_v21, %v5240_v30 }
 0x372   : > { %5671 = vst [vmem:[#allocation4 + $0x2b4] sm:$0xf] %v5577_v12  ;;  %5803 = vst [vmem:[#allocation4 + $0x278] sm:$0xf] %v5577_v12  ;;  %v5250_v58 = vrot.slane %v5248_v27, 5  ;;  %v5236_v62 = vrot.slane %v5235_v20, 4  ;;  %7688 = vmatprep.mubr.bf16.mxu0 %v10505_v61 }
 0x373   : > { %5935 = vst [vmem:[#allocation4 + $0x23c] sm:$0xf] %v5577_v12  ;;  %v5580_v23 = vrot.slane %v12576_v50, 5  ;;  %v5583_v41 = vrot.slane %v4958_v11, 5  ;;  %v5253_v7 = vshrl.u32 %v12552_v13, 16  ;;  %v5256_v51 = vshll.u32 %v12552_v13, 16 }
 0x374   : > { %v5262_v17 = vshll.u32 %v12576_v50, 16  ;;  %v5241_v9 = vsel %vm11090_vm10, %v5236_v62, %v5240_v30  ;;  %v5246_v36 = vrot.slane %v5245_v48, 4  ;;  %v5266_v13 = vshrl.u32 %v12576_v50, 16  ;;  %v12863_v45 = vld [vmem:[#allocation3 + $0x8c] sm:$0x1]  ;;  %v9512_v30 = vpop.f32.mrf.mxu1 }
 0x375   : > { %v5581_v35 = vsel %vm11102_vm11, %v8728_v26, %v5580_v23  ;;  %v5582_v54 = vrot.slane %v5580_v23, 4  ;;  %5446 = vst [vmem:[#allocation4 + $0x28c] sm:$0xf] %v5241_v9  ;;  %5758 = vst [vmem:[#allocation4 + $0x250] sm:$0xf] %v5241_v9  ;;  %v5255_v52 = vrot.slane %v5253_v7, 4 }
 0x376   : > { %5890 = vst [vmem:[#allocation4 + $0x214] sm:$0xf] %v5241_v9  ;;  %5672 = vst [vmem:[#allocation4 + $0x2d8] sm:$0xf] %v5581_v35  ;;  %v5258_v19 = vrot.slane %v5256_v51, 5  ;;  %v5264_v38 = vrot.slane %v5262_v17, 5  ;;  %v5251_v37 = vsel %vm11090_vm10, %v5246_v36, %v5250_v58  ;;  %v9513_v61 = vpop.f32.mrf.mxu1 }
 0x377   : > { %5804 = vst [vmem:[#allocation4 + $0x29c] sm:$0xf] %v5581_v35  ;;  %5936 = vst [vmem:[#allocation4 + $0x260] sm:$0xf] %v5581_v35  ;;  %v10499_v42 = vld [vmem:[#allocation4 + $0x1f8] ss:$36 sps:$4 sm:$0xff]   ;;  %v5584_v55 = vsel %vm11102_vm11, %v5582_v54, %v5583_v41  ;;  %v12889_v23 = vadd.f32 %v9513_v61, %v9512_v30 }
 0x378   : > { %v10503_v5 = vld [vmem:[#allocation4 + $0x248] ss:$36 sps:$4 sm:$0xff]   ;;  %v5272_v15 = vshll.u32 %v4958_v11, 16  ;;  %5447 = vst [vmem:[#allocation4 + $0x2b0] sm:$0xf] %v5251_v37  ;;  %v5259_v44 = vor.u32 %v5258_v19, %v5255_v52  ;;  %v5268_v28 = vrot.slane %v5266_v13, 4  ;;  %7520 = vmatmul.mubr.bf16.gmra.mxu1 %v10499_v42 }
 0x379   : > { %5759 = vst [vmem:[#allocation4 + $0x274] sm:$0xf] %v5251_v37  ;;  %5891 = vst [vmem:[#allocation4 + $0x238] sm:$0xf] %v5251_v37  ;;  %v8729_v50 = vrot.slane %v12608_v4, 9  ;;  %v5587_v57 = vrot.slane %v12653_v60, 5  ;;  %7689 = vmatmul.mubr.bf16.gmra.mxu0 %v10503_v5 }
 0x37a   : > { %5673 = vst [vmem:[#allocation4 + $0x2fc] sm:$0xf] %v5584_v55  ;;  %5805 = vst [vmem:[#allocation4 + $0x2c0] sm:$0xf] %v5584_v55  ;;  %v10508_v53 = vld [vmem:[#allocation4 + $0x244] ss:$36 sps:$4 sm:$0xff]   ;;  %v5269_v2 = vor.u32 %v5268_v28, %v5264_v38 }
 0x37b   : > { %5937 = vst [vmem:[#allocation4 + $0x284] sm:$0xf] %v5584_v55  ;;  %v5274_v31 = vrot.slane %v5272_v15, 5  ;;  %v10513_v8 = vld [vmem:[#allocation4 + $0x294] ss:$36 sps:$4 sm:$0xff]   ;;  %v5260_v18 = vrot.slane %v5259_v44, 4  ;;  %v5588_v39 = vsel %vm11102_vm11, %v8729_v50, %v5587_v57  ;;  %7527 = vmatprep.mubr.bf16.mxu1 %v10508_v53 }
 0x37c   : > { %v5589_v10 = vrot.slane %v5587_v57, 4  ;;  %v5590_v25 = vrot.slane %v12863_v45, 5  ;;  %5674 = vst [vmem:[#allocation4 + $0x320] sm:$0xf] %v5588_v39  ;;  %5806 = vst [vmem:[#allocation4 + $0x2e4] sm:$0xf] %v5588_v39  ;;  %7696 = vmatprep.mubr.bf16.mxu0 %v10513_v8 }
 0x37d   : > { %5938 = vst [vmem:[#allocation4 + $0x2a8] sm:$0xf] %v5588_v39  ;;  %v5277_v32 = vshrl.u32 %v12608_v4, 16  ;;  %v5280_v14 = vshll.u32 %v12608_v4, 16  ;;  %v5286_v29 = vshll.u32 %v12653_v60, 16  ;;  %v5265_v49 = vsel %vm11090_vm10, %v5260_v18, %v5264_v38 }
 0x37e   : > { %v5270_v40 = vrot.slane %v5269_v2, 4  ;;  %v5290_v46 = vshrl.u32 %v12653_v60, 16  ;;  %v5296_v56 = vshll.u32 %v12863_v45, 16  ;;  %v12881_v12 = vld [vmem:[#allocation3 + $0x98] sm:$0x1]  ;;  %v5591_v4 = vsel %vm11102_vm11, %v5589_v10, %v5590_v25 }
 0x37f   : > { %5448 = vst [vmem:[#allocation4 + $0x2d4] sm:$0xf] %v5265_v49  ;;  %5760 = vst [vmem:[#allocation4 + $0x298] sm:$0xf] %v5265_v49  ;;  %v5279_v27 = vrot.slane %v5277_v32, 4  ;;  %v5282_v16 = vrot.slane %v5280_v14, 5 }
 0x380   : > { %5892 = vst [vmem:[#allocation4 + $0x25c] sm:$0xf] %v5265_v49  ;;  %v5288_v20 = vrot.slane %v5286_v29, 5  ;;  %v10506_v21 = vld [vmem:[#allocation4 + $0x240] ss:$36 sps:$4 sm:$0xff]   ;;  %v5275_v11 = vsel %vm11090_vm10, %v5270_v40, %v5274_v31  ;;  %v5292_v60 = vrot.slane %v5290_v46, 4 }
 0x381   : > { %5675 = vst [vmem:[#allocation4 + $0x344] sm:$0xf] %v5591_v4  ;;  %5807 = vst [vmem:[#allocation4 + $0x308] sm:$0xf] %v5591_v4  ;;  %v10511_v58 = vld [vmem:[#allocation4 + $0x290] ss:$36 sps:$4 sm:$0xff]   ;;  %v5283_v62 = vor.u32 %v5282_v16, %v5279_v27  ;;  %7528 = vmatmul.mubr.bf16.gmra.mxu1 %v10506_v21 }
 0x382   : > { %5939 = vst [vmem:[#allocation4 + $0x2cc] sm:$0xf] %v5591_v4  ;;  %5449 = vst [vmem:[#allocation4 + $0x2f8] sm:$0xf] %v5275_v11  ;;  %v8730_v48 = vrot.slane %v12610_v6, 9  ;;  %v5594_v26 = vrot.slane %v12645_v63, 5  ;;  %v5293_v7 = vor.u32 %v5292_v60, %v5288_v20  ;;  %7697 = vmatmul.mubr.bf16.gmra.mxu0 %v10511_v58 }
 0x383   : > { %5761 = vst [vmem:[#allocation4 + $0x2bc] sm:$0xf] %v5275_v11  ;;  %5893 = vst [vmem:[#allocation4 + $0x280] sm:$0xf] %v5275_v11  ;;  %v10521_v41 = vld [vmem:[#allocation4 + $0x2dc] ss:$36 sps:$4 sm:$0xff]  }
 0x384   : > { %v5298_v51 = vrot.slane %v5296_v56, 5  ;;  %v5597_v17 = vrot.slane %v12881_v12, 5  ;;  %v10517_v9 = vld [vmem:[#allocation4 + $0x28c] ss:$36 sps:$4 sm:$0xff]   ;;  %v5284_v36 = vrot.slane %v5283_v62, 4  ;;  %v5595_v35 = vsel %vm11102_vm11, %v8730_v48, %v5594_v26  ;;  %7704 = vmatprep.mubr.bf16.mxu0 %v10521_v41 }
 0x385   : > { %v5596_v54 = vrot.slane %v5594_v26, 4  ;;  %v5301_v52 = vshrl.u32 %v12610_v6, 16  ;;  %v5294_v19 = vrot.slane %v5293_v7, 4  ;;  %5676 = vst [vmem:[#allocation4 + $0x368] sm:$0xf] %v5595_v35  ;;  %v5304_v38 = vshll.u32 %v12610_v6, 16  ;;  %7535 = vmatprep.mubr.bf16.mxu1 %v10517_v9 }
 0x386   : > { %5808 = vst [vmem:[#allocation4 + $0x32c] sm:$0xf] %v5595_v35  ;;  %5940 = vst [vmem:[#allocation4 + $0x2f0] sm:$0xf] %v5595_v35  ;;  %v5310_v13 = vshll.u32 %v12645_v63, 16  ;;  %v5314_v45 = vshrl.u32 %v12645_v63, 16  ;;  %v5289_v42 = vsel %vm11090_vm10, %v5284_v36, %v5288_v20 }
 0x387   : > { %v5598_v5 = vsel %vm11102_vm11, %v5596_v54, %v5597_v17  ;;  %v5303_v37 = vrot.slane %v5301_v52, 4  ;;  %v5320_v55 = vshll.u32 %v12881_v12, 16  ;;  %v5299_v15 = vsel %vm11090_vm10, %v5294_v19, %v5298_v51  ;;  %5450 = vst [vmem:[#allocation4 + $0x31c] sm:$0xf] %v5289_v42  ;;  %5762 = vst [vmem:[#allocation4 + $0x2e0] sm:$0xf] %v5289_v42 }
 0x388   : > { %5894 = vst [vmem:[#allocation4 + $0x2a4] sm:$0xf] %v5289_v42  ;;  %5677 = vst [vmem:[#allocation4 + $0x38c] sm:$0xf] %v5598_v5  ;;  %v5306_v6 = vrot.slane %v5304_v38, 5  ;;  %v5312_v63 = vrot.slane %v5310_v13, 5 }
 0x389   : > { %5809 = vst [vmem:[#allocation4 + $0x350] sm:$0xf] %v5598_v5  ;;  %5941 = vst [vmem:[#allocation4 + $0x314] sm:$0xf] %v5598_v5  ;;  %v5316_v44 = vrot.slane %v5314_v45, 4  ;;  %v5322_v8 = vrot.slane %v5320_v55, 5 }
 0x38a   : > { %v4967_v28 = vld [vmem:[#allocation3 + $0xa4] sm:$0x1]  ;;  %5451 = vst [vmem:[#allocation4 + $0x340] sm:$0xf] %v5299_v15  ;;  %5763 = vst [vmem:[#allocation4 + $0x304] sm:$0xf] %v5299_v15  ;;  %v5307_v53 = vor.u32 %v5306_v6, %v5303_v37 }
 0x38b   : > { %5895 = vst [vmem:[#allocation4 + $0x2c8] sm:$0xf] %v5299_v15  ;;  %v10515_v50 = vld [vmem:[#allocation4 + $0x288] ss:$36 sps:$4 sm:$0xff]   ;;  %v10519_v57 = vld [vmem:[#allocation4 + $0x2d8] ss:$36 sps:$4 sm:$0xff]   ;;  %v5317_v31 = vor.u32 %v5316_v44, %v5312_v63 }
 0x38c   : > { %v8731_v18 = vrot.slane %v12709_v1, 9  ;;  %v10529_v2 = vld [vmem:[#allocation4 + $0x324] ss:$36 sps:$4 sm:$0xff]   ;;  %v5601_v39 = vrot.slane %v12721_v43, 5  ;;  %v5604_v10 = vrot.slane %v4967_v28, 5  ;;  %v5325_v25 = vshrl.u32 %v12709_v1, 16  ;;  %7705 = vmatmul.mubr.bf16.gmra.mxu0 %v10519_v57  ;;  %7536 = vmatmul.mubr.bf16.gmra.mxu1 %v10515_v50 }
 0x38d   : > { %v5328_v32 = vshll.u32 %v12709_v1, 16  ;;  %v5308_v14 = vrot.slane %v5307_v53, 4  ;;  %v5318_v29 = vrot.slane %v5317_v31, 4  ;;  %v5334_v30 = vshll.u32 %v12721_v43, 16  ;;  %v10524_v40 = vld [vmem:[#allocation4 + $0x2d4] ss:$36 sps:$4 sm:$0xff]   ;;  %7712 = vmatprep.mubr.bf16.mxu0 %v10529_v2 }
 0x38e   : > { %v5338_v49 = vshrl.u32 %v12721_v43, 16  ;;  %v5602_v46 = vsel %vm11102_vm11, %v8731_v18, %v5601_v39  ;;  %v5603_v56 = vrot.slane %v5601_v39, 4  ;;  %v5327_v12 = vrot.slane %v5325_v25, 4  ;;  %v12917_v20 = vld [vmem:[#allocation3 + $0xb0] sm:$0x1]  ;;  %7543 = vmatprep.mubr.bf16.mxu1 %v10524_v40 }
 0x38f   : > { %v5330_v4 = vrot.slane %v5328_v32, 5  ;;  %v5313_v27 = vsel %vm11090_vm10, %v5308_v14, %v5312_v63  ;;  %v5323_v1 = vsel %vm11090_vm10, %v5318_v29, %v5322_v8  ;;  %5678 = vst [vmem:[#allocation4 + $0x3b0] sm:$0xf] %v5602_v46  ;;  %5810 = vst [vmem:[#allocation4 + $0x374] sm:$0xf] %v5602_v46  ;;  %v5336_v43 = vrot.slane %v5334_v30, 5 }
 0x390   : > { %5942 = vst [vmem:[#allocation4 + $0x338] sm:$0xf] %v5602_v46  ;;  %v5340_v16 = vrot.slane %v5338_v49, 4  ;;  %5452 = vst [vmem:[#allocation4 + $0x364] sm:$0xf] %v5313_v27  ;;  %v5605_v21 = vsel %vm11102_vm11, %v5603_v56, %v5604_v10  ;;  %v5344_v60 = vshll.u32 %v4967_v28, 16 }
 0x391   : > { %5453 = vst [vmem:[#allocation4 + $0x388] sm:$0xf] %v5323_v1  ;;  %5764 = vst [vmem:[#allocation4 + $0x328] sm:$0xf] %v5313_v27  ;;  %v5331_v11 = vor.u32 %v5330_v4, %v5327_v12  ;;  %v8732_v58 = vrot.slane %v12671_v3, 9  ;;  %v5608_v62 = vrot.slane %v12711_v34, 5 }
 0x392   : > { %5765 = vst [vmem:[#allocation4 + $0x34c] sm:$0xf] %v5323_v1  ;;  %5896 = vst [vmem:[#allocation4 + $0x2ec] sm:$0xf] %v5313_v27  ;;  %v5341_v61 = vor.u32 %v5340_v16, %v5336_v43  ;;  %v5346_v26 = vrot.slane %v5344_v60, 5  ;;  %v5611_v41 = vrot.slane %v12917_v20, 5 }
 0x393   : > { %5897 = vst [vmem:[#allocation4 + $0x310] sm:$0xf] %v5323_v1  ;;  %5679 = vst [vmem:[#allocation4 + $0x3d4] sm:$0xf] %v5605_v21  ;;  %v5332_v48 = vrot.slane %v5331_v11, 4  ;;  %v5349_v7 = vshrl.u32 %v12671_v3, 16  ;;  %v5609_v9 = vsel %vm11102_vm11, %v8732_v58, %v5608_v62 }
 0x394   : > { %5811 = vst [vmem:[#allocation4 + $0x398] sm:$0xf] %v5605_v21  ;;  %5943 = vst [vmem:[#allocation4 + $0x35c] sm:$0xf] %v5605_v21  ;;  %v10527_v51 = vld [vmem:[#allocation4 + $0x320] ss:$36 sps:$4 sm:$0xff]  }
 0x395   : > { %v5342_v17 = vrot.slane %v5341_v61, 4  ;;  %v5610_v36 = vrot.slane %v5608_v62, 4  ;;  %v5352_v35 = vshll.u32 %v12671_v3, 16  ;;  %v12928_v54 = vld [vmem:[#allocation3 + $0xbc] sm:$0x1]  ;;  %v5337_v19 = vsel %vm11090_vm10, %v5332_v48, %v5336_v43  ;;  %7713 = vmatmul.mubr.bf16.gmra.mxu0 %v10527_v51 }
 0x396   : > { %v10522_v52 = vld [vmem:[#allocation4 + $0x2d0] ss:$36 sps:$4 sm:$0xff]   ;;  %5680 = vst [vmem:[#allocation4 + $0x3f8] sm:$0xf] %v5609_v9  ;;  %5812 = vst [vmem:[#allocation4 + $0x3bc] sm:$0xf] %v5609_v9 }
 0x397   : > { %5944 = vst [vmem:[#allocation4 + $0x380] sm:$0xf] %v5609_v9  ;;  %v5351_v38 = vrot.slane %v5349_v7, 4  ;;  %v5358_v13 = vshll.u32 %v12711_v34, 16  ;;  %v5362_v45 = vshrl.u32 %v12711_v34, 16  ;;  %v5347_v37 = vsel %vm11090_vm10, %v5342_v17, %v5346_v26  ;;  %7544 = vmatmul.mubr.bf16.gmra.mxu1 %v10522_v52 }
 0x398   : > { %v10533_v42 = vld [vmem:[#allocation4 + $0x31c] ss:$36 sps:$4 sm:$0xff]   ;;  %v10537_v5 = vld [vmem:[#allocation4 + $0x36c] ss:$36 sps:$4 sm:$0xff]   ;;  %5454 = vst [vmem:[#allocation4 + $0x3ac] sm:$0xf] %v5337_v19  ;;  %v5612_v3 = vsel %vm11102_vm11, %v5610_v36, %v5611_v41 }
 0x399   : > { %5766 = vst [vmem:[#allocation4 + $0x370] sm:$0xf] %v5337_v19  ;;  %5898 = vst [vmem:[#allocation4 + $0x334] sm:$0xf] %v5337_v19  ;;  %v5354_v55 = vrot.slane %v5352_v35, 5  ;;  %v5368_v15 = vshll.u32 %v12917_v20, 16  ;;  %7720 = vmatprep.mubr.bf16.mxu0 %v10537_v5  ;;  %7551 = vmatprep.mubr.bf16.mxu1 %v10533_v42 }
 0x39a   : > { %5455 = vst [vmem:[#allocation4 + $0x3d0] sm:$0xf] %v5347_v37  ;;  %5767 = vst [vmem:[#allocation4 + $0x394] sm:$0xf] %v5347_v37  ;;  %v5360_v34 = vrot.slane %v5358_v13, 5  ;;  %v5364_v6 = vrot.slane %v5362_v45, 4 }
 0x39b   : > { %5899 = vst [vmem:[#allocation4 + $0x358] sm:$0xf] %v5347_v37  ;;  %5681 = vst [vmem:[#allocation4 + $0x41c] sm:$0xf] %v5612_v3  ;;  %v8733_v63 = vrot.slane %v12772_v59, 9  ;;  %v5615_v44 = vrot.slane %v12792_v24, 5  ;;  %v5355_v28 = vor.u32 %v5354_v55, %v5351_v38 }
 0x39c   : > { %5813 = vst [vmem:[#allocation4 + $0x3e0] sm:$0xf] %v5612_v3  ;;  %5945 = vst [vmem:[#allocation4 + $0x3a4] sm:$0xf] %v5612_v3  ;;  %v5365_v50 = vor.u32 %v5364_v6, %v5360_v34  ;;  %v5618_v31 = vrot.slane %v12928_v54, 5  ;;  %v5373_v18 = vshrl.u32 %v12772_v59, 16 }
 0x39d   : > { %v5616_v57 = vsel %vm11102_vm11, %v8733_v63, %v5615_v44  ;;  %v5617_v53 = vrot.slane %v5615_v44, 4  ;;  %v5356_v8 = vrot.slane %v5355_v28, 4  ;;  %v5376_v2 = vshll.u32 %v12772_v59, 16  ;;  %v10535_v46 = vld [vmem:[#allocation4 + $0x368] ss:$36 sps:$4 sm:$0xff]  }
 0x39e   : > { %5682 = vst [vmem:[#allocation4 + $0x440] sm:$0xf] %v5616_v57  ;;  %5814 = vst [vmem:[#allocation4 + $0x404] sm:$0xf] %v5616_v57  ;;  %v5382_v39 = vshll.u32 %v12792_v24, 16  ;;  %v5366_v10 = vrot.slane %v5365_v50, 4  ;;  %7721 = vmatmul.mubr.bf16.gmra.mxu0 %v10535_v46 }
 0x39f   : > { %5946 = vst [vmem:[#allocation4 + $0x3c8] sm:$0xf] %v5616_v57  ;;  %v5370_v25 = vrot.slane %v5368_v15, 5  ;;  %v5619_v32 = vsel %vm11102_vm11, %v5617_v53, %v5618_v31  ;;  %v5386_v14 = vshrl.u32 %v12792_v24, 16  ;;  %v5361_v29 = vsel %vm11090_vm10, %v5356_v8, %v5360_v34  ;;  %v10531_v24 = vld [vmem:[#allocation4 + $0x318] ss:$36 sps:$4 sm:$0xff]  }
 0x3a0   : > { %5683 = vst [vmem:[#allocation4 + $0x464] sm:$0xf] %v5619_v32  ;;  %5815 = vst [vmem:[#allocation4 + $0x428] sm:$0xf] %v5619_v32  ;;  %v5375_v30 = vrot.slane %v5373_v18, 4  ;;  %v5378_v49 = vrot.slane %v5376_v2, 5  ;;  %7552 = vmatmul.mubr.bf16.gmra.mxu1 %v10531_v24 }
 0x3a1   : > { %5947 = vst [vmem:[#allocation4 + $0x3ec] sm:$0xf] %v5619_v32  ;;  %v5384_v40 = vrot.slane %v5382_v39, 5  ;;  %v5371_v59 = vsel %vm11090_vm10, %v5366_v10, %v5370_v25  ;;  %5456 = vst [vmem:[#allocation4 + $0x3f4] sm:$0xf] %v5361_v29  ;;  %v5388_v56 = vrot.slane %v5386_v14, 4 }
 0x3a2   : > { %5768 = vst [vmem:[#allocation4 + $0x3b8] sm:$0xf] %v5361_v29  ;;  %5900 = vst [vmem:[#allocation4 + $0x37c] sm:$0xf] %v5361_v29  ;;  %v5392_v12 = vshll.u32 %v12928_v54, 16  ;;  %v5379_v27 = vor.u32 %v5378_v49, %v5375_v30  ;;  %v5717_v1 = vshrl.u32 %v12738_v0, 16 }
 0x3a3   : > { %v10545_v4 = vld [vmem:[#allocation4 + $0x3b4] ss:$36 sps:$4 sm:$0xff]   ;;  %5457 = vst [vmem:[#allocation4 + $0x418] sm:$0xf] %v5371_v59  ;;  %5769 = vst [vmem:[#allocation4 + $0x3dc] sm:$0xf] %v5371_v59  ;;  %v5389_v16 = vor.u32 %v5388_v56, %v5384_v40 }
 0x3a4   : > { %5901 = vst [vmem:[#allocation4 + $0x3a0] sm:$0xf] %v5371_v59  ;;  %v10540_v43 = vld [vmem:[#allocation4 + $0x364] ss:$36 sps:$4 sm:$0xff]   ;;  %v5720_v20 = vshll.u32 %v12738_v0, 16  ;;  %7728 = vmatprep.mubr.bf16.mxu0 %v10545_v4  ;;  %v5380_v21 = vrot.slane %v5379_v27, 4 }
 0x3a5   : > { %7559 = vmatprep.mubr.bf16.mxu1 %v10540_v43  ;;  %v5390_v11 = vrot.slane %v5389_v16, 4  ;;  %v5394_v60 = vrot.slane %v5392_v12, 5  ;;  %v5719_v61 = vrot.slane %v5717_v1, 4  ;;  %v4976_v26 = vld [vmem:[#allocation3 + $0xc8] sm:$0x1]  ;;  %v5726_v41 = vshll.u32 %v12785_v22, 16  ;;  %v9515_v12 = vpop.f32.mrf.mxu1 }
 0x3a6   : > { %v5385_v58 = vsel %vm11090_vm10, %v5380_v21, %v5384_v40  ;;  %v5722_v62 = vrot.slane %v5720_v20, 5  ;;  %v5730_v51 = vshrl.u32 %v12785_v22, 16  ;;  %v10538_v17 = vld [vmem:[#allocation4 + $0x360] ss:$36 sps:$4 sm:$0xff]   ;;  %v10543_v9 = vld [vmem:[#allocation4 + $0x3b0] ss:$36 sps:$4 sm:$0xff]  }
 0x3a7   : > { %v5395_v48 = vsel %vm11090_vm10, %v5390_v11, %v5394_v60  ;;  %5458 = vst [vmem:[#allocation4 + $0x43c] sm:$0xf] %v5385_v58  ;;  %5770 = vst [vmem:[#allocation4 + $0x400] sm:$0xf] %v5385_v58  ;;  %v5728_v36 = vrot.slane %v5726_v41, 5  ;;  %v5736_v19 = vshll.u32 %v4976_v26, 16  ;;  %7729 = vmatmul.mubr.bf16.gmra.mxu0 %v10543_v9  ;;  %v9516_v21 = vpop.f32.mrf.mxu1 }
 0x3a8   : > { %5902 = vst [vmem:[#allocation4 + $0x3c4] sm:$0xf] %v5385_v58  ;;  %5459 = vst [vmem:[#allocation4 + $0x460] sm:$0xf] %v5395_v48  ;;  %v5723_v7 = vor.u32 %v5722_v62, %v5719_v61  ;;  %v10553_v35 = vld [vmem:[#allocation4 + $0x3fc] ss:$36 sps:$4 sm:$0xff]   ;;  %7560 = vmatmul.mubr.bf16.gmra.mxu1 %v10538_v17  ;;  %v9624_v20 = vpop.f32.mrf.mxu0  ;;  %v9517_v61 = vadd.f32 %v9516_v21, %v9515_v12 }
 0x3a9   : > { %5771 = vst [vmem:[#allocation4 + $0x424] sm:$0xf] %v5395_v48  ;;  %5903 = vst [vmem:[#allocation4 + $0x3e8] sm:$0xf] %v5395_v48  ;;  %v5732_v52 = vrot.slane %v5730_v51, 4  ;;  %7736 = vmatprep.mubr.bf16.mxu0 %v10553_v35  ;;  %v8734_v42 = vrot.slane %v12738_v0, 9 }
 0x3aa   : > { %v5724_v54 = vrot.slane %v5723_v7, 4  ;;  %v10549_v38 = vld [vmem:[#allocation4 + $0x3ac] ss:$36 sps:$4 sm:$0xff]   ;;  %v5779_v5 = vrot.slane %v12785_v22, 5  ;;  %v5738_v3 = vrot.slane %v5736_v19, 5  ;;  %v5782_v34 = vrot.slane %v4976_v26, 5  ;;  %v9625_v60 = vpop.f32.mrf.mxu0 }
 0x3ab   : > { %v5733_v45 = vor.u32 %v5732_v52, %v5728_v36  ;;  %7567 = vmatprep.mubr.bf16.mxu1 %v10549_v38  ;;  %v10551_v63 = vld [vmem:[#allocation4 + $0x3f8] ss:$36 sps:$4 sm:$0xff]   ;;  %v10547_v22 = vld [vmem:[#allocation4 + $0x3a8] ss:$36 sps:$4 sm:$0xff]   ;;  %v10560_v50 = vld [vmem:[#allocation4 + $0x440] ss:$36 sps:$4 sm:$0xff]   ;;  %v9626_v58 = vadd.f32 %v9625_v60, %v9624_v20 }
 0x3ac   : > { %v5729_v13 = vsel %vm11090_vm10, %v5724_v54, %v5728_v36  ;;  %v5780_v55 = vsel %vm11102_vm11, %v8734_v42, %v5779_v5  ;;  %v5781_v15 = vrot.slane %v5779_v5, 4  ;;  %v10562_v44 = vld [vmem:[#allocation4 + $0x444] ss:$36 sps:$4 sm:$0xff]   ;;  %v10556_v28 = vld [vmem:[#allocation4 + $0x3f4] ss:$36 sps:$4 sm:$0xff]   ;;  %v9627_v48 = vpop.f32.mrf.mxu0 }
 0x3ad   : > { %5904 = vst [vmem:[#allocation4 + $0x40c] sm:$0xf] %v5729_v13  ;;  %5772 = vst [vmem:[#allocation4 + $0x448] sm:$0xf] %v5729_v13  ;;  %v5734_v37 = vrot.slane %v5733_v45, 4  ;;  %v10597_v25 = vld [vmem:[#allocation10 + $0x230] sm:$0xff]  }
 0x3ae   : > { %5816 = vst [vmem:[#allocation4 + $0x44c] sm:$0xf] %v5780_v55  ;;  %5948 = vst [vmem:[#allocation4 + $0x410] sm:$0xf] %v5780_v55  ;;  %v5783_v0 = vsel %vm11102_vm11, %v5781_v15, %v5782_v34  ;;  %v10575_v57 = vld [vmem:[#allocation4 + $0x1c] ss:$36 sps:$4 sm:$0xff]   ;;  %v9628_v7 = vpop.f32.mrf.mxu0 }
 0x3af   : > { %v5739_v6 = vsel %vm11090_vm10, %v5734_v37, %v5738_v3  ;;  %5817 = vst [vmem:[#allocation4 + $0x470] sm:$0xf] %v5783_v0  ;;  %5949 = vst [vmem:[#allocation4 + $0x434] sm:$0xf] %v5783_v0  ;;  %7737 = vmatmul.mubr.bf16.gmra.mxu0 %v10551_v63  ;;  %v10554_v53 = vld [vmem:[#allocation4 + $0x3f0] ss:$36 sps:$4 sm:$0xff]   ;;  %v9629_v36 = vadd.f32 %v9628_v7, %v9627_v48 }
 0x3b0   : > { %5905 = vst [vmem:[#allocation4 + $0x430] sm:$0xf] %v5739_v6  ;;  %5773 = vst [vmem:[#allocation4 + $0x46c] sm:$0xf] %v5739_v6  ;;  %7568 = vmatmul.mubr.bf16.gmra.mxu1 %v10547_v22  ;;  %7744 = vmatprep.mubr.bf16.mxu0 %v10562_v44  ;;  %v10567_v33 = vld [vmem:[#allocation4 + $0x43c] ss:$36 sps:$4 sm:$0xff]  }
 0x3b1   : > { %7575 = vmatprep.mubr.bf16.mxu1 %v10556_v28  ;;  %v10573_v31 = vld [vmem:[#allocation4 + $0x18] ss:$36 sps:$4 sm:$0xff]   ;;  %v10583_v47 = vld [vmem:[#allocation4 + $0x64] ss:$36 sps:$4 sm:$0xff]   ;;  %v10576_v39 = vld [vmem:[#allocation4 + $0x10] ss:$36 sps:$4 sm:$0xff]  }
 0x3b2   : > { %v10565_v8 = vld [vmem:[#allocation4 + $0x438] ss:$36 sps:$4 sm:$0xff]   ;;  %v10581_v2 = vld [vmem:[#allocation4 + $0x60] ss:$36 sps:$4 sm:$0xff]   ;;  %v10590_v10 = vld [vmem:[#allocation4 + $0xac] ss:$36 sps:$4 sm:$0xff]  }
 0x3b3   : > { %v10578_v18 = vld [vmem:[#allocation4 + $0x14] ss:$36 sps:$4 sm:$0xff]   ;;  %v10587_v32 = vld [vmem:[#allocation4 + $0x5c] ss:$36 sps:$4 sm:$0xff]   ;;  %v10610_v29 = vld [vmem:[#allocation10 + $0x228] sm:$0xff]  }
 0x3b4   : > { %v10696_v14 = vld [vmem:[#allocation10 + $0x238] sm:$0xff]   ;;  %v10588_v30 = vld [vmem:[#allocation4 + $0xa8] ss:$36 sps:$4 sm:$0xff]   ;;  %v10623_v46 = vld [vmem:[#allocation10 + $0x220] sm:$0xff]  }
 0x3b5   : > { %v10585_v49 = vld [vmem:[#allocation4 + $0x58] ss:$36 sps:$4 sm:$0xff]   ;;  %v10593_v59 = vld [vmem:[#allocation4 + $0xa4] ss:$36 sps:$4 sm:$0xff]   ;;  %v10594_v24 = vld [vmem:[#allocation4 + $0xf0] ss:$36 sps:$4 sm:$0xff]  }
 0x3b6   : > { %v10596_v40 = vld [vmem:[#allocation4 + $0xf4] ss:$36 sps:$4 sm:$0xff]   ;;  %v12976_v4 = vld [vmem:[%s13499_s4] ss:$0 sm:$0xff]  ;;  %v10591_v27 = vld [vmem:[#allocation4 + $0xa0] ss:$36 sps:$4 sm:$0xff]  }
 0x3b7   : > { %7745 = vmatmul.mubr.bf16.gmra.mxu0 %v10560_v50  ;;  %v10636_v56 = vld [vmem:[#allocation10 + $0x218] sm:$0xff]   ;;  %v10649_v43 = vld [vmem:[#allocation10 + $0x210] sm:$0xff]   ;;  %v7466_v11 = vadd.f32 %v12889_v23, %v12976_v4  ;;  %v10662_v62 = vld [vmem:[#allocation10 + $0x208] sm:$0xff]   ;;  %v7469_v9 = vadd.f32 %v9517_v61, %v12976_v4 }
 0x3b8   : > { %7576 = vmatmul.mubr.bf16.gmra.mxu1 %v10554_v53  ;;  %7946 = vmatprep.mubr.bf16.mxu0 %v10575_v57  ;;  %v10603_v1 = vld [vmem:[#allocation4 + $0x13c] ss:$36 sps:$4 sm:$0xff]   ;;  %v10600_v16 = vld [vmem:[#allocation4 + $0xec] ss:$36 sps:$4 sm:$0xff]   ;;  %v10609_v17 = vld [vmem:[#allocation4 + $0x184] ss:$36 sps:$4 sm:$0xff]  }
 0x3b9   : > { %7583 = vmatprep.mubr.bf16.mxu1 %v10567_v33  ;;  %v12980_v26 = vadd.f32 %v9626_v58, %v7466_v11  ;;  %v10601_v41 = vld [vmem:[#allocation4 + $0x138] ss:$36 sps:$4 sm:$0xff]   ;;  %v10598_v51 = vld [vmem:[#allocation4 + $0xe8] ss:$36 sps:$4 sm:$0xff]   ;;  %v10672_v23 = vld [vmem:[#allocation10 + $0x200] sm:$0xff]   ;;  %v12983_v54 = vadd.f32 %v9629_v36, %v7469_v9 }
 0x3ba   : > { %v10606_v35 = vld [vmem:[#allocation4 + $0x134] ss:$36 sps:$4 sm:$0xff]   ;;  %v10607_v52 = vld [vmem:[#allocation4 + $0x180] ss:$36 sps:$4 sm:$0xff]   ;;  %v10616_v38 = vld [vmem:[#allocation4 + $0x1cc] ss:$36 sps:$4 sm:$0xff]  }
 0x3bb   : > { %v10604_v19 = vld [vmem:[#allocation4 + $0x130] ss:$36 sps:$4 sm:$0xff]   ;;  %v10613_v13 = vld [vmem:[#allocation4 + $0x17c] ss:$36 sps:$4 sm:$0xff]   ;;  %v10614_v45 = vld [vmem:[#allocation4 + $0x1c8] ss:$36 sps:$4 sm:$0xff]  }
 0x3bc   : > { %v10611_v42 = vld [vmem:[#allocation4 + $0x178] ss:$36 sps:$4 sm:$0xff]   ;;  %v10619_v37 = vld [vmem:[#allocation4 + $0x1c4] ss:$36 sps:$4 sm:$0xff]   ;;  %v10620_v3 = vld [vmem:[#allocation4 + $0x210] ss:$36 sps:$4 sm:$0xff]  }
 0x3bd   : > { %v10622_v5 = vld [vmem:[#allocation4 + $0x214] ss:$36 sps:$4 sm:$0xff]   ;;  %v10617_v55 = vld [vmem:[#allocation4 + $0x1c0] ss:$36 sps:$4 sm:$0xff]   ;;  %v10626_v34 = vld [vmem:[#allocation4 + $0x20c] ss:$36 sps:$4 sm:$0xff]  }
 0x3be   : > { %v10629_v15 = vld [vmem:[#allocation4 + $0x25c] ss:$36 sps:$4 sm:$0xff]   ;;  %v10624_v28 = vld [vmem:[#allocation4 + $0x208] ss:$36 sps:$4 sm:$0xff]   ;;  %v10632_v53 = vld [vmem:[#allocation4 + $0x254] ss:$36 sps:$4 sm:$0xff]  }
 0x3bf   : > { %7947 = vmatmul.mubr.bf16.vlgmr.msra.gmra.mxu0 %v10573_v31  ;;  %v10627_v44 = vld [vmem:[#allocation4 + $0x258] ss:$36 sps:$4 sm:$0xff]   ;;  %v10635_v50 = vld [vmem:[#allocation4 + $0x2a4] ss:$36 sps:$4 sm:$0xff]  }
 0x3c0   : > { %7584 = vmatmul.mubr.bf16.gmra.mxu1 %v10565_v8  ;;  %7954 = vmatprep.mubr.bf16.mxu0 %v10583_v47  ;;  %v10648_v20 = vld [vmem:[#allocation4 + $0x334] ss:$36 sps:$4 sm:$0xff]   ;;  %v10645_v21 = vld [vmem:[#allocation4 + $0x2e4] ss:$36 sps:$4 sm:$0xff]  }
 0x3c1   : > { %7785 = vmatprep.mubr.bf16.mxu1 %v10578_v18  ;;  %v10633_v18 = vld [vmem:[#allocation4 + $0x2a0] ss:$36 sps:$4 sm:$0xff]  }
 0x3c2   : > { %v10643_v9 = vld [vmem:[#allocation4 + $0x2e0] ss:$36 sps:$4 sm:$0xff]  }
 0x3c7   : > { %7955 = vmatmul.mubr.bf16.gmra.mxu0 %v10581_v2 }
 0x3c8   : > { %7786 = vmatmul.mubr.bf16.vlgmr.msra.gmra.mxu1 %v10576_v39  ;;  %7962 = vmatprep.mubr.bf16.mxu0 %v10590_v10  ;;  %v10630_v10 = vld [vmem:[#allocation4 + $0x250] ss:$36 sps:$4 sm:$0xff]  }
 0x3c9   : > { %7793 = vmatprep.mubr.bf16.mxu1 %v10587_v32  ;;  %10017 = vmatpush3.bf16.msra.mxu1 %v10696_v14  ;;  %v10639_v14 = vld [vmem:[#allocation4 + $0x29c] ss:$36 sps:$4 sm:$0xff]  }
 0x3ca   : > { %10018 = vmatprep.subr.bf16.mxu1 %v10597_v25 }
 0x3cd   : > { %10019 = vmatpush3.bf16.msra.mxu1 %v10597_v25  ;;  %v10642_v25 = vld [vmem:[#allocation4 + $0x2ec] ss:$36 sps:$4 sm:$0xff]  }
 0x3ce   : > { %10020 = vmatprep.subr.bf16.mxu1 %v10610_v29 }
 0x3cf   : > { %7963 = vmatmul.mubr.bf16.gmra.mxu0 %v10588_v30 }
 0x3d0   : > { %7794 = vmatmul.mubr.bf16.gmra.mxu1 %v10585_v49  ;;  %7970 = vmatprep.mubr.bf16.mxu0 %v10596_v40 }
 0x3d1   : > { %7801 = vmatprep.mubr.bf16.mxu1 %v10593_v59  ;;  %10021 = vmatpush3.bf16.msra.mxu1 %v10610_v29 }
 0x3d2   : > { %10022 = vmatprep.subr.bf16.mxu1 %v10623_v46 }
 0x3d5   : > { %10023 = vmatpush3.bf16.msra.mxu1 %v10623_v46  ;;  %v9630_v6 = vpop.f32.mrf.mxu0 }
 0x3d6   : > { %10024 = vmatprep.subr.bf16.mxu1 %v10636_v56 }
 0x3d7   : > { %7971 = vmatmul.mubr.bf16.gmra.mxu0 %v10594_v24  ;;  %v9631_v63 = vpop.f32.mrf.mxu0 }
 0x3d8   : > { %7802 = vmatmul.mubr.bf16.gmra.mxu1 %v10591_v27  ;;  %7978 = vmatprep.mubr.bf16.mxu0 %v10603_v1  ;;  %v9632_v0 = vadd.f32 %v9631_v63, %v9630_v6  ;;  %v10640_v1 = vld [vmem:[#allocation4 + $0x2e8] ss:$36 sps:$4 sm:$0xff]  }
 0x3d9   : > { %7809 = vmatprep.mubr.bf16.mxu1 %v10600_v16  ;;  %10025 = vmatpush3.bf16.msra.mxu1 %v10636_v56  ;;  %v9633_v22 = vpop.f32.mrf.mxu0  ;;  %v10637_v16 = vld [vmem:[#allocation4 + $0x298] ss:$36 sps:$4 sm:$0xff]  }
 0x3da   : > { %10026 = vmatprep.subr.bf16.mxu1 %v10649_v43 }
 0x3db   : > { %v9634_v57 = vpop.f32.mrf.mxu0 }
 0x3dc   : > { %v9635_v33 = vadd.f32 %v9634_v57, %v9633_v22 }
 0x3dd   : > { %10027 = vmatpush3.bf16.msra.mxu1 %v10649_v43 }
 0x3de   : > { %10028 = vmatprep.subr.bf16.mxu1 %v10662_v62 }
 0x3df   : > { %7979 = vmatmul.mubr.bf16.gmra.mxu0 %v10601_v41 }
 0x3e0   : > { %7810 = vmatmul.mubr.bf16.gmra.mxu1 %v10598_v51  ;;  %7986 = vmatprep.mubr.bf16.mxu0 %v10609_v17  ;;  %v10646_v51 = vld [vmem:[#allocation4 + $0x330] ss:$36 sps:$4 sm:$0xff]  }
 0x3e1   : > { %7817 = vmatprep.mubr.bf16.mxu1 %v10606_v35  ;;  %10029 = vmatpush3.bf16.msra.mxu1 %v10662_v62 }
 0x3e2   : > { %10030 = vmatprep.subr.bf16.mxu1 %v10672_v23  ;;  %v9518_v31 = vpop.f32.mrf.mxu1 }
 0x3e4   : > { %v9519_v47 = vpop.f32.mrf.mxu1 }
 0x3e5   : > { %10031 = vmatpush3.bf16.msra.mxu1 %v10672_v23  ;;  %v9520_v8 = vadd.f32 %v9519_v47, %v9518_v31  ;;  %v10655_v23 = vld [vmem:[#allocation4 + $0x37c] ss:$36 sps:$4 sm:$0xff]  }
 0x3e6   : > { %v9521_v2 = vpop.f32.mrf.mxu1 }
 0x3e7   : > { %7987 = vmatmul.mubr.bf16.gmra.mxu0 %v10607_v52  ;;  %v7474_v32 = vadd.f32 %v9520_v8, %v12976_v4  ;;  %v10652_v52 = vld [vmem:[#allocation4 + $0x32c] ss:$36 sps:$4 sm:$0xff]   ;;  %v10659_v8 = vld [vmem:[#allocation4 + $0x3c0] ss:$36 sps:$4 sm:$0xff]  }
 0x3e8   : > { %7818 = vmatmul.mubr.bf16.gmra.mxu1 %v10604_v19  ;;  %7994 = vmatprep.mubr.bf16.mxu0 %v10616_v38  ;;  %v9636_v39 = vpop.f32.mrf.mxu0  ;;  %v9522_v29 = vpop.f32.mrf.mxu1 }
 0x3e9   : > { %7825 = vmatprep.mubr.bf16.mxu1 %v10613_v13  ;;  %v9523_v49 = vadd.f32 %v9522_v29, %v9521_v2  ;;  %v12986_v46 = vadd.f32 %v9632_v0, %v7474_v32  ;;  %v10668_v2 = vld [vmem:[#allocation4 + $0x40c] ss:$36 sps:$4 sm:$0xff]  }
 0x3ea   : > { %v9637_v30 = vpop.f32.mrf.mxu0 }
 0x3eb   : > { %v9638_v40 = vadd.f32 %v9637_v30, %v9636_v39  ;;  %v7477_v56 = vadd.f32 %v9523_v49, %v12976_v4  ;;  %v10665_v39 = vld [vmem:[#allocation4 + $0x3bc] ss:$36 sps:$4 sm:$0xff]  }
 0x3ec   : > { %v9639_v59 = vpop.f32.mrf.mxu0 }
 0x3ed   : > { %v12989_v27 = vadd.f32 %v9635_v33, %v7477_v56  ;;  %v10678_v56 = vld [vmem:[#allocation4 + $0x454] ss:$36 sps:$4 sm:$0xff]  }
 0x3ee   : > { %v9640_v12 = vpop.f32.mrf.mxu0 }
 0x3ef   : > { %7995 = vmatmul.mubr.bf16.gmra.mxu0 %v10614_v45  ;;  %v9641_v24 = vadd.f32 %v9640_v12, %v9639_v59 }
 0x3f0   : > { %7826 = vmatmul.mubr.bf16.gmra.mxu1 %v10611_v42  ;;  %8002 = vmatprep.mubr.bf16.mxu0 %v10622_v5  ;;  %v10653_v5 = vld [vmem:[#allocation4 + $0x378] ss:$36 sps:$4 sm:$0xff]  }
 0x3f1   : > { %7833 = vmatprep.mubr.bf16.mxu1 %v10619_v37 }
 0x3f4   : > { %v9524_v43 = vpop.f32.mrf.mxu1 }
 0x3f6   : > { %v9525_v11 = vpop.f32.mrf.mxu1 }
 0x3f7   : > { %8003 = vmatmul.mubr.bf16.gmra.mxu0 %v10620_v3  ;;  %v9526_v60 = vadd.f32 %v9525_v11, %v9524_v43  ;;  %v10650_v3 = vld [vmem:[#allocation4 + $0x328] ss:$36 sps:$4 sm:$0xff]   ;;  %v10663_v43 = vld [vmem:[#allocation4 + $0x3b8] ss:$36 sps:$4 sm:$0xff]  }
 0x3f8   : > { %7834 = vmatmul.mubr.bf16.gmra.mxu1 %v10617_v55  ;;  %8010 = vmatprep.mubr.bf16.mxu0 %v10629_v15  ;;  %v9527_v61 = vpop.f32.mrf.mxu1  ;;  %v10661_v15 = vld [vmem:[#allocation4 + $0x3c4] ss:$36 sps:$4 sm:$0xff]  }
 0x3f9   : > { %7841 = vmatprep.mubr.bf16.mxu1 %v10626_v34  ;;  %v7482_v58 = vadd.f32 %v9526_v60, %v12976_v4  ;;  %v10658_v34 = vld [vmem:[#allocation4 + $0x374] ss:$36 sps:$4 sm:$0xff]   ;;  %v10671_v11 = vld [vmem:[#allocation4 + $0x404] ss:$36 sps:$4 sm:$0xff]  }
 0x3fa   : > { %v9528_v62 = vpop.f32.mrf.mxu1 }
 0x3fb   : > { %v9529_v41 = vadd.f32 %v9528_v62, %v9527_v61  ;;  %v12992_v7 = vadd.f32 %v9638_v40, %v7482_v58 }
 0x3fc   : > { %v9642_v48 = vpop.f32.mrf.mxu0 }
 0x3fd   : > { %v7485_v36 = vadd.f32 %v9529_v41, %v12976_v4 }
 0x3fe   : > { %v9643_v17 = vpop.f32.mrf.mxu0 }
 0x3ff   : > { %8011 = vmatmul.mubr.bf16.gmra.mxu0 %v10627_v44  ;;  %v9644_v35 = vadd.f32 %v9643_v17, %v9642_v48  ;;  %v12995_v38 = vadd.f32 %v9641_v24, %v7485_v36  ;;  %v10666_v24 = vld [vmem:[#allocation4 + $0x408] ss:$36 sps:$4 sm:$0xff]   ;;  %v10676_v36 = vld [vmem:[#allocation4 + $0x450] ss:$36 sps:$4 sm:$0xff]  }
 0x400   : > { %7842 = vmatmul.mubr.bf16.gmra.mxu1 %v10624_v28  ;;  %8018 = vmatprep.mubr.bf16.mxu0 %v10635_v50  ;;  %v9645_v19 = vpop.f32.mrf.mxu0 }
 0x401   : > { %7849 = vmatprep.mubr.bf16.mxu1 %v10632_v53 }
 0x402   : > { %v9646_v13 = vpop.f32.mrf.mxu0 }
 0x403   : > { %v9647_v45 = vadd.f32 %v9646_v13, %v9645_v19  ;;  %v10669_v13 = vld [vmem:[#allocation4 + $0x400] ss:$36 sps:$4 sm:$0xff]  }
 0x407   : > { %8019 = vmatmul.mubr.bf16.gmra.mxu0 %v10633_v18  ;;  %v9530_v42 = vpop.f32.mrf.mxu1  ;;  %v10656_v18 = vld [vmem:[#allocation4 + $0x370] ss:$36 sps:$4 sm:$0xff]  }
 0x408   : > { %7850 = vmatmul.mubr.bf16.gmra.mxu1 %v10630_v10  ;;  %8026 = vmatprep.mubr.bf16.mxu0 %v10642_v25  ;;  %v9648_v37 = vpop.f32.mrf.mxu0 }
 0x409   : > { %7857 = vmatprep.mubr.bf16.mxu1 %v10639_v14  ;;  %v9531_v55 = vpop.f32.mrf.mxu1 }
 0x40a   : > { %v9532_v6 = vadd.f32 %v9531_v55, %v9530_v42  ;;  %v9649_v63 = vpop.f32.mrf.mxu0 }
 0x40b   : > { %v9533_v0 = vpop.f32.mrf.mxu1  ;;  %v9650_v22 = vadd.f32 %v9649_v63, %v9648_v37  ;;  %v10675_v37 = vld [vmem:[#allocation4 + $0x44c] ss:$36 sps:$4 sm:$0xff]  }
 0x40c   : > { %v7490_v44 = vadd.f32 %v9532_v6, %v12976_v4  ;;  %v9651_v28 = vpop.f32.mrf.mxu0 }
 0x40d   : > { %v9534_v50 = vpop.f32.mrf.mxu1 }
 0x40e   : > { %v9535_v57 = vadd.f32 %v9534_v50, %v9533_v0  ;;  %v9652_v53 = vpop.f32.mrf.mxu0  ;;  %v12998_v33 = vadd.f32 %v9644_v35, %v7490_v44 }
 0x40f   : > { %8027 = vmatmul.mubr.bf16.gmra.mxu0 %v10640_v1  ;;  %v9653_v31 = vadd.f32 %v9652_v53, %v9651_v28 }
 0x410   : > { %7858 = vmatmul.mubr.bf16.gmra.mxu1 %v10637_v16  ;;  %8034 = vmatprep.mubr.bf16.mxu0 %v10648_v20  ;;  %v7493_v47 = vadd.f32 %v9535_v57, %v12976_v4 }
 0x411   : > { %7865 = vmatprep.mubr.bf16.mxu1 %v10645_v21 }
 0x412   : > { %v13001_v25 = vadd.f32 %v9647_v45, %v7493_v47 }
 0x417   : > { %8035 = vmatmul.mubr.bf16.gmra.mxu0 %v10646_v51 }
 0x418   : > { %7866 = vmatmul.mubr.bf16.gmra.mxu1 %v10643_v9  ;;  %8042 = vmatprep.mubr.bf16.mxu0 %v10655_v23 }
 0x419   : > { %7873 = vmatprep.mubr.bf16.mxu1 %v10652_v52  ;;  %v9654_v10 = vpop.f32.mrf.mxu0 }
 0x41b   : > { %v9536_v32 = vpop.f32.mrf.mxu1  ;;  %v9655_v14 = vpop.f32.mrf.mxu0 }
 0x41c   : > { %v9656_v30 = vadd.f32 %v9655_v14, %v9654_v10 }
 0x41d   : > { %v9537_v29 = vpop.f32.mrf.mxu1  ;;  %v9657_v40 = vpop.f32.mrf.mxu0 }
 0x41e   : > { %v9538_v49 = vadd.f32 %v9537_v29, %v9536_v32 }
 0x41f   : > { %8043 = vmatmul.mubr.bf16.gmra.mxu0 %v10653_v5  ;;  %v9539_v59 = vpop.f32.mrf.mxu1  ;;  %v9658_v1 = vpop.f32.mrf.mxu0 }
 0x420   : > { %7874 = vmatmul.mubr.bf16.gmra.mxu1 %v10650_v3  ;;  %8050 = vmatprep.mubr.bf16.mxu0 %v10661_v15  ;;  %v7498_v12 = vadd.f32 %v9538_v49, %v12976_v4  ;;  %v9659_v20 = vadd.f32 %v9658_v1, %v9657_v40 }
 0x421   : > { %7881 = vmatprep.mubr.bf16.mxu1 %v10658_v34  ;;  %v9540_v16 = vpop.f32.mrf.mxu1 }
 0x422   : > { %v9541_v21 = vadd.f32 %v9540_v16, %v9539_v59  ;;  %v13004_v61 = vadd.f32 %v9650_v22, %v7498_v12  ;;  %v10680_v16 = vld [vmem:[#allocation4 + $0x68] ss:$36 sps:$4 sm:$0xff]  }
 0x423   : > { %v9660_v60 = vpop.f32.mrf.mxu0 }
 0x424   : > { %v9542_v58 = vpop.f32.mrf.mxu1  ;;  %v7501_v62 = vadd.f32 %v9541_v21, %v12976_v4 }
 0x425   : > { %v9661_v48 = vpop.f32.mrf.mxu0 }
 0x426   : > { %v9543_v41 = vpop.f32.mrf.mxu1  ;;  %v9662_v51 = vadd.f32 %v9661_v48, %v9660_v60  ;;  %v13007_v23 = vadd.f32 %v9653_v31, %v7501_v62  ;;  %v10673_v31 = vld [vmem:[#allocation4 + $0x448] ss:$36 sps:$4 sm:$0xff]  }
 0x427   : > { %8051 = vmatmul.mubr.bf16.gmra.mxu0 %v10659_v8  ;;  %v9544_v17 = vadd.f32 %v9543_v41, %v9542_v58  ;;  %v9663_v9 = vpop.f32.mrf.mxu0 }
 0x428   : > { %7882 = vmatmul.mubr.bf16.gmra.mxu1 %v10656_v18  ;;  %8058 = vmatprep.mubr.bf16.mxu0 %v10668_v2  ;;  %v9545_v35 = vpop.f32.mrf.mxu1  ;;  %v10679_v2 = vld [vmem:[#allocation4 + $0x20] ss:$36 sps:$4 sm:$0xff]  }
 0x429   : > { %7889 = vmatprep.mubr.bf16.mxu1 %v10665_v39  ;;  %v7506_v52 = vadd.f32 %v9544_v17, %v12976_v4  ;;  %v9664_v19 = vpop.f32.mrf.mxu0 }
 0x42a   : > { %v9546_v45 = vpop.f32.mrf.mxu1  ;;  %v9665_v42 = vadd.f32 %v9664_v19, %v9663_v9 }
 0x42b   : > { %v9547_v5 = vadd.f32 %v9546_v45, %v9545_v35  ;;  %v13010_v55 = vadd.f32 %v9656_v30, %v7506_v52 }
 0x42c   : > { %v9666_v3 = vpop.f32.mrf.mxu0 }
 0x42d   : > { %v9548_v15 = vpop.f32.mrf.mxu1  ;;  %v7509_v34 = vadd.f32 %v9547_v5, %v12976_v4 }
 0x42e   : > { %v9667_v6 = vpop.f32.mrf.mxu0 }
 0x42f   : > { %8059 = vmatmul.mubr.bf16.gmra.mxu0 %v10666_v24  ;;  %v9549_v63 = vpop.f32.mrf.mxu1  ;;  %v9668_v0 = vadd.f32 %v9667_v6, %v9666_v3  ;;  %v13013_v28 = vadd.f32 %v9659_v20, %v7509_v34  ;;  %v10683_v3 = vld [vmem:[#allocation4 + $0x140] ss:$36 sps:$4 sm:$0xff]  }
 0x430   : > { %7890 = vmatmul.mubr.bf16.gmra.mxu1 %v10663_v43  ;;  %8066 = vmatprep.mubr.bf16.mxu0 %v10678_v56  ;;  %v9550_v22 = vadd.f32 %v9549_v63, %v9548_v15  ;;  %v9669_v44 = vpop.f32.mrf.mxu0 }
 0x431   : > { %7897 = vmatprep.mubr.bf16.mxu1 %v10671_v11  ;;  %v9551_v50 = vpop.f32.mrf.mxu1  ;;  %v10681_v11 = vld [vmem:[#allocation4 + $0xb0] ss:$36 sps:$4 sm:$0xff]  }
 0x432   : > { %v7514_v57 = vadd.f32 %v9550_v22, %v12976_v4  ;;  %v9670_v53 = vpop.f32.mrf.mxu0 }
 0x433   : > { %v9552_v47 = vpop.f32.mrf.mxu1  ;;  %v9671_v8 = vadd.f32 %v9670_v53, %v9669_v44 }
 0x434   : > { %v9553_v18 = vadd.f32 %v9552_v47, %v9551_v50  ;;  %v13016_v10 = vadd.f32 %v9662_v51, %v7514_v57 }
 0x436   : > { %v7517_v14 = vadd.f32 %v9553_v18, %v12976_v4 }
 0x437   : > { %8067 = vmatmul.mubr.bf16.gmra.mxu0 %v10676_v36 }
 0x438   : > { %7898 = vmatmul.mubr.bf16.gmra.mxu1 %v10669_v13  ;;  %v9554_v32 = vpop.f32.mrf.mxu1  ;;  %v13019_v56 = vadd.f32 %v9665_v42, %v7517_v14  ;;  %v10682_v42 = vld [vmem:[#allocation4 + $0xf8] ss:$36 sps:$4 sm:$0xff]   ;;  %v10685_v14 = vld [vmem:[#allocation4 + $0x1d0] ss:$36 sps:$4 sm:$0xff]  }
 0x439   : > { %7905 = vmatprep.mubr.bf16.mxu1 %v10675_v37  ;;  %v9672_v39 = vpop.f32.mrf.mxu0 }
 0x43a   : > { %v9555_v30 = vpop.f32.mrf.mxu1 }
 0x43b   : > { %v9673_v29 = vpop.f32.mrf.mxu0  ;;  %v9556_v40 = vadd.f32 %v9555_v30, %v9554_v32 }
 0x43c   : > { %v9674_v49 = vadd.f32 %v9673_v29, %v9672_v39  ;;  %v9557_v12 = vpop.f32.mrf.mxu1 }
 0x43d   : > { %v9675_v59 = vpop.f32.mrf.mxu0  ;;  %v7522_v24 = vadd.f32 %v9556_v40, %v12976_v4 }
 0x43e   : > { %v9558_v43 = vpop.f32.mrf.mxu1 }
 0x43f   : > { %v9676_v1 = vpop.f32.mrf.mxu0  ;;  %v9559_v21 = vadd.f32 %v9558_v43, %v9557_v12  ;;  %v13022_v58 = vadd.f32 %v9668_v0, %v7522_v24 }
 0x440   : > { %7906 = vmatmul.mubr.bf16.gmra.mxu1 %v10673_v31  ;;  %v9677_v20 = vadd.f32 %v9676_v1, %v9675_v59 }
 0x441   : > { %10032 = vmatprep.mubr.bf16.mxu1 %v10679_v2  ;;  %v9560_v62 = vpop.f32.mrf.mxu1  ;;  %v7525_v48 = vadd.f32 %v9559_v21, %v12976_v4  ;;  %v10684_v2 = vld [vmem:[#allocation4 + $0x188] ss:$36 sps:$4 sm:$0xff]  }
 0x442   : > { %v9678_v60 = vpop.f32.mrf.mxu0 }
 0x443   : > { %v9561_v51 = vpop.f32.mrf.mxu1  ;;  %v13025_v35 = vadd.f32 %v9671_v8, %v7525_v48 }
 0x444   : > { %v9679_v41 = vpop.f32.mrf.mxu0  ;;  %v9562_v9 = vadd.f32 %v9561_v51, %v9560_v62  ;;  %v10686_v62 = vld [vmem:[#allocation4 + $0x218] ss:$36 sps:$4 sm:$0xff]   ;;  %v10687_v51 = vld [vmem:[#allocation4 + $0x260] ss:$36 sps:$4 sm:$0xff]  }
 0x445   : > { %v9680_v17 = vadd.f32 %v9679_v41, %v9678_v60  ;;  %v9563_v52 = vpop.f32.mrf.mxu1 }
 0x446   : > { %v9681_v36 = vpop.f32.mrf.mxu0  ;;  %v7530_v19 = vadd.f32 %v9562_v9, %v12976_v4 }
 0x447   : > { %v9564_v45 = vpop.f32.mrf.mxu1 }
 0x448   : > { %10033 = vmatmul.mubr.bf16.vlgmr.msra.gmra.mxu1 %v10680_v16  ;;  %v9682_v13 = vpop.f32.mrf.mxu0  ;;  %v9565_v37 = vadd.f32 %v9564_v45, %v9563_v52  ;;  %v13028_v34 = vadd.f32 %v9674_v49, %v7530_v19 }
 0x449   : > { %10036 = vmatprep.mubr.bf16.mxu1 %v10681_v11  ;;  %v9683_v5 = vadd.f32 %v9682_v13, %v9681_v36 }
 0x44a   : > { %v7533_v63 = vadd.f32 %v9565_v37, %v12976_v4 }
 0x44c   : > { %v9684_v15 = vpop.f32.mrf.mxu0  ;;  %v9566_v6 = vpop.f32.mrf.mxu1  ;;  %v13031_v53 = vadd.f32 %v9677_v20, %v7533_v63 }
 0x44e   : > { %v9685_v0 = vpop.f32.mrf.mxu0  ;;  %v9567_v22 = vpop.f32.mrf.mxu1 }
 0x44f   : > { %v9686_v44 = vadd.f32 %v9685_v0, %v9684_v15  ;;  %v9568_v50 = vadd.f32 %v9567_v22, %v9566_v6  ;;  %v10688_v0 = vld [vmem:[#allocation4 + $0x2a8] ss:$36 sps:$4 sm:$0xff]  }
 0x450   : > { %10037 = vmatmul.mubr.bf16.gmra.mxu1 %v10682_v42  ;;  %v9687_v57 = vpop.f32.mrf.mxu0  ;;  %v9569_v31 = vpop.f32.mrf.mxu1 }
 0x451   : > { %10040 = vmatprep.mubr.bf16.mxu1 %v10683_v3  ;;  %v7538_v47 = vadd.f32 %v9568_v50, %v12976_v4  ;;  %v10689_v50 = vld [vmem:[#allocation4 + $0x2f0] ss:$36 sps:$4 sm:$0xff]  }
 0x452   : > { %v9688_v8 = vpop.f32.mrf.mxu0  ;;  %v9570_v18 = vpop.f32.mrf.mxu1 }
 0x453   : > { %v9689_v39 = vadd.f32 %v9688_v8, %v9687_v57  ;;  %v9571_v32 = vadd.f32 %v9570_v18, %v9569_v31  ;;  %v13034_v30 = vadd.f32 %v9680_v17, %v7538_v47 }
 0x455   : > { %v9690_v29 = vpop.f32.mrf.mxu0  ;;  %v7541_v40 = vadd.f32 %v9571_v32, %v12976_v4 }
 0x457   : > { %v9572_v49 = vpop.f32.mrf.mxu1  ;;  %v9691_v59 = vpop.f32.mrf.mxu0  ;;  %v13037_v16 = vadd.f32 %v9683_v5, %v7541_v40 }
 0x458   : > { %10041 = vmatmul.mubr.bf16.gmra.mxu1 %v10684_v2  ;;  %v9692_v24 = vadd.f32 %v9691_v59, %v9690_v29 }
 0x459   : > { %10044 = vmatprep.mubr.bf16.mxu1 %v10685_v14  ;;  %v9573_v12 = vpop.f32.mrf.mxu1  ;;  %v9693_v43 = vpop.f32.mrf.mxu0 }
 0x45a   : > { %v9574_v1 = vadd.f32 %v9573_v12, %v9572_v49 }
 0x45b   : > { %v9575_v20 = vpop.f32.mrf.mxu1  ;;  %v9694_v11 = vpop.f32.mrf.mxu0 }
 0x45c   : > { %v7546_v21 = vadd.f32 %v9574_v1, %v12976_v4  ;;  %v9695_v48 = vadd.f32 %v9694_v11, %v9693_v43  ;;  %v10690_v1 = vld [vmem:[#allocation4 + $0x338] ss:$36 sps:$4 sm:$0xff]  }
 0x45d   : > { %v9576_v60 = vpop.f32.mrf.mxu1 }
 0x45e   : > { %v9577_v41 = vadd.f32 %v9576_v60, %v9575_v20  ;;  %v9696_v17 = vpop.f32.mrf.mxu0  ;;  %v13040_v9 = vadd.f32 %v9686_v44, %v7546_v21  ;;  %v10691_v20 = vld [vmem:[#allocation4 + $0x380] ss:$36 sps:$4 sm:$0xff]  }
 0x460   : > { %v9578_v36 = vpop.f32.mrf.mxu1  ;;  %10045 = vmatmul.mubr.bf16.gmra.mxu1 %v10686_v62  ;;  %v7549_v52 = vadd.f32 %v9577_v41, %v12976_v4  ;;  %v9697_v19 = vpop.f32.mrf.mxu0 }
 0x461   : > { %10048 = vmatprep.mubr.bf16.mxu1 %v10687_v51  ;;  %v9698_v45 = vadd.f32 %v9697_v19, %v9696_v17 }
 0x462   : > { %v9579_v13 = vpop.f32.mrf.mxu1  ;;  %v9699_v5 = vpop.f32.mrf.mxu0  ;;  %v13043_v37 = vadd.f32 %v9689_v39, %v7549_v52 }
 0x463   : > { %v9580_v42 = vadd.f32 %v9579_v13, %v9578_v36 }
 0x464   : > { %v9581_v3 = vpop.f32.mrf.mxu1  ;;  %v9700_v6 = vpop.f32.mrf.mxu0 }
 0x465   : > { %v7554_v15 = vadd.f32 %v9580_v42, %v12976_v4  ;;  %v9701_v22 = vadd.f32 %v9700_v6, %v9699_v5  ;;  %v10693_v6 = vld [vmem:[#allocation4 + $0x410] ss:$36 sps:$4 sm:$0xff]  }
 0x466   : > { %v9582_v63 = vpop.f32.mrf.mxu1 }
 0x467   : > { %v9583_v44 = vadd.f32 %v9582_v63, %v9581_v3  ;;  %v9702_v57 = vpop.f32.mrf.mxu0  ;;  %v13046_v31 = vadd.f32 %v9692_v24, %v7554_v15  ;;  %v10692_v3 = vld [vmem:[#allocation4 + $0x3c8] ss:$36 sps:$4 sm:$0xff]  }
 0x468   : > { %v9584_v47 = vpop.f32.mrf.mxu1  ;;  %10049 = vmatmul.mubr.bf16.gmra.mxu1 %v10688_v0 }
 0x469   : > { %v7557_v8 = vadd.f32 %v9583_v44, %v12976_v4  ;;  %10052 = vmatprep.mubr.bf16.mxu1 %v10689_v50  ;;  %v9703_v18 = vpop.f32.mrf.mxu0 }
 0x46a   : > { %v9585_v2 = vpop.f32.mrf.mxu1  ;;  %v9704_v39 = vadd.f32 %v9703_v18, %v9702_v57 }
 0x46b   : > { %v9586_v32 = vadd.f32 %v9585_v2, %v9584_v47  ;;  %v9705_v14 = vpop.f32.mrf.mxu0  ;;  %v13049_v29 = vadd.f32 %v9695_v48, %v7557_v8 }
 0x46c   : > { %v9587_v49 = vpop.f32.mrf.mxu1 }
 0x46d   : > { %v7562_v40 = vadd.f32 %v9586_v32, %v12976_v4  ;;  %v9706_v59 = vpop.f32.mrf.mxu0 }
 0x46e   : > { %v9588_v12 = vpop.f32.mrf.mxu1  ;;  %v9707_v24 = vadd.f32 %v9706_v59, %v9705_v14  ;;  %v10694_v14 = vld [vmem:[#allocation4 + $0x458] ss:$36 sps:$4 sm:$0xff]  }
 0x46f   : > { %v9589_v43 = vadd.f32 %v9588_v12, %v9587_v49  ;;  %v9708_v21 = vpop.f32.mrf.mxu0  ;;  %v13052_v11 = vadd.f32 %v9698_v45, %v7562_v40 }
 0x470   : > { %v9590_v60 = vpop.f32.mrf.mxu1  ;;  %10053 = vmatmul.mubr.bf16.gmra.mxu1 %v10690_v1 }
 0x471   : > { %v7565_v62 = vadd.f32 %v9589_v43, %v12976_v4  ;;  %10056 = vmatprep.mubr.bf16.mxu1 %v10691_v20  ;;  %v9709_v41 = vpop.f32.mrf.mxu0 }
 0x472   : > { %v9591_v48 = vpop.f32.mrf.mxu1  ;;  %v9710_v51 = vadd.f32 %v9709_v41, %v9708_v21 }
 0x473   : > { %v9592_v17 = vadd.f32 %v9591_v48, %v9590_v60  ;;  %v9711_v36 = vpop.f32.mrf.mxu0  ;;  %v13055_v52 = vadd.f32 %v9701_v22, %v7565_v62 }
 0x474   : > { %v9593_v19 = vpop.f32.mrf.mxu1 }
 0x475   : > { %v7570_v13 = vadd.f32 %v9592_v17, %v12976_v4  ;;  %v9712_v42 = vpop.f32.mrf.mxu0 }
 0x476   : > { %v9594_v5 = vpop.f32.mrf.mxu1  ;;  %v9713_v45 = vadd.f32 %v9712_v42, %v9711_v36 }
 0x477   : > { %v9595_v15 = vadd.f32 %v9594_v5, %v9593_v19  ;;  %v9714_v63 = vpop.f32.mrf.mxu0  ;;  %v13058_v0 = vadd.f32 %v9704_v39, %v7570_v13 }
 0x478   : > { %v9596_v44 = vpop.f32.mrf.mxu1  ;;  %10057 = vmatmul.mubr.bf16.gmra.mxu1 %v10692_v3 }
 0x479   : > { %v7573_v50 = vadd.f32 %v9595_v15, %v12976_v4  ;;  %10060 = vmatprep.mubr.bf16.mxu1 %v10693_v6  ;;  %v9715_v57 = vpop.f32.mrf.mxu0 }
 0x47a   : > { %v9597_v22 = vpop.f32.mrf.mxu1  ;;  %v9716_v47 = vadd.f32 %v9715_v57, %v9714_v63 }
 0x47b   : > { %v9598_v8 = vadd.f32 %v9597_v22, %v9596_v44  ;;  %v9717_v18 = vpop.f32.mrf.mxu0  ;;  %v13061_v2 = vadd.f32 %v9707_v24, %v7573_v50 }
 0x47c   : > { %v9599_v32 = vpop.f32.mrf.mxu1 }
 0x47d   : > { %v7578_v49 = vadd.f32 %v9598_v8, %v12976_v4  ;;  %v9718_v40 = vpop.f32.mrf.mxu0 }
 0x47e   : > { %v9600_v59 = vpop.f32.mrf.mxu1  ;;  %v9719_v39 = vadd.f32 %v9718_v40, %v9717_v18 }
 0x47f   : > { %v9601_v12 = vadd.f32 %v9600_v59, %v9599_v32  ;;  %v9848_v1 = vpop.f32.mrf.mxu0  ;;  %v13064_v43 = vadd.f32 %v9710_v51, %v7578_v49 }
 0x480   : > { %v9602_v20 = vpop.f32.mrf.mxu1  ;;  %10061 = vmatmul.mubr.bf16.gmra.mxu1 %v10694_v14 }
 0x481   : > { %v7581_v21 = vadd.f32 %v9601_v12, %v12976_v4  ;;  %v9849_v60 = vpop.f32.mrf.mxu0 }
 0x482   : > { %v9603_v62 = vpop.f32.mrf.mxu1  ;;  %v9850_v41 = vadd.f32 %v9849_v60, %v9848_v1 }
 0x483   : > { %v9604_v24 = vadd.f32 %v9603_v62, %v9602_v20  ;;  %v9851_v48 = vpop.f32.mrf.mxu0  ;;  %v13067_v17 = vadd.f32 %v9713_v45, %v7581_v21 }
 0x484   : > { %v9605_v36 = vpop.f32.mrf.mxu1 }
 0x485   : > { %v7586_v19 = vadd.f32 %v9604_v24, %v12976_v4  ;;  %v9852_v13 = vpop.f32.mrf.mxu0 }
 0x486   : > { %v9606_v42 = vpop.f32.mrf.mxu1  ;;  %v9853_v5 = vadd.f32 %v9852_v13, %v9851_v48 }
 0x487   : > { %v9607_v3 = vadd.f32 %v9606_v42, %v9605_v36  ;;  %v13070_v51 = vpop.f32.mrf.mxu0  ;;  %v13072_v15 = vadd.f32 %v9716_v47, %v7586_v19 }
 0x488   : > { %v9736_v6 = vpop.f32.mrf.mxu1 }
 0x489   : > { %13624 = vst [vmem:[#allocation27_spill] sm:$0xff] %v13072_v15  ;;  %v7589_v63 = vadd.f32 %v9607_v3, %v12976_v4  ;;  %v13075_v44 = vpop.f32.mrf.mxu0 }
 0x48a   : > { %v9737_v50 = vpop.f32.mrf.mxu1 }
 0x48b   : > { %v9738_v57 = vadd.f32 %v9737_v50, %v9736_v6  ;;  %v13077_v45 = vpop.f32.mrf.mxu0  ;;  %v13079_v22 = vadd.f32 %v9719_v39, %v7589_v63 }
 0x48c   : > { %v9739_v8 = vpop.f32.mrf.mxu1 }
 0x48d   : > { %13625 = vst [vmem:[#allocation30_spill] sm:$0xff] %v13079_v22  ;;  %v7788_v18 = vadd.f32 %v9738_v57, %v12980_v26  ;;  %v13082_v32 = vpop.f32.mrf.mxu0 }
 0x48e   : > { %v9740_v14 = vpop.f32.mrf.mxu1 }
 0x48f   : > { %v9741_v49 = vadd.f32 %v9740_v14, %v9739_v8  ;;  %v13084_v47 = vpop.f32.mrf.mxu0  ;;  %v13086_v40 = vadd.f32 %v9850_v41, %v7788_v18 }
 0x490   : > { %v9742_v4 = vpop.f32.mrf.mxu1 }
 0x491   : > { %v7791_v59 = vadd.f32 %v9741_v49, %v12983_v54  ;;  %v13089_v12 = vpop.f32.mrf.mxu0 }
 0x492   : > { %v9743_v1 = vpop.f32.mrf.mxu1 }
 0x493   : > { %v9744_v20 = vadd.f32 %v9743_v1, %v9742_v4  ;;  %v13091_v39 = vpop.f32.mrf.mxu0  ;;  %v13093_v21 = vadd.f32 %v9853_v5, %v7791_v59 }
 0x494   : > { %v9745_v26 = vpop.f32.mrf.mxu1 }
 0x495   : > { %v13096_v60 = vadd.f32 %v9744_v20, %v12986_v46  ;;  %v13098_v62 = vpop.f32.mrf.mxu0 }
 0x496   : > { %v9746_v24 = vpop.f32.mrf.mxu1 }
 0x497   : > { %v9747_v41 = vadd.f32 %v9746_v24, %v9745_v26  ;;  %v13100_v48 = vpop.f32.mrf.mxu0 }
 0x498   : > { %v9748_v36 = vpop.f32.mrf.mxu1 }
 0x499   : > { %v13103_v54 = vadd.f32 %v9747_v41, %v12989_v27  ;;  %v13105_v19 = vpop.f32.mrf.mxu0 }
 0x49a   : > { %v9749_v13 = vpop.f32.mrf.mxu1 }
 0x49b   : > { %v9750_v42 = vadd.f32 %v9749_v13, %v9748_v36  ;;  %v13107_v5 = vpop.f32.mrf.mxu0 }
 0x49c   : > { %v9751_v3 = vpop.f32.mrf.mxu1 }
 0x49d   : > { %v13110_v46 = vadd.f32 %v9750_v42, %v12992_v7  ;;  %v13112_v6 = vpop.f32.mrf.mxu0 }
 0x49e   : > { %v9752_v63 = vpop.f32.mrf.mxu1 }
 0x49f   : > { %v9753_v50 = vadd.f32 %v9752_v63, %v9751_v3  ;;  %v13114_v57 = vpop.f32.mrf.mxu0 }
 0x4a0   : > { %v9754_v8 = vpop.f32.mrf.mxu1 }
 0x4a1   : > { %v13117_v27 = vadd.f32 %v9753_v50, %v12995_v38  ;;  %v13119_v18 = vpop.f32.mrf.mxu0 }
 0x4a2   : > { %v9755_v14 = vpop.f32.mrf.mxu1 }
 0x4a3   : > { %v9756_v49 = vadd.f32 %v9755_v14, %v9754_v8  ;;  %v13121_v4 = vpop.f32.mrf.mxu0 }
 0x4a4   : > { %v9757_v59 = vpop.f32.mrf.mxu1 }
 0x4a5   : > { %v13124_v7 = vadd.f32 %v9756_v49, %v12998_v33  ;;  %v13126_v1 = vpop.f32.mrf.mxu0 }
 0x4a6   : > { %v9758_v20 = vpop.f32.mrf.mxu1 }
 0x4a7   : > { %v9759_v26 = vadd.f32 %v9758_v20, %v9757_v59  ;;  %v13128_v24 = vpop.f32.mrf.mxu0 }
 0x4a8   : > { %v9760_v41 = vpop.f32.mrf.mxu1 }
 0x4a9   : > { %v13131_v38 = vadd.f32 %v9759_v26, %v13001_v25  ;;  %v13133_v36 = vpop.f32.mrf.mxu0 }
 0x4aa   : > { %v9761_v13 = vpop.f32.mrf.mxu1 }
 0x4ab   : > { %v9762_v42 = vadd.f32 %v9761_v13, %v9760_v41  ;;  %v13135_v3 = vpop.f32.mrf.mxu0 }
 0x4ac   : > { %v9763_v63 = vpop.f32.mrf.mxu1 }
 0x4ad   : > { %v13138_v33 = vadd.f32 %v9762_v42, %v13004_v61  ;;  %v13140_v50 = vpop.f32.mrf.mxu0 }
 0x4ae   : > { %v9764_v8 = vpop.f32.mrf.mxu1 }
 0x4af   : > { %v9765_v14 = vadd.f32 %v9764_v8, %v9763_v63  ;;  %v13142_v49 = vpop.f32.mrf.mxu0 }
 0x4b0   : > { %13626 = vst [vmem:[#allocation31_spill] sm:$0xff] %v13142_v49  ;;  %v9766_v59 = vpop.f32.mrf.mxu1 }
 0x4b1   : > { %v13145_v25 = vadd.f32 %v9765_v14, %v13007_v23  ;;  %v13147_v20 = vpop.f32.mrf.mxu0 }
 0x4b2   : > { %13628 = vst [vmem:[#allocation34_spill] sm:$0xff] %v13147_v20  ;;  %v9767_v26 = vpop.f32.mrf.mxu1 }
 0x4b3   : > { %13627 = vst [vmem:[#allocation33_spill] sm:$0xff] %v13145_v25  ;;  %v9768_v41 = vadd.f32 %v9767_v26, %v9766_v59  ;;  %v13149_v13 = vpop.f32.mrf.mxu0 }
 0x4b4   : > { %13629 = vst [vmem:[#allocation22_spill] sm:$0xff] %v13149_v13  ;;  %v9769_v22 = vpop.f32.mrf.mxu1 }
 0x4b5   : > { %v13152_v61 = vadd.f32 %v9768_v41, %v13010_v55  ;;  %v13154_v42 = vpop.f32.mrf.mxu0 }
 0x4b6   : > { %13630 = vst [vmem:[#allocation37_spill] sm:$0xff] %v13154_v42  ;;  %v9770_v15 = vpop.f32.mrf.mxu1 }
 0x4b7   : > { %v9771_v63 = vadd.f32 %v9770_v15, %v9769_v22  ;;  %v13156_v8 = vpop.f32.mrf.mxu0 }
 0x4b8   : > { %13631 = vst [vmem:[#allocation39_spill] sm:$0xff] %v13156_v8  ;;  %v9772_v49 = vpop.f32.mrf.mxu1 }
 0x4b9   : > { %v13159_v23 = vadd.f32 %v9771_v63, %v13013_v28  ;;  %v13161_v14 = vpop.f32.mrf.mxu0 }
 0x4ba   : > { %13632 = vst [vmem:[#allocation40_spill] sm:$0xff] %v13161_v14  ;;  %v9773_v20 = vpop.f32.mrf.mxu1 }
 0x4bb   : > { %v9774_v59 = vadd.f32 %v9773_v20, %v9772_v49  ;;  %v13163_v26 = vpop.f32.mrf.mxu0 }
 0x4bc   : > { %v9775_v13 = vpop.f32.mrf.mxu1 }
 0x4bd   : > { %v13166_v55 = vadd.f32 %v9774_v59, %v13016_v10  ;;  %v13168_v41 = vpop.f32.mrf.mxu0 }
 0x4be   : > { %13634 = vst [vmem:[#allocation43_spill] sm:$0xff] %v13168_v41  ;;  %v9776_v42 = vpop.f32.mrf.mxu1 }
 0x4bf   : > { %13633 = vst [vmem:[#allocation23_spill] sm:$0xff] %v13166_v55  ;;  %v9777_v15 = vadd.f32 %v9776_v42, %v9775_v13  ;;  %v13173_v28 = vpop.f32.mrf.mxu0 }
 0x4c0   : > { %v9778_v22 = vpop.f32.mrf.mxu1  ;;  %13635 = vst [vmem:[#allocation20_spill] sm:$0xff] %v13173_v28 }
 0x4c1   : > { %v13171_v25 = vadd.f32 %v9777_v15, %v13019_v56  ;;  %v13178_v20 = vpop.f32.mrf.mxu0 }
 0x4c2   : > { %v9779_v63 = vpop.f32.mrf.mxu1  ;;  %13636 = vst [vmem:[#allocation24_spill] sm:$0xff] %v13178_v20 }
 0x4c3   : > { %v9780_v14 = vadd.f32 %v9779_v63, %v9778_v22  ;;  %v13183_v13 = vpop.f32.mrf.mxu0 }
 0x4c4   : > { %v9781_v8 = vpop.f32.mrf.mxu1  ;;  %13637 = vst [vmem:[#allocation25_spill] sm:$0xff] %v13183_v13 }
 0x4c5   : > { %v13176_v49 = vadd.f32 %v9780_v14, %v13022_v58  ;;  %v13188_v22 = vpop.f32.mrf.mxu0 }
 0x4c6   : > { %v9782_v10 = vpop.f32.mrf.mxu1  ;;  %13639 = vst [vmem:[#allocation28_spill] sm:$0xff] %v13188_v22 }
 0x4c7   : > { %v9783_v59 = vadd.f32 %v9782_v10, %v9781_v8  ;;  %v13193_v8 = vpop.f32.mrf.mxu0 }
 0x4c8   : > { %v9784_v55 = vpop.f32.mrf.mxu1 }
 0x4c9   : > { %v13181_v41 = vadd.f32 %v9783_v59, %v13025_v35  ;;  %v13195_v13 = vpop.f32.mrf.mxu0 }
 0x4ca   : > { %v9785_v56 = vpop.f32.mrf.mxu1 }
 0x4cb   : > { %v9786_v42 = vadd.f32 %v9785_v56, %v9784_v55  ;;  %v13200_v22 = vpop.f32.mrf.mxu0 }
 0x4cc   : > { %v9787_v15 = vpop.f32.mrf.mxu1  ;;  %13641 = vst [vmem:[#allocation32_spill] sm:$0xff] %v13200_v22 }
 0x4cd   : > { %v13186_v28 = vadd.f32 %v9786_v42, %v13028_v34 }
 0x4ce   : > { %v9788_v58 = vpop.f32.mrf.mxu1 }
 0x4cf   : > { %13638 = vst [vmem:[#allocation26_spill] sm:$0xff] %v13186_v28  ;;  %v9789_v14 = vadd.f32 %v9788_v58, %v9787_v15 }
 0x4d0   : > { %v9790_v63 = vpop.f32.mrf.mxu1 }
 0x4d1   : > { %v13191_v20 = vadd.f32 %v9789_v14, %v13031_v53 }
 0x4d2   : > { %v9791_v35 = vpop.f32.mrf.mxu1 }
 0x4d3   : > { %13640 = vst [vmem:[#allocation29_spill] sm:$0xff] %v13191_v20  ;;  %v9792_v10 = vadd.f32 %v9791_v35, %v9790_v63  ;;  %v13205_v20 = vpop.f32.mrf.mxu0 }
 0x4d4   : > { %v9793_v59 = vpop.f32.mrf.mxu1 }
 0x4d5   : > { %v13198_v55 = vadd.f32 %v9792_v10, %v13034_v30  ;;  %v13210_v10 = vpop.f32.mrf.mxu0 }
 0x4d6   : > { %v9794_v34 = vpop.f32.mrf.mxu1 }
 0x4d7   : > { %v9795_v56 = vadd.f32 %v9794_v34, %v9793_v59 }
 0x4d8   : > { %v9796_v42 = vpop.f32.mrf.mxu1 }
 0x4d9   : > { %v13203_v15 = vadd.f32 %v9795_v56, %v13037_v16  ;;  %v13215_v56 = vpop.f32.mrf.mxu0 }
 0x4da   : > { %v9797_v53 = vpop.f32.mrf.mxu1 }
 0x4db   : > { %13642 = vst [vmem:[#allocation45_spill] sm:$0xff] %v13203_v15  ;;  %v9798_v58 = vadd.f32 %v9797_v53, %v9796_v42 }
 0x4dc   : > { %v9799_v14 = vpop.f32.mrf.mxu1 }
 0x4dd   : > { %v13208_v63 = vadd.f32 %v9798_v58, %v13040_v9  ;;  %v13220_v58 = vpop.f32.mrf.mxu0 }
 0x4de   : > { %v9800_v35 = vpop.f32.mrf.mxu1  ;;  %13645 = vst [vmem:[#allocation36_spill] sm:$0xff] %v13220_v58 }
 0x4df   : > { %13643 = vst [vmem:[#allocation46_spill] sm:$0xff] %v13208_v63  ;;  %v9801_v28 = vadd.f32 %v9800_v35, %v9799_v14 }
 0x4e0   : > { %v9802_v30 = vpop.f32.mrf.mxu1 }
 0x4e1   : > { %v13213_v59 = vadd.f32 %v9801_v28, %v13043_v37  ;;  %v13225_v28 = vpop.f32.mrf.mxu0 }
 0x4e2   : > { %v9803_v34 = vpop.f32.mrf.mxu1 }
 0x4e3   : > { %13644 = vst [vmem:[#allocation35_spill] sm:$0xff] %v13213_v59  ;;  %v9804_v22 = vadd.f32 %v9803_v34, %v9802_v30 }
 0x4e4   : > { %v9805_v16 = vpop.f32.mrf.mxu1 }
 0x4e5   : > { %v13218_v42 = vadd.f32 %v9804_v22, %v13046_v31  ;;  %v13230_v22 = vpop.f32.mrf.mxu0 }
 0x4e6   : > { %v9806_v53 = vpop.f32.mrf.mxu1 }
 0x4e7   : > { %v9807_v15 = vadd.f32 %v9806_v53, %v9805_v16 }
 0x4e8   : > { %v9808_v9 = vpop.f32.mrf.mxu1 }
 0x4e9   : > { %v13223_v14 = vadd.f32 %v9807_v15, %v13049_v29  ;;  %v13235_v15 = vpop.f32.mrf.mxu0 }
 0x4ea   : > { %v9809_v35 = vpop.f32.mrf.mxu1 }
 0x4eb   : > { %13646 = vst [vmem:[#allocation42_spill] sm:$0xff] %v13223_v14  ;;  %v9810_v63 = vadd.f32 %v9809_v35, %v9808_v9 }
 0x4ec   : > { %v9811_v37 = vpop.f32.mrf.mxu1 }
 0x4ed   : > { %v13228_v30 = vadd.f32 %v9810_v63, %v13052_v11  ;;  %v13240_v63 = vpop.f32.mrf.mxu0 }
 0x4ee   : > { %v9812_v34 = vpop.f32.mrf.mxu1 }
 0x4ef   : > { %13647 = vst [vmem:[#allocation38_spill] sm:$0xff] %v13228_v30  ;;  %v9813_v59 = vadd.f32 %v9812_v34, %v9811_v37 }
 0x4f0   : > { %v9814_v31 = vpop.f32.mrf.mxu1 }
 0x4f1   : > { %v13233_v16 = vadd.f32 %v9813_v59, %v13055_v52  ;;  %v13245_v59 = vpop.f32.mrf.mxu0 }
 0x4f2   : > { %v9815_v53 = vpop.f32.mrf.mxu1 }
 0x4f3   : > { %13648 = vst [vmem:[#allocation41_spill] sm:$0xff] %v13233_v16  ;;  %v9816_v58 = vadd.f32 %v9815_v53, %v9814_v31 }
 0x4f4   : > { %v9817_v29 = vpop.f32.mrf.mxu1 }
 0x4f5   : > { %v13238_v9 = vadd.f32 %v9816_v58, %v13058_v0 }
 0x4f6   : > { %v9818_v35 = vpop.f32.mrf.mxu1 }
 0x4f7   : > { %v9819_v14 = vadd.f32 %v9818_v35, %v9817_v29  ;;  %v13252_v29 = vpop.f32.mrf.mxu0 }
 0x4f8   : > { %v9820_v11 = vpop.f32.mrf.mxu1 }
 0x4f9   : > { %v13243_v37 = vadd.f32 %v9819_v14, %v13061_v2 }
 0x4fa   : > { %v9821_v34 = vpop.f32.mrf.mxu1 }
 0x4fb   : > { %v9822_v30 = vadd.f32 %v9821_v34, %v9820_v11  ;;  %v9856_v11 = vadd.f32 %v13075_v44, %v13070_v51 }
 0x4fc   : > { %v9823_v52 = vpop.f32.mrf.mxu1 }
 0x4fd   : > { %v13248_v31 = vadd.f32 %v9822_v30, %v13064_v43  ;;  %v13263_v43 = vpop.f32.mrf.mxu0  ;;  %v7957_v34 = vadd.f32 %v9856_v11, %v13096_v60 }
 0x4fe   : > { %v9824_v53 = vpop.f32.mrf.mxu1 }
 0x4ff   : > { %13649 = vst [vmem:[#allocation21_spill] sm:$0xff] %v13248_v31  ;;  %v9825_v0 = vadd.f32 %v9824_v53, %v9823_v52  ;;  %v13270_v53 = vpop.f32.mrf.mxu0  ;;  %v10697_v31 = vld [vmem:[%s11053_s30 + $0x10] sm:$0xff] }
 0x500   : > { %v13250_v58 = vpop.f32.mrf.mxu1 }
 0x501   : > { %v13255_v35 = vadd.f32 %v9825_v0, %v13067_v17  ;;  %v9859_v17 = vadd.f32 %v13082_v32, %v13077_v45  ;;  %v13277_v60 = vpop.f32.mrf.mxu0  ;;  %v10698_v45 = vld [vmem:[%s11053_s30] sm:$0xff] }
 0x502   : > { %v13257_v2 = vpop.f32.mrf.mxu1 }
 0x503   : > { %13650 = vst [vmem:[#allocation44_spill] sm:$0xff] %v13255_v35  ;;  %v7960_v44 = vadd.f32 %v9859_v17, %v13103_v54  ;;  %v9862_v54 = vadd.f32 %v13089_v12, %v13084_v47 }
 0x504   : > { %v13259_v14 = vpop.f32.mrf.mxu1 }
 0x505   : > { %13651 = vst [vmem:[#allocation50_spill] sm:$0xff] %v13259_v14  ;;  %v7965_v17 = vadd.f32 %v9862_v54, %v13110_v46  ;;  %v10702_v46 = vld [vmem:[%s11053_s30 + $0x20] sm:$0xff] }
 0x506   : > { %v13265_v30 = vpop.f32.mrf.mxu1 }
 0x507   : > { %13652 = vst [vmem:[#allocation51_spill] sm:$0xff] %v13265_v30  ;;  %v9868_v30 = vadd.f32 %v13105_v19, %v13100_v48  ;;  %v10699_v48 = vld [vmem:[%s11053_s30 + $0x18] sm:$0xff] }
 0x508   : > { %v10034_v52 = vpop.f32.mrf.mxu1 }
 0x509   : > { %v8118_v0 = vadd.f32 %v10034_v52, %v7957_v34  ;;  %v7973_v11 = vadd.f32 %v9868_v30, %v13124_v7  ;;  %v13293_v52 = vpop.f32.mrf.mxu0  ;;  %v10701_v7 = vld [vmem:[%s11053_s30 + $0x30] sm:$0xff] }
 0x50a   : > { %v8109_v35 = vpop.f32.mrf.mxu1 }
 0x50b   : > { %v8238_v16 = vadd.f32 %v10697_v31, %v8118_v0  ;;  %v8110_v51 = vadd.f32 %v8109_v35, %v13086_v40 }
 0x50c   : > { %v10035_v14 = vpop.f32.mrf.mxu1 }
 0x50d   : > { %8270 = vst [vmem:[%s13281_s28 + $0x10] sm:$0xff] %v8238_v16  ;;  %v8236_v32 = vadd.f32 %v10698_v45, %v8110_v51  ;;  %v8121_v31 = vadd.f32 %v10035_v14, %v7960_v44  ;;  %v9871_v16 = vadd.f32 %v13112_v6, %v13107_v5  ;;  %v10700_v14 = vld [vmem:[%s11053_s30 + $0x8] sm:$0xff]  ;;  %v9880_v44 = vadd.f32 %v13133_v36, %v13128_v24  ;;  %v13305_v45 = vpop.f32.mrf.mxu0 }
 0x50e   : > { %v8112_v40 = vpop.f32.mrf.mxu1 }
 0x50f   : > { %8268 = vst [vmem:[%s13281_s28] sm:$0xff] %v8236_v32  ;;  %v8239_v19 = vadd.f32 %v10699_v48, %v8121_v31  ;;  %v8113_v35 = vadd.f32 %v8112_v40, %v13093_v21  ;;  %v9865_v21 = vadd.f32 %v13098_v62, %v13091_v39  ;;  %v7976_v6 = vadd.f32 %v9871_v16, %v13131_v38  ;;  %v10703_v38 = vld [vmem:[%s11053_s30 + $0x38] sm:$0xff] }
 0x510   : > { %v10038_v34 = vpop.f32.mrf.mxu1  ;;  %v9874_v40 = vadd.f32 %v13119_v18, %v13114_v57  ;;  %v7989_v36 = vadd.f32 %v9880_v44, %v13152_v61  ;;  %v9877_v16 = vadd.f32 %v13126_v1, %v13121_v4  ;;  %v10705_v61 = vld [vmem:[%s11053_s30 + $0x50] sm:$0xff] }
 0x511   : > { %8271 = vst [vmem:[%s13281_s28 + $0x18] sm:$0xff] %v8239_v19  ;;  %v8237_v47 = vadd.f32 %v10700_v14, %v8113_v35  ;;  %v8134_v12 = vadd.f32 %v10038_v34, %v7973_v11  ;;  %v7968_v62 = vadd.f32 %v9865_v21, %v13117_v27  ;;  %v9883_v19 = vadd.f32 %v13140_v50, %v13135_v3  ;;  %v13317_v35 = vpop.f32.mrf.mxu0  ;;  %v10704_v27 = vld [vmem:[%s11053_s30 + $0x28] sm:$0xff]  ;;  %v13655_v1 = vld [vmem:[#allocation33_spill] sm:$0xff] }
 0x512   : > { %v8125_v0 = vpop.f32.mrf.mxu1  ;;  %v7981_v18 = vadd.f32 %v9874_v40, %v13138_v33  ;;  %v10706_v33 = vld [vmem:[%s11053_s30 + $0x40] sm:$0xff] }
 0x513   : > { %8269 = vst [vmem:[%s13281_s28 + $0x8] sm:$0xff] %v8237_v47  ;;  %v8242_v30 = vadd.f32 %v10701_v7, %v8134_v12  ;;  %v8126_v5 = vadd.f32 %v8125_v0, %v7965_v17  ;;  %v7992_v50 = vadd.f32 %v9883_v19, %v13159_v23  ;;  %v13653_v12 = vld [vmem:[#allocation39_spill] sm:$0xff]  ;;  %v13654_v17 = vld [vmem:[#allocation40_spill] sm:$0xff]  ;;  %v13329_v21 = vpop.f32.mrf.mxu0  ;;  %v10707_v23 = vld [vmem:[%s11053_s30 + $0x58] sm:$0xff] }
 0x514   : > { %v10039_v51 = vpop.f32.mrf.mxu1  ;;  %v9892_v0 = vadd.f32 %v13654_v17, %v13653_v12 }
 0x515   : > { %8274 = vst [vmem:[%s13281_s28 + $0x30] sm:$0xff] %v8242_v30  ;;  %v8240_v32 = vadd.f32 %v10702_v46, %v8126_v5  ;;  %v8137_v39 = vadd.f32 %v10039_v51, %v7976_v6  ;;  %v7984_v30 = vadd.f32 %v9877_v16, %v13655_v1  ;;  %v13656_v6 = vld [vmem:[#allocation31_spill] sm:$0xff]  ;;  %v13657_v51 = vld [vmem:[#allocation34_spill] sm:$0xff] }
 0x516   : > { %v8128_v31 = vpop.f32.mrf.mxu1  ;;  %v9886_v44 = vadd.f32 %v13657_v51, %v13656_v6 }
 0x517   : > { %8272 = vst [vmem:[%s13281_s28 + $0x20] sm:$0xff] %v8240_v32  ;;  %v8243_v54 = vadd.f32 %v10703_v38, %v8137_v39  ;;  %v8129_v24 = vadd.f32 %v8128_v31, %v7968_v62  ;;  %v8005_v39 = vadd.f32 %v9892_v0, %v13176_v49  ;;  %v13658_v31 = vld [vmem:[#allocation43_spill] sm:$0xff]  ;;  %v13341_v38 = vpop.f32.mrf.mxu0  ;;  %v10709_v49 = vld [vmem:[%s11053_s30 + $0x70] sm:$0xff] }
 0x518   : > { %v10042_v48 = vpop.f32.mrf.mxu1  ;;  %v9895_v40 = vadd.f32 %v13658_v31, %v13163_v26  ;;  %v13667_v31 = vld [vmem:[#allocation28_spill] sm:$0xff] }
 0x519   : > { %8275 = vst [vmem:[%s13281_s28 + $0x38] sm:$0xff] %v8243_v54  ;;  %v8241_v11 = vadd.f32 %v10704_v27, %v8129_v24  ;;  %v8150_v57 = vadd.f32 %v10042_v48, %v7989_v36  ;;  %v10708_v54 = vld [vmem:[%s11053_s30 + $0x48] sm:$0xff]  ;;  %v13659_v48 = vld [vmem:[#allocation23_spill] sm:$0xff] }
 0x51a   : > { %v8141_v34 = vpop.f32.mrf.mxu1  ;;  %v7997_v19 = vadd.f32 %v9886_v44, %v13659_v48  ;;  %v8008_v16 = vadd.f32 %v9895_v40, %v13181_v41  ;;  %v10711_v41 = vld [vmem:[%s11053_s30 + $0x78] sm:$0xff] }
 0x51b   : > { %8273 = vst [vmem:[%s13281_s28 + $0x28] sm:$0xff] %v8241_v11  ;;  %v8246_v14 = vadd.f32 %v10705_v61, %v8150_v57  ;;  %v8142_v3 = vadd.f32 %v8141_v34, %v7981_v18  ;;  %v13660_v11 = vld [vmem:[#allocation22_spill] sm:$0xff]  ;;  %v13661_v57 = vld [vmem:[#allocation37_spill] sm:$0xff] }
 0x51c   : > { %v10043_v47 = vpop.f32.mrf.mxu1  ;;  %v9889_v18 = vadd.f32 %v13661_v57, %v13660_v11  ;;  %v10714_v11 = vld [vmem:[%s11053_s30 + $0x80] sm:$0xff] }
 0x51d   : > { %8278 = vst [vmem:[%s13281_s28 + $0x50] sm:$0xff] %v8246_v14  ;;  %v8244_v7 = vadd.f32 %v10706_v33, %v8142_v3  ;;  %v8153_v4 = vadd.f32 %v10043_v47, %v7992_v50  ;;  %v9904_v14 = vadd.f32 %v13195_v13, %v13193_v8  ;;  %v13353_v3 = vpop.f32.mrf.mxu0  ;;  %v10710_v50 = vld [vmem:[%s11053_s30 + $0x60] sm:$0xff]  ;;  %v13662_v33 = vld [vmem:[#allocation20_spill] sm:$0xff] }
 0x51e   : > { %v8144_v5 = vpop.f32.mrf.mxu1  ;;  %v8000_v17 = vadd.f32 %v9889_v18, %v13171_v25  ;;  %v10712_v25 = vld [vmem:[%s11053_s30 + $0x68] sm:$0xff] }
 0x51f   : > { %8276 = vst [vmem:[%s13281_s28 + $0x40] sm:$0xff] %v8244_v7  ;;  %v8247_v46 = vadd.f32 %v10707_v23, %v8153_v4  ;;  %v8145_v32 = vadd.f32 %v8144_v5, %v7984_v30  ;;  %v13663_v7 = vld [vmem:[#allocation24_spill] sm:$0xff]  ;;  %v8021_v8 = vadd.f32 %v9904_v14, %v13198_v55  ;;  %v13365_v51 = vpop.f32.mrf.mxu0  ;;  %v10713_v55 = vld [vmem:[%s11053_s30 + $0x90] sm:$0xff]  ;;  %v10715_v14 = vld [vmem:[%s11053_s30 + $0x98] sm:$0xff] }
 0x520   : > { %v10046_v62 = vpop.f32.mrf.mxu1  ;;  %v9898_v4 = vadd.f32 %v13663_v7, %v13662_v33  ;;  %v13664_v5 = vld [vmem:[#allocation32_spill] sm:$0xff] }
 0x521   : > { %8279 = vst [vmem:[%s13281_s28 + $0x58] sm:$0xff] %v8247_v46  ;;  %v8245_v24 = vadd.f32 %v10708_v54, %v8145_v32  ;;  %v8166_v36 = vadd.f32 %v10046_v62, %v8005_v39  ;;  %v9907_v6 = vadd.f32 %v13205_v20, %v13664_v5  ;;  %v13665_v46 = vld [vmem:[#allocation26_spill] sm:$0xff]  ;;  %v13666_v62 = vld [vmem:[#allocation25_spill] sm:$0xff]  ;;  %v9928_v5 = vadd.f32 %v13305_v45, %v13293_v52 }
 0x522   : > { %v8157_v27 = vpop.f32.mrf.mxu1  ;;  %v8013_v32 = vadd.f32 %v9898_v4, %v13665_v46  ;;  %v9901_v40 = vadd.f32 %v13667_v31, %v13666_v62  ;;  %v13671_v4 = vld [vmem:[#allocation36_spill] sm:$0xff]  ;;  %v9922_v46 = vadd.f32 %v13263_v43, %v13252_v29  ;;  %v10719_v31 = vld [vmem:[%s11053_s30 + $0xb8] sm:$0xff] }
 0x523   : > { %8277 = vst [vmem:[%s13281_s28 + $0x48] sm:$0xff] %v8245_v24  ;;  %v8250_v34 = vadd.f32 %v10709_v49, %v8166_v36  ;;  %v8158_v26 = vadd.f32 %v8157_v27, %v7997_v19  ;;  %v13668_v24 = vld [vmem:[#allocation45_spill] sm:$0xff]  ;;  %v9916_v19 = vadd.f32 %v13235_v15, %v13230_v22  ;;  %v13377_v27 = vpop.f32.mrf.mxu0  ;;  %v8053_v45 = vadd.f32 %v9928_v5, %v13238_v9  ;;  %v10726_v5 = vld [vmem:[%s11053_s30 + $0xe0] sm:$0xff] }
 0x524   : > { %v10047_v61 = vpop.f32.mrf.mxu1  ;;  %v8024_v36 = vadd.f32 %v9907_v6, %v13668_v24  ;;  %v13669_v49 = vld [vmem:[#allocation29_spill] sm:$0xff]  ;;  %v10718_v6 = vld [vmem:[%s11053_s30 + $0xa0] sm:$0xff]  ;;  %v9925_v24 = vadd.f32 %v13277_v60, %v13270_v53 }
 0x525   : > { %8282 = vst [vmem:[%s13281_s28 + $0x70] sm:$0xff] %v8250_v34  ;;  %v8248_v47 = vadd.f32 %v10710_v50, %v8158_v26  ;;  %v8169_v12 = vadd.f32 %v10047_v61, %v8008_v16  ;;  %v8016_v34 = vadd.f32 %v9901_v40, %v13669_v49  ;;  %v9910_v16 = vadd.f32 %v13215_v56, %v13210_v10  ;;  %v9938_v61 = vpop.f32.mrf.mxu0  ;;  %v13670_v10 = vld [vmem:[#allocation46_spill] sm:$0xff]  ;;  %v10721_v49 = vld [vmem:[%s11053_s30 + $0xd0] sm:$0xff]  ;;  %v10722_v53 = vld [vmem:[%s11053_s30 + $0xc0] sm:$0xff] }
 0x526   : > { %v8160_v0 = vpop.f32.mrf.mxu1  ;;  %v8037_v50 = vadd.f32 %v9916_v19, %v13218_v42  ;;  %v10717_v42 = vld [vmem:[%s11053_s30 + $0xb0] sm:$0xff]  ;;  %v13675_v19 = vld [vmem:[#allocation27_spill] sm:$0xff] }
 0x527   : > { %8280 = vst [vmem:[%s13281_s28 + $0x60] sm:$0xff] %v8248_v47  ;;  %v8251_v1 = vadd.f32 %v10711_v41, %v8169_v12  ;;  %v8161_v13 = vadd.f32 %v8160_v0, %v8000_v17  ;;  %v9919_v12 = vadd.f32 %v13245_v59, %v13240_v63  ;;  %v10716_v17 = vld [vmem:[%s11053_s30 + $0x88] sm:$0xff]  ;;  %v8029_v56 = vadd.f32 %v9910_v16, %v13670_v10  ;;  %v13672_v63 = vld [vmem:[#allocation42_spill] sm:$0xff] }
 0x528   : > { %v10050_v30 = vpop.f32.mrf.mxu1  ;;  %v9913_v41 = vadd.f32 %v13225_v28, %v13671_v4  ;;  %v13673_v28 = vld [vmem:[#allocation35_spill] sm:$0xff] }
 0x529   : > { %8283 = vst [vmem:[%s13281_s28 + $0x78] sm:$0xff] %v8251_v1  ;;  %v8249_v44 = vadd.f32 %v10712_v25, %v8161_v13  ;;  %v8182_v23 = vadd.f32 %v10050_v30, %v8021_v8  ;;  %v9939_v1 = vpop.f32.mrf.mxu0  ;;  %v8040_v59 = vadd.f32 %v9919_v12, %v13672_v63 }
 0x52a   : > { %v8173_v39 = vpop.f32.mrf.mxu1 }
 0x52b   : > { %8281 = vst [vmem:[%s13281_s28 + $0x68] sm:$0xff] %v8249_v44  ;;  %v8254_v54 = vadd.f32 %v10713_v55, %v8182_v23  ;;  %v8174_v20 = vadd.f32 %v8173_v39, %v8013_v32  ;;  %v8032_v23 = vadd.f32 %v9913_v41, %v13673_v28  ;;  %v9828_v39 = vadd.f32 %v13257_v2, %v13250_v58  ;;  %v9941_v62 = vpop.f32.mrf.mxu0  ;;  %v13674_v58 = vld [vmem:[#allocation38_spill] sm:$0xff] }
 0x52c   : > { %v10051_v48 = vpop.f32.mrf.mxu1  ;;  %v9931_v55 = vadd.f32 %v13329_v21, %v13317_v35  ;;  %v8045_v2 = vadd.f32 %v9922_v46, %v13674_v58  ;;  %v13677_v35 = vld [vmem:[#allocation51_spill] sm:$0xff] }
 0x52d   : > { %8286 = vst [vmem:[%s13281_s28 + $0x90] sm:$0xff] %v8254_v54  ;;  %v8252_v57 = vadd.f32 %v10714_v11, %v8174_v20  ;;  %v8185_v18 = vadd.f32 %v10051_v48, %v8024_v36  ;;  %v10720_v20 = vld [vmem:[%s11053_s30 + $0xa8] sm:$0xff]  ;;  %v9940_v36 = vadd.f32 %v9939_v1, %v9938_v61  ;;  %v7908_v11 = vadd.f32 %v9828_v39, %v13675_v19 }
 0x52e   : > { %v8176_v26 = vpop.f32.mrf.mxu1  ;;  %v8056_v9 = vadd.f32 %v9931_v55, %v13243_v37  ;;  %v13678_v37 = vld [vmem:[#allocation41_spill] sm:$0xff] }
 0x52f   : > { %8284 = vst [vmem:[%s13281_s28 + $0x80] sm:$0xff] %v8252_v57  ;;  %v8255_v22 = vadd.f32 %v10715_v14, %v8185_v18  ;;  %v8177_v15 = vadd.f32 %v8176_v26, %v8016_v34  ;;  %v13676_v57 = vld [vmem:[#allocation50_spill] sm:$0xff]  ;;  %v9942_v18 = vpop.f32.mrf.mxu0  ;;  %v8048_v14 = vadd.f32 %v9925_v24, %v13678_v37  ;;  %v8069_v10 = vadd.f32 %v9940_v36, %v7908_v11 }
 0x530   : > { %v10054_v47 = vpop.f32.mrf.mxu1  ;;  %v9831_v21 = vadd.f32 %v13677_v35, %v13676_v57 }
 0x531   : > { %8287 = vst [vmem:[%s13281_s28 + $0x98] sm:$0xff] %v8255_v22  ;;  %v8253_v0 = vadd.f32 %v10716_v17, %v8177_v15  ;;  %v8198_v33 = vadd.f32 %v10054_v47, %v8037_v50  ;;  %v9934_v22 = vadd.f32 %v13353_v3, %v13341_v38  ;;  %v9943_v15 = vadd.f32 %v9942_v18, %v9941_v62  ;;  %v13679_v47 = vld [vmem:[#allocation30_spill] sm:$0xff]  ;;  %v13680_v38 = vld [vmem:[#allocation21_spill] sm:$0xff] }
 0x532   : > { %v8189_v7 = vpop.f32.mrf.mxu1  ;;  %v7911_v12 = vadd.f32 %v9831_v21, %v13679_v47  ;;  %v10723_v17 = vld [vmem:[%s11053_s30 + $0xd8] sm:$0xff] }
 0x533   : > { %8285 = vst [vmem:[%s13281_s28 + $0x88] sm:$0xff] %v8253_v0  ;;  %v8258_v13 = vadd.f32 %v10717_v42, %v8198_v33  ;;  %v8190_v8 = vadd.f32 %v8189_v7, %v8029_v56  ;;  %v10724_v7 = vld [vmem:[%s11053_s30 + $0xc8] sm:$0xff]  ;;  %v8061_v3 = vadd.f32 %v9934_v22, %v13680_v38  ;;  %v9937_v42 = vadd.f32 %v13377_v27, %v13365_v51  ;;  %v10727_v27 = vld [vmem:[%s11053_s30 + $0xf8] sm:$0xff] }
 0x534   : > { %v10055_v30 = vpop.f32.mrf.mxu1 }
 0x535   : > { %8290 = vst [vmem:[%s13281_s28 + $0xb0] sm:$0xff] %v8258_v13  ;;  %v8256_v25 = vadd.f32 %v10718_v6, %v8190_v8  ;;  %v8201_v44 = vadd.f32 %v10055_v30, %v8040_v59  ;;  %v10725_v13 = vld [vmem:[%s11053_s30 + $0xf0] sm:$0xff]  ;;  %v8072_v59 = vadd.f32 %v9943_v15, %v7911_v12 }
 0x536   : > { %v8192_v32 = vpop.f32.mrf.mxu1 }
 0x537   : > { %8288 = vst [vmem:[%s13281_s28 + $0xa0] sm:$0xff] %v8256_v25  ;;  %v8259_v40 = vadd.f32 %v10719_v31, %v8201_v44  ;;  %v8193_v52 = vadd.f32 %v8192_v32, %v8032_v23  ;;  %v13681_v44 = vld [vmem:[#allocation44_spill] sm:$0xff] }
 0x538   : > { %v10058_v54 = vpop.f32.mrf.mxu1  ;;  %v8064_v28 = vadd.f32 %v9937_v42, %v13681_v44  ;;  %v10728_v32 = vld [vmem:[%s11053_s30 + $0xe8] sm:$0xff] }
 0x539   : > { %8291 = vst [vmem:[%s13281_s28 + $0xb8] sm:$0xff] %v8259_v40  ;;  %v8257_v29 = vadd.f32 %v10720_v20, %v8193_v52  ;;  %v8214_v43 = vadd.f32 %v10058_v54, %v8053_v45 }
 0x53a   : > { %v8205_v48 = vpop.f32.mrf.mxu1 }
 0x53b   : > { %8289 = vst [vmem:[%s13281_s28 + $0xa8] sm:$0xff] %v8257_v29  ;;  %v8262_v34 = vadd.f32 %v10721_v49, %v8214_v43  ;;  %v8206_v26 = vadd.f32 %v8205_v48, %v8045_v2 }
 0x53c   : > { %v10059_v16 = vpop.f32.mrf.mxu1 }
 0x53d   : > { %8294 = vst [vmem:[%s13281_s28 + $0xd0] sm:$0xff] %v8262_v34  ;;  %v8260_v60 = vadd.f32 %v10722_v53, %v8206_v26  ;;  %v8217_v61 = vadd.f32 %v10059_v16, %v8056_v9 }
 0x53e   : > { %v8208_v50 = vpop.f32.mrf.mxu1 }
 0x53f   : > { %8292 = vst [vmem:[%s13281_s28 + $0xc0] sm:$0xff] %v8260_v60  ;;  %v8263_v0 = vadd.f32 %v10723_v17, %v8217_v61  ;;  %v8209_v33 = vadd.f32 %v8208_v50, %v8048_v14 }
 0x540   : > { %v10062_v56 = vpop.f32.mrf.mxu1 }
 0x541   : > { %8295 = vst [vmem:[%s13281_s28 + $0xd8] sm:$0xff] %v8263_v0  ;;  %v8261_v4 = vadd.f32 %v10724_v7, %v8209_v33  ;;  %v8230_v41 = vadd.f32 %v10062_v56, %v8069_v10 }
 0x542   : > { %v8221_v1 = vpop.f32.mrf.mxu1 }
 0x543   : > { %8293 = vst [vmem:[%s13281_s28 + $0xc8] sm:$0xff] %v8261_v4  ;;  %v8266_v8 = vadd.f32 %v10725_v13, %v8230_v41  ;;  %v8222_v63 = vadd.f32 %v8221_v1, %v8061_v3 }
 0x544   : > { %v10063_v30 = vpop.f32.mrf.mxu1 }
 0x545   : > { %8298 = vst [vmem:[%s13281_s28 + $0xf0] sm:$0xff] %v8266_v8  ;;  %v8264_v6 = vadd.f32 %v10726_v5, %v8222_v63  ;;  %v8233_v25 = vadd.f32 %v10063_v30, %v8072_v59 }
 0x546   : > { %v8224_v51 = vpop.f32.mrf.mxu1 }
 0x547   : > { %8296 = vst [vmem:[%s13281_s28 + $0xe0] sm:$0xff] %v8264_v6  ;;  %v8267_v23 = vadd.f32 %v10727_v27, %v8233_v25  ;;  %v8225_v46 = vadd.f32 %v8224_v51, %v8064_v28 }
 0x549   : > { %8299 = vst [vmem:[%s13281_s28 + $0xf8] sm:$0xff] %v8267_v23  ;;  %v8265_v39 = vadd.f32 %v10728_v32, %v8225_v46 }
 0x54b   : > { %8297 = vst [vmem:[%s13281_s28 + $0xe8] sm:$0xff] %v8265_v39 }
 0x54c   : > { %10822 = shalt.err (!%p10819_p9)
}
 0x54d   : > { %s10823_s30 = scalar_lea.hbm %s13447_s14, 4096  ;;  %s10827_s11 = scalar_lea.hbm %s13500_s5, 8192 }
 0x54e   : > { %p10824_p13 = scmp.ne.s32.totalorder %s13447_s14, %s10823_s30  ;;  %p10828_p4 = scmp.lt.s32.totalorder %s13447_s14, %s13500_s5 }
 0x54f   : > { %p10829_p8 = scmp.lt.s32.totalorder %s10827_s11, %s10823_s30 }
 0x550   : > { %p10825_p5 = pnand %p10824_p13, %p13682_p10 }
 0x551   : > { %p10830_p3 = por %p10829_p8, %p10828_p4 }
 0x552   : > { %p10826_p0 = pneg %p10825_p5 }
 0x554   : > { %p10831_p11 = pnand %p10830_p3, %p10826_p0 }
 0x556   : > { %10834 = shalt.err (!%p10831_p11)
}
 0x557   : > { %s10888_s6 = smov 128   ;;  %s10889_s9 = smov 8  }
 0x558   : > { %10074 = dma.vmem_to_hbm [thread:$0]  (%p13682_p10), %s13449_s7, 4096, %s13447_s14, %s8301_s22, %s10888_s6, %s10888_s6, %s10889_s9  }
 0x559 PF: > { %s8329_s13 = sand.u32 1, %s10865_s18   ;;  %p13683_p1 = scmp.ne.s32.totalorder %s13516_s25, 0 }
 0x55a   : > { %p13684_p2 = scmp.ge.s32.totalorder %s10877_s21, 2  ;;  %s8330_s17 = scalar_lea.sflag [#allocation7], %s8329_s13 }
 0x55c   : > { %p10088_p6 = pnand %p13684_p2, %p13683_p1 }
 0x55e   : > { %p10089_p12 = pneg %p10088_p6 }
 0x560   : > { %10860 = dma.done.wait (%p10089_p12), %s8330_s17, 4096  }
 0x561   : > { %10862 = vsyncadd (%p10089_p12), %s8330_s17, 4294963200  ;;  %p19_p7 = scmp.ge.s32.totalorder %s10992_s15, 4   ;;  %s13685_s18 = smov %s10869_s19 }
 0x562   : > { %s13686_s19 = smov %s10873_s20  ;;  %s13687_s20 = smov %s11008_s27 }
 0x563   : > { %s13688_s21 = smov %s10992_s15  ;;  %21 = sbr.rel (!%p19_p7) target bundleno = 6 (0x6), region = 97 }
 0x568   :  { %8335 = vsyncpa [#allocation6], 1 }
 0x569   :  { %8337 = vsyncpa [#allocation6 + $0x1], 1 }
 0x56a   :  { %8338 = vsyncpa [#allocation9], 1 }
 0x56b   :  { %8339 = vsyncpa [#allocation7], 1 }
 0x56c   :  { %8341 = vsyncpa [#allocation7 + $0x1], 1 }

</bundles_post_ra>
